<compile_context>
chip_gen: v7x
topology: tpu7x:2x2x1
jax: 0.10.0
libtpu: 0.0.40
codegen_flags: <defaults>
</compile_context>

<pallas_src>
import functools

import jax
import jax.numpy as jnp
from jax import lax
from jax.experimental import pallas as pl
from jax.experimental.pallas import tpu as pltpu


def decoder_lstm_kernel(x_ref, w_ih_ref, w_hh_ref, b_ref,
                        h0_ref, c0_ref, w_out_ref, b_out_ref,
                        hpad_ref, pred_ref, hn_ref, cn_ref):
    S, B, H = x_ref.shape
    GP = h0_ref.shape[-1]          # per-gate padded lane width (multiple of 128)
    hp = lax.Precision.HIGHEST

    # Loop-invariant operands: loaded / broadcast ONCE, outside the recurrence.
    w_ih = w_ih_ref[...]                                   # (H,  4*GP)
    w_hh = w_hh_ref[...]                                   # (GP, 4*GP)
    b_bc = jnp.broadcast_to(b_ref[...], (B, 4 * GP))       # hoisted bias bcast

    h = h0_ref[...].astype(jnp.float32)                    # (B, GP)
    c = c0_ref[...].astype(jnp.float32)                    # (B, GP)

    # Fully-unrolled recurrence (S is small and static at trace time).
    for t in range(S):
        x_t = x_ref[t]                                     # (B, H), VMEM-resident
        gates = (jnp.dot(x_t, w_ih, precision=hp,
                         preferred_element_type=jnp.float32)
                 + jnp.dot(h, w_hh, precision=hp,
                           preferred_element_type=jnp.float32)
                 + b_bc)                                   # (B, 4*GP)

        # Each gate owns its own GP(=128)-lane tile -> tile-aligned slices.
        i_g = jax.nn.sigmoid(gates[:, 0 * GP:1 * GP])
        f_g = jax.nn.sigmoid(gates[:, 1 * GP:2 * GP])
        g_g = jnp.tanh(gates[:, 2 * GP:3 * GP])
        o_g = jax.nn.sigmoid(gates[:, 3 * GP:4 * GP])

        c = f_g * c + i_g * g_g
        h = o_g * jnp.tanh(c)

        # Lane-dense store of this step's (padded) hidden state.
        hpad_ref[t * B:(t + 1) * B, :] = h.astype(hpad_ref.dtype)

    # Final hidden / cell state (written once).
    hn_ref[...] = h[:, :H].astype(hn_ref.dtype)
    cn_ref[...] = c[:, :H].astype(cn_ref.dtype)

    # Hoisted projection: ONE (S*B, GP) @ (GP, O) matmul + bias + ReLU for all
    # time steps instead of S tiny matmuls inside the recurrence.
    h_all = hpad_ref[...].astype(jnp.float32)              # (S*B, GP)
    logits = (jnp.dot(h_all, w_out_ref[...], precision=hp,
                      preferred_element_type=jnp.float32)
              + b_out_ref[...])
    pred_ref[...] = jnp.maximum(logits, 0.0).astype(pred_ref.dtype)


def _pad_gate_cols(w, H, GP):
    """(rows, 4H) with PyTorch gate order i|f|g|o along columns ->
    (rows, 4*GP) with each gate zero-padded into its own GP-lane tile."""
    rows = w.shape[0]
    w4 = w.reshape(rows, 4, H)
    w4 = jnp.pad(w4, ((0, 0), (0, 0), (0, GP - H)))
    return w4.reshape(rows, 4 * GP)


def decoder_lstm_forward(x, hidden, params):
    """x: (S, B, H) f32; hidden = (h0, c0), each (1, B, H).
    Returns (output, (h_n, c_n), pred) matching the PyTorch module."""
    h0, c0 = hidden
    S, B, H = x.shape
    w_ih, w_hh, b_ih, b_hh, w_out, b_out = params          # PyTorch layouts
    O = w_out.shape[0]
    GP = pl.cdiv(H, 128) * 128                             # per-gate lane tile

    # Weight prep (plain XLA, outside the kernel): transpose + zero-pad so every
    # in-kernel matmul is a plain row-major dot and every gate sits on its own
    # 128-lane tile.  Zero rows/columns keep padded lanes exactly zero.
    w_ih_p = _pad_gate_cols(jnp.transpose(w_ih), H, GP)                     # (H, 4GP)
    w_hh_p = jnp.pad(_pad_gate_cols(jnp.transpose(w_hh), H, GP),
                     ((0, GP - H), (0, 0)))                                 # (GP, 4GP)
    b_p = _pad_gate_cols((b_ih + b_hh).reshape(1, 4 * H), H, GP)            # (1, 4GP)
    w_out_p = jnp.pad(jnp.transpose(w_out), ((0, GP - H), (0, 0)))          # (GP, O)
    b_out2 = b_out.reshape(1, O)
    h0_p = jnp.pad(h0[0].astype(jnp.float32), ((0, 0), (0, GP - H)))        # (B, GP)
    c0_p = jnp.pad(c0[0].astype(jnp.float32), ((0, 0), (0, GP - H)))        # (B, GP)

    vmem = pl.BlockSpec(memory_space=pltpu.MemorySpace.VMEM)

    h_pad, pred_flat, hn, cn = pl.pallas_call(
        decoder_lstm_kernel,
        out_shape=(
            jax.ShapeDtypeStruct((S * B, GP), x.dtype),  # padded h_t, all steps
            jax.ShapeDtypeStruct((S * B, O), x.dtype),   # ReLU(Linear(h)), flat
            jax.ShapeDtypeStruct((B, H), x.dtype),       # h_n
            jax.ShapeDtypeStruct((B, H), x.dtype),       # c_n
        ),
        in_specs=[vmem] * 8,
        out_specs=(vmem,) * 4,
        # TODO(synk): for very long sequences, chunk the time loop (periodic
        # writeback every T steps) so resident buffers fit v7x's 64 MiB VMEM.
    )(x, w_ih_p, w_hh_p, b_p, h0_p, c0_p, w_out_p, b_out2)

    # Cheap XLA-side layout fixups: strip gate padding, restore (S, B, ...).
    out = h_pad[:, :H].reshape(S, B, H)
    pred = pred_flat.reshape(S, B, O)
    return out, (hn[None], cn[None]), pred


def reference_forward(x, hidden, params):
    """Pure-JAX reference of the PyTorch DecoderLSTM forward."""
    h0, c0 = hidden
    w_ih, w_hh, b_ih, b_hh, w_out, b_out = params
    H = h0.shape[-1]
    hp = lax.Precision.HIGHEST

    def step(carry, x_t):
        h, c = carry
        gates = (jnp.dot(x_t, w_ih.T, precision=hp) + b_ih
                 + jnp.dot(h, w_hh.T, precision=hp) + b_hh)
        i = jax.nn.sigmoid(gates[:, 0 * H:1 * H])
        f = jax.nn.sigmoid(gates[:, 1 * H:2 * H])
        g = jnp.tanh(gates[:, 2 * H:3 * H])
        o = jax.nn.sigmoid(gates[:, 3 * H:4 * H])
        c_new = f * c + i * g
        h_new = o * jnp.tanh(c_new)
        return (h_new, c_new), h_new

    (hn, cn), out = lax.scan(step, (h0[0], c0[0]), x)
    pred = jnp.maximum(
        jnp.einsum('sbh,oh->sbo', out, w_out, precision=hp) + b_out, 0.0)
    return out, (hn[None], cn[None]), pred


if __name__ == "__main__":
    # Small shapes implied by the module: seq=8, batch=2, hidden=32, output=64.
    S, B, H, O = 8, 2, 32, 64

    key = jax.random.PRNGKey(0)
    ks = jax.random.split(key, 9)
    scale = 1.0 / jnp.sqrt(jnp.float32(H))   # PyTorch-style uniform(-1/sqrt(H), 1/sqrt(H))

    w_ih = jax.random.uniform(ks[0], (4 * H, H), jnp.float32, -scale, scale)
    w_hh = jax.random.uniform(ks[1], (4 * H, H), jnp.float32, -scale, scale)
    b_ih = jax.random.uniform(ks[2], (4 * H,), jnp.float32, -scale, scale)
    b_hh = jax.random.uniform(ks[3], (4 * H,), jnp.float32, -scale, scale)
    w_out = jax.random.uniform(ks[4], (O, H), jnp.float32, -scale, scale)
    b_out = jax.random.uniform(ks[5], (O,), jnp.float32, -scale, scale)
    params = (w_ih, w_hh, b_ih, b_hh, w_out, b_out)

    x = jax.random.normal(ks[6], (S, B, H), jnp.float32)
    h0 = jax.random.normal(ks[7], (1, B, H), jnp.float32)
    c0 = jax.random.normal(ks[8], (1, B, H), jnp.float32)

    fwd = jax.jit(functools.partial(decoder_lstm_forward, params=params))
    output, (h_n, c_n), pred = fwd(x, (h0, c0))
    jax.block_until_ready((output, h_n, c_n, pred))

    # Sanity check against a pure-JAX reference (tolerance tightened per review).
    r_out, (r_hn, r_cn), r_pred = reference_forward(x, (h0, c0), params)
    assert output.shape == (S, B, H) and pred.shape == (S, B, O)
    assert h_n.shape == (1, B, H) and c_n.shape == (1, B, H)
    for got, want in ((output, r_out), (h_n, r_hn), (c_n, r_cn), (pred, r_pred)):
        err = jnp.max(jnp.abs(got - want))
        assert err < 1e-4, err

    print("KERNEL_OK")
</pallas_src>

<mosaic_0001>
module attributes {stable_mosaic.version = 11 : i64} {
  func.func @decoder_lstm_kernel(%arg0: memref<8x2x32xf32, #tpu.memory_space<vmem>>, %arg1: memref<32x512xf32, #tpu.memory_space<vmem>>, %arg2: memref<128x512xf32, #tpu.memory_space<vmem>>, %arg3: memref<1x512xf32, #tpu.memory_space<vmem>>, %arg4: memref<2x128xf32, #tpu.memory_space<vmem>>, %arg5: memref<2x128xf32, #tpu.memory_space<vmem>>, %arg6: memref<128x64xf32, #tpu.memory_space<vmem>>, %arg7: memref<1x64xf32, #tpu.memory_space<vmem>>, %arg8: memref<16x128xf32, #tpu.memory_space<vmem>>, %arg9: memref<16x64xf32, #tpu.memory_space<vmem>>, %arg10: memref<2x32xf32, #tpu.memory_space<vmem>>, %arg11: memref<2x32xf32, #tpu.memory_space<vmem>>) attributes {dimension_semantics = [], scalar_prefetch = 0 : i64, scratch_operands = 0 : i64, tpu.core_type = #tpu.core_type<tc>} {
    %c0 = arith.constant 0 : index
    %c0_0 = arith.constant 0 : index
    %0 = vector.load %arg1[%c0, %c0_0] : memref<32x512xf32, #tpu.memory_space<vmem>>, vector<32x512xf32>
    %c0_1 = arith.constant 0 : index
    %c0_2 = arith.constant 0 : index
    %1 = vector.load %arg2[%c0_1, %c0_2] : memref<128x512xf32, #tpu.memory_space<vmem>>, vector<128x512xf32>
    %c0_3 = arith.constant 0 : index
    %c0_4 = arith.constant 0 : index
    %2 = vector.load %arg3[%c0_3, %c0_4] : memref<1x512xf32, #tpu.memory_space<vmem>>, vector<1x512xf32>
    %3 = vector.shape_cast %2 : vector<1x512xf32> to vector<1x512xf32>
    %4 = vector.broadcast %3 : vector<1x512xf32> to vector<2x512xf32>
    %c0_5 = arith.constant 0 : index
    %c0_6 = arith.constant 0 : index
    %5 = vector.load %arg4[%c0_5, %c0_6] : memref<2x128xf32, #tpu.memory_space<vmem>>, vector<2x128xf32>
    %c0_7 = arith.constant 0 : index
    %c0_8 = arith.constant 0 : index
    %6 = vector.load %arg5[%c0_7, %c0_8] : memref<2x128xf32, #tpu.memory_space<vmem>>, vector<2x128xf32>
    %c0_9 = arith.constant 0 : index
    %c0_10 = arith.constant 0 : index
    %c0_11 = arith.constant 0 : index
    %7 = vector.load %arg0[%c0_9, %c0_10, %c0_11] : memref<8x2x32xf32, #tpu.memory_space<vmem>>, vector<1x2x32xf32>
    %8 = vector.shape_cast %7 : vector<1x2x32xf32> to vector<2x32xf32>
    %cst = arith.constant dense<0.000000e+00> : vector<2x512xf32>
    %9 = tpu.matmul %8, %0, %cst {dimension_numbers = #tpu.dot_dimension_numbers<[1], [0], [0], [1], [0, 0, 1, 1], [], []>, precision = #tpu.contract_precision<fp32>} : vector<2x32xf32>, vector<32x512xf32>, vector<2x512xf32> -> vector<2x512xf32>
    %cst_12 = arith.constant dense<0.000000e+00> : vector<2x512xf32>
    %10 = tpu.matmul %5, %1, %cst_12 {dimension_numbers = #tpu.dot_dimension_numbers<[1], [0], [0], [1], [0, 0, 1, 1], [], []>, precision = #tpu.contract_precision<fp32>} : vector<2x128xf32>, vector<128x512xf32>, vector<2x512xf32> -> vector<2x512xf32>
    %11 = arith.addf %9, %10 : vector<2x512xf32>
    %12 = arith.addf %11, %4 : vector<2x512xf32>
    %13 = vector.extract_strided_slice %12 {offsets = [0, 0], sizes = [2, 128], strides = [1, 1]} : vector<2x512xf32> to vector<2x128xf32>
    %14 = arith.negf %13 : vector<2x128xf32>
    %15 = math.exp %14 : vector<2x128xf32>
    %cst_13 = arith.constant 1.000000e+00 : f32
    %16 = vector.broadcast %cst_13 : f32 to vector<2x128xf32>
    %17 = arith.addf %16, %15 : vector<2x128xf32>
    %18 = arith.divf %16, %17 : vector<2x128xf32>
    %19 = vector.extract_strided_slice %12 {offsets = [0, 128], sizes = [2, 128], strides = [1, 1]} : vector<2x512xf32> to vector<2x128xf32>
    %20 = arith.negf %19 : vector<2x128xf32>
    %21 = math.exp %20 : vector<2x128xf32>
    %cst_14 = arith.constant 1.000000e+00 : f32
    %22 = vector.broadcast %cst_14 : f32 to vector<2x128xf32>
    %23 = arith.addf %22, %21 : vector<2x128xf32>
    %24 = arith.divf %22, %23 : vector<2x128xf32>
    %25 = vector.extract_strided_slice %12 {offsets = [0, 256], sizes = [2, 128], strides = [1, 1]} : vector<2x512xf32> to vector<2x128xf32>
    %26 = math.tanh %25 : vector<2x128xf32>
    %27 = vector.extract_strided_slice %12 {offsets = [0, 384], sizes = [2, 128], strides = [1, 1]} : vector<2x512xf32> to vector<2x128xf32>
    %28 = arith.negf %27 : vector<2x128xf32>
    %29 = math.exp %28 : vector<2x128xf32>
    %cst_15 = arith.constant 1.000000e+00 : f32
    %30 = vector.broadcast %cst_15 : f32 to vector<2x128xf32>
    %31 = arith.addf %30, %29 : vector<2x128xf32>
    %32 = arith.divf %30, %31 : vector<2x128xf32>
    %33 = arith.mulf %24, %6 : vector<2x128xf32>
    %34 = arith.mulf %18, %26 : vector<2x128xf32>
    %35 = arith.addf %33, %34 : vector<2x128xf32>
    %36 = math.tanh %35 : vector<2x128xf32>
    %37 = arith.mulf %32, %36 : vector<2x128xf32>
    %c0_16 = arith.constant 0 : index
    %c0_17 = arith.constant 0 : index
    %38 = vector.load %arg8[%c0_16, %c0_17] : memref<16x128xf32, #tpu.memory_space<vmem>>, vector<2x128xf32>
    tpu.vector_store %arg8[%c0_16, %c0_17], %37 {strides = array<i32>} : memref<16x128xf32, #tpu.memory_space<vmem>>, vector<2x128xf32>,
    %c1 = arith.constant 1 : index
    %c0_18 = arith.constant 0 : index
    %c0_19 = arith.constant 0 : index
    %39 = vector.load %arg0[%c1, %c0_18, %c0_19] : memref<8x2x32xf32, #tpu.memory_space<vmem>>, vector<1x2x32xf32>
    %40 = vector.shape_cast %39 : vector<1x2x32xf32> to vector<2x32xf32>
    %cst_20 = arith.constant dense<0.000000e+00> : vector<2x512xf32>
    %41 = tpu.matmul %40, %0, %cst_20 {dimension_numbers = #tpu.dot_dimension_numbers<[1], [0], [0], [1], [0, 0, 1, 1], [], []>, precision = #tpu.contract_precision<fp32>} : vector<2x32xf32>, vector<32x512xf32>, vector<2x512xf32> -> vector<2x512xf32>
    %cst_21 = arith.constant dense<0.000000e+00> : vector<2x512xf32>
    %42 = tpu.matmul %37, %1, %cst_21 {dimension_numbers = #tpu.dot_dimension_numbers<[1], [0], [0], [1], [0, 0, 1, 1], [], []>, precision = #tpu.contract_precision<fp32>} : vector<2x128xf32>, vector<128x512xf32>, vector<2x512xf32> -> vector<2x512xf32>
    %43 = arith.addf %41, %42 : vector<2x512xf32>
    %44 = arith.addf %43, %4 : vector<2x512xf32>
    %45 = vector.extract_strided_slice %44 {offsets = [0, 0], sizes = [2, 128], strides = [1, 1]} : vector<2x512xf32> to vector<2x128xf32>
    %46 = arith.negf %45 : vector<2x128xf32>
    %47 = math.exp %46 : vector<2x128xf32>
    %cst_22 = arith.constant 1.000000e+00 : f32
    %48 = vector.broadcast %cst_22 : f32 to vector<2x128xf32>
    %49 = arith.addf %48, %47 : vector<2x128xf32>
    %50 = arith.divf %48, %49 : vector<2x128xf32>
    %51 = vector.extract_strided_slice %44 {offsets = [0, 128], sizes = [2, 128], strides = [1, 1]} : vector<2x512xf32> to vector<2x128xf32>
    %52 = arith.negf %51 : vector<2x128xf32>
    %53 = math.exp %52 : vector<2x128xf32>
    %cst_23 = arith.constant 1.000000e+00 : f32
    %54 = vector.broadcast %cst_23 : f32 to vector<2x128xf32>
    %55 = arith.addf %54, %53 : vector<2x128xf32>
    %56 = arith.divf %54, %55 : vector<2x128xf32>
    %57 = vector.extract_strided_slice %44 {offsets = [0, 256], sizes = [2, 128], strides = [1, 1]} : vector<2x512xf32> to vector<2x128xf32>
    %58 = math.tanh %57 : vector<2x128xf32>
    %59 = vector.extract_strided_slice %44 {offsets = [0, 384], sizes = [2, 128], strides = [1, 1]} : vector<2x512xf32> to vector<2x128xf32>
    %60 = arith.negf %59 : vector<2x128xf32>
    %61 = math.exp %60 : vector<2x128xf32>
    %cst_24 = arith.constant 1.000000e+00 : f32
    %62 = vector.broadcast %cst_24 : f32 to vector<2x128xf32>
    %63 = arith.addf %62, %61 : vector<2x128xf32>
    %64 = arith.divf %62, %63 : vector<2x128xf32>
    %65 = arith.mulf %56, %35 : vector<2x128xf32>
    %66 = arith.mulf %50, %58 : vector<2x128xf32>
    %67 = arith.addf %65, %66 : vector<2x128xf32>
    %68 = math.tanh %67 : vector<2x128xf32>
    %69 = arith.mulf %64, %68 : vector<2x128xf32>
    %c2 = arith.constant 2 : index
    %c0_25 = arith.constant 0 : index
    %70 = vector.load %arg8[%c2, %c0_25] : memref<16x128xf32, #tpu.memory_space<vmem>>, vector<2x128xf32>
    tpu.vector_store %arg8[%c2, %c0_25], %69 {strides = array<i32>} : memref<16x128xf32, #tpu.memory_space<vmem>>, vector<2x128xf32>,
    %c2_26 = arith.constant 2 : index
    %c0_27 = arith.constant 0 : index
    %c0_28 = arith.constant 0 : index
    %71 = vector.load %arg0[%c2_26, %c0_27, %c0_28] : memref<8x2x32xf32, #tpu.memory_space<vmem>>, vector<1x2x32xf32>
    %72 = vector.shape_cast %71 : vector<1x2x32xf32> to vector<2x32xf32>
    %cst_29 = arith.constant dense<0.000000e+00> : vector<2x512xf32>
    %73 = tpu.matmul %72, %0, %cst_29 {dimension_numbers = #tpu.dot_dimension_numbers<[1], [0], [0], [1], [0, 0, 1, 1], [], []>, precision = #tpu.contract_precision<fp32>} : vector<2x32xf32>, vector<32x512xf32>, vector<2x512xf32> -> vector<2x512xf32>
    %cst_30 = arith.constant dense<0.000000e+00> : vector<2x512xf32>
    %74 = tpu.matmul %69, %1, %cst_30 {dimension_numbers = #tpu.dot_dimension_numbers<[1], [0], [0], [1], [0, 0, 1, 1], [], []>, precision = #tpu.contract_precision<fp32>} : vector<2x128xf32>, vector<128x512xf32>, vector<2x512xf32> -> vector<2x512xf32>
    %75 = arith.addf %73, %74 : vector<2x512xf32>
    %76 = arith.addf %75, %4 : vector<2x512xf32>
    %77 = vector.extract_strided_slice %76 {offsets = [0, 0], sizes = [2, 128], strides = [1, 1]} : vector<2x512xf32> to vector<2x128xf32>
    %78 = arith.negf %77 : vector<2x128xf32>
    %79 = math.exp %78 : vector<2x128xf32>
    %cst_31 = arith.constant 1.000000e+00 : f32
    %80 = vector.broadcast %cst_31 : f32 to vector<2x128xf32>
    %81 = arith.addf %80, %79 : vector<2x128xf32>
    %82 = arith.divf %80, %81 : vector<2x128xf32>
    %83 = vector.extract_strided_slice %76 {offsets = [0, 128], sizes = [2, 128], strides = [1, 1]} : vector<2x512xf32> to vector<2x128xf32>
    %84 = arith.negf %83 : vector<2x128xf32>
    %85 = math.exp %84 : vector<2x128xf32>
    %cst_32 = arith.constant 1.000000e+00 : f32
    %86 = vector.broadcast %cst_32 : f32 to vector<2x128xf32>
    %87 = arith.addf %86, %85 : vector<2x128xf32>
    %88 = arith.divf %86, %87 : vector<2x128xf32>
    %89 = vector.extract_strided_slice %76 {offsets = [0, 256], sizes = [2, 128], strides = [1, 1]} : vector<2x512xf32> to vector<2x128xf32>
    %90 = math.tanh %89 : vector<2x128xf32>
    %91 = vector.extract_strided_slice %76 {offsets = [0, 384], sizes = [2, 128], strides = [1, 1]} : vector<2x512xf32> to vector<2x128xf32>
    %92 = arith.negf %91 : vector<2x128xf32>
    %93 = math.exp %92 : vector<2x128xf32>
    %cst_33 = arith.constant 1.000000e+00 : f32
    %94 = vector.broadcast %cst_33 : f32 to vector<2x128xf32>
    %95 = arith.addf %94, %93 : vector<2x128xf32>
    %96 = arith.divf %94, %95 : vector<2x128xf32>
    %97 = arith.mulf %88, %67 : vector<2x128xf32>
    %98 = arith.mulf %82, %90 : vector<2x128xf32>
    %99 = arith.addf %97, %98 : vector<2x128xf32>
    %100 = math.tanh %99 : vector<2x128xf32>
    %101 = arith.mulf %96, %100 : vector<2x128xf32>
    %c4 = arith.constant 4 : index
    %c0_34 = arith.constant 0 : index
    %102 = vector.load %arg8[%c4, %c0_34] : memref<16x128xf32, #tpu.memory_space<vmem>>, vector<2x128xf32>
    tpu.vector_store %arg8[%c4, %c0_34], %101 {strides = array<i32>} : memref<16x128xf32, #tpu.memory_space<vmem>>, vector<2x128xf32>,
    %c3 = arith.constant 3 : index
    %c0_35 = arith.constant 0 : index
    %c0_36 = arith.constant 0 : index
    %103 = vector.load %arg0[%c3, %c0_35, %c0_36] : memref<8x2x32xf32, #tpu.memory_space<vmem>>, vector<1x2x32xf32>
    %104 = vector.shape_cast %103 : vector<1x2x32xf32> to vector<2x32xf32>
    %cst_37 = arith.constant dense<0.000000e+00> : vector<2x512xf32>
    %105 = tpu.matmul %104, %0, %cst_37 {dimension_numbers = #tpu.dot_dimension_numbers<[1], [0], [0], [1], [0, 0, 1, 1], [], []>, precision = #tpu.contract_precision<fp32>} : vector<2x32xf32>, vector<32x512xf32>, vector<2x512xf32> -> vector<2x512xf32>
    %cst_38 = arith.constant dense<0.000000e+00> : vector<2x512xf32>
    %106 = tpu.matmul %101, %1, %cst_38 {dimension_numbers = #tpu.dot_dimension_numbers<[1], [0], [0], [1], [0, 0, 1, 1], [], []>, precision = #tpu.contract_precision<fp32>} : vector<2x128xf32>, vector<128x512xf32>, vector<2x512xf32> -> vector<2x512xf32>
    %107 = arith.addf %105, %106 : vector<2x512xf32>
    %108 = arith.addf %107, %4 : vector<2x512xf32>
    %109 = vector.extract_strided_slice %108 {offsets = [0, 0], sizes = [2, 128], strides = [1, 1]} : vector<2x512xf32> to vector<2x128xf32>
    %110 = arith.negf %109 : vector<2x128xf32>
    %111 = math.exp %110 : vector<2x128xf32>
    %cst_39 = arith.constant 1.000000e+00 : f32
    %112 = vector.broadcast %cst_39 : f32 to vector<2x128xf32>
    %113 = arith.addf %112, %111 : vector<2x128xf32>
    %114 = arith.divf %112, %113 : vector<2x128xf32>
    %115 = vector.extract_strided_slice %108 {offsets = [0, 128], sizes = [2, 128], strides = [1, 1]} : vector<2x512xf32> to vector<2x128xf32>
    %116 = arith.negf %115 : vector<2x128xf32>
    %117 = math.exp %116 : vector<2x128xf32>
    %cst_40 = arith.constant 1.000000e+00 : f32
    %118 = vector.broadcast %cst_40 : f32 to vector<2x128xf32>
    %119 = arith.addf %118, %117 : vector<2x128xf32>
    %120 = arith.divf %118, %119 : vector<2x128xf32>
    %121 = vector.extract_strided_slice %108 {offsets = [0, 256], sizes = [2, 128], strides = [1, 1]} : vector<2x512xf32> to vector<2x128xf32>
    %122 = math.tanh %121 : vector<2x128xf32>
    %123 = vector.extract_strided_slice %108 {offsets = [0, 384], sizes = [2, 128], strides = [1, 1]} : vector<2x512xf32> to vector<2x128xf32>
    %124 = arith.negf %123 : vector<2x128xf32>
    %125 = math.exp %124 : vector<2x128xf32>
    %cst_41 = arith.constant 1.000000e+00 : f32
    %126 = vector.broadcast %cst_41 : f32 to vector<2x128xf32>
    %127 = arith.addf %126, %125 : vector<2x128xf32>
    %128 = arith.divf %126, %127 : vector<2x128xf32>
    %129 = arith.mulf %120, %99 : vector<2x128xf32>
    %130 = arith.mulf %114, %122 : vector<2x128xf32>
    %131 = arith.addf %129, %130 : vector<2x128xf32>
    %132 = math.tanh %131 : vector<2x128xf32>
    %133 = arith.mulf %128, %132 : vector<2x128xf32>
    %c6 = arith.constant 6 : index
    %c0_42 = arith.constant 0 : index
    %134 = vector.load %arg8[%c6, %c0_42] : memref<16x128xf32, #tpu.memory_space<vmem>>, vector<2x128xf32>
    tpu.vector_store %arg8[%c6, %c0_42], %133 {strides = array<i32>} : memref<16x128xf32, #tpu.memory_space<vmem>>, vector<2x128xf32>,
    %c4_43 = arith.constant 4 : index
    %c0_44 = arith.constant 0 : index
    %c0_45 = arith.constant 0 : index
    %135 = vector.load %arg0[%c4_43, %c0_44, %c0_45] : memref<8x2x32xf32, #tpu.memory_space<vmem>>, vector<1x2x32xf32>
    %136 = vector.shape_cast %135 : vector<1x2x32xf32> to vector<2x32xf32>
    %cst_46 = arith.constant dense<0.000000e+00> : vector<2x512xf32>
    %137 = tpu.matmul %136, %0, %cst_46 {dimension_numbers = #tpu.dot_dimension_numbers<[1], [0], [0], [1], [0, 0, 1, 1], [], []>, precision = #tpu.contract_precision<fp32>} : vector<2x32xf32>, vector<32x512xf32>, vector<2x512xf32> -> vector<2x512xf32>
    %cst_47 = arith.constant dense<0.000000e+00> : vector<2x512xf32>
    %138 = tpu.matmul %133, %1, %cst_47 {dimension_numbers = #tpu.dot_dimension_numbers<[1], [0], [0], [1], [0, 0, 1, 1], [], []>, precision = #tpu.contract_precision<fp32>} : vector<2x128xf32>, vector<128x512xf32>, vector<2x512xf32> -> vector<2x512xf32>
    %139 = arith.addf %137, %138 : vector<2x512xf32>
    %140 = arith.addf %139, %4 : vector<2x512xf32>
    %141 = vector.extract_strided_slice %140 {offsets = [0, 0], sizes = [2, 128], strides = [1, 1]} : vector<2x512xf32> to vector<2x128xf32>
    %142 = arith.negf %141 : vector<2x128xf32>
    %143 = math.exp %142 : vector<2x128xf32>
    %cst_48 = arith.constant 1.000000e+00 : f32
    %144 = vector.broadcast %cst_48 : f32 to vector<2x128xf32>
    %145 = arith.addf %144, %143 : vector<2x128xf32>
    %146 = arith.divf %144, %145 : vector<2x128xf32>
    %147 = vector.extract_strided_slice %140 {offsets = [0, 128], sizes = [2, 128], strides = [1, 1]} : vector<2x512xf32> to vector<2x128xf32>
    %148 = arith.negf %147 : vector<2x128xf32>
    %149 = math.exp %148 : vector<2x128xf32>
    %cst_49 = arith.constant 1.000000e+00 : f32
    %150 = vector.broadcast %cst_49 : f32 to vector<2x128xf32>
    %151 = arith.addf %150, %149 : vector<2x128xf32>
    %152 = arith.divf %150, %151 : vector<2x128xf32>
    %153 = vector.extract_strided_slice %140 {offsets = [0, 256], sizes = [2, 128], strides = [1, 1]} : vector<2x512xf32> to vector<2x128xf32>
    %154 = math.tanh %153 : vector<2x128xf32>
    %155 = vector.extract_strided_slice %140 {offsets = [0, 384], sizes = [2, 128], strides = [1, 1]} : vector<2x512xf32> to vector<2x128xf32>
    %156 = arith.negf %155 : vector<2x128xf32>
    %157 = math.exp %156 : vector<2x128xf32>
    %cst_50 = arith.constant 1.000000e+00 : f32
    %158 = vector.broadcast %cst_50 : f32 to vector<2x128xf32>
    %159 = arith.addf %158, %157 : vector<2x128xf32>
    %160 = arith.divf %158, %159 : vector<2x128xf32>
    %161 = arith.mulf %152, %131 : vector<2x128xf32>
    %162 = arith.mulf %146, %154 : vector<2x128xf32>
    %163 = arith.addf %161, %162 : vector<2x128xf32>
    %164 = math.tanh %163 : vector<2x128xf32>
    %165 = arith.mulf %160, %164 : vector<2x128xf32>
    %c8 = arith.constant 8 : index
    %c0_51 = arith.constant 0 : index
    %166 = vector.load %arg8[%c8, %c0_51] : memref<16x128xf32, #tpu.memory_space<vmem>>, vector<2x128xf32>
    tpu.vector_store %arg8[%c8, %c0_51], %165 {strides = array<i32>} : memref<16x128xf32, #tpu.memory_space<vmem>>, vector<2x128xf32>,
    %c5 = arith.constant 5 : index
    %c0_52 = arith.constant 0 : index
    %c0_53 = arith.constant 0 : index
    %167 = vector.load %arg0[%c5, %c0_52, %c0_53] : memref<8x2x32xf32, #tpu.memory_space<vmem>>, vector<1x2x32xf32>
    %168 = vector.shape_cast %167 : vector<1x2x32xf32> to vector<2x32xf32>
    %cst_54 = arith.constant dense<0.000000e+00> : vector<2x512xf32>
    %169 = tpu.matmul %168, %0, %cst_54 {dimension_numbers = #tpu.dot_dimension_numbers<[1], [0], [0], [1], [0, 0, 1, 1], [], []>, precision = #tpu.contract_precision<fp32>} : vector<2x32xf32>, vector<32x512xf32>, vector<2x512xf32> -> vector<2x512xf32>
    %cst_55 = arith.constant dense<0.000000e+00> : vector<2x512xf32>
    %170 = tpu.matmul %165, %1, %cst_55 {dimension_numbers = #tpu.dot_dimension_numbers<[1], [0], [0], [1], [0, 0, 1, 1], [], []>, precision = #tpu.contract_precision<fp32>} : vector<2x128xf32>, vector<128x512xf32>, vector<2x512xf32> -> vector<2x512xf32>
    %171 = arith.addf %169, %170 : vector<2x512xf32>
    %172 = arith.addf %171, %4 : vector<2x512xf32>
    %173 = vector.extract_strided_slice %172 {offsets = [0, 0], sizes = [2, 128], strides = [1, 1]} : vector<2x512xf32> to vector<2x128xf32>
    %174 = arith.negf %173 : vector<2x128xf32>
    %175 = math.exp %174 : vector<2x128xf32>
    %cst_56 = arith.constant 1.000000e+00 : f32
    %176 = vector.broadcast %cst_56 : f32 to vector<2x128xf32>
    %177 = arith.addf %176, %175 : vector<2x128xf32>
    %178 = arith.divf %176, %177 : vector<2x128xf32>
    %179 = vector.extract_strided_slice %172 {offsets = [0, 128], sizes = [2, 128], strides = [1, 1]} : vector<2x512xf32> to vector<2x128xf32>
    %180 = arith.negf %179 : vector<2x128xf32>
    %181 = math.exp %180 : vector<2x128xf32>
    %cst_57 = arith.constant 1.000000e+00 : f32
    %182 = vector.broadcast %cst_57 : f32 to vector<2x128xf32>
    %183 = arith.addf %182, %181 : vector<2x128xf32>
    %184 = arith.divf %182, %183 : vector<2x128xf32>
    %185 = vector.extract_strided_slice %172 {offsets = [0, 256], sizes = [2, 128], strides = [1, 1]} : vector<2x512xf32> to vector<2x128xf32>
    %186 = math.tanh %185 : vector<2x128xf32>
    %187 = vector.extract_strided_slice %172 {offsets = [0, 384], sizes = [2, 128], strides = [1, 1]} : vector<2x512xf32> to vector<2x128xf32>
    %188 = arith.negf %187 : vector<2x128xf32>
    %189 = math.exp %188 : vector<2x128xf32>
    %cst_58 = arith.constant 1.000000e+00 : f32
    %190 = vector.broadcast %cst_58 : f32 to vector<2x128xf32>
    %191 = arith.addf %190, %189 : vector<2x128xf32>
    %192 = arith.divf %190, %191 : vector<2x128xf32>
    %193 = arith.mulf %184, %163 : vector<2x128xf32>
    %194 = arith.mulf %178, %186 : vector<2x128xf32>
    %195 = arith.addf %193, %194 : vector<2x128xf32>
    %196 = math.tanh %195 : vector<2x128xf32>
    %197 = arith.mulf %192, %196 : vector<2x128xf32>
    %c10 = arith.constant 10 : index
    %c0_59 = arith.constant 0 : index
    %198 = vector.load %arg8[%c10, %c0_59] : memref<16x128xf32, #tpu.memory_space<vmem>>, vector<2x128xf32>
    tpu.vector_store %arg8[%c10, %c0_59], %197 {strides = array<i32>} : memref<16x128xf32, #tpu.memory_space<vmem>>, vector<2x128xf32>,
    %c6_60 = arith.constant 6 : index
    %c0_61 = arith.constant 0 : index
    %c0_62 = arith.constant 0 : index
    %199 = vector.load %arg0[%c6_60, %c0_61, %c0_62] : memref<8x2x32xf32, #tpu.memory_space<vmem>>, vector<1x2x32xf32>
    %200 = vector.shape_cast %199 : vector<1x2x32xf32> to vector<2x32xf32>
    %cst_63 = arith.constant dense<0.000000e+00> : vector<2x512xf32>
    %201 = tpu.matmul %200, %0, %cst_63 {dimension_numbers = #tpu.dot_dimension_numbers<[1], [0], [0], [1], [0, 0, 1, 1], [], []>, precision = #tpu.contract_precision<fp32>} : vector<2x32xf32>, vector<32x512xf32>, vector<2x512xf32> -> vector<2x512xf32>
    %cst_64 = arith.constant dense<0.000000e+00> : vector<2x512xf32>
    %202 = tpu.matmul %197, %1, %cst_64 {dimension_numbers = #tpu.dot_dimension_numbers<[1], [0], [0], [1], [0, 0, 1, 1], [], []>, precision = #tpu.contract_precision<fp32>} : vector<2x128xf32>, vector<128x512xf32>, vector<2x512xf32> -> vector<2x512xf32>
    %203 = arith.addf %201, %202 : vector<2x512xf32>
    %204 = arith.addf %203, %4 : vector<2x512xf32>
    %205 = vector.extract_strided_slice %204 {offsets = [0, 0], sizes = [2, 128], strides = [1, 1]} : vector<2x512xf32> to vector<2x128xf32>
    %206 = arith.negf %205 : vector<2x128xf32>
    %207 = math.exp %206 : vector<2x128xf32>
    %cst_65 = arith.constant 1.000000e+00 : f32
    %208 = vector.broadcast %cst_65 : f32 to vector<2x128xf32>
    %209 = arith.addf %208, %207 : vector<2x128xf32>
    %210 = arith.divf %208, %209 : vector<2x128xf32>
    %211 = vector.extract_strided_slice %204 {offsets = [0, 128], sizes = [2, 128], strides = [1, 1]} : vector<2x512xf32> to vector<2x128xf32>
    %212 = arith.negf %211 : vector<2x128xf32>
    %213 = math.exp %212 : vector<2x128xf32>
    %cst_66 = arith.constant 1.000000e+00 : f32
    %214 = vector.broadcast %cst_66 : f32 to vector<2x128xf32>
    %215 = arith.addf %214, %213 : vector<2x128xf32>
    %216 = arith.divf %214, %215 : vector<2x128xf32>
    %217 = vector.extract_strided_slice %204 {offsets = [0, 256], sizes = [2, 128], strides = [1, 1]} : vector<2x512xf32> to vector<2x128xf32>
    %218 = math.tanh %217 : vector<2x128xf32>
    %219 = vector.extract_strided_slice %204 {offsets = [0, 384], sizes = [2, 128], strides = [1, 1]} : vector<2x512xf32> to vector<2x128xf32>
    %220 = arith.negf %219 : vector<2x128xf32>
    %221 = math.exp %220 : vector<2x128xf32>
    %cst_67 = arith.constant 1.000000e+00 : f32
    %222 = vector.broadcast %cst_67 : f32 to vector<2x128xf32>
    %223 = arith.addf %222, %221 : vector<2x128xf32>
    %224 = arith.divf %222, %223 : vector<2x128xf32>
    %225 = arith.mulf %216, %195 : vector<2x128xf32>
    %226 = arith.mulf %210, %218 : vector<2x128xf32>
    %227 = arith.addf %225, %226 : vector<2x128xf32>
    %228 = math.tanh %227 : vector<2x128xf32>
    %229 = arith.mulf %224, %228 : vector<2x128xf32>
    %c12 = arith.constant 12 : index
    %c0_68 = arith.constant 0 : index
    %230 = vector.load %arg8[%c12, %c0_68] : memref<16x128xf32, #tpu.memory_space<vmem>>, vector<2x128xf32>
    tpu.vector_store %arg8[%c12, %c0_68], %229 {strides = array<i32>} : memref<16x128xf32, #tpu.memory_space<vmem>>, vector<2x128xf32>,
    %c7 = arith.constant 7 : index
    %c0_69 = arith.constant 0 : index
    %c0_70 = arith.constant 0 : index
    %231 = vector.load %arg0[%c7, %c0_69, %c0_70] : memref<8x2x32xf32, #tpu.memory_space<vmem>>, vector<1x2x32xf32>
    %232 = vector.shape_cast %231 : vector<1x2x32xf32> to vector<2x32xf32>
    %cst_71 = arith.constant dense<0.000000e+00> : vector<2x512xf32>
    %233 = tpu.matmul %232, %0, %cst_71 {dimension_numbers = #tpu.dot_dimension_numbers<[1], [0], [0], [1], [0, 0, 1, 1], [], []>, precision = #tpu.contract_precision<fp32>} : vector<2x32xf32>, vector<32x512xf32>, vector<2x512xf32> -> vector<2x512xf32>
    %cst_72 = arith.constant dense<0.000000e+00> : vector<2x512xf32>
    %234 = tpu.matmul %229, %1, %cst_72 {dimension_numbers = #tpu.dot_dimension_numbers<[1], [0], [0], [1], [0, 0, 1, 1], [], []>, precision = #tpu.contract_precision<fp32>} : vector<2x128xf32>, vector<128x512xf32>, vector<2x512xf32> -> vector<2x512xf32>
    %235 = arith.addf %233, %234 : vector<2x512xf32>
    %236 = arith.addf %235, %4 : vector<2x512xf32>
    %237 = vector.extract_strided_slice %236 {offsets = [0, 0], sizes = [2, 128], strides = [1, 1]} : vector<2x512xf32> to vector<2x128xf32>
    %238 = arith.negf %237 : vector<2x128xf32>
    %239 = math.exp %238 : vector<2x128xf32>
    %cst_73 = arith.constant 1.000000e+00 : f32
    %240 = vector.broadcast %cst_73 : f32 to vector<2x128xf32>
    %241 = arith.addf %240, %239 : vector<2x128xf32>
    %242 = arith.divf %240, %241 : vector<2x128xf32>
    %243 = vector.extract_strided_slice %236 {offsets = [0, 128], sizes = [2, 128], strides = [1, 1]} : vector<2x512xf32> to vector<2x128xf32>
    %244 = arith.negf %243 : vector<2x128xf32>
    %245 = math.exp %244 : vector<2x128xf32>
    %cst_74 = arith.constant 1.000000e+00 : f32
    %246 = vector.broadcast %cst_74 : f32 to vector<2x128xf32>
    %247 = arith.addf %246, %245 : vector<2x128xf32>
    %248 = arith.divf %246, %247 : vector<2x128xf32>
    %249 = vector.extract_strided_slice %236 {offsets = [0, 256], sizes = [2, 128], strides = [1, 1]} : vector<2x512xf32> to vector<2x128xf32>
    %250 = math.tanh %249 : vector<2x128xf32>
    %251 = vector.extract_strided_slice %236 {offsets = [0, 384], sizes = [2, 128], strides = [1, 1]} : vector<2x512xf32> to vector<2x128xf32>
    %252 = arith.negf %251 : vector<2x128xf32>
    %253 = math.exp %252 : vector<2x128xf32>
    %cst_75 = arith.constant 1.000000e+00 : f32
    %254 = vector.broadcast %cst_75 : f32 to vector<2x128xf32>
    %255 = arith.addf %254, %253 : vector<2x128xf32>
    %256 = arith.divf %254, %255 : vector<2x128xf32>
    %257 = arith.mulf %248, %227 : vector<2x128xf32>
    %258 = arith.mulf %242, %250 : vector<2x128xf32>
    %259 = arith.addf %257, %258 : vector<2x128xf32>
    %260 = math.tanh %259 : vector<2x128xf32>
    %261 = arith.mulf %256, %260 : vector<2x128xf32>
    %c14 = arith.constant 14 : index
    %c0_76 = arith.constant 0 : index
    %262 = vector.load %arg8[%c14, %c0_76] : memref<16x128xf32, #tpu.memory_space<vmem>>, vector<2x128xf32>
    tpu.vector_store %arg8[%c14, %c0_76], %261 {strides = array<i32>} : memref<16x128xf32, #tpu.memory_space<vmem>>, vector<2x128xf32>,
    %263 = vector.extract_strided_slice %261 {offsets = [0, 0], sizes = [2, 32], strides = [1, 1]} : vector<2x128xf32> to vector<2x32xf32>
    %c0_77 = arith.constant 0 : index
    %c0_78 = arith.constant 0 : index
    %264 = vector.load %arg10[%c0_77, %c0_78] : memref<2x32xf32, #tpu.memory_space<vmem>>, vector<2x32xf32>
    tpu.vector_store %arg10[%c0_77, %c0_78], %263 {strides = array<i32>} : memref<2x32xf32, #tpu.memory_space<vmem>>, vector<2x32xf32>,
    %265 = vector.extract_strided_slice %259 {offsets = [0, 0], sizes = [2, 32], strides = [1, 1]} : vector<2x128xf32> to vector<2x32xf32>
    %c0_79 = arith.constant 0 : index
    %c0_80 = arith.constant 0 : index
    %266 = vector.load %arg11[%c0_79, %c0_80] : memref<2x32xf32, #tpu.memory_space<vmem>>, vector<2x32xf32>
    tpu.vector_store %arg11[%c0_79, %c0_80], %265 {strides = array<i32>} : memref<2x32xf32, #tpu.memory_space<vmem>>, vector<2x32xf32>,
    %c0_81 = arith.constant 0 : index
    %c0_82 = arith.constant 0 : index
    %267 = vector.load %arg8[%c0_81, %c0_82] : memref<16x128xf32, #tpu.memory_space<vmem>>, vector<16x128xf32>
    %c0_83 = arith.constant 0 : index
    %c0_84 = arith.constant 0 : index
    %268 = vector.load %arg6[%c0_83, %c0_84] : memref<128x64xf32, #tpu.memory_space<vmem>>, vector<128x64xf32>
    %cst_85 = arith.constant dense<0.000000e+00> : vector<16x64xf32>
    %269 = tpu.matmul %267, %268, %cst_85 {dimension_numbers = #tpu.dot_dimension_numbers<[1], [0], [0], [1], [0, 0, 1, 1], [], []>, precision = #tpu.contract_precision<fp32>} : vector<16x128xf32>, vector<128x64xf32>, vector<16x64xf32> -> vector<16x64xf32>
    %c0_86 = arith.constant 0 : index
    %c0_87 = arith.constant 0 : index
    %270 = vector.load %arg7[%c0_86, %c0_87] : memref<1x64xf32, #tpu.memory_space<vmem>>, vector<1x64xf32>
    %271 = vector.broadcast %270 : vector<1x64xf32> to vector<16x64xf32>
    %272 = arith.addf %269, %271 : vector<16x64xf32>
    %cst_88 = arith.constant 0.000000e+00 : f32
    %273 = vector.broadcast %cst_88 : f32 to vector<16x64xf32>
    %274 = arith.maximumf %272, %273 : vector<16x64xf32>
    %c0_89 = arith.constant 0 : index
    %c0_90 = arith.constant 0 : index
    %275 = vector.load %arg9[%c0_89, %c0_90] : memref<16x64xf32, #tpu.memory_space<vmem>>, vector<16x64xf32>
    tpu.vector_store %arg9[%c0_89, %c0_90], %274 {strides = array<i32>} : memref<16x64xf32, #tpu.memory_space<vmem>>, vector<16x64xf32>,
    return
  }
}

</mosaic_0001>

<bundles_post_ra>
// kernel: decoder_lstm_forward.1
= control target key start
LH: loop header
LB: loop body
LE: loop exit
PB: predicated region body
PF: predicated region fallthrough
CT: control target
= control target key end

     0   :  { %17 = vsyncpa [#allocation3], 0  ;;  %s33080_s0 = inlined_call_operand.vmem [shape: f32[8,2,32], index: 0, kind: input, shape index: {}]   ;;  %s33081_s1 = inlined_call_operand.hbm [shape: f32[32,512], index: 1, kind: input, shape index: {}]   ;;  %s33082_s2 = inlined_call_operand.hbm [shape: f32[128,512], index: 2, kind: input, shape index: {}]   ;;  %s33083_s3 = inlined_call_operand.vmem [shape: f32[1,512], index: 3, kind: input, shape index: {}]   ;;  %s33084_s4 = inlined_call_operand.vmem [shape: f32[2,128], index: 4, kind: input, shape index: {}]   ;;  %s33085_s5 = inlined_call_operand.vmem [shape: f32[2,128], index: 5, kind: input, shape index: {}]   ;;  %s33086_s6 = inlined_call_operand.hbm [shape: f32[128,64], index: 6, kind: input, shape index: {}]   ;;  %s33087_s7 = inlined_call_operand.vmem [shape: f32[1,64], index: 7, kind: input, shape index: {}]   ;;  %s33088_s8 = inlined_call_operand.hbm [shape: f32[16,128], index: 8, kind: output, shape index: {0}]   ;;  %s33089_s9 = inlined_call_operand.hbm [shape: f32[16,64], index: 9, kind: output, shape index: {1}]   ;;  %s33090_s10 = inlined_call_operand.hbm [shape: f32[2,32], index: 10, kind: output, shape index: {2}]   ;;  %s33091_s11 = inlined_call_operand.hbm [shape: f32[2,32], index: 11, kind: output, shape index: {3}]  }
   0x1   :  { %18 = vsyncpa [#allocation6], 0 }
   0x2   :  { %19 = vsyncpa [#allocation4], 0 }
   0x3   :  { %20 = vsyncpa [#allocation10], 0 }
   0x4   :  { %21 = vsyncpa [#allocation13], 0  ;;  %s28649_s17 = smov [#allocation5]   ;;  %s28650_s19 = smov [#allocation2]  }
   0x5   :  { %s41_s18 = sshll.u32 %s28649_s17, 4  ;;  %s29_s20 = sshll.u32 %s28650_s19, 4  ;;  %s42_s18 = int_to_ptr.vmem [resolvable:$true] %s41_s18  ;;  %s28721_s20 = int_to_ptr.vmem [resolvable:$true] %s29_s20 }
   0x6   :  { %s28485_s23 = scalar_lea.hbm %s33082_s2, 8192 }
   0x7   :  { %p28486_p0 = scmp.ne.s32.totalorder %s33082_s2, %s28485_s23  ;;  %p28489_p1 = scmp.lt.u32.totalorder %s28485_s23, %s33082_s2 }
   0x9   :  { %p28491_p2 = pnand %p28489_p1, %p28486_p0 }
   0xb   :  { %28494 = shalt.err (!%p28491_p2)
}
   0xc   :  { %s28495_s28 = scalar_lea.vmem %s42_s18, 8192  ;;  %p28500_p4 = scmp.lt.s32.totalorder %s42_s18, %s42_s18 }
   0xd   :  { %p28496_p3 = scmp.ne.s32.totalorder %s42_s18, %s28495_s28  ;;  %p28501_p5 = scmp.lt.s32.totalorder %s28495_s28, %s28495_s28 }
   0xf   :  { %p28502_p6 = por %p28501_p5, %p28500_p4 }
  0x11   :  { %p28503_p7 = pnand %p28502_p6, %p28496_p3 }
  0x13   :  { %28506 = shalt.err (!%p28503_p7)
}
  0x14   :  { %s28651_s29 = smov 512   ;;  %s28652_s30 = smov 32  }
  0x15   :  { %47 = dma.hbm_to_vmem [thread:$0]  %s33082_s2, 8192, %s42_s18, [#allocation6], %s28651_s29, %s28651_s29, %s28652_s30  }
  0x16   :  { %s28507_s16 = scalar_lea.hbm %s33081_s1, 2048 }
  0x17   :  { %p28508_p8 = scmp.ne.s32.totalorder %s33081_s1, %s28507_s16  ;;  %p28511_p9 = scmp.lt.u32.totalorder %s28507_s16, %s33081_s1 }
  0x19   :  { %p28513_p10 = pnand %p28511_p9, %p28508_p8 }
  0x1b   :  { %28516 = shalt.err (!%p28513_p10)
}
  0x1c   :  { %s28517_s23 = scalar_lea.vmem %s28721_s20, 2048  ;;  %p28522_p12 = scmp.lt.s32.totalorder %s28721_s20, %s28721_s20 }
  0x1d   :  { %p28518_p11 = scmp.ne.s32.totalorder %s28721_s20, %s28517_s23  ;;  %p28523_p13 = scmp.lt.s32.totalorder %s28517_s23, %s28517_s23 }
  0x1f   :  { %p28524_p0 = por %p28523_p13, %p28522_p12 }
  0x21   :  { %p28525_p1 = pnand %p28524_p0, %p28518_p11 }
  0x23   :  { %28528 = shalt.err (!%p28525_p1)
}
  0x24   :  { %35 = dma.hbm_to_vmem [thread:$0]  %s33081_s1, 2048, %s28721_s20, [#allocation3], %s28651_s29, %s28651_s29, %s28652_s30  }
  0x25   :  { %s28653_s24 = smov [#allocation7]   ;;  %s28529_s28 = scalar_lea.hbm %s33086_s6, 2048 }
  0x26   :  { %s59_s25 = sshll.u32 %s28653_s24, 4  ;;  %p28530_p2 = scmp.ne.s32.totalorder %s33086_s6, %s28529_s28  ;;  %s60_s25 = int_to_ptr.vmem [resolvable:$true] %s59_s25 }
  0x27   :  { %p28533_p3 = scmp.lt.u32.totalorder %s28529_s28, %s33086_s6 }
  0x29   :  { %p28535_p4 = pnand %p28533_p3, %p28530_p2 }
  0x2b   :  { %28538 = shalt.err (!%p28535_p4)
}
  0x2c   :  { %s28539_s16 = scalar_lea.vmem %s60_s25, 2048  ;;  %p28544_p6 = scmp.lt.s32.totalorder %s60_s25, %s60_s25 }
  0x2d   :  { %p28540_p5 = scmp.ne.s32.totalorder %s60_s25, %s28539_s16  ;;  %p28545_p7 = scmp.lt.s32.totalorder %s28539_s16, %s28539_s16 }
  0x2f   :  { %p28546_p8 = por %p28545_p7, %p28544_p6 }
  0x31   :  { %p28547_p9 = pnand %p28546_p8, %p28540_p5 }
  0x33   :  { %28550 = shalt.err (!%p28547_p9)
}
  0x34   :  { %s28654_s1 = smov 128   ;;  %s28655_s20 = smov 8  }
  0x35   :  { %65 = dma.hbm_to_vmem [thread:$0]  %s33086_s6, 2048, %s60_s25, [#allocation6], %s28654_s1, %s28654_s1, %s28655_s20  }
  0x36   :  { %28639 = dma.done.wait [#allocation3], 2048  }
  0x37   :  { %28640 = vsyncadd [#allocation3], 4294965248 }
  0x38   :  { %28641 = dma.done.wait [#allocation6], 10240  }
  0x39   :  { %28642 = vsyncadd [#allocation6], 4294957056  ;;  %v33092_v0 = vmov 0.0   ;;  %v28769_v1 = vld [vmem:[#allocation5 + $0x8] sm:$0xff]  ;;  %v28773_v3 = vld [vmem:[#allocation5] sm:$0xff]  ;;  %vm1892_vm0 = vcmask 261120  }
  0x3a   :  { %278 = vmatprep.mubr.f32.mxu1 %v33092_v0  ;;  %755 = vmatprep.mubr.f32.mxu0 %v33092_v0  ;;  %v28771_v2 = vld [vmem:[#allocation5 + $0x28] sm:$0xff]  ;;  %v182_v4 = vand.u32 4294901760, %v28769_v1  ;;  %v28777_v6 = vld [vmem:[#allocation5 + $0x20] sm:$0xff]  ;;  %v184_v7 = vand.u32 4294901760, %v28773_v3  ;;  %vm22821_vm1 = vcmask 254976  }
  0x3b   :  { %v186_v5 = vand.u32 4294901760, %v28771_v2  ;;  %v28780_v8 = vld [vmem:[#allocation5 + $0x48] sm:$0xff]  ;;  %v188_v10 = vand.u32 4294901760, %v28777_v6  ;;  %v28787_v13 = vld [vmem:[#allocation5 + $0x40] sm:$0xff] }
  0x3c   :  { %v28782_v9 = vld [vmem:[#allocation5 + $0x68] sm:$0xff]  ;;  %v190_v11 = vand.u32 4294901760, %v28780_v8  ;;  %v28789_v14 = vld [vmem:[#allocation5 + $0x60] sm:$0xff]  ;;  %v192_v17 = vand.u32 4294901760, %v28787_v13 }
  0x3d   :  { %v194_v12 = vand.u32 4294901760, %v28782_v9  ;;  %v28791_v15 = vld [vmem:[#allocation5 + $0x88] sm:$0xff]  ;;  %v28797_v16 = vpack.c.bf16 %v186_v5, %v182_v4  ;;  %v33108_v18 = vand.u32 4294901760, %v28789_v14  ;;  %v28804_v21 = vld [vmem:[#allocation5 + $0x80] sm:$0xff]  ;;  %v28812_v23 = vpack.c.bf16 %v188_v10, %v184_v7 }
  0x3e   :  { %v28801_v19 = vld [vmem:[#allocation5 + $0xa8] sm:$0xff]  ;;  %v33107_v20 = vand.u32 4294901760, %v28791_v15  ;;  %v28806_v22 = vld [vmem:[#allocation5 + $0xa0] sm:$0xff]  ;;  %v33101_v26 = vand.u32 4294901760, %v28804_v21 }
  0x3f   :  { %33505 = vst [vmem:[#allocation19_spill] sm:$0xff] %v28797_v16  ;;  %33506 = vst [vmem:[#allocation20_spill] sm:$0xff] %v28812_v23  ;;  %v28818_v24 = vpack.c.bf16 %v194_v12, %v190_v11  ;;  %v33102_v25 = vand.u32 4294901760, %v28801_v19  ;;  %v28822_v27 = vld [vmem:[#allocation5 + $0xc8] sm:$0xff]  ;;  %v28826_v29 = vld [vmem:[#allocation5 + $0xc0] sm:$0xff]  ;;  %23950 = vmatprep.subr.bf16.mxu1 %v28797_v16  ;;  %24046 = vmatprep.subr.bf16.mxu0 %v28797_v16  ;;  %v33100_v30 = vand.u32 4294901760, %v28806_v22 }
  0x40   :  { %v28824_v28 = vld [vmem:[#allocation5 + $0xe8] sm:$0xff]  ;;  %v33099_v31 = vand.u32 4294901760, %v28822_v27  ;;  %v28833_v33 = vld [vmem:[#allocation5 + $0xe0] sm:$0xff]  ;;  %23952 = vmatpush1.bf16.msra.mxu1 %v28812_v23  ;;  %24048 = vmatpush1.bf16.msra.mxu0 %v28812_v23  ;;  %v28845_v36 = vpack.c.bf16 %v33108_v18, %v192_v17  ;;  %v33098_v37 = vand.u32 4294901760, %v28826_v29 }
  0x41   :  { %33507 = vst [vmem:[#allocation21_spill] sm:$0xff] %v28818_v24  ;;  %v33094_v32 = vand.u32 4294901760, %v28824_v28  ;;  %v28835_v34 = vld [vmem:[#allocation5 + $0x108] sm:$0xff]  ;;  %v33097_v38 = vand.u32 4294901760, %v28833_v33  ;;  %v28850_v40 = vld [vmem:[#allocation5 + $0x100] sm:$0xff]  ;;  %23954 = vmatprep.subr.bf16.mxu1 %v28818_v24  ;;  %24050 = vmatprep.subr.bf16.mxu0 %v28818_v24  ;;  %v28862_v43 = vpack.c.bf16 %v33102_v25, %v33107_v20  ;;  %v28883_v54 = vpack.c.bf16 %v33100_v30, %v33101_v26 }
  0x42   :  { %v28837_v35 = vld [vmem:[#allocation5 + $0x128] sm:$0xff]  ;;  %33508 = vst [vmem:[#allocation22_spill] sm:$0xff] %v28845_v36  ;;  %v33096_v39 = vand.u32 4294901760, %v28835_v34  ;;  %v28852_v41 = vld [vmem:[#allocation5 + $0x120] sm:$0xff]  ;;  %v33106_v45 = vand.u32 4294901760, %v28850_v40 }
  0x43   :  { %v28854_v42 = vld [vmem:[#allocation5 + $0x148] sm:$0xff]  ;;  %33509 = vst [vmem:[#allocation23_spill] sm:$0xff] %v28862_v43  ;;  %v33095_v44 = vand.u32 4294901760, %v28837_v35  ;;  %v28868_v47 = vld [vmem:[#allocation5 + $0x140] sm:$0xff]  ;;  %v33103_v49 = vand.u32 4294901760, %v28852_v41  ;;  %33510 = vst [vmem:[#allocation24_spill] sm:$0xff] %v28883_v54  ;;  %v28889_v55 = vpack.c.bf16 %v33094_v32, %v33099_v31  ;;  %v28903_v59 = vpack.c.bf16 %v33097_v38, %v33098_v37 }
  0x44   :  { %v28866_v46 = vld [vmem:[#allocation5 + $0x168] sm:$0xff]  ;;  %v28870_v48 = vld [vmem:[#allocation5 + $0x160] sm:$0xff]  ;;  %v33105_v50 = vand.u32 4294901760, %v28854_v42  ;;  %23956 = vmatpush1.bf16.msra.mxu1 %v28845_v36  ;;  %24052 = vmatpush1.bf16.msra.mxu0 %v28845_v36  ;;  %v33114_v61 = vand.u32 4294901760, %v28868_v47  ;;  %v33527_v36 = vand.u32 4294901760, %v28789_v14 }
  0x45   :  { %v33104_v51 = vand.u32 4294901760, %v28866_v46  ;;  %v28875_v52 = vld [vmem:[#allocation5 + $0x188] sm:$0xff]  ;;  %33511 = vst [vmem:[#allocation25_spill] sm:$0xff] %v28889_v55  ;;  %v28891_v56 = vld [vmem:[#allocation5 + $0x180] sm:$0xff]  ;;  %33512 = vst [vmem:[#allocation26_spill] sm:$0xff] %v28903_v59  ;;  %v28909_v60 = vpack.c.bf16 %v33095_v44, %v33096_v39  ;;  %v33111_v62 = vand.u32 4294901760, %v28870_v48  ;;  %23958 = vmatprep.subr.bf16.mxu1 %v28862_v43  ;;  %24054 = vmatprep.subr.bf16.mxu0 %v28862_v43 }
  0x46   :  { %v28877_v53 = vld [vmem:[#allocation5 + $0x1a8] sm:$0xff]  ;;  %v28893_v57 = vld [vmem:[#allocation5 + $0x1a0] sm:$0xff]  ;;  %v28926_v44 = vpack.c.bf16 %v33103_v49, %v33106_v45  ;;  %v33110_v38 = vand.u32 4294901760, %v28875_v52  ;;  %v33113_v30 = vand.u32 4294901760, %v28891_v56  ;;  %v28944_v49 = vsub.f32 %v28769_v1, %v182_v4 }
  0x47   :  { %v28895_v58 = vld [vmem:[#allocation5 + $0x1c8] sm:$0xff]  ;;  %33513 = vst [vmem:[#allocation27_spill] sm:$0xff] %v28909_v60  ;;  %v28915_v0 = vld [vmem:[#allocation5 + $0x1c0] sm:$0xff]  ;;  %v28932_v39 = vpack.c.bf16 %v33104_v51, %v33105_v50  ;;  %v33109_v37 = vand.u32 4294901760, %v28877_v53  ;;  %v33112_v26 = vand.u32 4294901760, %v28893_v57  ;;  %v28951_v45 = vsub.f32 %v28771_v2, %v186_v5 }
  0x48   :  { %v28913_v63 = vld [vmem:[#allocation5 + $0x1e8] sm:$0xff]  ;;  %v179_v32 = vld [vmem:[%s33084_s4] sm:$0x3]  ;;  %33514 = vst [vmem:[#allocation28_spill] sm:$0xff] %v28926_v44  ;;  %v33130_v25 = vand.u32 4294901760, %v28895_v58  ;;  %23960 = vmatpush1.bf16.msra.mxu1 %v28883_v54  ;;  %24056 = vmatpush1.bf16.msra.mxu0 %v28883_v54  ;;  %v292_v1 = vand.u32 4294901760, %v28944_v49  ;;  %v28962_v4 = vsub.f32 %v28773_v3, %v184_v7  ;;  %v28967_v2 = vsub.f32 %v28777_v6, %v188_v10 }
  0x49   :  { %33515 = vst [vmem:[#allocation29_spill] sm:$0xff] %v28932_v39  ;;  %v28936_v31 = vld [vmem:[#allocation5 + $0x1e0] sm:$0xff]  ;;  %v33129_v51 = vand.u32 4294901760, %v28913_v63  ;;  %v28953_v20 = vand.u32 4294901760, %v179_v32  ;;  %23962 = vmatprep.subr.bf16.mxu1 %v28889_v55  ;;  %24058 = vmatprep.subr.bf16.mxu0 %v28889_v55  ;;  %v304_v5 = vand.u32 4294901760, %v28951_v45  ;;  %v28978_v50 = vsub.f32 %v28780_v8, %v190_v11 }
  0x4a   :  { %v28983_v3 = vsub.f32 %v28782_v9, %v194_v12  ;;  %v293_v6 = vsub.f32 %v28944_v49, %v292_v1  ;;  %v298_v7 = vand.u32 4294901760, %v28962_v4  ;;  %v310_v10 = vand.u32 4294901760, %v28967_v2 }
  0x4b   :  { %33516 = vst [vmem:[#allocation30_spill] sm:$0xff] %v28953_v20  ;;  %v28973_v18 = vsub.f32 %v179_v32, %v28953_v20  ;;  %v28991_v32 = vsub.f32 %v28787_v13, %v192_v17  ;;  %v28997_v8 = vpack.c.bf16 %v33111_v62, %v33114_v61  ;;  %v29003_v9 = vpack.c.bf16 %v33109_v37, %v33110_v38 }
  0x4c   :  { %v305_v11 = vsub.f32 %v28951_v45, %v304_v5  ;;  %v316_v12 = vand.u32 4294901760, %v28978_v50  ;;  %23964 = vmatpush1.bf16.msra.mxu1 %v28903_v59  ;;  %24060 = vmatpush1.bf16.msra.mxu0 %v28903_v59  ;;  %v29013_v13 = vpack.c.bf16 %v33112_v26, %v33113_v30  ;;  %v299_v37 = vsub.f32 %v28962_v4, %v298_v7 }
  0x4d   :  { %33517 = vst [vmem:[#allocation31_spill] sm:$0xff] %v28973_v18  ;;  %33518 = vst [vmem:[#allocation32_spill] sm:$0xff] %v28991_v32  ;;  %v29016_v17 = vand.u32 4294901760, %v28973_v18  ;;  %v311_v38 = vsub.f32 %v28967_v2, %v310_v10  ;;  %23966 = vmatprep.subr.bf16.mxu1 %v28909_v60  ;;  %24062 = vmatprep.subr.bf16.mxu0 %v28909_v60  ;;  %v29026_v62 = vpack.c.bf16 %v33129_v51, %v33130_v25 }
  0x4e   :  { %33519 = vst [vmem:[#allocation33_spill] sm:$0xff] %v28997_v8  ;;  %33520 = vst [vmem:[#allocation34_spill] sm:$0xff] %v29003_v9  ;;  %v33524_v26 = vand.u32 4294901760, %v28915_v0  ;;  %v33525_v30 = vand.u32 4294901760, %v28936_v31  ;;  %v294_v59 = vand.u32 4294901760, %v293_v6  ;;  %v328_v55 = vand.u32 4294901760, %v28983_v3 }
  0x4f   :  { %33521 = vst [vmem:[#allocation35_spill] sm:$0xff] %v29013_v13  ;;  %33522 = vst [vmem:[#allocation36_spill] sm:$0xff] %v29016_v17  ;;  %v306_v54 = vand.u32 4294901760, %v305_v11  ;;  %v317_v43 = vsub.f32 %v28978_v50, %v316_v12  ;;  %v322_v60 = vand.u32 4294901760, %v28991_v32  ;;  %v29040_v24 = vsub.f32 %v28789_v14, %v33527_v36 }
  0x50   :  { %33523 = vst [vmem:[#allocation37_spill] sm:$0xff] %v29026_v62  ;;  %v29032_v61 = vpack.c.bf16 %v33525_v30, %v33524_v26  ;;  %v29042_v51 = vpack.c.bf16 %v304_v5, %v292_v1  ;;  %v300_v25 = vand.u32 4294901760, %v299_v37  ;;  %v312_v23 = vand.u32 4294901760, %v311_v38  ;;  %23968 = vmatpush1.bf16.msra.mxu1 %v28926_v44  ;;  %24064 = vmatpush1.bf16.msra.mxu0 %v28926_v44 }
  0x51   :  { %33528 = vst [vmem:[#allocation39_spill] sm:$0xff] %v29040_v24  ;;  %v29044_v20 = vpack.c.bf16 %v310_v10, %v298_v7  ;;  %v282_v26 = vsub.f32 %v28973_v18, %v29016_v17  ;;  %v329_v30 = vsub.f32 %v28983_v3, %v328_v55  ;;  %v323_v6 = vsub.f32 %v28991_v32, %v322_v60 }
  0x52   :  { %33526 = vst [vmem:[#allocation38_spill] sm:$0xff] %v29032_v61  ;;  %33529 = vst [vmem:[#allocation40_spill] sm:$0xff] %v29042_v51  ;;  %v334_v14 = vand.u32 4294901760, %v29040_v24  ;;  %23970 = vmatprep.subr.bf16.mxu1 %v28932_v39  ;;  %24066 = vmatprep.subr.bf16.mxu0 %v28932_v39  ;;  %v33531_v36 = vand.u32 4294901760, %v28791_v15  ;;  %v33532_v38 = vand.u32 4294901760, %v28801_v19  ;;  %v33533_v5 = vand.u32 4294901760, %v28804_v21 }
  0x53   :  { %33530 = vst [vmem:[#allocation41_spill] sm:$0xff] %v29044_v20  ;;  %v29070_v10 = vpack.c.bf16 %v306_v54, %v294_v59  ;;  %v318_v11 = vand.u32 4294901760, %v317_v43  ;;  %v33535_v39 = vand.u32 4294901760, %v28806_v22  ;;  %v33538_v54 = vand.u32 4294901760, %v28822_v27 }
  0x54   :  { %v29058_v37 = vsub.f32 %v28791_v15, %v33531_v36  ;;  %v29063_v1 = vsub.f32 %v28801_v19, %v33532_v38  ;;  %v29068_v7 = vsub.f32 %v28804_v21, %v33533_v5  ;;  %v335_v18 = vsub.f32 %v29040_v24, %v334_v14  ;;  %23972 = vmatpush1.bf16.msra.mxu1 %v28997_v8 }
  0x55   :  { %33534 = vst [vmem:[#allocation42_spill] sm:$0xff] %v29070_v10  ;;  %v29076_v15 = vsub.f32 %v28806_v22, %v33535_v39  ;;  %v29078_v36 = vpack.c.bf16 %v312_v23, %v300_v25  ;;  %24068 = vmatpush1.bf16.msra.mxu0 %v28997_v8  ;;  %v330_v21 = vand.u32 4294901760, %v329_v30  ;;  %v29089_v22 = vsub.f32 %v28822_v27, %v33538_v54 }
  0x56   :  { %v340_v19 = vand.u32 4294901760, %v29058_v37  ;;  %v352_v38 = vand.u32 4294901760, %v29063_v1  ;;  %v346_v44 = vand.u32 4294901760, %v29068_v7  ;;  %v33539_v23 = vand.u32 4294901760, %v28824_v28  ;;  %23974 = vmatprep.subr.bf16.mxu1 %v29003_v9  ;;  %24070 = vmatprep.subr.bf16.mxu0 %v29003_v9 }
  0x57   :  { %33536 = vst [vmem:[#allocation43_spill] sm:$0xff] %v29076_v15  ;;  %33537 = vst [vmem:[#allocation44_spill] sm:$0xff] %v29078_v36  ;;  %v358_v43 = vand.u32 4294901760, %v29076_v15  ;;  %v324_v39 = vand.u32 4294901760, %v323_v6  ;;  %v336_v59 = vand.u32 4294901760, %v335_v18  ;;  %v29100_v8 = vpack.c.bf16 %v328_v55, %v316_v12 }
  0x58   :  { %v29094_v25 = vsub.f32 %v28824_v28, %v33539_v23  ;;  %v341_v30 = vsub.f32 %v29058_v37, %v340_v19  ;;  %v353_v5 = vsub.f32 %v29063_v1, %v352_v38  ;;  %v29102_v24 = vpack.c.bf16 %v334_v14, %v322_v60  ;;  %23976 = vmatpush1.bf16.msra.mxu1 %v29013_v13 }
  0x59   :  { %33540 = vst [vmem:[#allocation45_spill] sm:$0xff] %v29100_v8  ;;  %v347_v27 = vsub.f32 %v29068_v7, %v346_v44  ;;  %v359_v54 = vsub.f32 %v29076_v15, %v358_v43  ;;  %v364_v32 = vand.u32 4294901760, %v29089_v22  ;;  %24072 = vmatpush1.bf16.msra.mxu0 %v29013_v13  ;;  %v33542_v55 = vand.u32 4294901760, %v28826_v29  ;;  %23978 = vmatprep.subr.bf16.mxu1 %v29026_v62 }
  0x5a   :  { %33541 = vst [vmem:[#allocation46_spill] sm:$0xff] %v29102_v24  ;;  %v342_v28 = vand.u32 4294901760, %v341_v30  ;;  %v354_v23 = vand.u32 4294901760, %v353_v5  ;;  %v376_v9 = vand.u32 4294901760, %v29094_v25  ;;  %v33543_v12 = vand.u32 4294901760, %v28833_v33  ;;  %24074 = vmatprep.subr.bf16.mxu0 %v29026_v62 }
  0x5b   :  { %v348_v18 = vand.u32 4294901760, %v347_v27  ;;  %v360_v6 = vand.u32 4294901760, %v359_v54  ;;  %v29113_v60 = vsub.f32 %v28826_v29, %v33542_v55  ;;  %v29122_v30 = vand.u32 4294901760, %v282_v26 }
  0x5c   :  { %v29118_v14 = vsub.f32 %v28833_v33, %v33543_v12  ;;  %v29124_v5 = vpack.c.bf16 %v330_v21, %v318_v11  ;;  %v29126_v27 = vpack.c.bf16 %v336_v59, %v324_v39  ;;  %v29128_v54 = vpack.c.bf16 %v352_v38, %v340_v19  ;;  %23980 = vmatpush1.bf16.msra.mxu1 %v29032_v61 }
  0x5d   :  { %33544 = vst [vmem:[#allocation47_spill] sm:$0xff] %v29122_v30  ;;  %v365_v29 = vsub.f32 %v29089_v22, %v364_v32  ;;  %v377_v55 = vsub.f32 %v29094_v25, %v376_v9  ;;  %v370_v13 = vand.u32 4294901760, %v29113_v60  ;;  %v29134_v12 = vpack.c.bf16 %v354_v23, %v342_v28  ;;  %24076 = vmatpush1.bf16.msra.mxu0 %v29032_v61 }
  0x5e   :  { %33545 = vst [vmem:[#allocation48_spill] sm:$0xff] %v29124_v5  ;;  %33546 = vst [vmem:[#allocation49_spill] sm:$0xff] %v29126_v27  ;;  %v382_v33 = vand.u32 4294901760, %v29118_v14  ;;  %v29136_v15 = vpack.c.bf16 %v358_v43, %v346_v44  ;;  %v33550_v26 = vand.u32 4294901760, %v28835_v34  ;;  %v33551_v19 = vand.u32 4294901760, %v28837_v35  ;;  %23982 = vmatprep.subr.bf16.mxu1 %v29070_v10  ;;  %24078 = vmatprep.subr.bf16.mxu0 %v29042_v51 }
  0x5f   :  { %33547 = vst [vmem:[#allocation50_spill] sm:$0xff] %v29128_v54  ;;  %33548 = vst [vmem:[#allocation51_spill] sm:$0xff] %v29134_v12  ;;  %v29150_v21 = vpack.c.bf16 %v360_v6, %v348_v18  ;;  %v371_v39 = vsub.f32 %v29113_v60, %v370_v13  ;;  %v33554_v59 = vand.u32 4294901760, %v28850_v40  ;;  %v366_v23 = vand.u32 4294901760, %v365_v29  ;;  %284 = vmatmul.mubr.f32.vlgmr.msra.gmra.mrb[0].mxu1 %v29122_v30 }
  0x60   :  { %33549 = vst [vmem:[#allocation52_spill] sm:$0xff] %v29136_v15  ;;  %v29141_v11 = vsub.f32 %v28835_v34, %v33550_v26  ;;  %v29146_v38 = vsub.f32 %v28837_v35, %v33551_v19  ;;  %v383_v44 = vsub.f32 %v29118_v14, %v382_v33  ;;  %v29156_v34 = vpack.c.bf16 %v376_v9, %v364_v32 }
  0x61   :  { %33552 = vst [vmem:[#allocation53_spill] sm:$0xff] %v29150_v21  ;;  %v29163_v28 = vsub.f32 %v28850_v40, %v33554_v59  ;;  %v378_v18 = vand.u32 4294901760, %v377_v55  ;;  %v33555_v6 = vand.u32 4294901760, %v28852_v41  ;;  %v33556_v19 = vand.u32 4294901760, %v28854_v42  ;;  %759 = vmatmul.mubr.f32.vlgmr.msra.gmra.mrb[0].mxu0 %v29016_v17  ;;  %23984 = vmatpush1.bf16.msra.mxu1 %v29078_v36 }
  0x62   :  { %33553 = vst [vmem:[#allocation54_spill] sm:$0xff] %v29156_v34  ;;  %v388_v43 = vand.u32 4294901760, %v29141_v11  ;;  %v400_v35 = vand.u32 4294901760, %v29146_v38  ;;  %v372_v9 = vand.u32 4294901760, %v371_v39  ;;  %v384_v51 = vand.u32 4294901760, %v383_v44  ;;  %24080 = vmatpush1.bf16.msra.mxu0 %v29044_v20  ;;  %23986 = vmatprep.subr.bf16.mxu1 %v29124_v5 }
  0x63   :  { %v29168_v26 = vsub.f32 %v28852_v41, %v33555_v6  ;;  %v29173_v32 = vsub.f32 %v28854_v42, %v33556_v19  ;;  %v394_v29 = vand.u32 4294901760, %v29163_v28  ;;  %v33557_v59 = vand.u32 4294901760, %v28866_v46  ;;  %24082 = vmatprep.subr.bf16.mxu0 %v29100_v8 }
  0x64   :  { %v389_v40 = vsub.f32 %v29141_v11, %v388_v43  ;;  %v401_v41 = vsub.f32 %v29146_v38, %v400_v35  ;;  %v29191_v39 = vpack.c.bf16 %v382_v33, %v370_v13  ;;  %v33559_v19 = vand.u32 4294901760, %v28868_v47 }
  0x65   :  { %v406_v55 = vand.u32 4294901760, %v29168_v26  ;;  %v412_v42 = vand.u32 4294901760, %v29173_v32  ;;  %v29187_v6 = vsub.f32 %v28866_v46, %v33557_v59  ;;  %v395_v44 = vsub.f32 %v29163_v28, %v394_v29  ;;  %23988 = vmatpush1.bf16.msra.mxu1 %v29126_v27 }
  0x66   :  { %33558 = vst [vmem:[#allocation55_spill] sm:$0xff] %v29191_v39  ;;  %v29197_v20 = vsub.f32 %v28868_v47, %v33559_v19  ;;  %v29199_v36 = vpack.c.bf16 %v378_v18, %v366_v23  ;;  %v29201_v17 = vpack.c.bf16 %v400_v35, %v388_v43  ;;  %v33562_v5 = vmov 0.0   ;;  %24084 = vmatpush1.bf16.msra.mxu0 %v29102_v24 }
  0x67   :  { %v407_v46 = vsub.f32 %v29168_v26, %v406_v55  ;;  %v424_v59 = vand.u32 4294901760, %v29187_v6  ;;  %514 = vmatprep.mubr.f32.mxu1 %v33562_v5  ;;  %925 = vmatprep.mubr.f32.mxu0 %v33562_v5  ;;  %v29207_v13 = vpack.c.bf16 %v384_v51, %v372_v9  ;;  %v413_v33 = vsub.f32 %v29173_v32, %v412_v42 }
  0x68   :  { %33560 = vst [vmem:[#allocation56_spill] sm:$0xff] %v29199_v36  ;;  %33561 = vst [vmem:[#allocation57_spill] sm:$0xff] %v29201_v17  ;;  %v418_v8 = vand.u32 4294901760, %v29197_v20  ;;  %v33564_v47 = vand.u32 4294901760, %v28870_v48  ;;  %v390_v43 = vand.u32 4294901760, %v389_v40  ;;  %v402_v35 = vand.u32 4294901760, %v401_v41  ;;  %23990 = vmatprep.subr.bf16.mxu1 %v29134_v12  ;;  %24086 = vmatprep.subr.bf16.mxu0 %v29128_v54 }
  0x69   :  { %33563 = vst [vmem:[#allocation58_spill] sm:$0xff] %v29207_v13  ;;  %v29218_v18 = vpack.c.bf16 %v406_v55, %v394_v29  ;;  %v425_v51 = vsub.f32 %v29187_v6, %v424_v59  ;;  %v396_v9 = vand.u32 4294901760, %v395_v44  ;;  %v33567_v24 = vand.u32 4294901760, %v28877_v53  ;;  %23992 = vmatpush1.bf16.msra.mxu1 %v29150_v21 }
  0x6a   :  { %v29214_v23 = vsub.f32 %v28870_v48, %v33564_v47  ;;  %v33566_v48 = vand.u32 4294901760, %v28875_v52  ;;  %v408_v29 = vand.u32 4294901760, %v407_v46  ;;  %v419_v41 = vsub.f32 %v29197_v20, %v418_v8  ;;  %24088 = vmatpush1.bf16.msra.mxu0 %v29136_v15  ;;  %23994 = vmatprep.subr.bf16.mxu1 %v29199_v36 }
  0x6b   :  { %33565 = vst [vmem:[#allocation59_spill] sm:$0xff] %v29218_v18  ;;  %v29232_v40 = vsub.f32 %v28877_v53, %v33567_v24  ;;  %v33568_v55 = vand.u32 4294901760, %v28891_v56  ;;  %v33569_v44 = vand.u32 4294901760, %v28893_v57  ;;  %v29249_v53 = vpack.c.bf16 %v402_v35, %v390_v43  ;;  %24090 = vmatprep.subr.bf16.mxu0 %v29156_v34 }
  0x6c   :  { %v430_v19 = vand.u32 4294901760, %v29214_v23  ;;  %v29227_v47 = vsub.f32 %v28875_v52, %v33566_v48  ;;  %v414_v52 = vand.u32 4294901760, %v413_v33  ;;  %v426_v48 = vand.u32 4294901760, %v425_v51 }
  0x6d   :  { %v29238_v54 = vsub.f32 %v28891_v56, %v33568_v55  ;;  %v29243_v12 = vsub.f32 %v28893_v57, %v33569_v44  ;;  %33570 = vst [vmem:[#allocation60_spill] sm:$0xff] %v29249_v53  ;;  %v448_v56 = vand.u32 4294901760, %v29232_v40  ;;  %v33571_v33 = vand.u32 4294901760, %v28895_v58  ;;  %23996 = vmatpush1.bf16.msra.mxu1 %v29207_v13  ;;  %v29560_v13 = vld [vmem:[#allocation5 + $0xd0] sm:$0xff] }
  0x6e   :  { %v431_v27 = vsub.f32 %v29214_v23, %v430_v19  ;;  %v436_v24 = vand.u32 4294901760, %v29227_v47  ;;  %v33572_v43 = vand.u32 4294901760, %v28913_v63  ;;  %v29267_v44 = vpack.c.bf16 %v408_v29, %v396_v9  ;;  %24092 = vmatpush1.bf16.msra.mxu0 %v29191_v39  ;;  %23998 = vmatprep.subr.bf16.mxu1 %v29249_v53 }
  0x6f   :  { %v442_v46 = vand.u32 4294901760, %v29238_v54  ;;  %v454_v55 = vand.u32 4294901760, %v29243_v12  ;;  %v29260_v51 = vsub.f32 %v28895_v58, %v33571_v33  ;;  %v29269_v15 = vpack.c.bf16 %v424_v59, %v412_v42  ;;  %24094 = vmatprep.subr.bf16.mxu0 %v29201_v17 }
  0x70   :  { %v437_v57 = vsub.f32 %v29227_v47, %v436_v24  ;;  %v29265_v35 = vsub.f32 %v28913_v63, %v33572_v43  ;;  %33573 = vst [vmem:[#allocation61_spill] sm:$0xff] %v29267_v44  ;;  %v420_v21 = vand.u32 4294901760, %v419_v41  ;;  %v449_v36 = vsub.f32 %v29232_v40, %v448_v56 }
  0x71   :  { %33574 = vst [vmem:[#allocation62_spill] sm:$0xff] %v29269_v15  ;;  %v29272_v34 = vpack.c.bf16 %v426_v48, %v414_v52  ;;  %v432_v10 = vand.u32 4294901760, %v431_v27  ;;  %v443_v30 = vsub.f32 %v29238_v54, %v442_v46  ;;  %v460_v58 = vand.u32 4294901760, %v29260_v51  ;;  %24000 = vmatpush1.bf16.msra.mxu1 %v29267_v44 }
  0x72   :  { %v438_v63 = vand.u32 4294901760, %v437_v57  ;;  %v450_v33 = vand.u32 4294901760, %v449_v36  ;;  %v455_v9 = vsub.f32 %v29243_v12, %v454_v55  ;;  %v472_v42 = vand.u32 4294901760, %v29265_v35  ;;  %24096 = vmatpush1.bf16.msra.mxu0 %v29218_v18 }
  0x73   :  { %33575 = vst [vmem:[#allocation63_spill] sm:$0xff] %v29272_v34  ;;  %v461_v27 = vsub.f32 %v29260_v51, %v460_v58  ;;  %v33576_v59 = vand.u32 4294901760, %v28915_v0  ;;  %v33577_v41 = vand.u32 4294901760, %v28936_v31  ;;  %v29294_v48 = vpack.c.bf16 %v430_v19, %v418_v8  ;;  %24002 = vmatprep.subr.bf16.mxu1 %v29272_v34  ;;  %24098 = vmatprep.subr.bf16.mxu0 %v29269_v15 }
  0x74   :  { %v473_v36 = vsub.f32 %v29265_v35, %v472_v42  ;;  %v29296_v57 = vpack.c.bf16 %v448_v56, %v436_v24 }
  0x75   :  { %v29286_v29 = vsub.f32 %v28915_v0, %v33576_v59  ;;  %v29291_v52 = vsub.f32 %v28936_v31, %v33577_v41  ;;  %33578 = vst [vmem:[#allocation64_spill] sm:$0xff] %v29294_v48  ;;  %v29302_v0 = vpack.c.bf16 %v432_v10, %v420_v21  ;;  %v29304_v59 = vpack.c.bf16 %v450_v33, %v438_v63 }
  0x76   :  { %33579 = vst [vmem:[#allocation65_spill] sm:$0xff] %v29296_v57  ;;  %v444_v31 = vand.u32 4294901760, %v443_v30  ;;  %v456_v41 = vand.u32 4294901760, %v455_v9  ;;  %v462_v8 = vand.u32 4294901760, %v461_v27  ;;  %v474_v19 = vand.u32 4294901760, %v473_v36  ;;  %24100 = vmatpush1.bf16.msra.mxu0 %v29294_v48 }
  0x77   :  { %v466_v43 = vand.u32 4294901760, %v29286_v29  ;;  %v478_v17 = vand.u32 4294901760, %v29291_v52  ;;  %33580 = vst [vmem:[#allocation66_spill] sm:$0xff] %v29302_v0  ;;  %33581 = vst [vmem:[#allocation67_spill] sm:$0xff] %v29304_v59  ;;  %24004 = vmatpush1.bf16.msra.mxu1 %v29302_v0  ;;  %v29314_v21 = vpack.c.bf16 %v454_v55, %v442_v46  ;;  %24102 = vmatprep.subr.bf16.mxu0 %v29296_v57 }
  0x78   :  { %v29312_v10 = vpack.c.bf16 %v456_v41, %v444_v31  ;;  %24006 = vmatprep.subr.bf16.mxu1 %v29304_v59  ;;  %v29318_v33 = vpack.c.bf16 %v474_v19, %v462_v8  ;;  %v29320_v9 = vpack.c.bf16 %v472_v42, %v460_v58  ;;  %v29332_v46 = vpack.c.bf16 %v28951_v45, %v28944_v49  ;;  %v33591_v58 = vld [vmem:[#allocation30_spill] sm:$0xff]  ;;  %v33592_v45 = vld [vmem:[#allocation20_spill] sm:$0xff]  ;;  %v33594_v42 = vld [vmem:[#allocation39_spill] sm:$0xff] }
  0x79   :  { %v467_v24 = vsub.f32 %v29286_v29, %v466_v43  ;;  %v479_v56 = vsub.f32 %v29291_v52, %v478_v17  ;;  %33583 = vst [vmem:[#allocation69_spill] sm:$0xff] %v29314_v21  ;;  %v29326_v36 = vpack.c.bf16 %v478_v17, %v466_v43  ;;  %v29338_v55 = vpack.c.bf16 %v28967_v2, %v28962_v4  ;;  %v33593_v49 = vld [vmem:[#allocation32_spill] sm:$0xff]  ;;  %v33596_v2 = vld [vmem:[#allocation21_spill] sm:$0xff]  ;;  %v29372_v19 = vld [vmem:[#allocation2] sm:$0xff] }
  0x7a   :  { %33582 = vst [vmem:[#allocation68_spill] sm:$0xff] %v29312_v10  ;;  %33584 = vst [vmem:[#allocation70_spill] sm:$0xff] %v29318_v33  ;;  %24104 = vmatpush1.bf16.msra.mxu0 %v29314_v21  ;;  %v29344_v17 = vpack.c.bf16 %v28983_v3, %v28978_v50  ;;  %v29352_v4 = vpack.c.bf16 %v33594_v42, %v33593_v49  ;;  %v29358_v50 = vpack.c.bf16 %v29063_v1, %v29058_v37  ;;  %v29360_v3 = vld [vmem:[#allocation5 + $0x18] sm:$0xff]  ;;  %v29362_v43 = vld [vmem:[#allocation2 + $0x8] sm:$0xff] }
  0x7b   :  { %v468_v30 = vand.u32 4294901760, %v467_v24  ;;  %v480_v63 = vand.u32 4294901760, %v479_v56  ;;  %33585 = vst [vmem:[#allocation71_spill] sm:$0xff] %v29320_v9  ;;  %24008 = vmatpush1.bf16.msra.mxu1 %v29312_v10  ;;  %33587 = vst [vmem:[#allocation73_spill] sm:$0xff] %v29326_v36  ;;  %24106 = vmatprep.subr.bf16.mxu0 %v29320_v9  ;;  %v29366_v31 = vld [vmem:[#allocation5 + $0x38] sm:$0xff]  ;;  %v29368_v41 = vld [vmem:[#allocation2 + $0x28] sm:$0xff]  ;;  %v29395_v21 = vpack.c.bf16 %v29094_v25, %v29089_v22 }
  0x7c   :  { %24010 = vmatprep.subr.bf16.mxu1 %v29318_v33  ;;  %33588 = vst [vmem:[#allocation74_spill] sm:$0xff] %v29332_v46  ;;  %33589 = vst [vmem:[#allocation75_spill] sm:$0xff] %v29338_v55  ;;  %v29370_v8 = vld [vmem:[#allocation5 + $0x10] sm:$0xff]  ;;  %v29374_v24 = vld [vmem:[#allocation2 + $0x20] sm:$0xff]  ;;  %v1896_v49 = vand.u32 4294901760, %v29362_v43  ;;  %v29404_v48 = vpack.c.bf16 %v29118_v14, %v29113_v60  ;;  %v1898_v15 = vand.u32 4294901760, %v29372_v19  ;;  %v29411_v22 = vpack.c.bf16 %v29146_v38, %v29141_v11 }
  0x7d   :  { %v29324_v27 = vpack.c.bf16 %v480_v63, %v468_v30  ;;  %33590 = vst [vmem:[#allocation76_spill] sm:$0xff] %v29344_v17  ;;  %33595 = vst [vmem:[#allocation32_spill] sm:$0xff] %v29352_v4  ;;  %v181_v37 = vld [vmem:[%s33080_s0] sm:$0x3]  ;;  %v33599_v56 = vld [vmem:[#allocation43_spill] sm:$0xff]  ;;  %v1902_v18 = vand.u32 4294901760, %v29374_v24  ;;  %v29415_v25 = vpack.c.bf16 %v29168_v26, %v29163_v28  ;;  %v29423_v14 = vpack.c.bf16 %v29187_v6, %v29173_v32 }
  0x7e   :  { %24108 = vmatpush1.bf16.msra.mxu0 %v29326_v36  ;;  %33597 = vst [vmem:[#allocation39_spill] sm:$0xff] %v29358_v50  ;;  %v33598_v1 = vld [vmem:[#allocation22_spill] sm:$0xff]  ;;  %v29383_v30 = vpack.c.bf16 %v33599_v56, %v29068_v7  ;;  %v29387_v42 = vld [vmem:[#allocation2 + $0x48] sm:$0xff]  ;;  %33602 = vst [vmem:[#allocation77_spill] sm:$0xff] %v29395_v21  ;;  %v1900_v7 = vand.u32 4294901760, %v29368_v41  ;;  %v1894_v39 = vsel %vm1892_vm0, %v181_v37, 0  ;;  %v29427_v11 = vpack.c.bf16 %v29214_v23, %v29197_v20 }
  0x7f   :  { %33586 = vst [vmem:[#allocation72_spill] sm:$0xff] %v29324_v27  ;;  %24012 = vmatpush1.bf16.msra.mxu1 %v29324_v27  ;;  %24110 = vmatprep.subr.bf16.mxu0 %v28797_v16  ;;  %v29389_v36 = vld [vmem:[#allocation2 + $0x68] sm:$0xff]  ;;  %v29399_v56 = vld [vmem:[#allocation5 + $0x30] sm:$0xff]  ;;  %33603 = vst [vmem:[#allocation78_spill] sm:$0xff] %v29404_v48  ;;  %v1904_v63 = vand.u32 4294901760, %v29387_v42  ;;  %v29435_v37 = vsub.f32 %v29362_v43, %v1896_v49  ;;  %v29441_v32 = vpack.c.bf16 %v29232_v40, %v29227_v47 }
  0x80   :  { %24014 = vmatprep.subr.bf16.mxu1 %v29332_v46  ;;  %33600 = vst [vmem:[#allocation43_spill] sm:$0xff] %v29383_v30  ;;  %v33601_v9 = vld [vmem:[#allocation23_spill] sm:$0xff]  ;;  %33604 = vst [vmem:[#allocation79_spill] sm:$0xff] %v29411_v22  ;;  %v1908_v57 = vand.u32 4294901760, %v29389_v36  ;;  %v33606_v60 = vld [vmem:[#allocation24_spill] sm:$0xff]  ;;  %v29445_v20 = vpack.c.bf16 %v29243_v12, %v29238_v54  ;;  %v29451_v38 = vand.u32 4294901760, %v1894_v39  ;;  %v29454_v43 = vsub.f32 %v29368_v41, %v1900_v7 }
  0x81   :  { %927 = vmatmul.mubr.f32.vlgmr.msra.gmra.mrb[0].mxu0 %v33591_v58  ;;  %33605 = vst [vmem:[#allocation80_spill] sm:$0xff] %v29415_v25  ;;  %33607 = vst [vmem:[#allocation81_spill] sm:$0xff] %v29423_v14  ;;  %v29430_v28 = vld [vmem:[#allocation5 + $0x58] sm:$0xff]  ;;  %v29447_v6 = vld [vmem:[#allocation5 + $0x50] sm:$0xff]  ;;  %v29462_v47 = vpack.c.bf16 %v29291_v52, %v29286_v29  ;;  %v29465_v54 = vsub.f32 %v29372_v19, %v1898_v15  ;;  %v29468_v12 = vsub.f32 %v29374_v24, %v1902_v18 }
  0x82   :  { %516 = vmatmul.mubr.f32.vlgmr.msra.gmra.mrb[0].mxu1 %v33591_v58  ;;  %24112 = vmatpush1.bf16.msra.mxu0 %v33592_v45  ;;  %33608 = vst [vmem:[#allocation82_spill] sm:$0xff] %v29427_v11  ;;  %v29432_v26 = vld [vmem:[#allocation5 + $0x78] sm:$0xff]  ;;  %33610 = vst [vmem:[#allocation83_spill] sm:$0xff] %v29441_v32  ;;  %v29449_v23 = vld [vmem:[#allocation5 + $0x70] sm:$0xff]  ;;  %v33615_v29 = vand.u32 4294901760, %v29360_v3  ;;  %v33616_v52 = vand.u32 4294901760, %v29366_v31 }
  0x83   :  { %24016 = vmatpush1.bf16.msra.mxu1 %v29338_v55  ;;  %24114 = vmatprep.subr.bf16.mxu0 %v33596_v2  ;;  %33611 = vst [vmem:[#allocation84_spill] sm:$0xff] %v29445_v20  ;;  %33613 = vst [vmem:[#allocation86_spill] sm:$0xff] %v29462_v47  ;;  %v85_v40 = vld [vmem:[#allocation2 + $0x40] sm:$0xff]  ;;  %v29494_v55 = vsub.f32 %v1894_v39, %v29451_v38  ;;  %v33625_v39 = vand.u32 4294901760, %v29430_v28  ;;  %v33626_v27 = vand.u32 4294901760, %v29432_v26  ;;  %v29515_v33 = vld [vmem:[#allocation5 + $0xb8] sm:$0xff] }
  0x84   :  { %24018 = vmatprep.subr.bf16.mxu1 %v29344_v17  ;;  %650 = vmatprep.mubr.f32.mxu1 %v33562_v5  ;;  %v29473_v17 = vsub.f32 %v29387_v42, %v1904_v63  ;;  %v29484_v19 = vpack.c.bf16 %v33616_v52, %v33615_v29  ;;  %v33621_v29 = vand.u32 4294901760, %v29370_v8  ;;  %v33622_v52 = vand.u32 4294901760, %v29399_v56  ;;  %v29503_v42 = vld [vmem:[#allocation5 + $0x98] sm:$0xff]  ;;  %v33628_v10 = vld [vmem:[#allocation28_spill] sm:$0xff] }
  0x85   :  { %1029 = vmatprep.mubr.f32.mxu0 %v33562_v5  ;;  %33620 = vst [vmem:[#allocation89_spill] sm:$0xff] %v29494_v55  ;;  %v29513_v46 = vpack.c.bf16 %v33626_v27, %v33625_v39  ;;  %v33633_v27 = vand.u32 4294901760, %v29435_v37  ;;  %v29532_v59 = vld [vmem:[#allocation5 + $0x90] sm:$0xff]  ;;  %v33640_v53 = vand.u32 4294901760, %v29468_v12  ;;  %v33652_v16 = vand.u32 4294901760, %v29515_v33  ;;  %v29612_v45 = vld [vmem:[#allocation5 + $0x158] sm:$0xff] }
  0x86   :  { %24116 = vmatpush1.bf16.msra.mxu0 %v33598_v1  ;;  %33617 = vst [vmem:[#allocation87_spill] sm:$0xff] %v29484_v19  ;;  %v29501_v24 = vpack.c.bf16 %v33622_v52, %v33621_v29  ;;  %v33634_v52 = vld [vmem:[#allocation29_spill] sm:$0xff]  ;;  %v33639_v29 = vand.u32 4294901760, %v29465_v54 }
  0x87   :  { %24020 = vmatpush1.bf16.msra.mxu1 %v29352_v4  ;;  %24118 = vmatprep.subr.bf16.mxu0 %v33601_v9  ;;  %v89_v4 = vld [vmem:[#allocation2 + $0x60] sm:$0xff]  ;;  %33627 = vst [vmem:[#allocation92_spill] sm:$0xff] %v29513_v46  ;;  %v1983_v39 = vsub.f32 %v29435_v37, %v33633_v27  ;;  %v29547_v27 = vld [vmem:[#allocation5 + $0xf8] sm:$0xff] }
  0x88   :  { %24022 = vmatprep.subr.bf16.mxu1 %v29358_v50  ;;  %v29491_v50 = vpack.c.bf16 %v1900_v7, %v1896_v49  ;;  %33623 = vst [vmem:[#allocation90_spill] sm:$0xff] %v29501_v24  ;;  %v1910_v41 = vand.u32 4294901760, %v89_v4  ;;  %v29507_v7 = vpack.c.bf16 %v1902_v18, %v1898_v15  ;;  %v33630_v15 = vand.u32 4294901760, %v29447_v6  ;;  %v29580_v9 = vld [vmem:[#allocation5 + $0x138] sm:$0xff] }
  0x89   :  { %v33631_v18 = vand.u32 4294901760, %v29449_v23  ;;  %v1989_v44 = vsub.f32 %v29465_v54, %v33639_v29  ;;  %v29573_v29 = vld [vmem:[#allocation5 + $0x118] sm:$0xff]  ;;  %33646 = vst [vmem:[#allocation100_spill] sm:$0xff] %v29580_v9 }
  0x8a   :  { %24120 = vmatpush1.bf16.msra.mxu0 %v33606_v60  ;;  %33619 = vst [vmem:[#allocation88_spill] sm:$0xff] %v29491_v50  ;;  %33624 = vst [vmem:[#allocation91_spill] sm:$0xff] %v29507_v7 }
  0x8b   :  { %24024 = vmatpush1.bf16.msra.mxu1 %v29383_v30  ;;  %v33609_v30 = vld [vmem:[#allocation25_spill] sm:$0xff]  ;;  %v29527_v49 = vpack.c.bf16 %v33631_v18, %v33630_v15  ;;  %33644 = vst [vmem:[#allocation99_spill] sm:$0xff] %v29573_v29  ;;  %v1990_v60 = vand.u32 4294901760, %v1989_v44 }
  0x8c   :  { %24026 = vmatprep.subr.bf16.mxu1 %v29395_v21  ;;  %24122 = vmatprep.subr.bf16.mxu0 %v33609_v30  ;;  %v29458_v21 = vpack.c.bf16 %v29265_v35, %v29260_v51  ;;  %v29476_v51 = vsub.f32 %v29389_v36, %v1908_v57  ;;  %v33614_v35 = vld [vmem:[#allocation26_spill] sm:$0xff]  ;;  %v33618_v36 = vld [vmem:[#allocation27_spill] sm:$0xff]  ;;  %v29543_v18 = vld [vmem:[#allocation5 + $0xb0] sm:$0xff]  ;;  %v1984_v30 = vand.u32 4294901760, %v1983_v39  ;;  %v33651_v39 = vand.u32 4294901760, %v29503_v42 }
  0x8d   :  { %33632 = vst [vmem:[#allocation94_spill] sm:$0xff] %v29527_v49 }
  0x8e   :  { %33612 = vst [vmem:[#allocation85_spill] sm:$0xff] %v29458_v21  ;;  %24124 = vmatpush1.bf16.msra.mxu0 %v33614_v35  ;;  %v29571_v35 = vsub.f32 %v89_v4, %v1910_v41  ;;  %v29602_v44 = vpack.c.bf16 %v33652_v16, %v33651_v39  ;;  %v33659_v39 = vand.u32 4294901760, %v29547_v27 }
  0x8f   :  { %24028 = vmatpush1.bf16.msra.mxu1 %v29404_v48  ;;  %24126 = vmatprep.subr.bf16.mxu0 %v33618_v36  ;;  %v1906_v48 = vand.u32 4294901760, %v85_v40  ;;  %v29569_v36 = vld [vmem:[#allocation5 + $0xf0] sm:$0xff] }
  0x90   :  { %24030 = vmatprep.subr.bf16.mxu1 %v29411_v22  ;;  %v29521_v22 = vpack.c.bf16 %v1908_v57, %v1904_v63  ;;  %v29538_v57 = vand.u32 4294901760, %v29494_v55  ;;  %v33636_v63 = vand.u32 4294901760, %v29454_v43  ;;  %33643 = vst [vmem:[#allocation98_spill] sm:$0xff] %v29571_v35  ;;  %33653 = vst [vmem:[#allocation103_spill] sm:$0xff] %v29602_v44 }
  0x91   :  { %v29549_v0 = vsub.f32 %v85_v40, %v1906_v48 }
  0x92   :  { %24128 = vmatpush1.bf16.msra.mxu0 %v33628_v10  ;;  %33629 = vst [vmem:[#allocation93_spill] sm:$0xff] %v29521_v22  ;;  %33635 = vst [vmem:[#allocation95_spill] sm:$0xff] %v29538_v57  ;;  %v1995_v15 = vsub.f32 %v29454_v43, %v33636_v63  ;;  %v2001_v63 = vsub.f32 %v29468_v12, %v33640_v53  ;;  %v33641_v10 = vand.u32 4294901760, %v29473_v17  ;;  %v33645_v53 = vld [vmem:[#allocation33_spill] sm:$0xff] }
  0x93   :  { %24032 = vmatpush1.bf16.msra.mxu1 %v29415_v25  ;;  %24130 = vmatprep.subr.bf16.mxu0 %v33634_v52  ;;  %v29545_v25 = vld [vmem:[#allocation5 + $0xd8] sm:$0xff]  ;;  %33637 = vst [vmem:[#allocation96_spill] sm:$0xff] %v29549_v0  ;;  %v1972_v4 = vsub.f32 %v29494_v55, %v29538_v57  ;;  %v29590_v52 = vld [vmem:[#allocation5 + $0x130] sm:$0xff] }
  0x94   :  { %24034 = vmatprep.subr.bf16.mxu1 %v29423_v14  ;;  %v29551_v14 = vpack.c.bf16 %v1910_v41, %v1906_v48  ;;  %v2007_v40 = vsub.f32 %v29473_v17, %v33641_v10  ;;  %v33642_v48 = vand.u32 4294901760, %v29476_v51  ;;  %v1996_v41 = vand.u32 4294901760, %v1995_v15  ;;  %33649 = vst [vmem:[#allocation102_spill] sm:$0xff] %v29590_v52  ;;  %v29672_v57 = vld [vmem:[#allocation5 + $0x198] sm:$0xff] }
  0x95   :  { %v2002_v10 = vand.u32 4294901760, %v2001_v63  ;;  %v33654_v63 = vand.u32 4294901760, %v29532_v59  ;;  %v33658_v16 = vand.u32 4294901760, %v29545_v25  ;;  %v29629_v15 = vand.u32 4294901760, %v1972_v4  ;;  %v29674_v55 = vld [vmem:[#allocation5 + $0x1b8] sm:$0xff] }
  0x96   :  { %33638 = vst [vmem:[#allocation97_spill] sm:$0xff] %v29551_v14  ;;  %v2019_v34 = vsub.f32 %v29476_v51, %v33642_v48  ;;  %24132 = vmatpush1.bf16.msra.mxu0 %v33645_v53  ;;  %v33647_v48 = vld [vmem:[#allocation34_spill] sm:$0xff]  ;;  %v29588_v53 = vld [vmem:[#allocation5 + $0x110] sm:$0xff]  ;;  %v2008_v2 = vand.u32 4294901760, %v2007_v40  ;;  %v29616_v1 = vpack.c.bf16 %v1996_v41, %v1984_v30  ;;  %v33665_v30 = vand.u32 4294901760, %v29569_v36 }
  0x97   :  { %24036 = vmatpush1.bf16.msra.mxu1 %v29427_v11  ;;  %24134 = vmatprep.subr.bf16.mxu0 %v33647_v48  ;;  %33648 = vst [vmem:[#allocation101_spill] sm:$0xff] %v29588_v53  ;;  %v33650_v11 = vld [vmem:[#allocation35_spill] sm:$0xff]  ;;  %33662 = vst [vmem:[#allocation107_spill] sm:$0xff] %v29629_v15  ;;  %v33670_v4 = vand.u32 4294901760, %v29573_v29 }
  0x98   :  { %24038 = vmatprep.subr.bf16.mxu1 %v29441_v32  ;;  %v2020_v48 = vand.u32 4294901760, %v2019_v34  ;;  %v33655_v32 = vand.u32 4294901760, %v29543_v18  ;;  %33657 = vst [vmem:[#allocation105_spill] sm:$0xff] %v29616_v1  ;;  %v29627_v34 = vld [vmem:[#allocation5 + $0x178] sm:$0xff] }
  0x9a   :  { %24136 = vmatpush1.bf16.msra.mxu0 %v33650_v11  ;;  %v29608_v40 = vpack.c.bf16 %v33655_v32, %v33654_v63  ;;  %v33661_v32 = vand.u32 4294901760, %v29549_v0  ;;  %v29631_v11 = vpack.c.bf16 %v2002_v10, %v1990_v60  ;;  %v33671_v60 = vand.u32 4294901760, %v29580_v9 }
  0x9b   :  { %24040 = vmatpush1.bf16.msra.mxu1 %v29445_v20  ;;  %24138 = vmatprep.subr.bf16.mxu0 %v29026_v62  ;;  %v29622_v20 = vpack.c.bf16 %v33659_v39, %v33658_v16  ;;  %v29641_v16 = vpack.c.bf16 %v29454_v43, %v29435_v37  ;;  %v29643_v39 = vpack.c.bf16 %v2020_v48, %v2008_v2  ;;  %v33673_v2 = vand.u32 4294901760, %v29588_v53 }
  0x9c   :  { %33656 = vst [vmem:[#allocation104_spill] sm:$0xff] %v29608_v40  ;;  %24042 = vmatprep.subr.bf16.mxu1 %v29458_v21  ;;  %v2013_v63 = vsub.f32 %v29549_v0, %v33661_v32  ;;  %33663 = vst [vmem:[#allocation108_spill] sm:$0xff] %v29631_v11  ;;  %v33664_v21 = vand.u32 4294901760, %v29560_v13  ;;  %v33669_v32 = vand.u32 4294901760, %v29571_v35  ;;  %v29652_v10 = vpack.c.bf16 %v33671_v60, %v33670_v4  ;;  %v29670_v60 = vld [vmem:[#allocation5 + $0x170] sm:$0xff] }
  0x9d   :  { %33660 = vst [vmem:[#allocation106_spill] sm:$0xff] %v29622_v20  ;;  %33667 = vst [vmem:[#allocation110_spill] sm:$0xff] %v29641_v16  ;;  %v33674_v48 = vand.u32 4294901760, %v29590_v52  ;;  %v29685_v52 = vld [vmem:[#allocation5 + $0x1b0] sm:$0xff]  ;;  %v33678_v4 = vand.u32 4294901760, %v29366_v31  ;;  %v33680_v9 = vand.u32 4294901760, %v29370_v8 }
  0x9e   :  { %v29637_v41 = vpack.c.bf16 %v33665_v30, %v33664_v21  ;;  %33668 = vst [vmem:[#allocation111_spill] sm:$0xff] %v29643_v39  ;;  %v2025_v62 = vsub.f32 %v29571_v35, %v33669_v32  ;;  %33672 = vst [vmem:[#allocation112_spill] sm:$0xff] %v29652_v10  ;;  %v29655_v21 = vld [vmem:[#allocation5 + $0x150] sm:$0xff]  ;;  %24140 = vmatpush1.bf16.msra.mxu0 %v29032_v61  ;;  %v29667_v32 = vpack.c.bf16 %v29468_v12, %v29465_v54 }
  0x9f   :  { %24044 = vmatpush1.bf16.msra.mxu1 %v29462_v47  ;;  %v29663_v30 = vpack.c.bf16 %v33674_v48, %v33673_v2  ;;  %v33677_v47 = vand.u32 4294901760, %v29360_v3  ;;  %24334 = vmatprep.subr.bf16.mxu0 %v29491_v50  ;;  %v2014_v2 = vand.u32 4294901760, %v2013_v63  ;;  %v29683_v48 = vld [vmem:[#allocation5 + $0x190] sm:$0xff]  ;;  %v29690_v53 = vsub.f32 %v29366_v31, %v33678_v4 }
  0xa0   :  { %33666 = vst [vmem:[#allocation109_spill] sm:$0xff] %v29637_v41  ;;  %33676 = vst [vmem:[#allocation114_spill] sm:$0xff] %v29667_v32  ;;  %24142 = vmatprep.subr.bf16.mxu1 %v29484_v19  ;;  %v29695_v29 = vsub.f32 %v29370_v8, %v33680_v9  ;;  %v29704_v63 = vpack.c.bf16 %v29476_v51, %v29473_v17  ;;  %v33685_v50 = vand.u32 4294901760, %v29430_v28  ;;  %v33686_v4 = vand.u32 4294901760, %v29432_v26  ;;  %v33687_v8 = vld [vmem:[#allocation31_spill] sm:$0xff] }
  0xa1   :  { %33675 = vst [vmem:[#allocation113_spill] sm:$0xff] %v29663_v30  ;;  %v29679_v61 = vsub.f32 %v29360_v3, %v33677_v47  ;;  %33679 = vst [vmem:[#allocation115_spill] sm:$0xff] %v29690_v53  ;;  %v33682_v3 = vand.u32 4294901760, %v29399_v56  ;;  %1031 = vmatmul.mubr.f32.vlgmr.msra.gmra.mrb[0].mxu0 %v33591_v58  ;;  %v29739_v19 = vpack.c.bf16 %v29571_v35, %v29549_v0  ;;  %v33696_v35 = vand.u32 4294901760, %v29655_v21 }
  0xa2   :  { %33681 = vst [vmem:[#allocation116_spill] sm:$0xff] %v29695_v29  ;;  %33684 = vst [vmem:[#allocation118_spill] sm:$0xff] %v29704_v63  ;;  %v29710_v31 = vsub.f32 %v29430_v28, %v33685_v50  ;;  %v29715_v9 = vsub.f32 %v29432_v26, %v33686_v4  ;;  %653 = vmatmul.mubr.f32.vlgmr.msra.gmra.mrb[0].mxu1 %v33687_v8  ;;  %24336 = vmatpush1.bf16.msra.mxu0 %v29507_v7  ;;  %v33688_v50 = vand.u32 4294901760, %v29612_v45  ;;  %v29732_v8 = vld [vmem:[#allocation5 + $0x1d8] sm:$0xff]  ;;  %v29747_v4 = vld [vmem:[#allocation5 + $0x1d0] sm:$0xff] }
  0xa3   :  { %v29700_v47 = vsub.f32 %v29399_v56, %v33682_v3  ;;  %v2026_v56 = vand.u32 4294901760, %v2025_v62  ;;  %24144 = vmatpush1.bf16.msra.mxu1 %v29501_v24  ;;  %v33689_v28 = vand.u32 4294901760, %v29627_v34  ;;  %24338 = vmatprep.subr.bf16.mxu0 %v29521_v22  ;;  %33691 = vst [vmem:[#allocation120_spill] sm:$0xff] %v29739_v19  ;;  %v29741_v3 = vld [vmem:[#allocation5 + $0x1f8] sm:$0xff]  ;;  %v33692_v24 = vand.u32 4294901760, %v29447_v6 }
  0xa4   :  { %24146 = vmatprep.subr.bf16.mxu1 %v29513_v46  ;;  %1968 = vmatprep.mubr.f32.mxu0 %v33562_v5  ;;  %v33697_v0 = vand.u32 4294901760, %v29670_v60  ;;  %v33699_v46 = vand.u32 4294901760, %v29672_v57  ;;  %v33700_v63 = vand.u32 4294901760, %v29674_v55 }
  0xa5   :  { %33683 = vst [vmem:[#allocation117_spill] sm:$0xff] %v29700_v47  ;;  %v29728_v26 = vpack.c.bf16 %v33689_v28, %v33688_v50  ;;  %1133 = vmatprep.mubr.f32.mxu1 %v33562_v5  ;;  %v29755_v58 = vsub.f32 %v29447_v6, %v33692_v24  ;;  %v33694_v50 = vand.u32 4294901760, %v29449_v23  ;;  %v29762_v62 = vpack.c.bf16 %v2026_v56, %v2014_v2 }
  0xa6   :  { %v29768_v22 = vpack.c.bf16 %v33697_v0, %v33696_v35  ;;  %v29774_v7 = vpack.c.bf16 %v33700_v63, %v33699_v46  ;;  %24340 = vmatpush1.bf16.msra.mxu0 %v29551_v14  ;;  %v33703_v24 = vand.u32 4294901760, %v29685_v52  ;;  %v29786_v35 = vld [vmem:[#allocation5 + $0x1f0] sm:$0xff]  ;;  %v33705_v56 = vand.u32 4294901760, %v29679_v61 }
  0xa7   :  { %33690 = vst [vmem:[#allocation119_spill] sm:$0xff] %v29728_v26  ;;  %33693 = vst [vmem:[#allocation121_spill] sm:$0xff] %v29755_v58  ;;  %v29760_v28 = vsub.f32 %v29449_v23, %v33694_v50  ;;  %24148 = vmatpush1.bf16.msra.mxu1 %v29527_v49  ;;  %v33702_v23 = vand.u32 4294901760, %v29683_v48  ;;  %v33706_v63 = vand.u32 4294901760, %v29503_v42  ;;  %24342 = vmatprep.subr.bf16.mxu0 %v29616_v1  ;;  %v33708_v6 = vand.u32 4294901760, %v29695_v29 }
  0xa8   :  { %33695 = vst [vmem:[#allocation122_spill] sm:$0xff] %v29762_v62  ;;  %33698 = vst [vmem:[#allocation123_spill] sm:$0xff] %v29768_v22  ;;  %v1148_v46 = vsub.f32 %v29679_v61, %v33705_v56  ;;  %24150 = vmatprep.subr.bf16.mxu1 %v29602_v44  ;;  %v33709_v56 = vand.u32 4294901760, %v29700_v47  ;;  %v33711_v1 = vand.u32 4294901760, %v29715_v9 }
  0xa9   :  { %33701 = vst [vmem:[#allocation124_spill] sm:$0xff] %v29774_v7  ;;  %v29783_v2 = vpack.c.bf16 %v33703_v24, %v33702_v23  ;;  %v29794_v50 = vsub.f32 %v29503_v42, %v33706_v63  ;;  %v33707_v24 = vand.u32 4294901760, %v29690_v53  ;;  %v1154_v49 = vsub.f32 %v29695_v29, %v33708_v6  ;;  %1974 = vmatmul.mubr.f32.vlgmr.msra.gmra.mrb[0].mxu0 %v29629_v15 }
  0xaa   :  { %v1166_v14 = vsub.f32 %v29700_v47, %v33709_v56  ;;  %v33710_v42 = vand.u32 4294901760, %v29710_v31  ;;  %v1184_v23 = vsub.f32 %v29715_v9, %v33711_v1  ;;  %v33712_v29 = vand.u32 4294901760, %v29515_v33  ;;  %24344 = vmatpush1.bf16.msra.mxu0 %v29631_v11  ;;  %2084 = vmatprep.mubr.f32.mxu0 %v33562_v5 }
  0xab   :  { %33704 = vst [vmem:[#allocation125_spill] sm:$0xff] %v29783_v2  ;;  %v1160_v0 = vsub.f32 %v29690_v53, %v33707_v24  ;;  %v33713_v47 = vand.u32 4294901760, %v29532_v59  ;;  %v33714_v1 = vand.u32 4294901760, %v29543_v18  ;;  %24152 = vmatpush1.bf16.msra.mxu1 %v29608_v40  ;;  %v33715_v6 = vand.u32 4294901760, %v29732_v8  ;;  %24346 = vmatprep.subr.bf16.mxu0 %v29643_v39 }
  0xac   :  { %v1172_v63 = vsub.f32 %v29710_v31, %v33710_v42  ;;  %v29821_v56 = vsub.f32 %v29515_v33, %v33712_v29  ;;  %v33716_v24 = vand.u32 4294901760, %v29741_v3  ;;  %v33718_v29 = vand.u32 4294901760, %v29435_v37  ;;  %24154 = vmatprep.subr.bf16.mxu1 %v29622_v20  ;;  %v33775_v20 = vld [vmem:[#allocation117_spill] sm:$0xff] }
  0xad   :  { %v29826_v42 = vsub.f32 %v29532_v59, %v33713_v47  ;;  %v29831_v44 = vsub.f32 %v29543_v18, %v33714_v1  ;;  %v33719_v59 = vand.u32 4294901760, %v29454_v43  ;;  %v33721_v18 = vand.u32 4294901760, %v29545_v25 }
  0xae   :  { %v29839_v33 = vpack.c.bf16 %v33716_v24, %v33715_v6  ;;  %v1149_v11 = vand.u32 4294901760, %v1148_v46  ;;  %v1161_v24 = vand.u32 4294901760, %v1160_v0  ;;  %v1155_v6 = vand.u32 4294901760, %v1154_v49  ;;  %24348 = vmatpush1.bf16.msra.mxu0 %v29762_v62 }
  0xaf   :  { %v29845_v47 = vpack.c.bf16 %v33719_v59, %v33718_v29  ;;  %v29851_v1 = vsub.f32 %v29545_v25, %v33721_v18  ;;  %v1167_v40 = vand.u32 4294901760, %v1166_v14  ;;  %v1173_v37 = vand.u32 4294901760, %v1172_v63  ;;  %24156 = vmatpush1.bf16.msra.mxu1 %v29637_v41  ;;  %24350 = vmatprep.subr.bf16.mxu0 %v29641_v16  ;;  %v33750_v16 = vld [vmem:[#allocation101_spill] sm:$0xff] }
  0xb0   :  { %33717 = vst [vmem:[#allocation126_spill] sm:$0xff] %v29839_v33  ;;  %v1185_v43 = vand.u32 4294901760, %v1184_v23  ;;  %v33722_v29 = vand.u32 4294901760, %v29755_v58  ;;  %v33723_v25 = vand.u32 4294901760, %v29760_v28  ;;  %v33724_v49 = vand.u32 4294901760, %v29547_v27  ;;  %24158 = vmatprep.subr.bf16.mxu1 %v29652_v10 }
  0xb1   :  { %33720 = vst [vmem:[#allocation127_spill] sm:$0xff] %v29845_v47  ;;  %v33726_v23 = vand.u32 4294901760, %v29747_v4  ;;  %v33727_v63 = vand.u32 4294901760, %v29786_v35  ;;  %v33730_v0 = vand.u32 4294901760, %v29468_v12  ;;  %v33732_v15 = vand.u32 4294901760, %v29794_v50  ;;  %2086 = vmatmul.mubr.f32.vlgmr.msra.gmra.mrb[0].mxu0 %v29451_v38 }
  0xb2   :  { %v29859_v59 = vsub.f32 %v29755_v58, %v33722_v29  ;;  %v29864_v18 = vsub.f32 %v29760_v28, %v33723_v25  ;;  %v29872_v46 = vsub.f32 %v29547_v27, %v33724_v49  ;;  %v33729_v25 = vand.u32 4294901760, %v29465_v54  ;;  %24352 = vmatpush1.bf16.msra.mxu0 %v29667_v32  ;;  %v33747_v49 = vld [vmem:[#allocation118_spill] sm:$0xff]  ;;  %2172 = vmatprep.mubr.f32.mxu0 %v33562_v5 }
  0xb3   :  { %v29880_v29 = vpack.c.bf16 %v33727_v63, %v33726_v23  ;;  %v29891_v27 = vsub.f32 %v29794_v50, %v33732_v15  ;;  %v29896_v62 = vpack.c.bf16 %v1161_v24, %v1149_v11  ;;  %v33734_v23 = vand.u32 4294901760, %v29473_v17  ;;  %24160 = vmatpush1.bf16.msra.mxu1 %v29663_v30  ;;  %24354 = vmatprep.subr.bf16.mxu0 %v33747_v49 }
  0xb4   :  { %33725 = vst [vmem:[#allocation128_spill] sm:$0xff] %v29872_v46  ;;  %v29886_v14 = vpack.c.bf16 %v33730_v0, %v33729_v25  ;;  %v33735_v54 = vand.u32 4294901760, %v29476_v51  ;;  %v33737_v0 = vand.u32 4294901760, %v29560_v13  ;;  %v29909_v15 = vpack.c.bf16 %v1167_v40, %v1155_v6  ;;  %24162 = vmatprep.subr.bf16.mxu1 %v29728_v26  ;;  %v33769_v26 = vld [vmem:[#allocation93_spill] sm:$0xff] }
  0xb5   :  { %33728 = vst [vmem:[#allocation129_spill] sm:$0xff] %v29880_v29  ;;  %33733 = vst [vmem:[#allocation131_spill] sm:$0xff] %v29896_v62  ;;  %v29911_v25 = vpack.c.bf16 %v1185_v43, %v1173_v37  ;;  %v33740_v17 = vand.u32 4294901760, %v29821_v56  ;;  %v33741_v24 = vand.u32 4294901760, %v29826_v42  ;;  %v33742_v40 = vand.u32 4294901760, %v29831_v44  ;;  %v33748_v37 = vld [vmem:[#allocation100_spill] sm:$0xff] }
  0xb6   :  { %33731 = vst [vmem:[#allocation130_spill] sm:$0xff] %v29886_v14  ;;  %v29902_v12 = vpack.c.bf16 %v33735_v54, %v33734_v23  ;;  %v29907_v63 = vsub.f32 %v29560_v13, %v33737_v0  ;;  %33738 = vst [vmem:[#allocation133_spill] sm:$0xff] %v29909_v15  ;;  %v33743_v23 = vand.u32 4294901760, %v29851_v1  ;;  %v33744_v0 = vand.u32 4294901760, %v29569_v36  ;;  %24356 = vmatpush1.bf16.msra.mxu0 %v29739_v19 }
  0xb7   :  { %33739 = vst [vmem:[#allocation134_spill] sm:$0xff] %v29911_v25  ;;  %v29919_v51 = vsub.f32 %v29821_v56, %v33740_v17  ;;  %v29924_v13 = vsub.f32 %v29826_v42, %v33741_v24  ;;  %v29929_v6 = vsub.f32 %v29831_v44, %v33742_v40  ;;  %v33745_v24 = vld [vmem:[#allocation99_spill] sm:$0xff]  ;;  %v33749_v32 = vand.u32 4294901760, %v33748_v37  ;;  %24164 = vmatpush1.bf16.msra.mxu1 %v29768_v22  ;;  %v33767_v22 = vld [vmem:[#allocation89_spill] sm:$0xff] }
  0xb8   :  { %33736 = vst [vmem:[#allocation132_spill] sm:$0xff] %v29902_v12  ;;  %v29938_v54 = vsub.f32 %v29851_v1, %v33743_v23  ;;  %v29943_v17 = vsub.f32 %v29569_v36, %v33744_v0  ;;  %v33746_v40 = vand.u32 4294901760, %v33745_v24  ;;  %v33751_v39 = vand.u32 4294901760, %v33750_v16  ;;  %v33752_v0 = vld [vmem:[#allocation102_spill] sm:$0xff]  ;;  %24166 = vmatprep.subr.bf16.mxu1 %v29774_v7 }
  0xb9   :  { %v29956_v23 = vsub.f32 %v33748_v37, %v33749_v32  ;;  %v33753_v30 = vand.u32 4294901760, %v33752_v0  ;;  %v33755_v32 = vand.u32 4294901760, %v29627_v34  ;;  %v33758_v49 = vand.u32 4294901760, %v29672_v57  ;;  %2175 = vmatmul.mubr.f32.vlgmr.msra.gmra.mrb[0].mxu0 %v33767_v22 }
  0xba   :  { %v29948_v11 = vsub.f32 %v33745_v24, %v33746_v40  ;;  %v29961_v36 = vsub.f32 %v33750_v16, %v33751_v39  ;;  %v33754_v40 = vand.u32 4294901760, %v29612_v45  ;;  %v33756_v16 = vand.u32 4294901760, %v29655_v21  ;;  %2253 = vmatprep.mubr.f32.mxu0 %v33562_v5 }
  0xbb   :  { %v29966_v24 = vsub.f32 %v33752_v0, %v33753_v30  ;;  %v29977_v37 = vsub.f32 %v29627_v34, %v33755_v32  ;;  %v33757_v30 = vand.u32 4294901760, %v29670_v60  ;;  %v33760_v32 = vand.u32 4294901760, %v29683_v48  ;;  %24168 = vmatpush1.bf16.msra.mxu1 %v29783_v2  ;;  %v33773_v2 = vld [vmem:[#allocation116_spill] sm:$0xff] }
  0xbc   :  { %v29972_v43 = vsub.f32 %v29612_v45, %v33754_v40  ;;  %v29982_v39 = vsub.f32 %v29655_v21, %v33756_v16  ;;  %v29992_v45 = vsub.f32 %v29672_v57, %v33758_v49  ;;  %v33759_v40 = vand.u32 4294901760, %v29674_v55  ;;  %24170 = vmatprep.subr.bf16.mxu1 %v29839_v33 }
  0xbd   :  { %v29987_v0 = vsub.f32 %v29670_v60, %v33757_v30  ;;  %v30002_v21 = vsub.f32 %v29683_v48, %v33760_v32  ;;  %v33761_v16 = vand.u32 4294901760, %v29685_v52  ;;  %v1237_v57 = vand.u32 4294901760, %v29943_v17  ;;  %v33765_v32 = vld [vmem:[#allocation88_spill] sm:$0xff] }
  0xbe   :  { %v29997_v34 = vsub.f32 %v29674_v55, %v33759_v40  ;;  %v33762_v49 = vand.u32 4294901760, %v29732_v8  ;;  %v33763_v30 = vand.u32 4294901760, %v29741_v3  ;;  %v33764_v40 = vand.u32 4294901760, %v29747_v4  ;;  %24358 = vmatprep.subr.bf16.mxu0 %v33765_v32 }
  0xbf   :  { %v30007_v60 = vsub.f32 %v29685_v52, %v33761_v16  ;;  %v1243_v16 = vand.u32 4294901760, %v29948_v11  ;;  %v1255_v19 = vand.u32 4294901760, %v29956_v23  ;;  %v33770_v41 = vand.u32 4294901760, %v29679_v61  ;;  %24172 = vmatpush1.bf16.msra.mxu1 %v29880_v29 }
  0xc0   :  { %v30015_v55 = vsub.f32 %v29732_v8, %v33762_v49  ;;  %v30020_v48 = vsub.f32 %v29741_v3, %v33763_v30  ;;  %v30025_v52 = vsub.f32 %v29747_v4, %v33764_v40  ;;  %v33766_v49 = vand.u32 4294901760, %v29786_v35  ;;  %24174 = vmatprep.subr.bf16.mxu1 %v29896_v62  ;;  %v33819_v62 = vld [vmem:[#allocation47_spill] sm:$0xff] }
  0xc1   :  { %v1261_v30 = vand.u32 4294901760, %v29966_v24  ;;  %v33771_v10 = vand.u32 4294901760, %v29690_v53  ;;  %v33776_v40 = vand.u32 4294901760, %v33775_v20  ;;  %v33778_v4 = vand.u32 4294901760, %v29710_v31 }
  0xc2   :  { %v30035_v3 = vsub.f32 %v29786_v35, %v33766_v49  ;;  %v33768_v35 = vld [vmem:[#allocation91_spill] sm:$0xff]  ;;  %v33774_v49 = vand.u32 4294901760, %v33773_v2  ;;  %v33779_v7 = vand.u32 4294901760, %v29715_v9  ;;  %v33781_v8 = vand.u32 4294901760, %v29755_v58  ;;  %1139 = vmatmul.mubr.f32.vlgmr.msra.gmra.mrb[2].mxu1 %v33819_v62 }
  0xc3   :  { %24360 = vmatpush1.bf16.msra.mxu0 %v33768_v35  ;;  %v30059_v22 = vpack.c.bf16 %v33771_v10, %v33770_v41  ;;  %v33782_v53 = vand.u32 4294901760, %v29760_v28  ;;  %v33784_v10 = vand.u32 4294901760, %v29794_v50  ;;  %24176 = vmatpush1.bf16.msra.mxu1 %v29909_v15  ;;  %v33828_v62 = vand.u32 4294901760, %v29891_v27 }
  0xc4   :  { %24362 = vmatprep.subr.bf16.mxu0 %v33769_v26  ;;  %v30065_v35 = vpack.c.bf16 %v33776_v40, %v33774_v49  ;;  %v30071_v33 = vpack.c.bf16 %v33779_v7, %v33778_v4  ;;  %v33787_v49 = vand.u32 4294901760, %v29826_v42  ;;  %v33790_v4 = vand.u32 4294901760, %v29851_v1  ;;  %24178 = vmatprep.subr.bf16.mxu1 %v29911_v25 }
  0xc5   :  { %33772 = vst [vmem:[#allocation99_spill] sm:$0xff] %v30059_v22  ;;  %v30078_v41 = vpack.c.bf16 %v33782_v53, %v33781_v8  ;;  %v33785_v22 = vand.u32 4294901760, %v29821_v56  ;;  %v33793_v53 = vand.u32 4294901760, %v29907_v63  ;;  %1369 = vmatprep.mubr.f32.mxu1 %v33562_v5 }
  0xc6   :  { %33777 = vst [vmem:[#allocation100_spill] sm:$0xff] %v30065_v35  ;;  %33780 = vst [vmem:[#allocation101_spill] sm:$0xff] %v30071_v33  ;;  %v33788_v35 = vand.u32 4294901760, %v29831_v44  ;;  %v33791_v33 = vand.u32 4294901760, %v29872_v46 }
  0xc7   :  { %33783 = vst [vmem:[#allocation102_spill] sm:$0xff] %v30078_v41  ;;  %v30084_v40 = vpack.c.bf16 %v33785_v22, %v33784_v10  ;;  %v30100_v8 = vpack.c.bf16 %v1237_v57, %v33793_v53  ;;  %v30102_v41 = vpack.c.bf16 %v1255_v19, %v1243_v16  ;;  %v33796_v22 = vand.u32 4294901760, %v29961_v36 }
  0xc8   :  { %v30090_v7 = vpack.c.bf16 %v33788_v35, %v33787_v49  ;;  %v30096_v58 = vpack.c.bf16 %v33791_v33, %v33790_v4  ;;  %v33799_v35 = vand.u32 4294901760, %v29977_v37  ;;  %v33801_v33 = vld [vmem:[#allocation97_spill] sm:$0xff]  ;;  %v1209_v4 = vand.u32 4294901760, %v29919_v51 }
  0xc9   :  { %33786 = vst [vmem:[#allocation116_spill] sm:$0xff] %v30084_v40  ;;  %33794 = vst [vmem:[#allocation136_spill] sm:$0xff] %v30100_v8  ;;  %v30106_v10 = vpack.c.bf16 %v1261_v30, %v33796_v22  ;;  %v33798_v40 = vand.u32 4294901760, %v29972_v43  ;;  %24364 = vmatpush1.bf16.msra.mxu0 %v33801_v33  ;;  %v33802_v53 = vand.u32 4294901760, %v29982_v39  ;;  %v33805_v22 = vand.u32 4294901760, %v29992_v45 }
  0xca   :  { %33789 = vst [vmem:[#allocation117_spill] sm:$0xff] %v30090_v7  ;;  %33792 = vst [vmem:[#allocation135_spill] sm:$0xff] %v30096_v58  ;;  %24366 = vmatprep.subr.bf16.mxu0 %v29845_v47  ;;  %v33811_v51 = vand.u32 4294901760, %v29872_v46  ;;  %v33820_v47 = vand.u32 4294901760, %v29859_v59  ;;  %v33823_v7 = vld [vmem:[#allocation96_spill] sm:$0xff]  ;;  %v30172_v59 = vpack.c.bf16 %v1209_v4, %v33828_v62  ;;  %v33832_v4 = vand.u32 4294901760, %v29961_v36 }
  0xcb   :  { %33795 = vst [vmem:[#allocation137_spill] sm:$0xff] %v30102_v41  ;;  %33797 = vst [vmem:[#allocation138_spill] sm:$0xff] %v30106_v10  ;;  %v30112_v49 = vpack.c.bf16 %v33799_v35, %v33798_v40  ;;  %v33803_v41 = vand.u32 4294901760, %v29987_v0  ;;  %v33806_v10 = vand.u32 4294901760, %v29997_v34  ;;  %v33808_v40 = vand.u32 4294901760, %v30002_v21 }
  0xcc   :  { %v33809_v35 = vand.u32 4294901760, %v30007_v60  ;;  %v33824_v29 = vand.u32 4294901760, %v33823_v7  ;;  %33829 = vst [vmem:[#allocation96_spill] sm:$0xff] %v30172_v59  ;;  %v1238_v7 = vsub.f32 %v29943_v17, %v1237_v57  ;;  %v1250_v57 = vsub.f32 %v29961_v36, %v33832_v4 }
  0xcd   :  { %33800 = vst [vmem:[#allocation139_spill] sm:$0xff] %v30112_v49  ;;  %v30121_v8 = vpack.c.bf16 %v33803_v41, %v33802_v53  ;;  %v30127_v58 = vpack.c.bf16 %v33806_v10, %v33805_v22  ;;  %v1232_v41 = vsub.f32 %v29872_v46, %v33811_v51  ;;  %v33812_v53 = vand.u32 4294901760, %v30015_v55 }
  0xce   :  { %v30133_v49 = vpack.c.bf16 %v33809_v35, %v33808_v40  ;;  %v33815_v22 = vand.u32 4294901760, %v30025_v52  ;;  %v33818_v35 = vld [vmem:[#allocation95_spill] sm:$0xff]  ;;  %v33821_v51 = vand.u32 4294901760, %v29864_v18  ;;  %v1203_v46 = vand.u32 4294901760, %v29924_v13 }
  0xcf   :  { %33804 = vst [vmem:[#allocation140_spill] sm:$0xff] %v30121_v8  ;;  %33807 = vst [vmem:[#allocation141_spill] sm:$0xff] %v30127_v58  ;;  %v33813_v8 = vand.u32 4294901760, %v30020_v48  ;;  %v33816_v58 = vand.u32 4294901760, %v30035_v3  ;;  %2257 = vmatmul.mubr.f32.vlgmr.msra.gmra.mrb[0].mxu0 %v33818_v35  ;;  %v1233_v13 = vand.u32 4294901760, %v1232_v41  ;;  %v1251_v62 = vand.u32 4294901760, %v1250_v57 }
  0xd0   :  { %33810 = vst [vmem:[#allocation142_spill] sm:$0xff] %v30133_v49  ;;  %v30158_v49 = vpack.c.bf16 %v33821_v51, %v33820_v47  ;;  %24368 = vmatpush1.bf16.msra.mxu0 %v29886_v14  ;;  %v33830_v47 = vand.u32 4294901760, %v29907_v63  ;;  %2351 = vmatprep.mubr.f32.mxu0 %v33562_v5  ;;  %v1262_v51 = vsub.f32 %v29966_v24, %v1261_v30  ;;  %v33837_v4 = vand.u32 4294901760, %v29987_v0 }
  0xd1   :  { %v30144_v10 = vpack.c.bf16 %v33813_v8, %v33812_v53  ;;  %v30150_v40 = vpack.c.bf16 %v33816_v58, %v33815_v22  ;;  %v33825_v8 = vld [vmem:[#allocation98_spill] sm:$0xff]  ;;  %v1215_v58 = vand.u32 4294901760, %v29929_v6  ;;  %24370 = vmatprep.subr.bf16.mxu0 %v29902_v12  ;;  %v1244_v6 = vsub.f32 %v29948_v11, %v1243_v16 }
  0xd2   :  { %33822 = vst [vmem:[#allocation95_spill] sm:$0xff] %v30158_v49  ;;  %v33826_v53 = vand.u32 4294901760, %v33825_v8  ;;  %v1226_v18 = vsub.f32 %v29907_v63, %v33830_v47  ;;  %v1256_v22 = vsub.f32 %v29956_v23, %v1255_v19  ;;  %24180 = vmatpush1.bf16.msra.mxu1 %v30158_v49  ;;  %v1239_v16 = vand.u32 4294901760, %v1238_v7 }
  0xd3   :  { %33814 = vst [vmem:[#allocation143_spill] sm:$0xff] %v30144_v10  ;;  %33817 = vst [vmem:[#allocation144_spill] sm:$0xff] %v30150_v40  ;;  %v30185_v27 = vpack.c.bf16 %v1215_v58, %v1203_v46  ;;  %v33833_v19 = vand.u32 4294901760, %v29972_v43  ;;  %v33834_v8 = vand.u32 4294901760, %v29977_v37  ;;  %24182 = vmatprep.subr.bf16.mxu1 %v30172_v59  ;;  %v1245_v30 = vand.u32 4294901760, %v1244_v6 }
  0xd4   :  { %v30164_v10 = vpack.c.bf16 %v33826_v53, %v33824_v29  ;;  %v1221_v29 = vand.u32 4294901760, %v29938_v54  ;;  %v1227_v54 = vand.u32 4294901760, %v1226_v18  ;;  %v1257_v58 = vand.u32 4294901760, %v1256_v22 }
  0xd5   :  { %33831 = vst [vmem:[#allocation98_spill] sm:$0xff] %v30185_v27  ;;  %v1268_v41 = vsub.f32 %v29972_v43, %v33833_v19  ;;  %v1280_v46 = vsub.f32 %v29977_v37, %v33834_v8  ;;  %v1263_v47 = vand.u32 4294901760, %v1262_v51  ;;  %v33836_v18 = vand.u32 4294901760, %v29982_v39  ;;  %v33838_v8 = vld [vmem:[#allocation91_spill] sm:$0xff] }
  0xd6   :  { %33827 = vst [vmem:[#allocation47_spill] sm:$0xff] %v30164_v10  ;;  %24372 = vmatpush1.bf16.msra.mxu0 %v30164_v10  ;;  %v30201_v53 = vpack.c.bf16 %v1233_v13, %v1221_v29  ;;  %v1286_v19 = vsub.f32 %v29987_v0, %v33837_v4  ;;  %24184 = vmatpush1.bf16.msra.mxu1 %v30185_v27  ;;  %v33841_v57 = vand.u32 4294901760, %v29992_v45  ;;  %v33848_v10 = vand.u32 4294901760, %v30020_v48 }
  0xd7   :  { %24374 = vmatprep.subr.bf16.mxu0 %v33765_v32  ;;  %v1274_v7 = vsub.f32 %v29982_v39, %v33836_v18  ;;  %v30212_v29 = vpack.c.bf16 %v1239_v16, %v1227_v54  ;;  %v1269_v13 = vand.u32 4294901760, %v1268_v41  ;;  %v1281_v6 = vand.u32 4294901760, %v1280_v46  ;;  %v33905_v32 = vld [vmem:[#allocation123_spill] sm:$0xff] }
  0xd8   :  { %33835 = vst [vmem:[#allocation145_spill] sm:$0xff] %v30201_v53  ;;  %24186 = vmatprep.subr.bf16.mxu1 %v30201_v53  ;;  %v30216_v22 = vpack.c.bf16 %v1257_v58, %v1245_v30  ;;  %v1292_v51 = vsub.f32 %v29992_v45, %v33841_v57  ;;  %v33842_v18 = vand.u32 4294901760, %v29997_v34  ;;  %v30225_v54 = vpack.c.bf16 %v1263_v47, %v1251_v62 }
  0xd9   :  { %2353 = vmatmul.mubr.f32.vlgmr.msra.gmra.mrb[0].mxu0 %v29451_v38  ;;  %33839 = vst [vmem:[#allocation146_spill] sm:$0xff] %v30212_v29  ;;  %v1275_v16 = vand.u32 4294901760, %v1274_v7  ;;  %v1287_v41 = vand.u32 4294901760, %v1286_v19  ;;  %v30229_v46 = vpack.c.bf16 %v1281_v6, %v1269_v13  ;;  %v33845_v30 = vand.u32 4294901760, %v30002_v21  ;;  %v33849_v6 = vld [vmem:[#allocation19_spill] sm:$0xff] }
  0xda   :  { %24376 = vmatpush1.bf16.msra.mxu0 %v33838_v8  ;;  %33840 = vst [vmem:[#allocation147_spill] sm:$0xff] %v30216_v22  ;;  %v1304_v4 = vsub.f32 %v29997_v34, %v33842_v18  ;;  %2431 = vmatprep.mubr.f32.mxu0 %v33562_v5  ;;  %33843 = vst [vmem:[#allocation148_spill] sm:$0xff] %v30225_v54  ;;  %v33846_v57 = vand.u32 4294901760, %v30007_v60  ;;  %v1293_v62 = vand.u32 4294901760, %v1292_v51  ;;  %v33847_v7 = vand.u32 4294901760, %v30015_v55  ;;  %v33857_v8 = vld [vmem:[#allocation22_spill] sm:$0xff] }
  0xdb   :  { %24378 = vmatprep.subr.bf16.mxu0 %v33769_v26  ;;  %24188 = vmatpush1.bf16.msra.mxu1 %v30212_v29  ;;  %33844 = vst [vmem:[#allocation149_spill] sm:$0xff] %v30229_v46  ;;  %v1298_v58 = vsub.f32 %v30002_v21, %v33845_v30  ;;  %v1328_v13 = vsub.f32 %v30020_v48, %v33848_v10  ;;  %v33851_v51 = vand.u32 4294901760, %v30025_v52  ;;  %v33855_v26 = vld [vmem:[#allocation21_spill] sm:$0xff] }
  0xdc   :  { %v1310_v18 = vsub.f32 %v30007_v60, %v33846_v57  ;;  %24190 = vmatprep.subr.bf16.mxu1 %v30216_v22  ;;  %v1305_v47 = vand.u32 4294901760, %v1304_v4  ;;  %v1316_v19 = vsub.f32 %v30015_v55, %v33847_v7  ;;  %v30246_v30 = vpack.c.bf16 %v1287_v41, %v1275_v16 }
  0xdd   :  { %v1299_v57 = vand.u32 4294901760, %v1298_v58  ;;  %v1322_v4 = vsub.f32 %v30025_v52, %v33851_v51  ;;  %v33852_v7 = vand.u32 4294901760, %v30035_v3  ;;  %v1329_v41 = vand.u32 4294901760, %v1328_v13 }
  0xde   :  { %24380 = vmatpush1.bf16.msra.mxu0 %v33801_v33  ;;  %33850 = vst [vmem:[#allocation150_spill] sm:$0xff] %v30246_v30  ;;  %v1311_v12 = vand.u32 4294901760, %v1310_v18  ;;  %v33853_v33 = vld [vmem:[#allocation20_spill] sm:$0xff]  ;;  %v30257_v10 = vpack.c.bf16 %v1305_v47, %v1293_v62  ;;  %v1317_v16 = vand.u32 4294901760, %v1316_v19  ;;  %v33859_v62 = vld [vmem:[#allocation23_spill] sm:$0xff] }
  0xdf   :  { %24430 = vmatprep.subr.bf16.mxu0 %v33849_v6  ;;  %24192 = vmatpush1.bf16.msra.mxu1 %v30225_v54  ;;  %v1334_v14 = vsub.f32 %v30035_v3, %v33852_v7  ;;  %v1323_v18 = vand.u32 4294901760, %v1322_v4  ;;  %v33861_v19 = vld [vmem:[#allocation24_spill] sm:$0xff]  ;;  %v33866_v4 = vld [vmem:[#allocation26_spill] sm:$0xff] }
  0xe0   :  { %24194 = vmatprep.subr.bf16.mxu1 %v30229_v46  ;;  %33854 = vst [vmem:[#allocation151_spill] sm:$0xff] %v30257_v10  ;;  %v30262_v58 = vpack.c.bf16 %v1311_v12, %v1299_v57  ;;  %v30266_v7 = vpack.c.bf16 %v1329_v41, %v1317_v16  ;;  %v33862_v12 = vld [vmem:[#allocation115_spill] sm:$0xff]  ;;  %v30282_v57 = vpack.c.bf16 %v33775_v20, %v33773_v2  ;;  %v87_v6 = vld [vmem:[#allocation2 + $0x50] sm:$0xff] }
  0xe1   :  { %2433 = vmatmul.mubr.f32.vlgmr.msra.gmra.mrb[0].mxu0 %v29451_v38  ;;  %v1335_v51 = vand.u32 4294901760, %v1334_v14  ;;  %v30276_v13 = vpack.c.bf16 %v33862_v12, %v29679_v61  ;;  %v33864_v14 = vld [vmem:[#allocation25_spill] sm:$0xff]  ;;  %v30288_v16 = vpack.c.bf16 %v29715_v9, %v29710_v31  ;;  %v33868_v41 = vld [vmem:[#allocation27_spill] sm:$0xff]  ;;  %v33869_v61 = vld [vmem:[#allocation30_spill] sm:$0xff]  ;;  %v30301_v20 = vpack.c.bf16 %v29821_v56, %v29794_v50 }
  0xe2   :  { %24432 = vmatpush1.bf16.msra.mxu0 %v33853_v33  ;;  %3109 = vmatprep.mubr.f32.mxu0 %v33562_v5  ;;  %33856 = vst [vmem:[#allocation152_spill] sm:$0xff] %v30262_v58  ;;  %33858 = vst [vmem:[#allocation153_spill] sm:$0xff] %v30266_v7  ;;  %v33873_v31 = vld [vmem:[#allocation28_spill] sm:$0xff]  ;;  %v33874_v9 = vld [vmem:[#allocation29_spill] sm:$0xff]  ;;  %v30308_v2 = vpack.c.bf16 %v29831_v44, %v29826_v42  ;;  %v30320_v56 = vpack.c.bf16 %v29943_v17, %v29907_v63 }
  0xe3   :  { %24434 = vmatprep.subr.bf16.mxu0 %v33855_v26  ;;  %24196 = vmatpush1.bf16.msra.mxu1 %v30246_v30  ;;  %v30270_v47 = vpack.c.bf16 %v1335_v51, %v1323_v18  ;;  %33863 = vst [vmem:[#allocation115_spill] sm:$0xff] %v30276_v13  ;;  %33865 = vst [vmem:[#allocation155_spill] sm:$0xff] %v30282_v57  ;;  %v33870_v18 = vld [vmem:[#allocation121_spill] sm:$0xff]  ;;  %v33879_v50 = vld [vmem:[#allocation34_spill] sm:$0xff]  ;;  %v30325_v44 = vpack.c.bf16 %v29956_v23, %v29948_v11 }
  0xe4   :  { %24198 = vmatprep.subr.bf16.mxu1 %v30257_v10  ;;  %33867 = vst [vmem:[#allocation156_spill] sm:$0xff] %v30288_v16  ;;  %v30295_v51 = vpack.c.bf16 %v29760_v28, %v33870_v18  ;;  %33872 = vst [vmem:[#allocation121_spill] sm:$0xff] %v30301_v20  ;;  %v33876_v28 = vld [vmem:[#allocation128_spill] sm:$0xff]  ;;  %v33878_v18 = vld [vmem:[#allocation33_spill] sm:$0xff]  ;;  %v30337_v63 = vpack.c.bf16 %v29977_v37, %v29972_v43  ;;  %v30344_v23 = vpack.c.bf16 %v29987_v0, %v29982_v39 }
  0xe5   :  { %33860 = vst [vmem:[#allocation154_spill] sm:$0xff] %v30270_v47  ;;  %33875 = vst [vmem:[#allocation157_spill] sm:$0xff] %v30308_v2  ;;  %v30313_v12 = vpack.c.bf16 %v33876_v28, %v29851_v1  ;;  %v33882_v42 = vld [vmem:[#allocation35_spill] sm:$0xff]  ;;  %v33883_v1 = vld [vmem:[#allocation37_spill] sm:$0xff]  ;;  %v30332_v28 = vpack.c.bf16 %v29966_v24, %v29961_v36  ;;  %v30349_v36 = vpack.c.bf16 %v29997_v34, %v29992_v45 }
  0xe6   :  { %24436 = vmatpush1.bf16.msra.mxu0 %v33857_v8  ;;  %33871 = vst [vmem:[#allocation30_spill] sm:$0xff] %v30295_v51  ;;  %33880 = vst [vmem:[#allocation158_spill] sm:$0xff] %v30320_v56  ;;  %v33886_v17 = vld [vmem:[#allocation38_spill] sm:$0xff]  ;;  %v30354_v43 = vpack.c.bf16 %v30007_v60, %v30002_v21  ;;  %v30359_v24 = vpack.c.bf16 %v30020_v48, %v30015_v55  ;;  %v30364_v37 = vpack.c.bf16 %v30035_v3, %v30025_v52  ;;  %v33893_v39 = vld [vmem:[#allocation87_spill] sm:$0xff] }
  0xe7   :  { %24438 = vmatprep.subr.bf16.mxu0 %v33859_v62  ;;  %24200 = vmatpush1.bf16.msra.mxu1 %v30262_v58  ;;  %33877 = vst [vmem:[#allocation128_spill] sm:$0xff] %v30313_v12  ;;  %33881 = vst [vmem:[#allocation159_spill] sm:$0xff] %v30325_v44  ;;  %v33887_v11 = vld [vmem:[#allocation42_spill] sm:$0xff]  ;;  %v33894_v0 = vld [vmem:[#allocation31_spill] sm:$0xff] }
  0xe8   :  { %24202 = vmatprep.subr.bf16.mxu1 %v30266_v7  ;;  %33884 = vst [vmem:[#allocation160_spill] sm:$0xff] %v30332_v28  ;;  %33885 = vst [vmem:[#allocation161_spill] sm:$0xff] %v30337_v63  ;;  %v33895_v45 = vld [vmem:[#allocation90_spill] sm:$0xff]  ;;  %v33896_v34 = vld [vmem:[#allocation92_spill] sm:$0xff] }
  0xe9   :  { %33888 = vst [vmem:[#allocation162_spill] sm:$0xff] %v30344_v23  ;;  %33889 = vst [vmem:[#allocation163_spill] sm:$0xff] %v30349_v36  ;;  %v33897_v21 = vld [vmem:[#allocation94_spill] sm:$0xff]  ;;  %v33898_v60 = vld [vmem:[#allocation103_spill] sm:$0xff] }
  0xea   :  { %24440 = vmatpush1.bf16.msra.mxu0 %v33861_v19  ;;  %33890 = vst [vmem:[#allocation164_spill] sm:$0xff] %v30354_v43  ;;  %33891 = vst [vmem:[#allocation165_spill] sm:$0xff] %v30359_v24  ;;  %v33899_v55 = vld [vmem:[#allocation104_spill] sm:$0xff]  ;;  %v33900_v48 = vld [vmem:[#allocation106_spill] sm:$0xff] }
  0xeb   :  { %24442 = vmatprep.subr.bf16.mxu0 %v33864_v14  ;;  %24204 = vmatpush1.bf16.msra.mxu1 %v30270_v47  ;;  %33892 = vst [vmem:[#allocation166_spill] sm:$0xff] %v30364_v37  ;;  %v33901_v52 = vld [vmem:[#allocation109_spill] sm:$0xff]  ;;  %v33902_v3 = vld [vmem:[#allocation112_spill] sm:$0xff]  ;;  %v33917_v62 = vld [vmem:[#allocation135_spill] sm:$0xff] }
  0xec   :  { %24206 = vmatprep.subr.bf16.mxu1 %v30276_v13  ;;  %v33915_v14 = vld [vmem:[#allocation116_spill] sm:$0xff]  ;;  %v33916_v19 = vld [vmem:[#allocation117_spill] sm:$0xff] }
  0xed   :  { %v33918_v8 = vld [vmem:[#allocation136_spill] sm:$0xff]  ;;  %v33919_v26 = vld [vmem:[#allocation137_spill] sm:$0xff] }
  0xee   :  { %24444 = vmatpush1.bf16.msra.mxu0 %v33866_v4  ;;  %1371 = vmatmul.mubr.f32.vlgmr.msra.gmra.mrb[2].mxu1 %v33869_v61  ;;  %v33914_v4 = vld [vmem:[#allocation102_spill] sm:$0xff]  ;;  %v33923_v33 = vld [vmem:[#allocation141_spill] sm:$0xff] }
  0xef   :  { %24446 = vmatprep.subr.bf16.mxu0 %v33868_v41  ;;  %24208 = vmatpush1.bf16.msra.mxu1 %v30282_v57  ;;  %v33913_v41 = vld [vmem:[#allocation101_spill] sm:$0xff] }
  0xf0   :  { %1505 = vmatprep.mubr.f32.mxu1 %v33562_v5  ;;  %24210 = vmatprep.subr.bf16.mxu1 %v30288_v16 }
  0xf2   :  { %24448 = vmatpush1.bf16.msra.mxu0 %v33873_v31  ;;  %v33912_v31 = vld [vmem:[#allocation100_spill] sm:$0xff] }
  0xf3   :  { %24450 = vmatprep.subr.bf16.mxu0 %v33874_v9  ;;  %24212 = vmatpush1.bf16.msra.mxu1 %v30295_v51  ;;  %v33911_v9 = vld [vmem:[#allocation36_spill] sm:$0xff] }
  0xf4   :  { %24214 = vmatprep.subr.bf16.mxu1 %v30301_v20 }
  0xf6   :  { %24452 = vmatpush1.bf16.msra.mxu0 %v33878_v18  ;;  %v33910_v18 = vld [vmem:[#allocation99_spill] sm:$0xff] }
  0xf7   :  { %24454 = vmatprep.subr.bf16.mxu0 %v33879_v50  ;;  %24216 = vmatpush1.bf16.msra.mxu1 %v30308_v2  ;;  %v33909_v50 = vld [vmem:[#allocation129_spill] sm:$0xff] }
  0xf8   :  { %24218 = vmatprep.subr.bf16.mxu1 %v30313_v12 }
  0xfa   :  { %24456 = vmatpush1.bf16.msra.mxu0 %v33882_v42  ;;  %v33908_v42 = vld [vmem:[#allocation126_spill] sm:$0xff] }
  0xfb   :  { %24458 = vmatprep.subr.bf16.mxu0 %v33883_v1  ;;  %24220 = vmatpush1.bf16.msra.mxu1 %v30320_v56  ;;  %v33907_v1 = vld [vmem:[#allocation125_spill] sm:$0xff] }
  0xfc   :  { %24222 = vmatprep.subr.bf16.mxu1 %v30325_v44 }
  0xfe   :  { %24460 = vmatpush1.bf16.msra.mxu0 %v33886_v17  ;;  %v33906_v17 = vld [vmem:[#allocation124_spill] sm:$0xff] }
  0xff   :  { %24462 = vmatprep.subr.bf16.mxu0 %v33887_v11  ;;  %24224 = vmatpush1.bf16.msra.mxu1 %v30332_v28  ;;  %v33903_v11 = vld [vmem:[#allocation113_spill] sm:$0xff] }
 0x100   :  { %24226 = vmatprep.subr.bf16.mxu1 %v30337_v63 }
 0x103   :  { %24228 = vmatpush1.bf16.msra.mxu1 %v30344_v23 }
 0x104   :  { %24230 = vmatprep.subr.bf16.mxu1 %v30349_v36  ;;  %v2449_v36 = vand.u32 4294901760, %v87_v6 }
 0x107   :  { %24232 = vmatpush1.bf16.msra.mxu1 %v30354_v43 }
 0x108   :  { %24234 = vmatprep.subr.bf16.mxu1 %v30359_v24 }
 0x10b   :  { %24236 = vmatpush1.bf16.msra.mxu1 %v30364_v37  ;;  %v91_v37 = vld [vmem:[#allocation2 + $0x70] sm:$0xff] }
 0x10c   :  { %24238 = vmatprep.subr.bf16.mxu1 %v33893_v39  ;;  %v2453_v23 = vand.u32 4294901760, %v91_v37 }
 0x10e   :  { %1508 = vmatmul.mubr.f32.vlgmr.msra.gmra.mrb[2].mxu1 %v33894_v0  ;;  %v33904_v0 = vld [vmem:[#allocation119_spill] sm:$0xff]  ;;  %v30440_v20 = vsub.f32 %v91_v37, %v2453_v23  ;;  %v30468_v57 = vpack.c.bf16 %v2453_v23, %v2449_v36 }
 0x10f   :  { %24240 = vmatpush1.bf16.msra.mxu1 %v33895_v45  ;;  %1610 = vmatprep.mubr.f32.mxu1 %v33562_v5 }
 0x110   :  { %24242 = vmatprep.subr.bf16.mxu1 %v33896_v34  ;;  %v2567_v16 = vand.u32 4294901760, %v30440_v20  ;;  %33930 = vst [vmem:[#allocation90_spill] sm:$0xff] %v30468_v57 }
 0x112   :  { %v2568_v47 = vsub.f32 %v30440_v20, %v2567_v16 }
 0x113   :  { %24244 = vmatpush1.bf16.msra.mxu1 %v33897_v21 }
 0x114   :  { %24246 = vmatprep.subr.bf16.mxu1 %v33898_v60 }
 0x117   :  { %24248 = vmatpush1.bf16.msra.mxu1 %v33899_v55 }
 0x118   :  { %24250 = vmatprep.subr.bf16.mxu1 %v33900_v48 }
 0x11b   :  { %24252 = vmatpush1.bf16.msra.mxu1 %v33901_v52 }
 0x11c   :  { %24254 = vmatprep.subr.bf16.mxu1 %v33902_v3 }
 0x11f   :  { %24256 = vmatpush1.bf16.msra.mxu1 %v33903_v11 }
 0x120   :  { %24258 = vmatprep.subr.bf16.mxu1 %v33904_v0 }
 0x123   :  { %24260 = vmatpush1.bf16.msra.mxu1 %v33905_v32 }
 0x124   :  { %24262 = vmatprep.subr.bf16.mxu1 %v33906_v17 }
 0x127   :  { %24264 = vmatpush1.bf16.msra.mxu1 %v33907_v1 }
 0x128   :  { %24266 = vmatprep.subr.bf16.mxu1 %v33908_v42 }
 0x12b   :  { %24268 = vmatpush1.bf16.msra.mxu1 %v33909_v50 }
 0x12c   :  { %24270 = vmatprep.subr.bf16.mxu1 %v33910_v18  ;;  %v33920_v18 = vld [vmem:[#allocation138_spill] sm:$0xff] }
 0x12e   :  { %1614 = vmatmul.mubr.f32.vlgmr.msra.gmra.mrb[2].mxu1 %v33911_v9  ;;  %v33921_v9 = vld [vmem:[#allocation139_spill] sm:$0xff] }
 0x12f   :  { %24272 = vmatpush1.bf16.msra.mxu1 %v33912_v31  ;;  %1780 = vmatprep.mubr.f32.mxu1 %v33562_v5  ;;  %v33922_v31 = vld [vmem:[#allocation140_spill] sm:$0xff] }
 0x130   :  { %24274 = vmatprep.subr.bf16.mxu1 %v33913_v41  ;;  %v33924_v41 = vld [vmem:[#allocation142_spill] sm:$0xff] }
 0x133   :  { %24276 = vmatpush1.bf16.msra.mxu1 %v33914_v4  ;;  %v33925_v4 = vld [vmem:[#allocation143_spill] sm:$0xff] }
 0x134   :  { %24278 = vmatprep.subr.bf16.mxu1 %v33915_v14 }
 0x137   :  { %24280 = vmatpush1.bf16.msra.mxu1 %v33916_v19 }
 0x138   :  { %24282 = vmatprep.subr.bf16.mxu1 %v33917_v62 }
 0x13b   :  { %24284 = vmatpush1.bf16.msra.mxu1 %v33918_v8 }
 0x13c   :  { %24286 = vmatprep.subr.bf16.mxu1 %v33919_v26  ;;  %v92_v26 = vld [vmem:[#allocation2 + $0x78] sm:$0xff] }
 0x13d   :  { %v2451_v14 = vand.u32 4294901760, %v92_v26 }
 0x13f   :  { %24288 = vmatpush1.bf16.msra.mxu1 %v33920_v18  ;;  %v88_v18 = vld [vmem:[#allocation2 + $0x58] sm:$0xff] }
 0x140   :  { %24290 = vmatprep.subr.bf16.mxu1 %v33921_v9  ;;  %v83_v9 = vld [vmem:[#allocation2 + $0x30] sm:$0xff]  ;;  %v2447_v19 = vand.u32 4294901760, %v88_v18 }
 0x141   :  { %v2445_v62 = vand.u32 4294901760, %v83_v9 }
 0x142   :  { %v30429_v12 = vsub.f32 %v88_v18, %v2447_v19 }
 0x143   :  { %24292 = vmatpush1.bf16.msra.mxu1 %v33922_v31  ;;  %v79_v31 = vld [vmem:[#allocation2 + $0x10] sm:$0xff]  ;;  %v30424_v28 = vsub.f32 %v83_v9, %v2445_v62  ;;  %v30438_v9 = vsub.f32 %v87_v6, %v2449_v36  ;;  %v30453_v6 = vpack.c.bf16 %v2451_v14, %v2447_v19  ;;  %v2569_v36 = vand.u32 4294901760, %v2568_v47 }
 0x144   :  { %24294 = vmatprep.subr.bf16.mxu1 %v33923_v33  ;;  %v2441_v8 = vand.u32 4294901760, %v79_v31 }
 0x145   :  { %33927 = vst [vmem:[#allocation31_spill] sm:$0xff] %v30453_v6 }
 0x146   :  { %v30422_v63 = vsub.f32 %v79_v31, %v2441_v8  ;;  %v30451_v2 = vpack.c.bf16 %v2445_v62, %v2441_v8 }
 0x147   :  { %24296 = vmatpush1.bf16.msra.mxu1 %v33924_v41 }
 0x148   :  { %24298 = vmatprep.subr.bf16.mxu1 %v33925_v4  ;;  %v80_v4 = vld [vmem:[#allocation2 + $0x18] sm:$0xff]  ;;  %33926 = vst [vmem:[#allocation87_spill] sm:$0xff] %v30451_v2  ;;  %v33928_v37 = vand.u32 4294901760, %v30422_v63 }
 0x149   :  { %v2439_v41 = vand.u32 4294901760, %v80_v4 }
 0x14a   :  { %v2532_v31 = vsub.f32 %v30422_v63, %v33928_v37 }
 0x14b   :  { %24300 = vmatpush1.bf16.msra.mxu1 %v30150_v40  ;;  %v84_v40 = vld [vmem:[#allocation2 + $0x38] sm:$0xff]  ;;  %v30417_v24 = vsub.f32 %v80_v4, %v2439_v41  ;;  %v30431_v4 = vsub.f32 %v92_v26, %v2451_v14 }
 0x14c   :  { %24302 = vmatprep.subr.bf16.mxu1 %v33893_v39  ;;  %v2443_v33 = vand.u32 4294901760, %v84_v40 }
 0x14d   :  { %v33386_v44 = vand.u32 4294901760, %v30417_v24  ;;  %v30501_v47 = vpack.c.bf16 %v30431_v4, %v30429_v12 }
 0x14e   :  { %1782 = vmatmul.mubr.f32.vlgmr.msra.gmra.mrb[2].mxu1 %v33869_v61  ;;  %v30419_v43 = vsub.f32 %v84_v40, %v2443_v33  ;;  %v30433_v40 = vpack.c.bf16 %v2443_v33, %v2439_v41  ;;  %v2549_v33 = vand.u32 4294901760, %v30429_v12  ;;  %v2561_v41 = vand.u32 4294901760, %v30431_v4 }
 0x14f   :  { %24304 = vmatpush1.bf16.msra.mxu1 %v33895_v45  ;;  %1884 = vmatprep.mubr.f32.mxu1 %v33562_v5  ;;  %v2526_v18 = vsub.f32 %v30417_v24, %v33386_v44  ;;  %v33929_v44 = vand.u32 4294901760, %v30424_v28  ;;  %33938 = vst [vmem:[#allocation112_spill] sm:$0xff] %v30501_v47 }
 0x150   :  { %24306 = vmatprep.subr.bf16.mxu1 %v33896_v34  ;;  %v33389_v56 = vand.u32 4294901760, %v30419_v43  ;;  %v2550_v19 = vsub.f32 %v30429_v12, %v2549_v33  ;;  %v2562_v14 = vsub.f32 %v30431_v4, %v2561_v41  ;;  %v33940_v12 = vld [vmem:[#allocation89_spill] sm:$0xff]  ;;  %v33942_v4 = vand.u32 4294901760, %v30419_v43 }
 0x151   :  { %v2544_v51 = vsub.f32 %v30424_v28, %v33929_v44  ;;  %v2527_v8 = vand.u32 4294901760, %v2526_v18  ;;  %v2533_v44 = vand.u32 4294901760, %v2532_v31 }
 0x152   :  { %v2538_v26 = vsub.f32 %v30419_v43, %v33389_v56  ;;  %v2555_v56 = vand.u32 4294901760, %v30438_v9  ;;  %v2563_v7 = vand.u32 4294901760, %v2562_v14  ;;  %v33944_v14 = vand.u32 4294901760, %v30422_v63 }
 0x153   :  { %24308 = vmatpush1.bf16.msra.mxu1 %v33897_v21  ;;  %v2545_v37 = vand.u32 4294901760, %v2544_v51  ;;  %v33934_v51 = vld [vmem:[#allocation107_spill] sm:$0xff] }
 0x154   :  { %24310 = vmatprep.subr.bf16.mxu1 %v33898_v60  ;;  %v2539_v62 = vand.u32 4294901760, %v2538_v26  ;;  %v2556_v13 = vsub.f32 %v30438_v9, %v2555_v56  ;;  %v2551_v26 = vand.u32 4294901760, %v2550_v19 }
 0x156   :  { %v30475_v18 = vpack.c.bf16 %v2539_v62, %v2527_v8  ;;  %v2557_v23 = vand.u32 4294901760, %v2556_v13  ;;  %v30481_v31 = vpack.c.bf16 %v2563_v7, %v2551_v26  ;;  %v30491_v8 = vpack.c.bf16 %v30419_v43, %v30417_v24 }
 0x157   :  { %24312 = vmatpush1.bf16.msra.mxu1 %v33899_v55  ;;  %v30496_v7 = vpack.c.bf16 %v30424_v28, %v30422_v63  ;;  %v30507_v13 = vpack.c.bf16 %v30440_v20, %v30438_v9  ;;  %v33941_v20 = vand.u32 4294901760, %v30417_v24  ;;  %v30531_v26 = vpack.c.bf16 %v2561_v41, %v2549_v33  ;;  %v157_v41 = vld [vmem:[%s33083_s3] sm:$0xf] }
 0x158   :  { %24314 = vmatprep.subr.bf16.mxu1 %v33900_v48  ;;  %33931 = vst [vmem:[#allocation92_spill] sm:$0xff] %v30475_v18  ;;  %33933 = vst [vmem:[#allocation103_spill] sm:$0xff] %v30481_v31  ;;  %v30485_v58 = vpack.c.bf16 %v2569_v36, %v2557_v23  ;;  %v30535_v24 = vpack.c.bf16 %v2567_v16, %v2555_v56  ;;  %v159_v63 = vlaneseq }
 0x159   :  { %33936 = vst [vmem:[#allocation106_spill] sm:$0xff] %v30491_v8  ;;  %33937 = vst [vmem:[#allocation109_spill] sm:$0xff] %v30496_v7  ;;  %v30521_v9 = vpack.c.bf16 %v33942_v4, %v33941_v20 }
 0x15a   :  { %33935 = vst [vmem:[#allocation104_spill] sm:$0xff] %v30485_v58  ;;  %33939 = vst [vmem:[#allocation113_spill] sm:$0xff] %v30507_v13  ;;  %v160_v43 = vshrl.u32 %v159_v63, 7 }
 0x15b   :  { %24316 = vmatpush1.bf16.msra.mxu1 %v33901_v52  ;;  %33943 = vst [vmem:[#allocation119_spill] sm:$0xff] %v30521_v9  ;;  %33947 = vst [vmem:[#allocation124_spill] sm:$0xff] %v30531_v26 }
 0x15c   :  { %24318 = vmatprep.subr.bf16.mxu1 %v33902_v3  ;;  %33948 = vst [vmem:[#allocation125_spill] sm:$0xff] %v30535_v24  ;;  %v165_v33 = vsub.s32 1, %v160_v43  ;;  %v161_v23 = vsub.s32 0, %v160_v43  ;;  %v169_v4 = vsub.s32 2, %v160_v43 }
 0x15e   :  { %v30568_v36 = vrot.slane %v157_v41, %v165_v33  ;;  %v30574_v63 = vrot.slane %v157_v41, %v169_v4 }
 0x15f   :  { %24320 = vmatpush1.bf16.msra.mxu1 %v33903_v11 }
 0x160   :  { %24322 = vmatprep.subr.bf16.mxu1 %v33904_v0  ;;  %33950 = vst [vmem:[#allocation126_spill] sm:$0xff] %v30568_v36 }
 0x163   :  { %24324 = vmatpush1.bf16.msra.mxu1 %v33905_v32 }
 0x164   :  { %24326 = vmatprep.subr.bf16.mxu1 %v33906_v17 }
 0x167   :  { %24328 = vmatpush1.bf16.msra.mxu1 %v33907_v1 }
 0x168   :  { %24330 = vmatprep.subr.bf16.mxu1 %v33908_v42 }
 0x16b   :  { %24332 = vmatpush1.bf16.msra.mxu1 %v33909_v50 }
 0x16c   :  { %24382 = vmatprep.subr.bf16.mxu1 %v30433_v40 }
 0x16e   :  { %1886 = vmatmul.mubr.f32.vlgmr.msra.gmra.mrb[2].mxu1 %v33869_v61  ;;  %v30478_v61 = vpack.c.bf16 %v2545_v37, %v2533_v44  ;;  %v33945_v44 = vand.u32 4294901760, %v30424_v28  ;;  %v33949_v28 = vld [vmem:[#allocation131_spill] sm:$0xff] }
 0x16f   :  { %24384 = vmatpush1.bf16.msra.mxu1 %v30451_v2  ;;  %2511 = vmatprep.mubr.f32.mxu1 %v33562_v5 }
 0x170   :  { %24386 = vmatprep.subr.bf16.mxu1 %v30453_v6  ;;  %33932 = vst [vmem:[#allocation94_spill] sm:$0xff] %v30478_v61  ;;  %v30528_v37 = vpack.c.bf16 %v33945_v44, %v33944_v14  ;;  %v173_v44 = vsub.s32 3, %v160_v43  ;;  %v180_v43 = vld [vmem:[%s33085_s5] sm:$0x3] }
 0x172   :  { %33946 = vst [vmem:[#allocation123_spill] sm:$0xff] %v30528_v37  ;;  %v30576_v33 = vrot.slane %v157_v41, %v173_v44 }
 0x173   :  { %24388 = vmatpush1.bf16.msra.mxu1 %v30468_v57 }
 0x174   :  { %24390 = vmatprep.subr.bf16.mxu1 %v30475_v18 }
 0x175   :  { %v654_v62 = vpop.f32.mrb[0].mxu1 }
 0x176   :  { %2517 = vmatmul.mubr.f32.vlgmr.msra.gmra.mrb[2].mxu1 %v33934_v51  ;;  %v656_v19 = vpop.f32.mrb[1].mxu1  ;;  %v30570_v51 = vrot.slane %v157_v41, %v161_v23 }
 0x177   :  { %24392 = vmatpush1.bf16.msra.mxu1 %v30478_v61  ;;  %2627 = vmatprep.mubr.f32.mxu1 %v33562_v5 }
 0x178   :  { %24394 = vmatprep.subr.bf16.mxu1 %v30481_v31  ;;  %33951 = vst [vmem:[#allocation129_spill] sm:$0xff] %v30570_v51 }
 0x17b   :  { %24396 = vmatpush1.bf16.msra.mxu1 %v30485_v58 }
 0x17c   :  { %24398 = vmatprep.subr.bf16.mxu1 %v30491_v8 }
 0x17e   :  { %2629 = vmatmul.mubr.f32.vlgmr.msra.gmra.mrb[2].mxu1 %v29451_v38 }
 0x17f   :  { %24400 = vmatpush1.bf16.msra.mxu1 %v30496_v7  ;;  %2715 = vmatprep.mubr.f32.mxu1 %v33562_v5 }
 0x180   :  { %24402 = vmatprep.subr.bf16.mxu1 %v30501_v47 }
 0x183   :  { %24404 = vmatpush1.bf16.msra.mxu1 %v30507_v13 }
 0x184   :  { %24406 = vmatprep.subr.bf16.mxu1 %v30433_v40 }
 0x186   :  { %2718 = vmatmul.mubr.f32.vlgmr.msra.gmra.mrb[2].mxu1 %v33940_v12 }
 0x187   :  { %24408 = vmatpush1.bf16.msra.mxu1 %v30451_v2  ;;  %2796 = vmatprep.mubr.f32.mxu1 %v33562_v5 }
 0x188   :  { %24410 = vmatprep.subr.bf16.mxu1 %v30453_v6 }
 0x18b   :  { %24412 = vmatpush1.bf16.msra.mxu1 %v30468_v57 }
 0x18c   :  { %24414 = vmatprep.subr.bf16.mxu1 %v30521_v9 }
 0x18e   :  { %2800 = vmatmul.mubr.f32.vlgmr.msra.gmra.mrb[2].mxu1 %v33818_v35 }
 0x18f   :  { %24416 = vmatpush1.bf16.msra.mxu1 %v30528_v37  ;;  %2894 = vmatprep.mubr.f32.mxu1 %v33562_v5 }
 0x190   :  { %24418 = vmatprep.subr.bf16.mxu1 %v30531_v26 }
 0x193   :  { %24420 = vmatpush1.bf16.msra.mxu1 %v30535_v24 }
 0x194   :  { %24422 = vmatprep.subr.bf16.mxu1 %v30433_v40 }
 0x196   :  { %2896 = vmatmul.mubr.f32.vlgmr.msra.gmra.mrb[2].mxu1 %v29451_v38 }
 0x197   :  { %24424 = vmatpush1.bf16.msra.mxu1 %v30451_v2  ;;  %2974 = vmatprep.mubr.f32.mxu1 %v33562_v5 }
 0x198   :  { %24426 = vmatprep.subr.bf16.mxu1 %v30453_v6 }
 0x19b   :  { %24428 = vmatpush1.bf16.msra.mxu1 %v30468_v57 }
 0x19c   :  { %24622 = vmatprep.subr.bf16.mxu1 %v33893_v39 }
 0x19e   :  { %2976 = vmatmul.mubr.f32.vlgmr.msra.gmra.mrb[2].mxu1 %v29451_v38 }
 0x19f   :  { %24624 = vmatpush1.bf16.msra.mxu1 %v33895_v45  ;;  %3964 = vmatprep.mubr.f32.mxu1 %v33562_v5 }
 0x1a0   :  { %24626 = vmatprep.subr.bf16.mxu1 %v33896_v34 }
 0x1a3   :  { %24628 = vmatpush1.bf16.msra.mxu1 %v33897_v21 }
 0x1a4   :  { %24630 = vmatprep.subr.bf16.mxu1 %v33898_v60 }
 0x1a7   :  { %24632 = vmatpush1.bf16.msra.mxu1 %v33899_v55 }
 0x1a8   :  { %24634 = vmatprep.subr.bf16.mxu1 %v33900_v48 }
 0x1ab   :  { %24636 = vmatpush1.bf16.msra.mxu1 %v33901_v52 }
 0x1ac   :  { %24638 = vmatprep.subr.bf16.mxu1 %v33902_v3 }
 0x1af   :  { %24640 = vmatpush1.bf16.msra.mxu1 %v33903_v11 }
 0x1b0   :  { %24642 = vmatprep.subr.bf16.mxu1 %v33904_v0 }
 0x1b3   :  { %24644 = vmatpush1.bf16.msra.mxu1 %v33905_v32 }
 0x1b4   :  { %v2434_v38 = vpop.f32.mrb[0].mxu0  ;;  %24646 = vmatprep.subr.bf16.mxu1 %v33906_v17 }
 0x1b5   :  { %v27981_v35 = vadd.f32 %v2434_v38, %v654_v62  ;;  %v2436_v16 = vpop.f32.mrb[1].mxu0 }
 0x1b6   :  { %v27982_v56 = vadd.f32 %v2436_v16, %v656_v19 }
 0x1b7   :  { %24648 = vmatpush1.bf16.msra.mxu1 %v33907_v1  ;;  %v2982_v19 = vadd.f32 %v27981_v35, %v30570_v51 }
 0x1b8   :  { %24650 = vmatprep.subr.bf16.mxu1 %v33908_v42  ;;  %v2983_v62 = vadd.f32 %v27982_v56, %v30568_v36 }
 0x1b9   :  { %v23599_v20 = vmul.f32 -1.442695, %v2982_v19 }
 0x1ba   :  { %v23600_v12 = vmul.f32 -1.442695, %v2983_v62 }
 0x1bb   :  { %24652 = vmatpush1.bf16.msra.mxu1 %v33909_v50 }
 0x1bc   :  { %24654 = vmatprep.subr.bf16.mxu1 %v33949_v28  ;;  %28357 = vpow2.f32 %v23600_v12 }
 0x1bd   :  { %28359 = vpow2.f32 %v23599_v20 }
 0x1c6   :  { %v28358_v14 = vpop.eup %28357 }
 0x1c7   :  { %v28360_v38 = vpop.eup %28359  ;;  %v2995_v16 = vadd.f32 1.0, %v28358_v14 }
 0x1c8   :  { %v2989_v28 = vadd.f32 1.0, %v28360_v38 }
 0x1c9   :  { %28361 = vrcp.f32 %v2995_v16 }
 0x1ca   :  { %28363 = vrcp.f32 %v2989_v28 }
 0x1d3   :  { %v28362_v19 = vpop.eup %28361 }
 0x1d4   :  { %v28364_v12 = vpop.eup %28363  ;;  %v3005_v41 = vmul.f32 %v28362_v19, %v180_v43  ;;  %v33953_v43 = vld [vmem:[#allocation44_spill] sm:$0xff] }
 0x271   :  { %v2977_v23 = vpop.f32.mrb[2].mxu1 }
 0x272   :  { %v2984_v56 = vadd.f32 %v2977_v23, %v30574_v63  ;;  %v2979_v36 = vpop.f32.mrb[3].mxu1 }
 0x273   :  { %v2985_v35 = vadd.f32 %v2979_v36, %v30576_v33 }
 0x274   :  { %28365 = vtanh.f32 %v2984_v56 }
 0x275   :  { %v23601_v62 = vmul.f32 -1.442695, %v2985_v35 }
 0x277   :  { %28367 = vpow2.f32 %v23601_v62 }
 0x27e   :  { %v28366_v20 = vpop.eup %28365 }
 0x27f   :  { %v3006_v4 = vmul.f32 %v28366_v20, %v28364_v12  ;;  %v33954_v12 = vld [vmem:[#allocation48_spill] sm:$0xff]  ;;  %v33955_v20 = vld [vmem:[#allocation49_spill] sm:$0xff] }
 0x281   :  { %v28368_v14 = vpop.eup %28367  ;;  %v30583_v44 = vadd.f32 %v3006_v4, %v3005_v41  ;;  %v33956_v41 = vld [vmem:[#allocation51_spill] sm:$0xff]  ;;  %v33957_v4 = vld [vmem:[#allocation53_spill] sm:$0xff] }
 0x282   :  { %v3002_v38 = vadd.f32 1.0, %v28368_v14  ;;  %v33958_v14 = vld [vmem:[#allocation56_spill] sm:$0xff] }
 0x283   :  { %33952 = vst [vmem:[#allocation36_spill] sm:$0xff] %v30583_v44  ;;  %28369 = vtanh.f32 %v30583_v44  ;;  %v34035_v44 = vld [vmem:[#allocation57_spill] sm:$0xff] }
 0x284   :  { %28371 = vrcp.f32 %v3002_v38  ;;  %v33959_v38 = vld [vmem:[#allocation58_spill] sm:$0xff] }
 0x28d   :  { %v28370_v28 = vpop.eup %28369 }
 0x28e   :  { %v28372_v36 = vpop.eup %28371 }
 0x28f   :  { %v3009_v16 = vmul.f32 %v28372_v36, %v28370_v28  ;;  %v33960_v28 = vld [vmem:[#allocation60_spill] sm:$0xff]  ;;  %v33961_v36 = vld [vmem:[#allocation61_spill] sm:$0xff] }
 0x291   :  { %3010 = vst [vmem:[#allocation8] sm:$0x3] %v3009_v16  ;;  %v30586_v23 = vand.u32 4294901760, %v3009_v16 }
 0x293   :  { %v30589_v56 = vsub.f32 %v3009_v16, %v30586_v23  ;;  %v33962_v16 = vld [vmem:[#allocation63_spill] sm:$0xff] }
 0x295   :  { %v30592_v35 = vand.u32 4294901760, %v30589_v56 }
 0x297   :  { %v3113_v62 = vsub.f32 %v30589_v56, %v30592_v35 }
 0x299   :  { %v3114_v19 = vand.u32 4294901760, %v3113_v62  ;;  %v33963_v62 = vld [vmem:[#allocation66_spill] sm:$0xff] }
 0x29b   :  { %3115 = vmatmul.mubr.f32.vlgmr.msra.gmra.mrb[2].mxu0 %v3114_v19  ;;  %3970 = vmatmul.mubr.f32.vlgmr.msra.gmra.mrb[4].mxu1 %v3114_v19  ;;  %v33964_v19 = vld [vmem:[#allocation67_spill] sm:$0xff] }
 0x29c   :  { %24464 = vmatpush1.bf16.msra.mxu0 %v33953_v43  ;;  %24656 = vmatpush1.bf16.msra.mxu1 %v29909_v15  ;;  %v34028_v15 = vld [vmem:[#allocation116_spill] sm:$0xff] }
 0x29d   :  { %24466 = vmatprep.subr.bf16.mxu0 %v33954_v12  ;;  %24658 = vmatprep.subr.bf16.mxu1 %v29911_v25  ;;  %v34024_v25 = vld [vmem:[#allocation101_spill] sm:$0xff]  ;;  %v34025_v12 = vld [vmem:[#allocation46_spill] sm:$0xff]  ;;  %v34034_v43 = vld [vmem:[#allocation136_spill] sm:$0xff] }
 0x29e   :  { %3345 = vmatprep.mubr.f32.mxu0 %v33562_v5  ;;  %4200 = vmatprep.mubr.f32.mxu1 %v33562_v5 }
 0x2a0   :  { %24468 = vmatpush1.bf16.msra.mxu0 %v33955_v20  ;;  %24660 = vmatpush1.bf16.msra.mxu1 %v30158_v49  ;;  %v34022_v49 = vld [vmem:[#allocation100_spill] sm:$0xff]  ;;  %v34023_v20 = vld [vmem:[#allocation45_spill] sm:$0xff] }
 0x2a1   :  { %24470 = vmatprep.subr.bf16.mxu0 %v33956_v41  ;;  %24662 = vmatprep.subr.bf16.mxu1 %v30172_v59  ;;  %v34020_v59 = vld [vmem:[#allocation99_spill] sm:$0xff]  ;;  %v34021_v41 = vld [vmem:[#allocation41_spill] sm:$0xff] }
 0x2a4   :  { %24472 = vmatpush1.bf16.msra.mxu0 %v33957_v4  ;;  %24664 = vmatpush1.bf16.msra.mxu1 %v30185_v27  ;;  %v34018_v27 = vld [vmem:[#allocation38_spill] sm:$0xff]  ;;  %v34019_v4 = vld [vmem:[#allocation40_spill] sm:$0xff] }
 0x2a5   :  { %24474 = vmatprep.subr.bf16.mxu0 %v33958_v14  ;;  %24666 = vmatprep.subr.bf16.mxu1 %v30201_v53  ;;  %v34016_v53 = vld [vmem:[#allocation35_spill] sm:$0xff]  ;;  %v34017_v14 = vld [vmem:[#allocation37_spill] sm:$0xff] }
 0x2a8   :  { %24476 = vmatpush1.bf16.msra.mxu0 %v33959_v38  ;;  %24668 = vmatpush1.bf16.msra.mxu1 %v30212_v29  ;;  %v33965_v29 = vld [vmem:[#allocation68_spill] sm:$0xff]  ;;  %v34015_v38 = vld [vmem:[#allocation34_spill] sm:$0xff] }
 0x2a9   :  { %24478 = vmatprep.subr.bf16.mxu0 %v33960_v28  ;;  %24670 = vmatprep.subr.bf16.mxu1 %v30216_v22  ;;  %v33966_v28 = vld [vmem:[#allocation152_spill] sm:$0xff]  ;;  %v33967_v22 = vld [vmem:[#allocation70_spill] sm:$0xff] }
 0x2ac   :  { %24480 = vmatpush1.bf16.msra.mxu0 %v33961_v36  ;;  %24672 = vmatpush1.bf16.msra.mxu1 %v30225_v54  ;;  %v33968_v36 = vld [vmem:[#allocation153_spill] sm:$0xff]  ;;  %v33969_v54 = vld [vmem:[#allocation72_spill] sm:$0xff] }
 0x2ad   :  { %24482 = vmatprep.subr.bf16.mxu0 %v33962_v16  ;;  %24674 = vmatprep.subr.bf16.mxu1 %v30229_v46  ;;  %v33970_v16 = vld [vmem:[#allocation154_spill] sm:$0xff] }
 0x2ae   :  { %v33971_v46 = vld [vmem:[#allocation74_spill] sm:$0xff] }
 0x2b0   :  { %24484 = vmatpush1.bf16.msra.mxu0 %v33963_v62  ;;  %24676 = vmatpush1.bf16.msra.mxu1 %v30246_v30  ;;  %v33972_v62 = vld [vmem:[#allocation115_spill] sm:$0xff] }
 0x2b1   :  { %24486 = vmatprep.subr.bf16.mxu0 %v33964_v19  ;;  %24678 = vmatprep.subr.bf16.mxu1 %v30257_v10  ;;  %v33973_v10 = vld [vmem:[#allocation75_spill] sm:$0xff]  ;;  %v33986_v19 = vld [vmem:[#allocation158_spill] sm:$0xff] }
 0x2b2   :  { %v33987_v30 = vld [vmem:[#allocation79_spill] sm:$0xff] }
 0x2b4   :  { %24488 = vmatpush1.bf16.msra.mxu0 %v33965_v29  ;;  %24680 = vmatpush1.bf16.msra.mxu1 %v33966_v28  ;;  %v33974_v29 = vld [vmem:[#allocation155_spill] sm:$0xff]  ;;  %v33975_v28 = vld [vmem:[#allocation76_spill] sm:$0xff] }
 0x2b5   :  { %24490 = vmatprep.subr.bf16.mxu0 %v33967_v22  ;;  %24682 = vmatprep.subr.bf16.mxu1 %v33968_v36  ;;  %v33976_v22 = vld [vmem:[#allocation156_spill] sm:$0xff]  ;;  %v33981_v36 = vld [vmem:[#allocation43_spill] sm:$0xff] }
 0x2b8   :  { %24492 = vmatpush1.bf16.msra.mxu0 %v33969_v54  ;;  %24684 = vmatpush1.bf16.msra.mxu1 %v33970_v16  ;;  %v33977_v16 = vld [vmem:[#allocation32_spill] sm:$0xff]  ;;  %v33980_v54 = vld [vmem:[#allocation121_spill] sm:$0xff] }
 0x2b9   :  { %24494 = vmatprep.subr.bf16.mxu0 %v33971_v46  ;;  %24686 = vmatprep.subr.bf16.mxu1 %v33972_v62  ;;  %v33978_v46 = vld [vmem:[#allocation30_spill] sm:$0xff]  ;;  %v33979_v62 = vld [vmem:[#allocation39_spill] sm:$0xff] }
 0x2bb   :  { %3347 = vmatmul.mubr.f32.vlgmr.msra.gmra.mrb[2].mxu0 %v30586_v23  ;;  %4202 = vmatmul.mubr.f32.vlgmr.msra.gmra.mrb[4].mxu1 %v30586_v23 }
 0x2bc   :  { %24496 = vmatpush1.bf16.msra.mxu0 %v33973_v10  ;;  %24688 = vmatpush1.bf16.msra.mxu1 %v33974_v29  ;;  %v33982_v10 = vld [vmem:[#allocation157_spill] sm:$0xff] }
 0x2bd   :  { %24498 = vmatprep.subr.bf16.mxu0 %v33975_v28  ;;  %24690 = vmatprep.subr.bf16.mxu1 %v33976_v22  ;;  %v33983_v29 = vld [vmem:[#allocation77_spill] sm:$0xff]  ;;  %v33984_v28 = vld [vmem:[#allocation128_spill] sm:$0xff]  ;;  %v33985_v22 = vld [vmem:[#allocation78_spill] sm:$0xff] }
 0x2be   :  { %3481 = vmatprep.mubr.f32.mxu0 %v33562_v5  ;;  %4336 = vmatprep.mubr.f32.mxu1 %v33562_v5 }
 0x2c0   :  { %24500 = vmatpush1.bf16.msra.mxu0 %v33977_v16  ;;  %24692 = vmatpush1.bf16.msra.mxu1 %v33978_v46  ;;  %v33988_v16 = vld [vmem:[#allocation159_spill] sm:$0xff]  ;;  %v33989_v46 = vld [vmem:[#allocation80_spill] sm:$0xff] }
 0x2c1   :  { %24502 = vmatprep.subr.bf16.mxu0 %v33979_v62  ;;  %24694 = vmatprep.subr.bf16.mxu1 %v33980_v54  ;;  %v33990_v62 = vld [vmem:[#allocation160_spill] sm:$0xff]  ;;  %v33991_v54 = vld [vmem:[#allocation81_spill] sm:$0xff] }
 0x2c4   :  { %24504 = vmatpush1.bf16.msra.mxu0 %v33981_v36  ;;  %24696 = vmatpush1.bf16.msra.mxu1 %v33982_v10  ;;  %v33992_v36 = vld [vmem:[#allocation161_spill] sm:$0xff]  ;;  %v33993_v10 = vld [vmem:[#allocation82_spill] sm:$0xff] }
 0x2c5   :  { %24506 = vmatprep.subr.bf16.mxu0 %v33983_v29  ;;  %24698 = vmatprep.subr.bf16.mxu1 %v33984_v28  ;;  %v33994_v29 = vld [vmem:[#allocation162_spill] sm:$0xff]  ;;  %v33995_v28 = vld [vmem:[#allocation83_spill] sm:$0xff] }
 0x2c8   :  { %24508 = vmatpush1.bf16.msra.mxu0 %v33985_v22  ;;  %24700 = vmatpush1.bf16.msra.mxu1 %v33986_v19  ;;  %v33996_v22 = vld [vmem:[#allocation163_spill] sm:$0xff]  ;;  %v33997_v19 = vld [vmem:[#allocation84_spill] sm:$0xff] }
 0x2c9   :  { %24510 = vmatprep.subr.bf16.mxu0 %v33987_v30  ;;  %24702 = vmatprep.subr.bf16.mxu1 %v33988_v16  ;;  %v33998_v30 = vld [vmem:[#allocation164_spill] sm:$0xff]  ;;  %v33999_v16 = vld [vmem:[#allocation85_spill] sm:$0xff] }
 0x2cc   :  { %24512 = vmatpush1.bf16.msra.mxu0 %v33989_v46  ;;  %24704 = vmatpush1.bf16.msra.mxu1 %v33990_v62  ;;  %v34000_v46 = vld [vmem:[#allocation165_spill] sm:$0xff]  ;;  %v34001_v62 = vld [vmem:[#allocation86_spill] sm:$0xff] }
 0x2cd   :  { %24514 = vmatprep.subr.bf16.mxu0 %v33991_v54  ;;  %24706 = vmatprep.subr.bf16.mxu1 %v33992_v36  ;;  %v34002_v54 = vld [vmem:[#allocation166_spill] sm:$0xff]  ;;  %v34003_v36 = vld [vmem:[#allocation19_spill] sm:$0xff] }
 0x2d0   :  { %24516 = vmatpush1.bf16.msra.mxu0 %v33993_v10  ;;  %24708 = vmatpush1.bf16.msra.mxu1 %v33994_v29  ;;  %v34013_v29 = vld [vmem:[#allocation29_spill] sm:$0xff] }
 0x2d1   :  { %24518 = vmatprep.subr.bf16.mxu0 %v33995_v28  ;;  %24710 = vmatprep.subr.bf16.mxu1 %v33996_v22  ;;  %v34004_v22 = vld [vmem:[#allocation20_spill] sm:$0xff]  ;;  %v34014_v10 = vld [vmem:[#allocation33_spill] sm:$0xff] }
 0x2d2   :  { %v34012_v28 = vld [vmem:[#allocation28_spill] sm:$0xff] }
 0x2d4   :  { %24520 = vmatpush1.bf16.msra.mxu0 %v33997_v19  ;;  %24712 = vmatpush1.bf16.msra.mxu1 %v33998_v30  ;;  %v34005_v30 = vld [vmem:[#allocation21_spill] sm:$0xff]  ;;  %v34011_v19 = vld [vmem:[#allocation27_spill] sm:$0xff] }
 0x2d5   :  { %24522 = vmatprep.subr.bf16.mxu0 %v33999_v16  ;;  %24714 = vmatprep.subr.bf16.mxu1 %v34000_v46  ;;  %v34009_v46 = vld [vmem:[#allocation25_spill] sm:$0xff]  ;;  %v34010_v16 = vld [vmem:[#allocation26_spill] sm:$0xff] }
 0x2d8   :  { %24524 = vmatpush1.bf16.msra.mxu0 %v34001_v62  ;;  %24716 = vmatpush1.bf16.msra.mxu1 %v34002_v54  ;;  %v34006_v54 = vld [vmem:[#allocation22_spill] sm:$0xff]  ;;  %v34007_v62 = vld [vmem:[#allocation23_spill] sm:$0xff] }
 0x2d9   :  { %24526 = vmatprep.subr.bf16.mxu0 %v34003_v36  ;;  %24718 = vmatprep.subr.bf16.mxu1 %v33893_v39 }
 0x2db   :  { %3484 = vmatmul.mubr.f32.vlgmr.msra.gmra.mrb[2].mxu0 %v30589_v56  ;;  %4339 = vmatmul.mubr.f32.vlgmr.msra.gmra.mrb[4].mxu1 %v30589_v56  ;;  %v34008_v56 = vld [vmem:[#allocation24_spill] sm:$0xff] }
 0x2dc   :  { %24528 = vmatpush1.bf16.msra.mxu0 %v34004_v22  ;;  %24720 = vmatpush1.bf16.msra.mxu1 %v33895_v45 }
 0x2dd   :  { %24530 = vmatprep.subr.bf16.mxu0 %v34005_v30  ;;  %24722 = vmatprep.subr.bf16.mxu1 %v33896_v34 }
 0x2de   :  { %3586 = vmatprep.mubr.f32.mxu0 %v33562_v5  ;;  %4441 = vmatprep.mubr.f32.mxu1 %v33562_v5 }
 0x2e0   :  { %24532 = vmatpush1.bf16.msra.mxu0 %v34006_v54  ;;  %24724 = vmatpush1.bf16.msra.mxu1 %v33897_v21 }
 0x2e1   :  { %24534 = vmatprep.subr.bf16.mxu0 %v34007_v62  ;;  %24726 = vmatprep.subr.bf16.mxu1 %v33898_v60 }
 0x2e4   :  { %24536 = vmatpush1.bf16.msra.mxu0 %v34008_v56  ;;  %24728 = vmatpush1.bf16.msra.mxu1 %v33899_v55 }
 0x2e5   :  { %24538 = vmatprep.subr.bf16.mxu0 %v34009_v46  ;;  %24730 = vmatprep.subr.bf16.mxu1 %v33900_v48 }
 0x2e8   :  { %24540 = vmatpush1.bf16.msra.mxu0 %v34010_v16  ;;  %24732 = vmatpush1.bf16.msra.mxu1 %v33901_v52 }
 0x2e9   :  { %24542 = vmatprep.subr.bf16.mxu0 %v34011_v19  ;;  %24734 = vmatprep.subr.bf16.mxu1 %v33902_v3 }
 0x2ec   :  { %24544 = vmatpush1.bf16.msra.mxu0 %v34012_v28  ;;  %24736 = vmatpush1.bf16.msra.mxu1 %v33903_v11 }
 0x2ed   :  { %24546 = vmatprep.subr.bf16.mxu0 %v34013_v29  ;;  %24738 = vmatprep.subr.bf16.mxu1 %v33904_v0 }
 0x2f0   :  { %24548 = vmatpush1.bf16.msra.mxu0 %v34014_v10  ;;  %24740 = vmatpush1.bf16.msra.mxu1 %v33905_v32 }
 0x2f1   :  { %24550 = vmatprep.subr.bf16.mxu0 %v34015_v38  ;;  %24742 = vmatprep.subr.bf16.mxu1 %v33906_v17 }
 0x2f4   :  { %24552 = vmatpush1.bf16.msra.mxu0 %v34016_v53  ;;  %24744 = vmatpush1.bf16.msra.mxu1 %v33907_v1 }
 0x2f5   :  { %24554 = vmatprep.subr.bf16.mxu0 %v34017_v14  ;;  %24746 = vmatprep.subr.bf16.mxu1 %v33908_v42 }
 0x2f8   :  { %24556 = vmatpush1.bf16.msra.mxu0 %v34018_v27  ;;  %24748 = vmatpush1.bf16.msra.mxu1 %v33909_v50 }
 0x2f9   :  { %24558 = vmatprep.subr.bf16.mxu0 %v34019_v4  ;;  %24750 = vmatprep.subr.bf16.mxu1 %v34020_v59  ;;  %v34026_v4 = vld [vmem:[#allocation102_spill] sm:$0xff] }
 0x2fa   :  { %v34027_v59 = vld [vmem:[#allocation50_spill] sm:$0xff] }
 0x2fb   :  { %3590 = vmatmul.mubr.f32.vlgmr.msra.gmra.mrb[2].mxu0 %v30592_v35  ;;  %4445 = vmatmul.mubr.f32.vlgmr.msra.gmra.mrb[4].mxu1 %v30592_v35  ;;  %v34029_v35 = vld [vmem:[#allocation52_spill] sm:$0xff] }
 0x2fc   :  { %24560 = vmatpush1.bf16.msra.mxu0 %v34021_v41  ;;  %24752 = vmatpush1.bf16.msra.mxu1 %v34022_v49  ;;  %v34030_v41 = vld [vmem:[#allocation117_spill] sm:$0xff]  ;;  %v34031_v49 = vld [vmem:[#allocation54_spill] sm:$0xff] }
 0x2fd   :  { %24562 = vmatprep.subr.bf16.mxu0 %v34023_v20  ;;  %24754 = vmatprep.subr.bf16.mxu1 %v34024_v25  ;;  %v34032_v20 = vld [vmem:[#allocation135_spill] sm:$0xff] }
 0x2fe   :  { %3756 = vmatprep.mubr.f32.mxu0 %v33562_v5  ;;  %4611 = vmatprep.mubr.f32.mxu1 %v33562_v5  ;;  %v34033_v25 = vld [vmem:[#allocation55_spill] sm:$0xff] }
 0x300   :  { %24564 = vmatpush1.bf16.msra.mxu0 %v34025_v12  ;;  %24756 = vmatpush1.bf16.msra.mxu1 %v34026_v4  ;;  %v34036_v12 = vld [vmem:[#allocation137_spill] sm:$0xff]  ;;  %v34037_v4 = vld [vmem:[#allocation59_spill] sm:$0xff] }
 0x301   :  { %24566 = vmatprep.subr.bf16.mxu0 %v34027_v59  ;;  %24758 = vmatprep.subr.bf16.mxu1 %v34028_v15  ;;  %v34038_v59 = vld [vmem:[#allocation138_spill] sm:$0xff] }
 0x302   :  { %v34039_v15 = vld [vmem:[#allocation62_spill] sm:$0xff] }
 0x304   :  { %24568 = vmatpush1.bf16.msra.mxu0 %v34029_v35  ;;  %24760 = vmatpush1.bf16.msra.mxu1 %v34030_v41  ;;  %v34040_v35 = vld [vmem:[#allocation139_spill] sm:$0xff]  ;;  %v34041_v41 = vld [vmem:[#allocation64_spill] sm:$0xff] }
 0x305   :  { %24570 = vmatprep.subr.bf16.mxu0 %v34031_v49  ;;  %24762 = vmatprep.subr.bf16.mxu1 %v34032_v20  ;;  %v34042_v49 = vld [vmem:[#allocation140_spill] sm:$0xff]  ;;  %v34043_v20 = vld [vmem:[#allocation65_spill] sm:$0xff] }
 0x308   :  { %24572 = vmatpush1.bf16.msra.mxu0 %v34033_v25  ;;  %24764 = vmatpush1.bf16.msra.mxu1 %v34034_v43  ;;  %v34044_v25 = vld [vmem:[#allocation141_spill] sm:$0xff] }
 0x309   :  { %24574 = vmatprep.subr.bf16.mxu0 %v34035_v44  ;;  %24766 = vmatprep.subr.bf16.mxu1 %v34036_v12  ;;  %v34045_v43 = vld [vmem:[#allocation69_spill] sm:$0xff]  ;;  %v34046_v44 = vld [vmem:[#allocation142_spill] sm:$0xff]  ;;  %v34047_v12 = vld [vmem:[#allocation71_spill] sm:$0xff] }
 0x30c   :  { %24576 = vmatpush1.bf16.msra.mxu0 %v34037_v4  ;;  %24768 = vmatpush1.bf16.msra.mxu1 %v34038_v59  ;;  %v34048_v4 = vld [vmem:[#allocation143_spill] sm:$0xff]  ;;  %v34049_v59 = vld [vmem:[#allocation73_spill] sm:$0xff] }
 0x30d   :  { %24578 = vmatprep.subr.bf16.mxu0 %v34039_v15  ;;  %24770 = vmatprep.subr.bf16.mxu1 %v34040_v35  ;;  %v34050_v15 = vld [vmem:[#allocation144_spill] sm:$0xff]  ;;  %v34057_v35 = vld [vmem:[#allocation111_spill] sm:$0xff] }
 0x310   :  { %24580 = vmatpush1.bf16.msra.mxu0 %v34041_v41  ;;  %24772 = vmatpush1.bf16.msra.mxu1 %v34042_v49  ;;  %v34054_v49 = vld [vmem:[#allocation97_spill] sm:$0xff] }
 0x311   :  { %24582 = vmatprep.subr.bf16.mxu0 %v34043_v20  ;;  %24774 = vmatprep.subr.bf16.mxu1 %v34044_v25  ;;  %v34053_v25 = vld [vmem:[#allocation93_spill] sm:$0xff] }
 0x312   :  { %v34055_v41 = vld [vmem:[#allocation105_spill] sm:$0xff] }
 0x314   :  { %24584 = vmatpush1.bf16.msra.mxu0 %v34045_v43  ;;  %24776 = vmatpush1.bf16.msra.mxu1 %v34046_v44  ;;  %v34051_v44 = vld [vmem:[#allocation88_spill] sm:$0xff]  ;;  %v34052_v43 = vld [vmem:[#allocation91_spill] sm:$0xff] }
 0x315   :  { %24586 = vmatprep.subr.bf16.mxu0 %v34047_v12  ;;  %24778 = vmatprep.subr.bf16.mxu1 %v34048_v4 }
 0x318   :  { %24588 = vmatpush1.bf16.msra.mxu0 %v34049_v59  ;;  %24780 = vmatpush1.bf16.msra.mxu1 %v34050_v15  ;;  %v23602_v15 = vld [vmem:[%s33080_s0 + $0x2] sm:$0x3] }
 0x319   :  { %24590 = vmatprep.subr.bf16.mxu0 %v34003_v36  ;;  %24782 = vmatprep.subr.bf16.mxu1 %v33893_v39  ;;  %v4724_v59 = vsel %vm1892_vm0, %v23602_v15, 0 }
 0x31a   :  { %v30766_v4 = vand.u32 4294901760, %v4724_v59 }
 0x31b   :  { %3758 = vmatmul.mubr.f32.vlgmr.msra.gmra.mrb[2].mxu0 %v30586_v23  ;;  %4613 = vmatmul.mubr.f32.vlgmr.msra.gmra.mrb[4].mxu1 %v30586_v23 }
 0x31c   :  { %24592 = vmatpush1.bf16.msra.mxu0 %v34004_v22  ;;  %24784 = vmatpush1.bf16.msra.mxu1 %v33895_v45  ;;  %v4800_v12 = vsub.f32 %v4724_v59, %v30766_v4 }
 0x31d   :  { %24594 = vmatprep.subr.bf16.mxu0 %v34005_v30  ;;  %24786 = vmatprep.subr.bf16.mxu1 %v33896_v34 }
 0x31e   :  { %3860 = vmatprep.mubr.f32.mxu0 %v33562_v5  ;;  %4715 = vmatprep.mubr.f32.mxu1 %v33562_v5  ;;  %v4801_v15 = vand.u32 4294901760, %v4800_v12 }
 0x320   :  { %24596 = vmatpush1.bf16.msra.mxu0 %v34006_v54  ;;  %24788 = vmatpush1.bf16.msra.mxu1 %v33897_v21  ;;  %v4802_v59 = vsub.f32 %v4800_v12, %v4801_v15 }
 0x321   :  { %24598 = vmatprep.subr.bf16.mxu0 %v34007_v62  ;;  %24790 = vmatprep.subr.bf16.mxu1 %v33898_v60 }
 0x322   :  { %v4803_v20 = vand.u32 4294901760, %v4802_v59  ;;  %v34058_v59 = vld [vmem:[#allocation122_spill] sm:$0xff] }
 0x324   :  { %24600 = vmatpush1.bf16.msra.mxu0 %v34008_v56  ;;  %24792 = vmatpush1.bf16.msra.mxu1 %v33899_v55 }
 0x325   :  { %24602 = vmatprep.subr.bf16.mxu0 %v34009_v46  ;;  %24794 = vmatprep.subr.bf16.mxu1 %v33900_v48 }
 0x328   :  { %24604 = vmatpush1.bf16.msra.mxu0 %v34010_v16  ;;  %24796 = vmatpush1.bf16.msra.mxu1 %v33901_v52 }
 0x329   :  { %24606 = vmatprep.subr.bf16.mxu0 %v34011_v19  ;;  %24798 = vmatprep.subr.bf16.mxu1 %v33902_v3 }
 0x32c   :  { %24608 = vmatpush1.bf16.msra.mxu0 %v34012_v28  ;;  %24800 = vmatpush1.bf16.msra.mxu1 %v33903_v11 }
 0x32d   :  { %24610 = vmatprep.subr.bf16.mxu0 %v34013_v29  ;;  %24802 = vmatprep.subr.bf16.mxu1 %v33904_v0 }
 0x330   :  { %24612 = vmatpush1.bf16.msra.mxu0 %v34014_v10  ;;  %24804 = vmatpush1.bf16.msra.mxu1 %v33905_v32 }
 0x331   :  { %24614 = vmatprep.subr.bf16.mxu0 %v34015_v38  ;;  %24806 = vmatprep.subr.bf16.mxu1 %v33906_v17 }
 0x334   :  { %24616 = vmatpush1.bf16.msra.mxu0 %v34016_v53  ;;  %24808 = vmatpush1.bf16.msra.mxu1 %v33907_v1 }
 0x335   :  { %24618 = vmatprep.subr.bf16.mxu0 %v34017_v14  ;;  %24810 = vmatprep.subr.bf16.mxu1 %v33908_v42 }
 0x338   :  { %24620 = vmatpush1.bf16.msra.mxu0 %v34018_v27  ;;  %24812 = vmatpush1.bf16.msra.mxu1 %v33909_v50 }
 0x339   :  { %24814 = vmatprep.subr.bf16.mxu0 %v34051_v44  ;;  %24862 = vmatprep.subr.bf16.mxu1 %v30433_v40 }
 0x33b   :  { %3862 = vmatmul.mubr.f32.vlgmr.msra.gmra.mrb[2].mxu0 %v30586_v23  ;;  %4717 = vmatmul.mubr.f32.vlgmr.msra.gmra.mrb[4].mxu1 %v30586_v23  ;;  %v34056_v23 = vld [vmem:[#allocation108_spill] sm:$0xff] }
 0x33c   :  { %24816 = vmatpush1.bf16.msra.mxu0 %v34052_v43  ;;  %24864 = vmatpush1.bf16.msra.mxu1 %v30451_v2 }
 0x33d   :  { %24818 = vmatprep.subr.bf16.mxu0 %v34053_v25  ;;  %24866 = vmatprep.subr.bf16.mxu1 %v30453_v6 }
 0x33e   :  { %4798 = vmatprep.mubr.f32.mxu0 %v33562_v5  ;;  %5341 = vmatprep.mubr.f32.mxu1 %v33562_v5 }
 0x340   :  { %24820 = vmatpush1.bf16.msra.mxu0 %v34054_v49  ;;  %24868 = vmatpush1.bf16.msra.mxu1 %v30468_v57 }
 0x341   :  { %24822 = vmatprep.subr.bf16.mxu0 %v34055_v41  ;;  %24870 = vmatprep.subr.bf16.mxu1 %v30475_v18  ;;  %v34059_v41 = vld [vmem:[#allocation110_spill] sm:$0xff] }
 0x343   :  { %4804 = vmatmul.mubr.f32.vlgmr.msra.gmra.mrb[2].mxu0 %v4803_v20  ;;  %5347 = vmatmul.mubr.f32.vlgmr.msra.gmra.mrb[4].mxu1 %v4803_v20  ;;  %v34060_v20 = vld [vmem:[#allocation114_spill] sm:$0xff] }
 0x344   :  { %24824 = vmatpush1.bf16.msra.mxu0 %v34056_v23  ;;  %24872 = vmatpush1.bf16.msra.mxu1 %v30478_v61 }
 0x345   :  { %24826 = vmatprep.subr.bf16.mxu0 %v34057_v35  ;;  %24874 = vmatprep.subr.bf16.mxu1 %v30481_v31  ;;  %v34061_v31 = vld [vmem:[#allocation118_spill] sm:$0xff] }
 0x346   :  { %4914 = vmatprep.mubr.f32.mxu0 %v33562_v5  ;;  %5457 = vmatprep.mubr.f32.mxu1 %v33562_v5 }
 0x348   :  { %24828 = vmatpush1.bf16.msra.mxu0 %v34058_v59  ;;  %24876 = vmatpush1.bf16.msra.mxu1 %v30485_v58  ;;  %v34062_v58 = vld [vmem:[#allocation120_spill] sm:$0xff] }
 0x349   :  { %24830 = vmatprep.subr.bf16.mxu0 %v34059_v41  ;;  %24878 = vmatprep.subr.bf16.mxu1 %v30491_v8 }
 0x34b   :  { %4916 = vmatmul.mubr.f32.vlgmr.msra.gmra.mrb[2].mxu0 %v30766_v4  ;;  %5459 = vmatmul.mubr.f32.vlgmr.msra.gmra.mrb[4].mxu1 %v30766_v4 }
 0x34c   :  { %24832 = vmatpush1.bf16.msra.mxu0 %v34060_v20  ;;  %24880 = vmatpush1.bf16.msra.mxu1 %v30496_v7 }
 0x34d   :  { %24834 = vmatprep.subr.bf16.mxu0 %v34061_v31  ;;  %24882 = vmatprep.subr.bf16.mxu1 %v30501_v47  ;;  %v34066_v47 = vld [vmem:[#allocation47_spill] sm:$0xff] }
 0x34e   :  { %5002 = vmatprep.mubr.f32.mxu0 %v33562_v5  ;;  %5545 = vmatprep.mubr.f32.mxu1 %v33562_v5 }
 0x350   :  { %24836 = vmatpush1.bf16.msra.mxu0 %v34062_v58  ;;  %24884 = vmatpush1.bf16.msra.mxu1 %v30507_v13  ;;  %v34063_v13 = vld [vmem:[#allocation127_spill] sm:$0xff]  ;;  %v34065_v58 = vld [vmem:[#allocation132_spill] sm:$0xff] }
 0x351   :  { %24838 = vmatprep.subr.bf16.mxu0 %v34051_v44  ;;  %24886 = vmatprep.subr.bf16.mxu1 %v30433_v40 }
 0x353   :  { %5005 = vmatmul.mubr.f32.vlgmr.msra.gmra.mrb[2].mxu0 %v4800_v12  ;;  %5548 = vmatmul.mubr.f32.vlgmr.msra.gmra.mrb[4].mxu1 %v4800_v12  ;;  %v34064_v12 = vld [vmem:[#allocation130_spill] sm:$0xff] }
 0x354   :  { %24840 = vmatpush1.bf16.msra.mxu0 %v34052_v43  ;;  %24888 = vmatpush1.bf16.msra.mxu1 %v30451_v2 }
 0x355   :  { %24842 = vmatprep.subr.bf16.mxu0 %v34053_v25  ;;  %24890 = vmatprep.subr.bf16.mxu1 %v30453_v6 }
 0x356   :  { %5083 = vmatprep.mubr.f32.mxu0 %v33562_v5  ;;  %5626 = vmatprep.mubr.f32.mxu1 %v33562_v5 }
 0x358   :  { %24844 = vmatpush1.bf16.msra.mxu0 %v34054_v49  ;;  %24892 = vmatpush1.bf16.msra.mxu1 %v30468_v57 }
 0x359   :  { %24846 = vmatprep.subr.bf16.mxu0 %v34063_v13  ;;  %24894 = vmatprep.subr.bf16.mxu1 %v30521_v9 }
 0x35b   :  { %5087 = vmatmul.mubr.f32.vlgmr.msra.gmra.mrb[2].mxu0 %v4801_v15  ;;  %5630 = vmatmul.mubr.f32.vlgmr.msra.gmra.mrb[4].mxu1 %v4801_v15  ;;  %v34068_v15 = vld [vmem:[#allocation131_spill] sm:$0xff] }
 0x35c   :  { %24848 = vmatpush1.bf16.msra.mxu0 %v34064_v12  ;;  %24896 = vmatpush1.bf16.msra.mxu1 %v30528_v37  ;;  %v34069_v12 = vld [vmem:[#allocation126_spill] sm:$0xff] }
 0x35d   :  { %24850 = vmatprep.subr.bf16.mxu0 %v34065_v58  ;;  %24898 = vmatprep.subr.bf16.mxu1 %v30531_v26 }
 0x35e   :  { %5181 = vmatprep.mubr.f32.mxu0 %v33562_v5  ;;  %5724 = vmatprep.mubr.f32.mxu1 %v33562_v5 }
 0x360   :  { %24852 = vmatpush1.bf16.msra.mxu0 %v34066_v47  ;;  %24900 = vmatpush1.bf16.msra.mxu1 %v30535_v24 }
 0x361   :  { %24854 = vmatprep.subr.bf16.mxu0 %v34051_v44  ;;  %24902 = vmatprep.subr.bf16.mxu1 %v30433_v40 }
 0x363   :  { %5183 = vmatmul.mubr.f32.vlgmr.msra.gmra.mrb[2].mxu0 %v30766_v4  ;;  %5726 = vmatmul.mubr.f32.vlgmr.msra.gmra.mrb[4].mxu1 %v30766_v4 }
 0x364   :  { %24856 = vmatpush1.bf16.msra.mxu0 %v34052_v43  ;;  %24904 = vmatpush1.bf16.msra.mxu1 %v30451_v2 }
 0x365   :  { %24858 = vmatprep.subr.bf16.mxu0 %v34053_v25  ;;  %24906 = vmatprep.subr.bf16.mxu1 %v30453_v6 }
 0x366   :  { %5261 = vmatprep.mubr.f32.mxu0 %v33562_v5  ;;  %5804 = vmatprep.mubr.f32.mxu1 %v33562_v5 }
 0x368   :  { %24860 = vmatpush1.bf16.msra.mxu0 %v34054_v49  ;;  %24908 = vmatpush1.bf16.msra.mxu1 %v30468_v57 }
 0x369   :  { %24910 = vmatprep.subr.bf16.mxu0 %v34003_v36  ;;  %25102 = vmatprep.subr.bf16.mxu1 %v33893_v39 }
 0x36b   :  { %5263 = vmatmul.mubr.f32.vlgmr.msra.gmra.mrb[2].mxu0 %v30766_v4  ;;  %5806 = vmatmul.mubr.f32.vlgmr.msra.gmra.mrb[4].mxu1 %v30766_v4  ;;  %v34067_v4 = vld [vmem:[#allocation42_spill] sm:$0xff] }
 0x36c   :  { %24912 = vmatpush1.bf16.msra.mxu0 %v34004_v22  ;;  %25104 = vmatpush1.bf16.msra.mxu1 %v33895_v45 }
 0x36d   :  { %24914 = vmatprep.subr.bf16.mxu0 %v34005_v30  ;;  %25106 = vmatprep.subr.bf16.mxu1 %v33896_v34 }
 0x36e   :  { %5939 = vmatprep.mubr.f32.mxu0 %v33562_v5  ;;  %6794 = vmatprep.mubr.f32.mxu1 %v33562_v5 }
 0x370   :  { %24916 = vmatpush1.bf16.msra.mxu0 %v34006_v54  ;;  %25108 = vmatpush1.bf16.msra.mxu1 %v33897_v21 }
 0x371   :  { %24918 = vmatprep.subr.bf16.mxu0 %v34007_v62  ;;  %25110 = vmatprep.subr.bf16.mxu1 %v33898_v60 }
 0x374   :  { %24920 = vmatpush1.bf16.msra.mxu0 %v34008_v56  ;;  %25112 = vmatpush1.bf16.msra.mxu1 %v33899_v55 }
 0x375   :  { %24922 = vmatprep.subr.bf16.mxu0 %v34009_v46  ;;  %25114 = vmatprep.subr.bf16.mxu1 %v33900_v48 }
 0x378   :  { %24924 = vmatpush1.bf16.msra.mxu0 %v34010_v16  ;;  %25116 = vmatpush1.bf16.msra.mxu1 %v33901_v52 }
 0x379   :  { %24926 = vmatprep.subr.bf16.mxu0 %v34011_v19  ;;  %25118 = vmatprep.subr.bf16.mxu1 %v33902_v3 }
 0x37c   :  { %24928 = vmatpush1.bf16.msra.mxu0 %v34012_v28  ;;  %25120 = vmatpush1.bf16.msra.mxu1 %v33903_v11 }
 0x37d   :  { %24930 = vmatprep.subr.bf16.mxu0 %v34013_v29  ;;  %25122 = vmatprep.subr.bf16.mxu1 %v33904_v0 }
 0x380   :  { %24932 = vmatpush1.bf16.msra.mxu0 %v34014_v10  ;;  %25124 = vmatpush1.bf16.msra.mxu1 %v33905_v32 }
 0x381   :  { %24934 = vmatprep.subr.bf16.mxu0 %v34015_v38  ;;  %25126 = vmatprep.subr.bf16.mxu1 %v33906_v17 }
 0x384   :  { %24936 = vmatpush1.bf16.msra.mxu0 %v34016_v53  ;;  %25128 = vmatpush1.bf16.msra.mxu1 %v33907_v1 }
 0x385   :  { %24938 = vmatprep.subr.bf16.mxu0 %v34017_v14  ;;  %25130 = vmatprep.subr.bf16.mxu1 %v33908_v42 }
 0x388   :  { %24940 = vmatpush1.bf16.msra.mxu0 %v34018_v27  ;;  %25132 = vmatpush1.bf16.msra.mxu1 %v33909_v50 }
 0x389   :  { %24942 = vmatprep.subr.bf16.mxu0 %v34067_v4  ;;  %25134 = vmatprep.subr.bf16.mxu1 %v34068_v15 }
 0x43e   :  { %v5264_v24 = vpop.f32.mrb[2].mxu0  ;;  %v5807_v47 = vpop.f32.mrb[4].mxu1 }
 0x43f   :  { %v5812_v26 = vadd.f32 %v5264_v24, %v30570_v51  ;;  %v5266_v58 = vpop.f32.mrb[3].mxu0  ;;  %v5809_v37 = vpop.f32.mrb[5].mxu1  ;;  %v5814_v8 = vadd.f32 %v5807_v47, %v30574_v63 }
 0x440   :  { %v5813_v9 = vadd.f32 %v5266_v58, %v34069_v12  ;;  %v5815_v7 = vadd.f32 %v5809_v37, %v30576_v33 }
 0x441   :  { %v23603_v13 = vmul.f32 -1.442695, %v5812_v26 }
 0x442   :  { %v23604_v31 = vmul.f32 -1.442695, %v5813_v9  ;;  %v23605_v20 = vmul.f32 -1.442695, %v5815_v7 }
 0x443   :  { %28373 = vpow2.f32 %v23603_v13 }
 0x444   :  { %28375 = vpow2.f32 %v23604_v31  ;;  %v34070_v31 = vld [vmem:[#allocation36_spill] sm:$0xff] }
 0x445   :  { %28377 = vpow2.f32 %v23605_v20 }
 0x446   :  { %28379 = vtanh.f32 %v5814_v8 }
 0x44d   :  { %v28374_v4 = vpop.eup %28373 }
 0x44e   :  { %v28376_v41 = vpop.eup %28375  ;;  %v5819_v15 = vadd.f32 1.0, %v28374_v4  ;;  %v34071_v4 = vld [vmem:[#allocation44_spill] sm:$0xff] }
 0x44f   :  { %v5825_v59 = vadd.f32 1.0, %v28376_v41  ;;  %v28378_v24 = vpop.eup %28377 }
 0x450   :  { %28381 = vrcp.f32 %v5819_v15  ;;  %v28380_v51 = vpop.eup %28379  ;;  %v5832_v13 = vadd.f32 1.0, %v28378_v24  ;;  %v34072_v15 = vld [vmem:[#allocation133_spill] sm:$0xff]  ;;  %v34073_v24 = vld [vmem:[#allocation48_spill] sm:$0xff] }
 0x451   :  { %28383 = vrcp.f32 %v5825_v59 }
 0x452   :  { %28385 = vrcp.f32 %v5832_v13  ;;  %v34077_v13 = vld [vmem:[#allocation51_spill] sm:$0xff] }
 0x45a   :  { %v28382_v58 = vpop.eup %28381 }
 0x45b   :  { %v28384_v26 = vpop.eup %28383  ;;  %v5836_v9 = vmul.f32 %v28382_v58, %v28380_v51  ;;  %v34074_v58 = vld [vmem:[#allocation134_spill] sm:$0xff] }
 0x45c   :  { %v5835_v12 = vmul.f32 %v28384_v26, %v34070_v31  ;;  %v28386_v7 = vpop.eup %28385  ;;  %v34075_v26 = vld [vmem:[#allocation49_spill] sm:$0xff]  ;;  %v34078_v31 = vld [vmem:[#allocation96_spill] sm:$0xff] }
 0x45e   :  { %v30888_v37 = vadd.f32 %v5836_v9, %v5835_v12  ;;  %v34076_v9 = vld [vmem:[#allocation95_spill] sm:$0xff] }
 0x460   :  { %28387 = vtanh.f32 %v30888_v37 }
 0x46a   :  { %v28388_v47 = vpop.eup %28387 }
 0x46b   :  { %v5839_v20 = vmul.f32 %v28388_v47, %v28386_v7  ;;  %v34079_v7 = vld [vmem:[#allocation53_spill] sm:$0xff]  ;;  %v34080_v47 = vld [vmem:[#allocation98_spill] sm:$0xff] }
 0x46d   :  { %5840 = vst [vmem:[#allocation8 + $0x2] sm:$0x3] %v5839_v20  ;;  %v30891_v8 = vand.u32 4294901760, %v5839_v20 }
 0x46f   :  { %v30894_v41 = vsub.f32 %v5839_v20, %v30891_v8  ;;  %v34081_v20 = vld [vmem:[#allocation56_spill] sm:$0xff] }
 0x471   :  { %v30897_v59 = vand.u32 4294901760, %v30894_v41 }
 0x473   :  { %v5943_v51 = vsub.f32 %v30894_v41, %v30897_v59 }
 0x475   :  { %v5944_v12 = vand.u32 4294901760, %v5943_v51  ;;  %v34082_v51 = vld [vmem:[#allocation145_spill] sm:$0xff] }
 0x477   :  { %5945 = vmatmul.mubr.f32.vlgmr.msra.gmra.mrb[4].mxu0 %v5944_v12  ;;  %6800 = vmatmul.mubr.f32.vlgmr.msra.gmra.mrb[6].mxu1 %v5944_v12  ;;  %v34083_v12 = vld [vmem:[#allocation58_spill] sm:$0xff] }
 0x478   :  { %24944 = vmatpush1.bf16.msra.mxu0 %v34071_v4  ;;  %25136 = vmatpush1.bf16.msra.mxu1 %v34072_v15 }
 0x479   :  { %24946 = vmatprep.subr.bf16.mxu0 %v34073_v24  ;;  %25138 = vmatprep.subr.bf16.mxu1 %v34074_v58  ;;  %v34084_v58 = vld [vmem:[#allocation146_spill] sm:$0xff]  ;;  %v34085_v24 = vld [vmem:[#allocation60_spill] sm:$0xff] }
 0x47a   :  { %6175 = vmatprep.mubr.f32.mxu0 %v33562_v5  ;;  %7030 = vmatprep.mubr.f32.mxu1 %v33562_v5 }
 0x47c   :  { %24948 = vmatpush1.bf16.msra.mxu0 %v34075_v26  ;;  %25140 = vmatpush1.bf16.msra.mxu1 %v34076_v9  ;;  %v34086_v26 = vld [vmem:[#allocation147_spill] sm:$0xff]  ;;  %v34087_v9 = vld [vmem:[#allocation61_spill] sm:$0xff] }
 0x47d   :  { %24950 = vmatprep.subr.bf16.mxu0 %v34077_v13  ;;  %25142 = vmatprep.subr.bf16.mxu1 %v34078_v31  ;;  %v34088_v13 = vld [vmem:[#allocation148_spill] sm:$0xff]  ;;  %v34089_v31 = vld [vmem:[#allocation63_spill] sm:$0xff] }
 0x480   :  { %24952 = vmatpush1.bf16.msra.mxu0 %v34079_v7  ;;  %25144 = vmatpush1.bf16.msra.mxu1 %v34080_v47  ;;  %v34090_v7 = vld [vmem:[#allocation149_spill] sm:$0xff]  ;;  %v34091_v47 = vld [vmem:[#allocation66_spill] sm:$0xff] }
 0x481   :  { %24954 = vmatprep.subr.bf16.mxu0 %v34081_v20  ;;  %25146 = vmatprep.subr.bf16.mxu1 %v34082_v51  ;;  %v34092_v20 = vld [vmem:[#allocation150_spill] sm:$0xff]  ;;  %v34093_v51 = vld [vmem:[#allocation67_spill] sm:$0xff] }
 0x484   :  { %24956 = vmatpush1.bf16.msra.mxu0 %v34083_v12  ;;  %25148 = vmatpush1.bf16.msra.mxu1 %v34084_v58  ;;  %v34094_v12 = vld [vmem:[#allocation151_spill] sm:$0xff]  ;;  %v34095_v58 = vld [vmem:[#allocation68_spill] sm:$0xff] }
 0x485   :  { %24958 = vmatprep.subr.bf16.mxu0 %v34085_v24  ;;  %25150 = vmatprep.subr.bf16.mxu1 %v34086_v26  ;;  %v34096_v24 = vld [vmem:[#allocation152_spill] sm:$0xff]  ;;  %v34097_v26 = vld [vmem:[#allocation70_spill] sm:$0xff] }
 0x488   :  { %24960 = vmatpush1.bf16.msra.mxu0 %v34087_v9  ;;  %25152 = vmatpush1.bf16.msra.mxu1 %v34088_v13  ;;  %v34098_v9 = vld [vmem:[#allocation153_spill] sm:$0xff]  ;;  %v34099_v13 = vld [vmem:[#allocation72_spill] sm:$0xff] }
 0x489   :  { %24962 = vmatprep.subr.bf16.mxu0 %v34089_v31  ;;  %25154 = vmatprep.subr.bf16.mxu1 %v34090_v7  ;;  %v34100_v31 = vld [vmem:[#allocation154_spill] sm:$0xff] }
 0x48a   :  { %v34101_v7 = vld [vmem:[#allocation74_spill] sm:$0xff] }
 0x48c   :  { %24964 = vmatpush1.bf16.msra.mxu0 %v34091_v47  ;;  %25156 = vmatpush1.bf16.msra.mxu1 %v34092_v20  ;;  %v34102_v47 = vld [vmem:[#allocation115_spill] sm:$0xff] }
 0x48d   :  { %24966 = vmatprep.subr.bf16.mxu0 %v34093_v51  ;;  %25158 = vmatprep.subr.bf16.mxu1 %v34094_v12  ;;  %v34103_v12 = vld [vmem:[#allocation75_spill] sm:$0xff]  ;;  %v34116_v51 = vld [vmem:[#allocation158_spill] sm:$0xff] }
 0x48e   :  { %v34117_v20 = vld [vmem:[#allocation79_spill] sm:$0xff] }
 0x490   :  { %24968 = vmatpush1.bf16.msra.mxu0 %v34095_v58  ;;  %25160 = vmatpush1.bf16.msra.mxu1 %v34096_v24  ;;  %v34104_v58 = vld [vmem:[#allocation155_spill] sm:$0xff]  ;;  %v34105_v24 = vld [vmem:[#allocation76_spill] sm:$0xff] }
 0x491   :  { %24970 = vmatprep.subr.bf16.mxu0 %v34097_v26  ;;  %25162 = vmatprep.subr.bf16.mxu1 %v34098_v9  ;;  %v34106_v26 = vld [vmem:[#allocation156_spill] sm:$0xff]  ;;  %v34111_v9 = vld [vmem:[#allocation43_spill] sm:$0xff] }
 0x494   :  { %24972 = vmatpush1.bf16.msra.mxu0 %v34099_v13  ;;  %25164 = vmatpush1.bf16.msra.mxu1 %v34100_v31  ;;  %v34107_v31 = vld [vmem:[#allocation32_spill] sm:$0xff]  ;;  %v34110_v13 = vld [vmem:[#allocation121_spill] sm:$0xff] }
 0x495   :  { %24974 = vmatprep.subr.bf16.mxu0 %v34101_v7  ;;  %25166 = vmatprep.subr.bf16.mxu1 %v34102_v47  ;;  %v34108_v7 = vld [vmem:[#allocation30_spill] sm:$0xff]  ;;  %v34109_v47 = vld [vmem:[#allocation39_spill] sm:$0xff] }
 0x497   :  { %6177 = vmatmul.mubr.f32.vlgmr.msra.gmra.mrb[4].mxu0 %v30891_v8  ;;  %7032 = vmatmul.mubr.f32.vlgmr.msra.gmra.mrb[6].mxu1 %v30891_v8 }
 0x498   :  { %24976 = vmatpush1.bf16.msra.mxu0 %v34103_v12  ;;  %25168 = vmatpush1.bf16.msra.mxu1 %v34104_v58  ;;  %v34112_v12 = vld [vmem:[#allocation157_spill] sm:$0xff] }
 0x499   :  { %24978 = vmatprep.subr.bf16.mxu0 %v34105_v24  ;;  %25170 = vmatprep.subr.bf16.mxu1 %v34106_v26  ;;  %v34113_v58 = vld [vmem:[#allocation77_spill] sm:$0xff]  ;;  %v34114_v24 = vld [vmem:[#allocation128_spill] sm:$0xff]  ;;  %v34115_v26 = vld [vmem:[#allocation78_spill] sm:$0xff] }
 0x49a   :  { %6311 = vmatprep.mubr.f32.mxu0 %v33562_v5  ;;  %7166 = vmatprep.mubr.f32.mxu1 %v33562_v5 }
 0x49c   :  { %24980 = vmatpush1.bf16.msra.mxu0 %v34107_v31  ;;  %25172 = vmatpush1.bf16.msra.mxu1 %v34108_v7  ;;  %v34118_v31 = vld [vmem:[#allocation159_spill] sm:$0xff]  ;;  %v34119_v7 = vld [vmem:[#allocation80_spill] sm:$0xff] }
 0x49d   :  { %24982 = vmatprep.subr.bf16.mxu0 %v34109_v47  ;;  %25174 = vmatprep.subr.bf16.mxu1 %v34110_v13  ;;  %v34120_v47 = vld [vmem:[#allocation160_spill] sm:$0xff]  ;;  %v34121_v13 = vld [vmem:[#allocation81_spill] sm:$0xff] }
 0x4a0   :  { %24984 = vmatpush1.bf16.msra.mxu0 %v34111_v9  ;;  %25176 = vmatpush1.bf16.msra.mxu1 %v34112_v12  ;;  %v34122_v9 = vld [vmem:[#allocation161_spill] sm:$0xff]  ;;  %v34123_v12 = vld [vmem:[#allocation82_spill] sm:$0xff] }
 0x4a1   :  { %24986 = vmatprep.subr.bf16.mxu0 %v34113_v58  ;;  %25178 = vmatprep.subr.bf16.mxu1 %v34114_v24  ;;  %v34124_v58 = vld [vmem:[#allocation162_spill] sm:$0xff]  ;;  %v34125_v24 = vld [vmem:[#allocation83_spill] sm:$0xff] }
 0x4a4   :  { %24988 = vmatpush1.bf16.msra.mxu0 %v34115_v26  ;;  %25180 = vmatpush1.bf16.msra.mxu1 %v34116_v51  ;;  %v34126_v26 = vld [vmem:[#allocation163_spill] sm:$0xff]  ;;  %v34127_v51 = vld [vmem:[#allocation84_spill] sm:$0xff] }
 0x4a5   :  { %24990 = vmatprep.subr.bf16.mxu0 %v34117_v20  ;;  %25182 = vmatprep.subr.bf16.mxu1 %v34118_v31  ;;  %v34128_v20 = vld [vmem:[#allocation164_spill] sm:$0xff]  ;;  %v34129_v31 = vld [vmem:[#allocation85_spill] sm:$0xff] }
 0x4a8   :  { %24992 = vmatpush1.bf16.msra.mxu0 %v34119_v7  ;;  %25184 = vmatpush1.bf16.msra.mxu1 %v34120_v47  ;;  %v34130_v7 = vld [vmem:[#allocation165_spill] sm:$0xff]  ;;  %v34131_v47 = vld [vmem:[#allocation86_spill] sm:$0xff] }
 0x4a9   :  { %24994 = vmatprep.subr.bf16.mxu0 %v34121_v13  ;;  %25186 = vmatprep.subr.bf16.mxu1 %v34122_v9  ;;  %v34132_v13 = vld [vmem:[#allocation166_spill] sm:$0xff] }
 0x4ac   :  { %24996 = vmatpush1.bf16.msra.mxu0 %v34123_v12  ;;  %25188 = vmatpush1.bf16.msra.mxu1 %v34124_v58  ;;  %v34149_v58 = vld [vmem:[#allocation57_spill] sm:$0xff] }
 0x4ad   :  { %24998 = vmatprep.subr.bf16.mxu0 %v34125_v24  ;;  %25190 = vmatprep.subr.bf16.mxu1 %v34126_v26  ;;  %v34142_v26 = vld [vmem:[#allocation116_spill] sm:$0xff] }
 0x4ae   :  { %v34148_v24 = vld [vmem:[#allocation136_spill] sm:$0xff] }
 0x4b0   :  { %25000 = vmatpush1.bf16.msra.mxu0 %v34127_v51  ;;  %25192 = vmatpush1.bf16.msra.mxu1 %v34128_v20  ;;  %v34138_v20 = vld [vmem:[#allocation101_spill] sm:$0xff]  ;;  %v34139_v51 = vld [vmem:[#allocation46_spill] sm:$0xff] }
 0x4b1   :  { %25002 = vmatprep.subr.bf16.mxu0 %v34129_v31  ;;  %25194 = vmatprep.subr.bf16.mxu1 %v34130_v7  ;;  %v34136_v7 = vld [vmem:[#allocation100_spill] sm:$0xff]  ;;  %v34137_v31 = vld [vmem:[#allocation45_spill] sm:$0xff] }
 0x4b4   :  { %25004 = vmatpush1.bf16.msra.mxu0 %v34131_v47  ;;  %25196 = vmatpush1.bf16.msra.mxu1 %v34132_v13  ;;  %v34134_v13 = vld [vmem:[#allocation99_spill] sm:$0xff]  ;;  %v34135_v47 = vld [vmem:[#allocation41_spill] sm:$0xff] }
 0x4b5   :  { %25006 = vmatprep.subr.bf16.mxu0 %v34003_v36  ;;  %25198 = vmatprep.subr.bf16.mxu1 %v33893_v39 }
 0x4b7   :  { %6314 = vmatmul.mubr.f32.vlgmr.msra.gmra.mrb[4].mxu0 %v30894_v41  ;;  %7169 = vmatmul.mubr.f32.vlgmr.msra.gmra.mrb[6].mxu1 %v30894_v41  ;;  %v34133_v41 = vld [vmem:[#allocation40_spill] sm:$0xff] }
 0x4b8   :  { %25008 = vmatpush1.bf16.msra.mxu0 %v34004_v22  ;;  %25200 = vmatpush1.bf16.msra.mxu1 %v33895_v45 }
 0x4b9   :  { %25010 = vmatprep.subr.bf16.mxu0 %v34005_v30  ;;  %25202 = vmatprep.subr.bf16.mxu1 %v33896_v34 }
 0x4ba   :  { %6416 = vmatprep.mubr.f32.mxu0 %v33562_v5  ;;  %7271 = vmatprep.mubr.f32.mxu1 %v33562_v5 }
 0x4bc   :  { %25012 = vmatpush1.bf16.msra.mxu0 %v34006_v54  ;;  %25204 = vmatpush1.bf16.msra.mxu1 %v33897_v21 }
 0x4bd   :  { %25014 = vmatprep.subr.bf16.mxu0 %v34007_v62  ;;  %25206 = vmatprep.subr.bf16.mxu1 %v33898_v60 }
 0x4c0   :  { %25016 = vmatpush1.bf16.msra.mxu0 %v34008_v56  ;;  %25208 = vmatpush1.bf16.msra.mxu1 %v33899_v55 }
 0x4c1   :  { %25018 = vmatprep.subr.bf16.mxu0 %v34009_v46  ;;  %25210 = vmatprep.subr.bf16.mxu1 %v33900_v48 }
 0x4c4   :  { %25020 = vmatpush1.bf16.msra.mxu0 %v34010_v16  ;;  %25212 = vmatpush1.bf16.msra.mxu1 %v33901_v52 }
 0x4c5   :  { %25022 = vmatprep.subr.bf16.mxu0 %v34011_v19  ;;  %25214 = vmatprep.subr.bf16.mxu1 %v33902_v3 }
 0x4c8   :  { %25024 = vmatpush1.bf16.msra.mxu0 %v34012_v28  ;;  %25216 = vmatpush1.bf16.msra.mxu1 %v33903_v11 }
 0x4c9   :  { %25026 = vmatprep.subr.bf16.mxu0 %v34013_v29  ;;  %25218 = vmatprep.subr.bf16.mxu1 %v33904_v0 }
 0x4cc   :  { %25028 = vmatpush1.bf16.msra.mxu0 %v34014_v10  ;;  %25220 = vmatpush1.bf16.msra.mxu1 %v33905_v32 }
 0x4cd   :  { %25030 = vmatprep.subr.bf16.mxu0 %v34015_v38  ;;  %25222 = vmatprep.subr.bf16.mxu1 %v33906_v17 }
 0x4d0   :  { %25032 = vmatpush1.bf16.msra.mxu0 %v34016_v53  ;;  %25224 = vmatpush1.bf16.msra.mxu1 %v33907_v1 }
 0x4d1   :  { %25034 = vmatprep.subr.bf16.mxu0 %v34017_v14  ;;  %25226 = vmatprep.subr.bf16.mxu1 %v33908_v42 }
 0x4d4   :  { %25036 = vmatpush1.bf16.msra.mxu0 %v34018_v27  ;;  %25228 = vmatpush1.bf16.msra.mxu1 %v33909_v50 }
 0x4d5   :  { %25038 = vmatprep.subr.bf16.mxu0 %v34133_v41  ;;  %25230 = vmatprep.subr.bf16.mxu1 %v34134_v13  ;;  %v34140_v41 = vld [vmem:[#allocation102_spill] sm:$0xff] }
 0x4d6   :  { %v34141_v13 = vld [vmem:[#allocation50_spill] sm:$0xff] }
 0x4d7   :  { %6420 = vmatmul.mubr.f32.vlgmr.msra.gmra.mrb[4].mxu0 %v30897_v59  ;;  %7275 = vmatmul.mubr.f32.vlgmr.msra.gmra.mrb[6].mxu1 %v30897_v59  ;;  %v34143_v59 = vld [vmem:[#allocation52_spill] sm:$0xff] }
 0x4d8   :  { %25040 = vmatpush1.bf16.msra.mxu0 %v34135_v47  ;;  %25232 = vmatpush1.bf16.msra.mxu1 %v34136_v7  ;;  %v34144_v47 = vld [vmem:[#allocation117_spill] sm:$0xff]  ;;  %v34145_v7 = vld [vmem:[#allocation54_spill] sm:$0xff] }
 0x4d9   :  { %25042 = vmatprep.subr.bf16.mxu0 %v34137_v31  ;;  %25234 = vmatprep.subr.bf16.mxu1 %v34138_v20  ;;  %v34146_v31 = vld [vmem:[#allocation135_spill] sm:$0xff] }
 0x4da   :  { %6586 = vmatprep.mubr.f32.mxu0 %v33562_v5  ;;  %7441 = vmatprep.mubr.f32.mxu1 %v33562_v5  ;;  %v34147_v20 = vld [vmem:[#allocation55_spill] sm:$0xff] }
 0x4dc   :  { %25044 = vmatpush1.bf16.msra.mxu0 %v34139_v51  ;;  %25236 = vmatpush1.bf16.msra.mxu1 %v34140_v41  ;;  %v34150_v51 = vld [vmem:[#allocation137_spill] sm:$0xff]  ;;  %v34151_v41 = vld [vmem:[#allocation59_spill] sm:$0xff] }
 0x4dd   :  { %25046 = vmatprep.subr.bf16.mxu0 %v34141_v13  ;;  %25238 = vmatprep.subr.bf16.mxu1 %v34142_v26  ;;  %v34152_v13 = vld [vmem:[#allocation138_spill] sm:$0xff] }
 0x4de   :  { %v34153_v26 = vld [vmem:[#allocation62_spill] sm:$0xff] }
 0x4e0   :  { %25048 = vmatpush1.bf16.msra.mxu0 %v34143_v59  ;;  %25240 = vmatpush1.bf16.msra.mxu1 %v34144_v47  ;;  %v34154_v59 = vld [vmem:[#allocation139_spill] sm:$0xff]  ;;  %v34155_v47 = vld [vmem:[#allocation64_spill] sm:$0xff] }
 0x4e1   :  { %25050 = vmatprep.subr.bf16.mxu0 %v34145_v7  ;;  %25242 = vmatprep.subr.bf16.mxu1 %v34146_v31  ;;  %v34156_v7 = vld [vmem:[#allocation140_spill] sm:$0xff]  ;;  %v34157_v31 = vld [vmem:[#allocation65_spill] sm:$0xff] }
 0x4e4   :  { %25052 = vmatpush1.bf16.msra.mxu0 %v34147_v20  ;;  %25244 = vmatpush1.bf16.msra.mxu1 %v34148_v24  ;;  %v34158_v20 = vld [vmem:[#allocation141_spill] sm:$0xff] }
 0x4e5   :  { %25054 = vmatprep.subr.bf16.mxu0 %v34149_v58  ;;  %25246 = vmatprep.subr.bf16.mxu1 %v34150_v51  ;;  %v34159_v24 = vld [vmem:[#allocation69_spill] sm:$0xff]  ;;  %v34160_v58 = vld [vmem:[#allocation142_spill] sm:$0xff]  ;;  %v34161_v51 = vld [vmem:[#allocation71_spill] sm:$0xff] }
 0x4e8   :  { %25056 = vmatpush1.bf16.msra.mxu0 %v34151_v41  ;;  %25248 = vmatpush1.bf16.msra.mxu1 %v34152_v13  ;;  %v34162_v41 = vld [vmem:[#allocation143_spill] sm:$0xff]  ;;  %v34163_v13 = vld [vmem:[#allocation73_spill] sm:$0xff] }
 0x4e9   :  { %25058 = vmatprep.subr.bf16.mxu0 %v34153_v26  ;;  %25250 = vmatprep.subr.bf16.mxu1 %v34154_v59  ;;  %v34164_v26 = vld [vmem:[#allocation144_spill] sm:$0xff] }
 0x4ec   :  { %25060 = vmatpush1.bf16.msra.mxu0 %v34155_v47  ;;  %25252 = vmatpush1.bf16.msra.mxu1 %v34156_v7 }
 0x4ed   :  { %25062 = vmatprep.subr.bf16.mxu0 %v34157_v31  ;;  %25254 = vmatprep.subr.bf16.mxu1 %v34158_v20  ;;  %v34168_v20 = vld [vmem:[#allocation104_spill] sm:$0xff] }
 0x4f0   :  { %25064 = vmatpush1.bf16.msra.mxu0 %v34159_v24  ;;  %25256 = vmatpush1.bf16.msra.mxu1 %v34160_v58  ;;  %v34165_v24 = vld [vmem:[#allocation105_spill] sm:$0xff] }
 0x4f1   :  { %25066 = vmatprep.subr.bf16.mxu0 %v34161_v51  ;;  %25258 = vmatprep.subr.bf16.mxu1 %v34162_v41 }
 0x4f4   :  { %25068 = vmatpush1.bf16.msra.mxu0 %v34163_v13  ;;  %25260 = vmatpush1.bf16.msra.mxu1 %v34164_v26  ;;  %v23606_v26 = vld [vmem:[%s33080_s0 + $0x4] sm:$0x3] }
 0x4f5   :  { %25070 = vmatprep.subr.bf16.mxu0 %v34003_v36  ;;  %25262 = vmatprep.subr.bf16.mxu1 %v33893_v39  ;;  %v7554_v13 = vsel %vm1892_vm0, %v23606_v26, 0 }
 0x4f6   :  { %v31071_v41 = vand.u32 4294901760, %v7554_v13 }
 0x4f7   :  { %6588 = vmatmul.mubr.f32.vlgmr.msra.gmra.mrb[4].mxu0 %v30891_v8  ;;  %7443 = vmatmul.mubr.f32.vlgmr.msra.gmra.mrb[6].mxu1 %v30891_v8 }
 0x4f8   :  { %25072 = vmatpush1.bf16.msra.mxu0 %v34004_v22  ;;  %25264 = vmatpush1.bf16.msra.mxu1 %v33895_v45  ;;  %v7630_v51 = vsub.f32 %v7554_v13, %v31071_v41 }
 0x4f9   :  { %25074 = vmatprep.subr.bf16.mxu0 %v34005_v30  ;;  %25266 = vmatprep.subr.bf16.mxu1 %v33896_v34 }
 0x4fa   :  { %6690 = vmatprep.mubr.f32.mxu0 %v33562_v5  ;;  %7545 = vmatprep.mubr.f32.mxu1 %v33562_v5  ;;  %v7631_v26 = vand.u32 4294901760, %v7630_v51 }
 0x4fc   :  { %25076 = vmatpush1.bf16.msra.mxu0 %v34006_v54  ;;  %25268 = vmatpush1.bf16.msra.mxu1 %v33897_v21  ;;  %v7632_v13 = vsub.f32 %v7630_v51, %v7631_v26 }
 0x4fd   :  { %25078 = vmatprep.subr.bf16.mxu0 %v34007_v62  ;;  %25270 = vmatprep.subr.bf16.mxu1 %v33898_v60 }
 0x4fe   :  { %v7633_v58 = vand.u32 4294901760, %v7632_v13  ;;  %v34167_v13 = vld [vmem:[#allocation122_spill] sm:$0xff] }
 0x500   :  { %25080 = vmatpush1.bf16.msra.mxu0 %v34008_v56  ;;  %25272 = vmatpush1.bf16.msra.mxu1 %v33899_v55 }
 0x501   :  { %25082 = vmatprep.subr.bf16.mxu0 %v34009_v46  ;;  %25274 = vmatprep.subr.bf16.mxu1 %v33900_v48 }
 0x504   :  { %25084 = vmatpush1.bf16.msra.mxu0 %v34010_v16  ;;  %25276 = vmatpush1.bf16.msra.mxu1 %v33901_v52 }
 0x505   :  { %25086 = vmatprep.subr.bf16.mxu0 %v34011_v19  ;;  %25278 = vmatprep.subr.bf16.mxu1 %v33902_v3 }
 0x508   :  { %25088 = vmatpush1.bf16.msra.mxu0 %v34012_v28  ;;  %25280 = vmatpush1.bf16.msra.mxu1 %v33903_v11 }
 0x509   :  { %25090 = vmatprep.subr.bf16.mxu0 %v34013_v29  ;;  %25282 = vmatprep.subr.bf16.mxu1 %v33904_v0 }
 0x50c   :  { %25092 = vmatpush1.bf16.msra.mxu0 %v34014_v10  ;;  %25284 = vmatpush1.bf16.msra.mxu1 %v33905_v32 }
 0x50d   :  { %25094 = vmatprep.subr.bf16.mxu0 %v34015_v38  ;;  %25286 = vmatprep.subr.bf16.mxu1 %v33906_v17 }
 0x510   :  { %25096 = vmatpush1.bf16.msra.mxu0 %v34016_v53  ;;  %25288 = vmatpush1.bf16.msra.mxu1 %v33907_v1 }
 0x511   :  { %25098 = vmatprep.subr.bf16.mxu0 %v34017_v14  ;;  %25290 = vmatprep.subr.bf16.mxu1 %v33908_v42 }
 0x514   :  { %25100 = vmatpush1.bf16.msra.mxu0 %v34018_v27  ;;  %25292 = vmatpush1.bf16.msra.mxu1 %v33909_v50 }
 0x515   :  { %25294 = vmatprep.subr.bf16.mxu0 %v34051_v44  ;;  %25342 = vmatprep.subr.bf16.mxu1 %v30433_v40 }
 0x517   :  { %6692 = vmatmul.mubr.f32.vlgmr.msra.gmra.mrb[4].mxu0 %v30891_v8  ;;  %7547 = vmatmul.mubr.f32.vlgmr.msra.gmra.mrb[6].mxu1 %v30891_v8  ;;  %v34166_v8 = vld [vmem:[#allocation103_spill] sm:$0xff] }
 0x518   :  { %25296 = vmatpush1.bf16.msra.mxu0 %v34052_v43  ;;  %25344 = vmatpush1.bf16.msra.mxu1 %v30451_v2 }
 0x519   :  { %25298 = vmatprep.subr.bf16.mxu0 %v34053_v25  ;;  %25346 = vmatprep.subr.bf16.mxu1 %v30453_v6 }
 0x51a   :  { %7628 = vmatprep.mubr.f32.mxu0 %v33562_v5  ;;  %8171 = vmatprep.mubr.f32.mxu1 %v33562_v5 }
 0x51c   :  { %25300 = vmatpush1.bf16.msra.mxu0 %v34054_v49  ;;  %25348 = vmatpush1.bf16.msra.mxu1 %v30468_v57 }
 0x51d   :  { %25302 = vmatprep.subr.bf16.mxu0 %v34165_v24  ;;  %25350 = vmatprep.subr.bf16.mxu1 %v30475_v18  ;;  %v34169_v24 = vld [vmem:[#allocation110_spill] sm:$0xff] }
 0x51e   :  { %v34170_v18 = vld [vmem:[#allocation106_spill] sm:$0xff] }
 0x51f   :  { %7634 = vmatmul.mubr.f32.vlgmr.msra.gmra.mrb[4].mxu0 %v7633_v58  ;;  %8177 = vmatmul.mubr.f32.vlgmr.msra.gmra.mrb[6].mxu1 %v7633_v58  ;;  %v34171_v58 = vld [vmem:[#allocation114_spill] sm:$0xff] }
 0x520   :  { %25304 = vmatpush1.bf16.msra.mxu0 %v34056_v23  ;;  %25352 = vmatpush1.bf16.msra.mxu1 %v30478_v61  ;;  %v34174_v61 = vld [vmem:[#allocation112_spill] sm:$0xff] }
 0x521   :  { %25306 = vmatprep.subr.bf16.mxu0 %v34057_v35  ;;  %25354 = vmatprep.subr.bf16.mxu1 %v34166_v8  ;;  %v34172_v35 = vld [vmem:[#allocation109_spill] sm:$0xff]  ;;  %v34173_v8 = vld [vmem:[#allocation118_spill] sm:$0xff] }
 0x522   :  { %7744 = vmatprep.mubr.f32.mxu0 %v33562_v5  ;;  %8287 = vmatprep.mubr.f32.mxu1 %v33562_v5 }
 0x524   :  { %25308 = vmatpush1.bf16.msra.mxu0 %v34167_v13  ;;  %25356 = vmatpush1.bf16.msra.mxu1 %v34168_v20  ;;  %v34175_v20 = vld [vmem:[#allocation120_spill] sm:$0xff] }
 0x525   :  { %25310 = vmatprep.subr.bf16.mxu0 %v34169_v24  ;;  %25358 = vmatprep.subr.bf16.mxu1 %v34170_v18  ;;  %v34176_v24 = vld [vmem:[#allocation113_spill] sm:$0xff] }
 0x526   :  { %v34184_v18 = vld [vmem:[#allocation125_spill] sm:$0xff] }
 0x527   :  { %7746 = vmatmul.mubr.f32.vlgmr.msra.gmra.mrb[4].mxu0 %v31071_v41  ;;  %8289 = vmatmul.mubr.f32.vlgmr.msra.gmra.mrb[6].mxu1 %v31071_v41 }
 0x528   :  { %25312 = vmatpush1.bf16.msra.mxu0 %v34171_v58  ;;  %25360 = vmatpush1.bf16.msra.mxu1 %v34172_v35  ;;  %v34182_v35 = vld [vmem:[#allocation124_spill] sm:$0xff]  ;;  %v34183_v58 = vld [vmem:[#allocation47_spill] sm:$0xff] }
 0x529   :  { %25314 = vmatprep.subr.bf16.mxu0 %v34173_v8  ;;  %25362 = vmatprep.subr.bf16.mxu1 %v34174_v61  ;;  %v34180_v61 = vld [vmem:[#allocation123_spill] sm:$0xff]  ;;  %v34181_v8 = vld [vmem:[#allocation132_spill] sm:$0xff] }
 0x52a   :  { %7832 = vmatprep.mubr.f32.mxu0 %v33562_v5  ;;  %8375 = vmatprep.mubr.f32.mxu1 %v33562_v5 }
 0x52c   :  { %25316 = vmatpush1.bf16.msra.mxu0 %v34175_v20  ;;  %25364 = vmatpush1.bf16.msra.mxu1 %v34176_v24  ;;  %v34177_v24 = vld [vmem:[#allocation127_spill] sm:$0xff] }
 0x52d   :  { %25318 = vmatprep.subr.bf16.mxu0 %v34051_v44  ;;  %25366 = vmatprep.subr.bf16.mxu1 %v30433_v40  ;;  %v34178_v20 = vld [vmem:[#allocation119_spill] sm:$0xff] }
 0x52f   :  { %7835 = vmatmul.mubr.f32.vlgmr.msra.gmra.mrb[4].mxu0 %v7630_v51  ;;  %8378 = vmatmul.mubr.f32.vlgmr.msra.gmra.mrb[6].mxu1 %v7630_v51  ;;  %v34179_v51 = vld [vmem:[#allocation130_spill] sm:$0xff] }
 0x530   :  { %25320 = vmatpush1.bf16.msra.mxu0 %v34052_v43  ;;  %25368 = vmatpush1.bf16.msra.mxu1 %v30451_v2 }
 0x531   :  { %25322 = vmatprep.subr.bf16.mxu0 %v34053_v25  ;;  %25370 = vmatprep.subr.bf16.mxu1 %v30453_v6 }
 0x532   :  { %7913 = vmatprep.mubr.f32.mxu0 %v33562_v5  ;;  %8456 = vmatprep.mubr.f32.mxu1 %v33562_v5 }
 0x534   :  { %25324 = vmatpush1.bf16.msra.mxu0 %v34054_v49  ;;  %25372 = vmatpush1.bf16.msra.mxu1 %v30468_v57 }
 0x535   :  { %25326 = vmatprep.subr.bf16.mxu0 %v34177_v24  ;;  %25374 = vmatprep.subr.bf16.mxu1 %v34178_v20  ;;  %v34188_v20 = vld [vmem:[#allocation126_spill] sm:$0xff] }
 0x537   :  { %7917 = vmatmul.mubr.f32.vlgmr.msra.gmra.mrb[4].mxu0 %v7631_v26  ;;  %8460 = vmatmul.mubr.f32.vlgmr.msra.gmra.mrb[6].mxu1 %v7631_v26  ;;  %v34186_v26 = vld [vmem:[#allocation131_spill] sm:$0xff] }
 0x538   :  { %25328 = vmatpush1.bf16.msra.mxu0 %v34179_v51  ;;  %25376 = vmatpush1.bf16.msra.mxu1 %v34180_v61 }
 0x539   :  { %25330 = vmatprep.subr.bf16.mxu0 %v34181_v8  ;;  %25378 = vmatprep.subr.bf16.mxu1 %v34182_v35  ;;  %v34187_v35 = vld [vmem:[#allocation129_spill] sm:$0xff] }
 0x53a   :  { %8011 = vmatprep.mubr.f32.mxu0 %v33562_v5  ;;  %8554 = vmatprep.mubr.f32.mxu1 %v33562_v5 }
 0x53c   :  { %25332 = vmatpush1.bf16.msra.mxu0 %v34183_v58  ;;  %25380 = vmatpush1.bf16.msra.mxu1 %v34184_v18 }
 0x53d   :  { %25334 = vmatprep.subr.bf16.mxu0 %v34051_v44  ;;  %25382 = vmatprep.subr.bf16.mxu1 %v30433_v40 }
 0x53f   :  { %8013 = vmatmul.mubr.f32.vlgmr.msra.gmra.mrb[4].mxu0 %v31071_v41  ;;  %8556 = vmatmul.mubr.f32.vlgmr.msra.gmra.mrb[6].mxu1 %v31071_v41 }
 0x540   :  { %25336 = vmatpush1.bf16.msra.mxu0 %v34052_v43  ;;  %25384 = vmatpush1.bf16.msra.mxu1 %v30451_v2 }
 0x541   :  { %25338 = vmatprep.subr.bf16.mxu0 %v34053_v25  ;;  %25386 = vmatprep.subr.bf16.mxu1 %v30453_v6 }
 0x542   :  { %8091 = vmatprep.mubr.f32.mxu0 %v33562_v5  ;;  %8634 = vmatprep.mubr.f32.mxu1 %v33562_v5 }
 0x544   :  { %25340 = vmatpush1.bf16.msra.mxu0 %v34054_v49  ;;  %25388 = vmatpush1.bf16.msra.mxu1 %v30468_v57 }
 0x545   :  { %25390 = vmatprep.subr.bf16.mxu0 %v34003_v36  ;;  %25582 = vmatprep.subr.bf16.mxu1 %v33893_v39 }
 0x547   :  { %8093 = vmatmul.mubr.f32.vlgmr.msra.gmra.mrb[4].mxu0 %v31071_v41  ;;  %8636 = vmatmul.mubr.f32.vlgmr.msra.gmra.mrb[6].mxu1 %v31071_v41  ;;  %v34185_v41 = vld [vmem:[#allocation42_spill] sm:$0xff] }
 0x548   :  { %25392 = vmatpush1.bf16.msra.mxu0 %v34004_v22  ;;  %25584 = vmatpush1.bf16.msra.mxu1 %v33895_v45 }
 0x549   :  { %25394 = vmatprep.subr.bf16.mxu0 %v34005_v30  ;;  %25586 = vmatprep.subr.bf16.mxu1 %v33896_v34 }
 0x54a   :  { %8769 = vmatprep.mubr.f32.mxu0 %v33562_v5  ;;  %9624 = vmatprep.mubr.f32.mxu1 %v33562_v5 }
 0x54c   :  { %25396 = vmatpush1.bf16.msra.mxu0 %v34006_v54  ;;  %25588 = vmatpush1.bf16.msra.mxu1 %v33897_v21 }
 0x54d   :  { %25398 = vmatprep.subr.bf16.mxu0 %v34007_v62  ;;  %25590 = vmatprep.subr.bf16.mxu1 %v33898_v60 }
 0x550   :  { %25400 = vmatpush1.bf16.msra.mxu0 %v34008_v56  ;;  %25592 = vmatpush1.bf16.msra.mxu1 %v33899_v55 }
 0x551   :  { %25402 = vmatprep.subr.bf16.mxu0 %v34009_v46  ;;  %25594 = vmatprep.subr.bf16.mxu1 %v33900_v48 }
 0x554   :  { %25404 = vmatpush1.bf16.msra.mxu0 %v34010_v16  ;;  %25596 = vmatpush1.bf16.msra.mxu1 %v33901_v52 }
 0x555   :  { %25406 = vmatprep.subr.bf16.mxu0 %v34011_v19  ;;  %25598 = vmatprep.subr.bf16.mxu1 %v33902_v3 }
 0x558   :  { %25408 = vmatpush1.bf16.msra.mxu0 %v34012_v28  ;;  %25600 = vmatpush1.bf16.msra.mxu1 %v33903_v11 }
 0x559   :  { %25410 = vmatprep.subr.bf16.mxu0 %v34013_v29  ;;  %25602 = vmatprep.subr.bf16.mxu1 %v33904_v0 }
 0x55c   :  { %25412 = vmatpush1.bf16.msra.mxu0 %v34014_v10  ;;  %25604 = vmatpush1.bf16.msra.mxu1 %v33905_v32 }
 0x55d   :  { %25414 = vmatprep.subr.bf16.mxu0 %v34015_v38  ;;  %25606 = vmatprep.subr.bf16.mxu1 %v33906_v17 }
 0x560   :  { %25416 = vmatpush1.bf16.msra.mxu0 %v34016_v53  ;;  %25608 = vmatpush1.bf16.msra.mxu1 %v33907_v1 }
 0x561   :  { %25418 = vmatprep.subr.bf16.mxu0 %v34017_v14  ;;  %25610 = vmatprep.subr.bf16.mxu1 %v33908_v42 }
 0x564   :  { %25420 = vmatpush1.bf16.msra.mxu0 %v34018_v27  ;;  %25612 = vmatpush1.bf16.msra.mxu1 %v33909_v50 }
 0x565   :  { %25422 = vmatprep.subr.bf16.mxu0 %v34185_v41  ;;  %25614 = vmatprep.subr.bf16.mxu1 %v34186_v26 }
 0x61a   :  { %v8094_v18 = vpop.f32.mrb[4].mxu0  ;;  %v8637_v58 = vpop.f32.mrb[6].mxu1 }
 0x61b   :  { %v8642_v8 = vadd.f32 %v8094_v18, %v34187_v35  ;;  %v8096_v61 = vpop.f32.mrb[5].mxu0  ;;  %v8639_v51 = vpop.f32.mrb[7].mxu1  ;;  %v8644_v6 = vadd.f32 %v8637_v58, %v30574_v63 }
 0x61c   :  { %v8643_v24 = vadd.f32 %v8096_v61, %v34188_v20  ;;  %v8645_v57 = vadd.f32 %v8639_v51, %v30576_v33 }
 0x61d   :  { %v23607_v13 = vmul.f32 -1.442695, %v8642_v8 }
 0x61e   :  { %v23608_v23 = vmul.f32 -1.442695, %v8643_v24  ;;  %v23609_v49 = vmul.f32 -1.442695, %v8645_v57 }
 0x61f   :  { %28389 = vpow2.f32 %v23607_v13 }
 0x620   :  { %28391 = vpow2.f32 %v23608_v23 }
 0x621   :  { %28393 = vpow2.f32 %v23609_v49 }
 0x622   :  { %28395 = vtanh.f32 %v8644_v6 }
 0x629   :  { %v28390_v41 = vpop.eup %28389 }
 0x62a   :  { %v28392_v25 = vpop.eup %28391  ;;  %v8649_v26 = vadd.f32 1.0, %v28390_v41  ;;  %v34189_v41 = vld [vmem:[#allocation48_spill] sm:$0xff] }
 0x62b   :  { %v8655_v2 = vadd.f32 1.0, %v28392_v25  ;;  %v28394_v18 = vpop.eup %28393 }
 0x62c   :  { %28397 = vrcp.f32 %v8649_v26  ;;  %v28396_v35 = vpop.eup %28395  ;;  %v8662_v13 = vadd.f32 1.0, %v28394_v18  ;;  %v34190_v26 = vld [vmem:[#allocation134_spill] sm:$0xff]  ;;  %v34191_v18 = vld [vmem:[#allocation49_spill] sm:$0xff] }
 0x62d   :  { %28399 = vrcp.f32 %v8655_v2 }
 0x62e   :  { %28401 = vrcp.f32 %v8662_v13  ;;  %v34195_v13 = vld [vmem:[#allocation53_spill] sm:$0xff] }
 0x636   :  { %v28398_v61 = vpop.eup %28397 }
 0x637   :  { %v28400_v8 = vpop.eup %28399  ;;  %v8666_v24 = vmul.f32 %v28398_v61, %v28396_v35  ;;  %v34192_v61 = vld [vmem:[#allocation95_spill] sm:$0xff] }
 0x638   :  { %v8665_v23 = vmul.f32 %v28400_v8, %v30888_v37  ;;  %v28402_v57 = vpop.eup %28401  ;;  %v34193_v8 = vld [vmem:[#allocation51_spill] sm:$0xff] }
 0x63a   :  { %v31193_v51 = vadd.f32 %v8666_v24, %v8665_v23  ;;  %v34194_v24 = vld [vmem:[#allocation96_spill] sm:$0xff]  ;;  %v34196_v23 = vld [vmem:[#allocation98_spill] sm:$0xff] }
 0x63c   :  { %28403 = vtanh.f32 %v31193_v51 }
 0x646   :  { %v28404_v58 = vpop.eup %28403 }
 0x647   :  { %v8669_v49 = vmul.f32 %v28404_v58, %v28402_v57  ;;  %v34197_v57 = vld [vmem:[#allocation56_spill] sm:$0xff]  ;;  %v34198_v58 = vld [vmem:[#allocation145_spill] sm:$0xff] }
 0x649   :  { %8670 = vst [vmem:[#allocation8 + $0x4] sm:$0x3] %v8669_v49  ;;  %v31196_v25 = vand.u32 4294901760, %v8669_v49 }
 0x64b   :  { %v31199_v2 = vsub.f32 %v8669_v49, %v31196_v25  ;;  %v34199_v49 = vld [vmem:[#allocation58_spill] sm:$0xff] }
 0x64d   :  { %v31202_v6 = vand.u32 4294901760, %v31199_v2 }
 0x64f   :  { %v8773_v35 = vsub.f32 %v31199_v2, %v31202_v6 }
 0x651   :  { %v8774_v37 = vand.u32 4294901760, %v8773_v35  ;;  %v34200_v35 = vld [vmem:[#allocation146_spill] sm:$0xff] }
 0x653   :  { %8775 = vmatmul.mubr.f32.vlgmr.msra.gmra.mrb[6].mxu0 %v8774_v37  ;;  %9630 = vmatmul.mubr.f32.vlgmr.msra.gmra.mrb[8].mxu1 %v8774_v37  ;;  %v34201_v37 = vld [vmem:[#allocation60_spill] sm:$0xff] }
 0x654   :  { %25424 = vmatpush1.bf16.msra.mxu0 %v34071_v4  ;;  %25616 = vmatpush1.bf16.msra.mxu1 %v34072_v15 }
 0x655   :  { %25426 = vmatprep.subr.bf16.mxu0 %v34189_v41  ;;  %25618 = vmatprep.subr.bf16.mxu1 %v34190_v26 }
 0x656   :  { %9005 = vmatprep.mubr.f32.mxu0 %v33562_v5  ;;  %9860 = vmatprep.mubr.f32.mxu1 %v33562_v5 }
 0x658   :  { %25428 = vmatpush1.bf16.msra.mxu0 %v34191_v18  ;;  %25620 = vmatpush1.bf16.msra.mxu1 %v34192_v61  ;;  %v34202_v18 = vld [vmem:[#allocation147_spill] sm:$0xff]  ;;  %v34203_v61 = vld [vmem:[#allocation61_spill] sm:$0xff] }
 0x659   :  { %25430 = vmatprep.subr.bf16.mxu0 %v34193_v8  ;;  %25622 = vmatprep.subr.bf16.mxu1 %v34194_v24  ;;  %v34204_v8 = vld [vmem:[#allocation148_spill] sm:$0xff]  ;;  %v34205_v24 = vld [vmem:[#allocation63_spill] sm:$0xff] }
 0x65c   :  { %25432 = vmatpush1.bf16.msra.mxu0 %v34195_v13  ;;  %25624 = vmatpush1.bf16.msra.mxu1 %v34196_v23  ;;  %v34206_v13 = vld [vmem:[#allocation149_spill] sm:$0xff]  ;;  %v34207_v23 = vld [vmem:[#allocation66_spill] sm:$0xff] }
 0x65d   :  { %25434 = vmatprep.subr.bf16.mxu0 %v34197_v57  ;;  %25626 = vmatprep.subr.bf16.mxu1 %v34198_v58  ;;  %v34208_v57 = vld [vmem:[#allocation150_spill] sm:$0xff]  ;;  %v34209_v58 = vld [vmem:[#allocation67_spill] sm:$0xff] }
 0x660   :  { %25436 = vmatpush1.bf16.msra.mxu0 %v34199_v49  ;;  %25628 = vmatpush1.bf16.msra.mxu1 %v34200_v35  ;;  %v34210_v49 = vld [vmem:[#allocation151_spill] sm:$0xff]  ;;  %v34211_v35 = vld [vmem:[#allocation68_spill] sm:$0xff] }
 0x661   :  { %25438 = vmatprep.subr.bf16.mxu0 %v34201_v37  ;;  %25630 = vmatprep.subr.bf16.mxu1 %v34202_v18  ;;  %v34212_v37 = vld [vmem:[#allocation152_spill] sm:$0xff]  ;;  %v34213_v18 = vld [vmem:[#allocation70_spill] sm:$0xff] }
 0x664   :  { %25440 = vmatpush1.bf16.msra.mxu0 %v34203_v61  ;;  %25632 = vmatpush1.bf16.msra.mxu1 %v34204_v8  ;;  %v34214_v61 = vld [vmem:[#allocation153_spill] sm:$0xff]  ;;  %v34215_v8 = vld [vmem:[#allocation72_spill] sm:$0xff] }
 0x665   :  { %25442 = vmatprep.subr.bf16.mxu0 %v34205_v24  ;;  %25634 = vmatprep.subr.bf16.mxu1 %v34206_v13  ;;  %v34216_v24 = vld [vmem:[#allocation154_spill] sm:$0xff] }
 0x666   :  { %v34217_v13 = vld [vmem:[#allocation74_spill] sm:$0xff] }
 0x668   :  { %25444 = vmatpush1.bf16.msra.mxu0 %v34207_v23  ;;  %25636 = vmatpush1.bf16.msra.mxu1 %v34208_v57  ;;  %v34218_v23 = vld [vmem:[#allocation115_spill] sm:$0xff] }
 0x669   :  { %25446 = vmatprep.subr.bf16.mxu0 %v34209_v58  ;;  %25638 = vmatprep.subr.bf16.mxu1 %v34210_v49  ;;  %v34219_v49 = vld [vmem:[#allocation75_spill] sm:$0xff]  ;;  %v34232_v58 = vld [vmem:[#allocation158_spill] sm:$0xff] }
 0x66a   :  { %v34233_v57 = vld [vmem:[#allocation79_spill] sm:$0xff] }
 0x66c   :  { %25448 = vmatpush1.bf16.msra.mxu0 %v34211_v35  ;;  %25640 = vmatpush1.bf16.msra.mxu1 %v34212_v37  ;;  %v34220_v35 = vld [vmem:[#allocation155_spill] sm:$0xff]  ;;  %v34221_v37 = vld [vmem:[#allocation76_spill] sm:$0xff] }
 0x66d   :  { %25450 = vmatprep.subr.bf16.mxu0 %v34213_v18  ;;  %25642 = vmatprep.subr.bf16.mxu1 %v34214_v61  ;;  %v34222_v18 = vld [vmem:[#allocation156_spill] sm:$0xff]  ;;  %v34227_v61 = vld [vmem:[#allocation43_spill] sm:$0xff] }
 0x670   :  { %25452 = vmatpush1.bf16.msra.mxu0 %v34215_v8  ;;  %25644 = vmatpush1.bf16.msra.mxu1 %v34216_v24  ;;  %v34223_v24 = vld [vmem:[#allocation32_spill] sm:$0xff]  ;;  %v34226_v8 = vld [vmem:[#allocation121_spill] sm:$0xff] }
 0x671   :  { %25454 = vmatprep.subr.bf16.mxu0 %v34217_v13  ;;  %25646 = vmatprep.subr.bf16.mxu1 %v34218_v23  ;;  %v34224_v13 = vld [vmem:[#allocation30_spill] sm:$0xff]  ;;  %v34225_v23 = vld [vmem:[#allocation39_spill] sm:$0xff] }
 0x673   :  { %9007 = vmatmul.mubr.f32.vlgmr.msra.gmra.mrb[6].mxu0 %v31196_v25  ;;  %9862 = vmatmul.mubr.f32.vlgmr.msra.gmra.mrb[8].mxu1 %v31196_v25 }
 0x674   :  { %25456 = vmatpush1.bf16.msra.mxu0 %v34219_v49  ;;  %25648 = vmatpush1.bf16.msra.mxu1 %v34220_v35  ;;  %v34228_v49 = vld [vmem:[#allocation157_spill] sm:$0xff] }
 0x675   :  { %25458 = vmatprep.subr.bf16.mxu0 %v34221_v37  ;;  %25650 = vmatprep.subr.bf16.mxu1 %v34222_v18  ;;  %v34229_v35 = vld [vmem:[#allocation77_spill] sm:$0xff]  ;;  %v34230_v37 = vld [vmem:[#allocation128_spill] sm:$0xff]  ;;  %v34231_v18 = vld [vmem:[#allocation78_spill] sm:$0xff] }
 0x676   :  { %9141 = vmatprep.mubr.f32.mxu0 %v33562_v5  ;;  %9996 = vmatprep.mubr.f32.mxu1 %v33562_v5 }
 0x678   :  { %25460 = vmatpush1.bf16.msra.mxu0 %v34223_v24  ;;  %25652 = vmatpush1.bf16.msra.mxu1 %v34224_v13  ;;  %v34234_v24 = vld [vmem:[#allocation159_spill] sm:$0xff]  ;;  %v34235_v13 = vld [vmem:[#allocation80_spill] sm:$0xff] }
 0x679   :  { %25462 = vmatprep.subr.bf16.mxu0 %v34225_v23  ;;  %25654 = vmatprep.subr.bf16.mxu1 %v34226_v8  ;;  %v34236_v23 = vld [vmem:[#allocation160_spill] sm:$0xff]  ;;  %v34237_v8 = vld [vmem:[#allocation81_spill] sm:$0xff] }
 0x67c   :  { %25464 = vmatpush1.bf16.msra.mxu0 %v34227_v61  ;;  %25656 = vmatpush1.bf16.msra.mxu1 %v34228_v49 }
 0x67d   :  { %25466 = vmatprep.subr.bf16.mxu0 %v34229_v35  ;;  %25658 = vmatprep.subr.bf16.mxu1 %v34230_v37  ;;  %v34238_v35 = vld [vmem:[#allocation162_spill] sm:$0xff]  ;;  %v34239_v37 = vld [vmem:[#allocation83_spill] sm:$0xff] }
 0x680   :  { %25468 = vmatpush1.bf16.msra.mxu0 %v34231_v18  ;;  %25660 = vmatpush1.bf16.msra.mxu1 %v34232_v58  ;;  %v34240_v18 = vld [vmem:[#allocation163_spill] sm:$0xff]  ;;  %v34241_v58 = vld [vmem:[#allocation84_spill] sm:$0xff] }
 0x681   :  { %25470 = vmatprep.subr.bf16.mxu0 %v34233_v57  ;;  %25662 = vmatprep.subr.bf16.mxu1 %v34234_v24  ;;  %v34242_v57 = vld [vmem:[#allocation164_spill] sm:$0xff]  ;;  %v34243_v24 = vld [vmem:[#allocation85_spill] sm:$0xff] }
 0x684   :  { %25472 = vmatpush1.bf16.msra.mxu0 %v34235_v13  ;;  %25664 = vmatpush1.bf16.msra.mxu1 %v34236_v23  ;;  %v34244_v13 = vld [vmem:[#allocation165_spill] sm:$0xff]  ;;  %v34245_v23 = vld [vmem:[#allocation86_spill] sm:$0xff] }
 0x685   :  { %25474 = vmatprep.subr.bf16.mxu0 %v34237_v8  ;;  %25666 = vmatprep.subr.bf16.mxu1 %v34122_v9  ;;  %v34246_v8 = vld [vmem:[#allocation166_spill] sm:$0xff] }
 0x688   :  { %25476 = vmatpush1.bf16.msra.mxu0 %v34123_v12  ;;  %25668 = vmatpush1.bf16.msra.mxu1 %v34238_v35  ;;  %v34263_v35 = vld [vmem:[#allocation57_spill] sm:$0xff]  ;;  %v34287_v12 = vld [vmem:[#allocation104_spill] sm:$0xff] }
 0x689   :  { %25478 = vmatprep.subr.bf16.mxu0 %v34239_v37  ;;  %25670 = vmatprep.subr.bf16.mxu1 %v34240_v18  ;;  %v34256_v18 = vld [vmem:[#allocation116_spill] sm:$0xff] }
 0x68a   :  { %v34262_v37 = vld [vmem:[#allocation136_spill] sm:$0xff] }
 0x68c   :  { %25480 = vmatpush1.bf16.msra.mxu0 %v34241_v58  ;;  %25672 = vmatpush1.bf16.msra.mxu1 %v34242_v57  ;;  %v34252_v57 = vld [vmem:[#allocation101_spill] sm:$0xff]  ;;  %v34253_v58 = vld [vmem:[#allocation46_spill] sm:$0xff] }
 0x68d   :  { %25482 = vmatprep.subr.bf16.mxu0 %v34243_v24  ;;  %25674 = vmatprep.subr.bf16.mxu1 %v34244_v13  ;;  %v34250_v13 = vld [vmem:[#allocation100_spill] sm:$0xff]  ;;  %v34251_v24 = vld [vmem:[#allocation45_spill] sm:$0xff] }
 0x690   :  { %25484 = vmatpush1.bf16.msra.mxu0 %v34245_v23  ;;  %25676 = vmatpush1.bf16.msra.mxu1 %v34246_v8  ;;  %v34248_v8 = vld [vmem:[#allocation99_spill] sm:$0xff]  ;;  %v34249_v23 = vld [vmem:[#allocation41_spill] sm:$0xff] }
 0x691   :  { %25486 = vmatprep.subr.bf16.mxu0 %v34003_v36  ;;  %25678 = vmatprep.subr.bf16.mxu1 %v33893_v39 }
 0x693   :  { %9144 = vmatmul.mubr.f32.vlgmr.msra.gmra.mrb[6].mxu0 %v31199_v2  ;;  %9999 = vmatmul.mubr.f32.vlgmr.msra.gmra.mrb[8].mxu1 %v31199_v2  ;;  %v34247_v2 = vld [vmem:[#allocation40_spill] sm:$0xff] }
 0x694   :  { %25488 = vmatpush1.bf16.msra.mxu0 %v34004_v22  ;;  %25680 = vmatpush1.bf16.msra.mxu1 %v33895_v45 }
 0x695   :  { %25490 = vmatprep.subr.bf16.mxu0 %v34005_v30  ;;  %25682 = vmatprep.subr.bf16.mxu1 %v33896_v34 }
 0x696   :  { %9246 = vmatprep.mubr.f32.mxu0 %v33562_v5  ;;  %10101 = vmatprep.mubr.f32.mxu1 %v33562_v5 }
 0x698   :  { %25492 = vmatpush1.bf16.msra.mxu0 %v34006_v54  ;;  %25684 = vmatpush1.bf16.msra.mxu1 %v33897_v21 }
 0x699   :  { %25494 = vmatprep.subr.bf16.mxu0 %v34007_v62  ;;  %25686 = vmatprep.subr.bf16.mxu1 %v33898_v60 }
 0x69c   :  { %25496 = vmatpush1.bf16.msra.mxu0 %v34008_v56  ;;  %25688 = vmatpush1.bf16.msra.mxu1 %v33899_v55 }
 0x69d   :  { %25498 = vmatprep.subr.bf16.mxu0 %v34009_v46  ;;  %25690 = vmatprep.subr.bf16.mxu1 %v33900_v48 }
 0x6a0   :  { %25500 = vmatpush1.bf16.msra.mxu0 %v34010_v16  ;;  %25692 = vmatpush1.bf16.msra.mxu1 %v33901_v52 }
 0x6a1   :  { %25502 = vmatprep.subr.bf16.mxu0 %v34011_v19  ;;  %25694 = vmatprep.subr.bf16.mxu1 %v33902_v3 }
 0x6a4   :  { %25504 = vmatpush1.bf16.msra.mxu0 %v34012_v28  ;;  %25696 = vmatpush1.bf16.msra.mxu1 %v33903_v11 }
 0x6a5   :  { %25506 = vmatprep.subr.bf16.mxu0 %v34013_v29  ;;  %25698 = vmatprep.subr.bf16.mxu1 %v33904_v0 }
 0x6a8   :  { %25508 = vmatpush1.bf16.msra.mxu0 %v34014_v10  ;;  %25700 = vmatpush1.bf16.msra.mxu1 %v33905_v32 }
 0x6a9   :  { %25510 = vmatprep.subr.bf16.mxu0 %v34015_v38  ;;  %25702 = vmatprep.subr.bf16.mxu1 %v33906_v17 }
 0x6ac   :  { %25512 = vmatpush1.bf16.msra.mxu0 %v34016_v53  ;;  %25704 = vmatpush1.bf16.msra.mxu1 %v33907_v1 }
 0x6ad   :  { %25514 = vmatprep.subr.bf16.mxu0 %v34017_v14  ;;  %25706 = vmatprep.subr.bf16.mxu1 %v33908_v42 }
 0x6b0   :  { %25516 = vmatpush1.bf16.msra.mxu0 %v34018_v27  ;;  %25708 = vmatpush1.bf16.msra.mxu1 %v33909_v50 }
 0x6b1   :  { %25518 = vmatprep.subr.bf16.mxu0 %v34247_v2  ;;  %25710 = vmatprep.subr.bf16.mxu1 %v34248_v8  ;;  %v34254_v2 = vld [vmem:[#allocation102_spill] sm:$0xff] }
 0x6b2   :  { %v34255_v8 = vld [vmem:[#allocation50_spill] sm:$0xff] }
 0x6b3   :  { %9250 = vmatmul.mubr.f32.vlgmr.msra.gmra.mrb[6].mxu0 %v31202_v6  ;;  %10105 = vmatmul.mubr.f32.vlgmr.msra.gmra.mrb[8].mxu1 %v31202_v6  ;;  %v34257_v6 = vld [vmem:[#allocation52_spill] sm:$0xff] }
 0x6b4   :  { %25520 = vmatpush1.bf16.msra.mxu0 %v34249_v23  ;;  %25712 = vmatpush1.bf16.msra.mxu1 %v34250_v13  ;;  %v34258_v23 = vld [vmem:[#allocation117_spill] sm:$0xff]  ;;  %v34259_v13 = vld [vmem:[#allocation54_spill] sm:$0xff] }
 0x6b5   :  { %25522 = vmatprep.subr.bf16.mxu0 %v34251_v24  ;;  %25714 = vmatprep.subr.bf16.mxu1 %v34252_v57  ;;  %v34260_v24 = vld [vmem:[#allocation135_spill] sm:$0xff] }
 0x6b6   :  { %9416 = vmatprep.mubr.f32.mxu0 %v33562_v5  ;;  %10271 = vmatprep.mubr.f32.mxu1 %v33562_v5  ;;  %v34261_v57 = vld [vmem:[#allocation55_spill] sm:$0xff] }
 0x6b8   :  { %25524 = vmatpush1.bf16.msra.mxu0 %v34253_v58  ;;  %25716 = vmatpush1.bf16.msra.mxu1 %v34254_v2  ;;  %v34264_v58 = vld [vmem:[#allocation137_spill] sm:$0xff]  ;;  %v34265_v2 = vld [vmem:[#allocation59_spill] sm:$0xff] }
 0x6b9   :  { %25526 = vmatprep.subr.bf16.mxu0 %v34255_v8  ;;  %25718 = vmatprep.subr.bf16.mxu1 %v34256_v18  ;;  %v34266_v8 = vld [vmem:[#allocation138_spill] sm:$0xff] }
 0x6ba   :  { %v34267_v18 = vld [vmem:[#allocation62_spill] sm:$0xff] }
 0x6bc   :  { %25528 = vmatpush1.bf16.msra.mxu0 %v34257_v6  ;;  %25720 = vmatpush1.bf16.msra.mxu1 %v34258_v23  ;;  %v34284_v23 = vld [vmem:[#allocation111_spill] sm:$0xff] }
 0x6bd   :  { %25530 = vmatprep.subr.bf16.mxu0 %v34259_v13  ;;  %25722 = vmatprep.subr.bf16.mxu1 %v34260_v24  ;;  %v34282_v24 = vld [vmem:[#allocation108_spill] sm:$0xff]  ;;  %v34283_v13 = vld [vmem:[#allocation94_spill] sm:$0xff]  ;;  %v34285_v6 = vld [vmem:[#allocation103_spill] sm:$0xff] }
 0x6c0   :  { %25532 = vmatpush1.bf16.msra.mxu0 %v34261_v57  ;;  %25724 = vmatpush1.bf16.msra.mxu1 %v34262_v37  ;;  %v34268_v57 = vld [vmem:[#allocation141_spill] sm:$0xff] }
 0x6c1   :  { %25534 = vmatprep.subr.bf16.mxu0 %v34263_v35  ;;  %25726 = vmatprep.subr.bf16.mxu1 %v34264_v58  ;;  %v34269_v37 = vld [vmem:[#allocation69_spill] sm:$0xff]  ;;  %v34270_v35 = vld [vmem:[#allocation142_spill] sm:$0xff]  ;;  %v34271_v58 = vld [vmem:[#allocation71_spill] sm:$0xff] }
 0x6c4   :  { %25536 = vmatpush1.bf16.msra.mxu0 %v34265_v2  ;;  %25728 = vmatpush1.bf16.msra.mxu1 %v34266_v8  ;;  %v34272_v2 = vld [vmem:[#allocation143_spill] sm:$0xff]  ;;  %v34273_v8 = vld [vmem:[#allocation73_spill] sm:$0xff] }
 0x6c5   :  { %25538 = vmatprep.subr.bf16.mxu0 %v34267_v18  ;;  %25730 = vmatprep.subr.bf16.mxu1 %v34154_v59  ;;  %v34274_v18 = vld [vmem:[#allocation144_spill] sm:$0xff]  ;;  %v34280_v59 = vld [vmem:[#allocation105_spill] sm:$0xff] }
 0x6c8   :  { %25540 = vmatpush1.bf16.msra.mxu0 %v34155_v47  ;;  %25732 = vmatpush1.bf16.msra.mxu1 %v34156_v7  ;;  %v34278_v7 = vld [vmem:[#allocation97_spill] sm:$0xff]  ;;  %v34279_v47 = vld [vmem:[#allocation90_spill] sm:$0xff] }
 0x6c9   :  { %25542 = vmatprep.subr.bf16.mxu0 %v34157_v31  ;;  %25734 = vmatprep.subr.bf16.mxu1 %v34268_v57  ;;  %v34277_v57 = vld [vmem:[#allocation31_spill] sm:$0xff] }
 0x6cc   :  { %25544 = vmatpush1.bf16.msra.mxu0 %v34269_v37  ;;  %25736 = vmatpush1.bf16.msra.mxu1 %v34270_v35  ;;  %v34275_v35 = vld [vmem:[#allocation87_spill] sm:$0xff]  ;;  %v34276_v37 = vld [vmem:[#allocation93_spill] sm:$0xff] }
 0x6cd   :  { %25546 = vmatprep.subr.bf16.mxu0 %v34271_v58  ;;  %25738 = vmatprep.subr.bf16.mxu1 %v34272_v2 }
 0x6d0   :  { %25548 = vmatpush1.bf16.msra.mxu0 %v34273_v8  ;;  %25740 = vmatpush1.bf16.msra.mxu1 %v34274_v18  ;;  %v23610_v18 = vld [vmem:[%s33080_s0 + $0x6] sm:$0x3] }
 0x6d1   :  { %25550 = vmatprep.subr.bf16.mxu0 %v34003_v36  ;;  %25742 = vmatprep.subr.bf16.mxu1 %v33893_v39  ;;  %v10384_v8 = vsel %vm1892_vm0, %v23610_v18, 0 }
 0x6d2   :  { %v31376_v2 = vand.u32 4294901760, %v10384_v8 }
 0x6d3   :  { %9418 = vmatmul.mubr.f32.vlgmr.msra.gmra.mrb[6].mxu0 %v31196_v25  ;;  %10273 = vmatmul.mubr.f32.vlgmr.msra.gmra.mrb[8].mxu1 %v31196_v25 }
 0x6d4   :  { %25552 = vmatpush1.bf16.msra.mxu0 %v34004_v22  ;;  %25744 = vmatpush1.bf16.msra.mxu1 %v33895_v45  ;;  %v10460_v58 = vsub.f32 %v10384_v8, %v31376_v2 }
 0x6d5   :  { %25554 = vmatprep.subr.bf16.mxu0 %v34005_v30  ;;  %25746 = vmatprep.subr.bf16.mxu1 %v33896_v34 }
 0x6d6   :  { %9520 = vmatprep.mubr.f32.mxu0 %v33562_v5  ;;  %10375 = vmatprep.mubr.f32.mxu1 %v33562_v5  ;;  %v10461_v18 = vand.u32 4294901760, %v10460_v58 }
 0x6d8   :  { %25556 = vmatpush1.bf16.msra.mxu0 %v34006_v54  ;;  %25748 = vmatpush1.bf16.msra.mxu1 %v33897_v21  ;;  %v10462_v8 = vsub.f32 %v10460_v58, %v10461_v18 }
 0x6d9   :  { %25558 = vmatprep.subr.bf16.mxu0 %v34007_v62  ;;  %25750 = vmatprep.subr.bf16.mxu1 %v33898_v60 }
 0x6da   :  { %v10463_v31 = vand.u32 4294901760, %v10462_v8  ;;  %v34286_v8 = vld [vmem:[#allocation122_spill] sm:$0xff] }
 0x6dc   :  { %25560 = vmatpush1.bf16.msra.mxu0 %v34008_v56  ;;  %25752 = vmatpush1.bf16.msra.mxu1 %v33899_v55 }
 0x6dd   :  { %25562 = vmatprep.subr.bf16.mxu0 %v34009_v46  ;;  %25754 = vmatprep.subr.bf16.mxu1 %v33900_v48 }
 0x6e0   :  { %25564 = vmatpush1.bf16.msra.mxu0 %v34010_v16  ;;  %25756 = vmatpush1.bf16.msra.mxu1 %v33901_v52 }
 0x6e1   :  { %25566 = vmatprep.subr.bf16.mxu0 %v34011_v19  ;;  %25758 = vmatprep.subr.bf16.mxu1 %v33902_v3 }
 0x6e4   :  { %25568 = vmatpush1.bf16.msra.mxu0 %v34012_v28  ;;  %25760 = vmatpush1.bf16.msra.mxu1 %v33903_v11 }
 0x6e5   :  { %25570 = vmatprep.subr.bf16.mxu0 %v34013_v29  ;;  %25762 = vmatprep.subr.bf16.mxu1 %v33904_v0 }
 0x6e8   :  { %25572 = vmatpush1.bf16.msra.mxu0 %v34014_v10  ;;  %25764 = vmatpush1.bf16.msra.mxu1 %v33905_v32 }
 0x6e9   :  { %25574 = vmatprep.subr.bf16.mxu0 %v34015_v38  ;;  %25766 = vmatprep.subr.bf16.mxu1 %v33906_v17 }
 0x6ec   :  { %25576 = vmatpush1.bf16.msra.mxu0 %v34016_v53  ;;  %25768 = vmatpush1.bf16.msra.mxu1 %v33907_v1 }
 0x6ed   :  { %25578 = vmatprep.subr.bf16.mxu0 %v34017_v14  ;;  %25770 = vmatprep.subr.bf16.mxu1 %v33908_v42 }
 0x6f0   :  { %25580 = vmatpush1.bf16.msra.mxu0 %v34018_v27  ;;  %25772 = vmatpush1.bf16.msra.mxu1 %v33909_v50 }
 0x6f1   :  { %25774 = vmatprep.subr.bf16.mxu0 %v34051_v44  ;;  %25822 = vmatprep.subr.bf16.mxu1 %v30433_v40 }
 0x6f3   :  { %9522 = vmatmul.mubr.f32.vlgmr.msra.gmra.mrb[6].mxu0 %v31196_v25  ;;  %10377 = vmatmul.mubr.f32.vlgmr.msra.gmra.mrb[8].mxu1 %v31196_v25  ;;  %v34281_v25 = vld [vmem:[#allocation92_spill] sm:$0xff] }
 0x6f4   :  { %25776 = vmatpush1.bf16.msra.mxu0 %v34052_v43  ;;  %25824 = vmatpush1.bf16.msra.mxu1 %v34275_v35 }
 0x6f5   :  { %25778 = vmatprep.subr.bf16.mxu0 %v34276_v37  ;;  %25826 = vmatprep.subr.bf16.mxu1 %v34277_v57 }
 0x6f6   :  { %10458 = vmatprep.mubr.f32.mxu0 %v33562_v5  ;;  %11001 = vmatprep.mubr.f32.mxu1 %v33562_v5 }
 0x6f8   :  { %25780 = vmatpush1.bf16.msra.mxu0 %v34278_v7  ;;  %25828 = vmatpush1.bf16.msra.mxu1 %v34279_v47 }
 0x6f9   :  { %25782 = vmatprep.subr.bf16.mxu0 %v34280_v59  ;;  %25830 = vmatprep.subr.bf16.mxu1 %v34281_v25  ;;  %v34288_v59 = vld [vmem:[#allocation110_spill] sm:$0xff] }
 0x6fa   :  { %v34289_v25 = vld [vmem:[#allocation106_spill] sm:$0xff] }
 0x6fb   :  { %10464 = vmatmul.mubr.f32.vlgmr.msra.gmra.mrb[6].mxu0 %v10463_v31  ;;  %11007 = vmatmul.mubr.f32.vlgmr.msra.gmra.mrb[8].mxu1 %v10463_v31  ;;  %v34290_v31 = vld [vmem:[#allocation114_spill] sm:$0xff] }
 0x6fc   :  { %25784 = vmatpush1.bf16.msra.mxu0 %v34282_v24  ;;  %25832 = vmatpush1.bf16.msra.mxu1 %v34283_v13  ;;  %v34293_v13 = vld [vmem:[#allocation112_spill] sm:$0xff] }
 0x6fd   :  { %25786 = vmatprep.subr.bf16.mxu0 %v34284_v23  ;;  %25834 = vmatprep.subr.bf16.mxu1 %v34285_v6  ;;  %v34291_v23 = vld [vmem:[#allocation109_spill] sm:$0xff]  ;;  %v34292_v6 = vld [vmem:[#allocation118_spill] sm:$0xff] }
 0x6fe   :  { %10574 = vmatprep.mubr.f32.mxu0 %v33562_v5  ;;  %11117 = vmatprep.mubr.f32.mxu1 %v33562_v5 }
 0x700   :  { %25788 = vmatpush1.bf16.msra.mxu0 %v34286_v8  ;;  %25836 = vmatpush1.bf16.msra.mxu1 %v34287_v12  ;;  %v34294_v12 = vld [vmem:[#allocation120_spill] sm:$0xff] }
 0x701   :  { %25790 = vmatprep.subr.bf16.mxu0 %v34288_v59  ;;  %25838 = vmatprep.subr.bf16.mxu1 %v34289_v25  ;;  %v34295_v59 = vld [vmem:[#allocation113_spill] sm:$0xff] }
 0x702   :  { %v34303_v25 = vld [vmem:[#allocation125_spill] sm:$0xff] }
 0x703   :  { %10576 = vmatmul.mubr.f32.vlgmr.msra.gmra.mrb[6].mxu0 %v31376_v2  ;;  %11119 = vmatmul.mubr.f32.vlgmr.msra.gmra.mrb[8].mxu1 %v31376_v2 }
 0x704   :  { %25792 = vmatpush1.bf16.msra.mxu0 %v34290_v31  ;;  %25840 = vmatpush1.bf16.msra.mxu1 %v34291_v23  ;;  %v34301_v23 = vld [vmem:[#allocation124_spill] sm:$0xff]  ;;  %v34302_v31 = vld [vmem:[#allocation47_spill] sm:$0xff] }
 0x705   :  { %25794 = vmatprep.subr.bf16.mxu0 %v34292_v6  ;;  %25842 = vmatprep.subr.bf16.mxu1 %v34293_v13  ;;  %v34299_v13 = vld [vmem:[#allocation123_spill] sm:$0xff]  ;;  %v34300_v6 = vld [vmem:[#allocation132_spill] sm:$0xff] }
 0x706   :  { %10662 = vmatprep.mubr.f32.mxu0 %v33562_v5  ;;  %11205 = vmatprep.mubr.f32.mxu1 %v33562_v5 }
 0x708   :  { %25796 = vmatpush1.bf16.msra.mxu0 %v34294_v12  ;;  %25844 = vmatpush1.bf16.msra.mxu1 %v34295_v59  ;;  %v34296_v59 = vld [vmem:[#allocation127_spill] sm:$0xff] }
 0x709   :  { %25798 = vmatprep.subr.bf16.mxu0 %v34051_v44  ;;  %25846 = vmatprep.subr.bf16.mxu1 %v30433_v40  ;;  %v34297_v12 = vld [vmem:[#allocation119_spill] sm:$0xff] }
 0x70b   :  { %10665 = vmatmul.mubr.f32.vlgmr.msra.gmra.mrb[6].mxu0 %v10460_v58  ;;  %11208 = vmatmul.mubr.f32.vlgmr.msra.gmra.mrb[8].mxu1 %v10460_v58  ;;  %v34298_v58 = vld [vmem:[#allocation130_spill] sm:$0xff] }
 0x70c   :  { %25800 = vmatpush1.bf16.msra.mxu0 %v34052_v43  ;;  %25848 = vmatpush1.bf16.msra.mxu1 %v34275_v35 }
 0x70d   :  { %25802 = vmatprep.subr.bf16.mxu0 %v34276_v37  ;;  %25850 = vmatprep.subr.bf16.mxu1 %v34277_v57 }
 0x70e   :  { %10743 = vmatprep.mubr.f32.mxu0 %v33562_v5  ;;  %11286 = vmatprep.mubr.f32.mxu1 %v33562_v5 }
 0x710   :  { %25804 = vmatpush1.bf16.msra.mxu0 %v34278_v7  ;;  %25852 = vmatpush1.bf16.msra.mxu1 %v34279_v47 }
 0x711   :  { %25806 = vmatprep.subr.bf16.mxu0 %v34296_v59  ;;  %25854 = vmatprep.subr.bf16.mxu1 %v34297_v12 }
 0x713   :  { %10747 = vmatmul.mubr.f32.vlgmr.msra.gmra.mrb[6].mxu0 %v10461_v18  ;;  %11290 = vmatmul.mubr.f32.vlgmr.msra.gmra.mrb[8].mxu1 %v10461_v18  ;;  %v34305_v18 = vld [vmem:[#allocation131_spill] sm:$0xff] }
 0x714   :  { %25808 = vmatpush1.bf16.msra.mxu0 %v34298_v58  ;;  %25856 = vmatpush1.bf16.msra.mxu1 %v34299_v13 }
 0x715   :  { %25810 = vmatprep.subr.bf16.mxu0 %v34300_v6  ;;  %25858 = vmatprep.subr.bf16.mxu1 %v34301_v23  ;;  %v34306_v23 = vld [vmem:[#allocation129_spill] sm:$0xff] }
 0x716   :  { %10841 = vmatprep.mubr.f32.mxu0 %v33562_v5  ;;  %11384 = vmatprep.mubr.f32.mxu1 %v33562_v5 }
 0x718   :  { %25812 = vmatpush1.bf16.msra.mxu0 %v34302_v31  ;;  %25860 = vmatpush1.bf16.msra.mxu1 %v34303_v25 }
 0x719   :  { %25814 = vmatprep.subr.bf16.mxu0 %v34051_v44  ;;  %25862 = vmatprep.subr.bf16.mxu1 %v30433_v40 }
 0x71b   :  { %10843 = vmatmul.mubr.f32.vlgmr.msra.gmra.mrb[6].mxu0 %v31376_v2  ;;  %11386 = vmatmul.mubr.f32.vlgmr.msra.gmra.mrb[8].mxu1 %v31376_v2 }
 0x71c   :  { %25816 = vmatpush1.bf16.msra.mxu0 %v34052_v43  ;;  %25864 = vmatpush1.bf16.msra.mxu1 %v34275_v35 }
 0x71d   :  { %25818 = vmatprep.subr.bf16.mxu0 %v34276_v37  ;;  %25866 = vmatprep.subr.bf16.mxu1 %v34277_v57 }
 0x71e   :  { %10921 = vmatprep.mubr.f32.mxu0 %v33562_v5  ;;  %11464 = vmatprep.mubr.f32.mxu1 %v33562_v5 }
 0x720   :  { %25820 = vmatpush1.bf16.msra.mxu0 %v34278_v7  ;;  %25868 = vmatpush1.bf16.msra.mxu1 %v34279_v47 }
 0x721   :  { %25870 = vmatprep.subr.bf16.mxu0 %v34003_v36  ;;  %26062 = vmatprep.subr.bf16.mxu1 %v33893_v39 }
 0x723   :  { %10923 = vmatmul.mubr.f32.vlgmr.msra.gmra.mrb[6].mxu0 %v31376_v2  ;;  %11466 = vmatmul.mubr.f32.vlgmr.msra.gmra.mrb[8].mxu1 %v31376_v2  ;;  %v34304_v2 = vld [vmem:[#allocation42_spill] sm:$0xff] }
 0x724   :  { %25872 = vmatpush1.bf16.msra.mxu0 %v34004_v22  ;;  %26064 = vmatpush1.bf16.msra.mxu1 %v33895_v45 }
 0x725   :  { %25874 = vmatprep.subr.bf16.mxu0 %v34005_v30  ;;  %26066 = vmatprep.subr.bf16.mxu1 %v33896_v34 }
 0x726   :  { %11599 = vmatprep.mubr.f32.mxu0 %v33562_v5  ;;  %12454 = vmatprep.mubr.f32.mxu1 %v33562_v5 }
 0x728   :  { %25876 = vmatpush1.bf16.msra.mxu0 %v34006_v54  ;;  %26068 = vmatpush1.bf16.msra.mxu1 %v33897_v21 }
 0x729   :  { %25878 = vmatprep.subr.bf16.mxu0 %v34007_v62  ;;  %26070 = vmatprep.subr.bf16.mxu1 %v33898_v60 }
 0x72c   :  { %25880 = vmatpush1.bf16.msra.mxu0 %v34008_v56  ;;  %26072 = vmatpush1.bf16.msra.mxu1 %v33899_v55 }
 0x72d   :  { %25882 = vmatprep.subr.bf16.mxu0 %v34009_v46  ;;  %26074 = vmatprep.subr.bf16.mxu1 %v33900_v48 }
 0x730   :  { %25884 = vmatpush1.bf16.msra.mxu0 %v34010_v16  ;;  %26076 = vmatpush1.bf16.msra.mxu1 %v33901_v52 }
 0x731   :  { %25886 = vmatprep.subr.bf16.mxu0 %v34011_v19  ;;  %26078 = vmatprep.subr.bf16.mxu1 %v33902_v3 }
 0x734   :  { %25888 = vmatpush1.bf16.msra.mxu0 %v34012_v28  ;;  %26080 = vmatpush1.bf16.msra.mxu1 %v33903_v11 }
 0x735   :  { %25890 = vmatprep.subr.bf16.mxu0 %v34013_v29  ;;  %26082 = vmatprep.subr.bf16.mxu1 %v33904_v0 }
 0x738   :  { %25892 = vmatpush1.bf16.msra.mxu0 %v34014_v10  ;;  %26084 = vmatpush1.bf16.msra.mxu1 %v33905_v32 }
 0x739   :  { %25894 = vmatprep.subr.bf16.mxu0 %v34015_v38  ;;  %26086 = vmatprep.subr.bf16.mxu1 %v33906_v17 }
 0x73c   :  { %25896 = vmatpush1.bf16.msra.mxu0 %v34016_v53  ;;  %26088 = vmatpush1.bf16.msra.mxu1 %v33907_v1 }
 0x73d   :  { %25898 = vmatprep.subr.bf16.mxu0 %v34017_v14  ;;  %26090 = vmatprep.subr.bf16.mxu1 %v33908_v42 }
 0x740   :  { %25900 = vmatpush1.bf16.msra.mxu0 %v34018_v27  ;;  %26092 = vmatpush1.bf16.msra.mxu1 %v33909_v50 }
 0x741   :  { %25902 = vmatprep.subr.bf16.mxu0 %v34304_v2  ;;  %26094 = vmatprep.subr.bf16.mxu1 %v34305_v18 }
 0x7f6   :  { %v10924_v25 = vpop.f32.mrb[6].mxu0  ;;  %v11467_v31 = vpop.f32.mrb[8].mxu1 }
 0x7f7   :  { %v11472_v6 = vadd.f32 %v10924_v25, %v34306_v23  ;;  %v10926_v13 = vpop.f32.mrb[7].mxu0  ;;  %v11469_v58 = vpop.f32.mrb[9].mxu1  ;;  %v11474_v7 = vadd.f32 %v11467_v31, %v30574_v63 }
 0x7f8   :  { %v11473_v12 = vadd.f32 %v10926_v13, %v34188_v20  ;;  %v11475_v24 = vadd.f32 %v11469_v58, %v30576_v33 }
 0x7f9   :  { %v23611_v59 = vmul.f32 -1.442695, %v11472_v6 }
 0x7fa   :  { %v23612_v8 = vmul.f32 -1.442695, %v11473_v12  ;;  %v23613_v47 = vmul.f32 -1.442695, %v11475_v24 }
 0x7fb   :  { %28405 = vpow2.f32 %v23611_v59 }
 0x7fc   :  { %28407 = vpow2.f32 %v23612_v8 }
 0x7fd   :  { %28409 = vpow2.f32 %v23613_v47 }
 0x7fe   :  { %28411 = vtanh.f32 %v11474_v7 }
 0x805   :  { %v28406_v2 = vpop.eup %28405 }
 0x806   :  { %v28408_v57 = vpop.eup %28407  ;;  %v11479_v18 = vadd.f32 1.0, %v28406_v2  ;;  %v34307_v2 = vld [vmem:[#allocation49_spill] sm:$0xff] }
 0x807   :  { %v11485_v37 = vadd.f32 1.0, %v28408_v57  ;;  %v28410_v25 = vpop.eup %28409 }
 0x808   :  { %28413 = vrcp.f32 %v11479_v18  ;;  %v28412_v23 = vpop.eup %28411  ;;  %v11492_v59 = vadd.f32 1.0, %v28410_v25  ;;  %v34308_v18 = vld [vmem:[#allocation95_spill] sm:$0xff] }
 0x809   :  { %28415 = vrcp.f32 %v11485_v37  ;;  %v34309_v25 = vld [vmem:[#allocation51_spill] sm:$0xff] }
 0x80a   :  { %28417 = vrcp.f32 %v11492_v59  ;;  %v34313_v59 = vld [vmem:[#allocation56_spill] sm:$0xff] }
 0x812   :  { %v28414_v13 = vpop.eup %28413 }
 0x813   :  { %v28416_v6 = vpop.eup %28415  ;;  %v11496_v12 = vmul.f32 %v28414_v13, %v28412_v23  ;;  %v34310_v13 = vld [vmem:[#allocation96_spill] sm:$0xff] }
 0x814   :  { %v11495_v8 = vmul.f32 %v28416_v6, %v31193_v51  ;;  %v28418_v24 = vpop.eup %28417  ;;  %v34311_v6 = vld [vmem:[#allocation53_spill] sm:$0xff] }
 0x816   :  { %v31498_v58 = vadd.f32 %v11496_v12, %v11495_v8  ;;  %v34312_v12 = vld [vmem:[#allocation98_spill] sm:$0xff]  ;;  %v34314_v8 = vld [vmem:[#allocation145_spill] sm:$0xff] }
 0x818   :  { %28419 = vtanh.f32 %v31498_v58 }
 0x822   :  { %v28420_v31 = vpop.eup %28419 }
 0x823   :  { %v11499_v47 = vmul.f32 %v28420_v31, %v28418_v24  ;;  %v34315_v24 = vld [vmem:[#allocation58_spill] sm:$0xff] }
 0x824   :  { %v34316_v31 = vld [vmem:[#allocation146_spill] sm:$0xff] }
 0x825   :  { %11500 = vst [vmem:[#allocation8 + $0x6] sm:$0x3] %v11499_v47  ;;  %v31501_v7 = vand.u32 4294901760, %v11499_v47 }
 0x827   :  { %v31504_v57 = vsub.f32 %v11499_v47, %v31501_v7  ;;  %v34317_v47 = vld [vmem:[#allocation60_spill] sm:$0xff] }
 0x829   :  { %v31507_v37 = vand.u32 4294901760, %v31504_v57 }
 0x82b   :  { %v11603_v51 = vsub.f32 %v31504_v57, %v31507_v37 }
 0x82d   :  { %v11604_v23 = vand.u32 4294901760, %v11603_v51  ;;  %v34318_v51 = vld [vmem:[#allocation147_spill] sm:$0xff] }
 0x82f   :  { %11605 = vmatmul.mubr.f32.vlgmr.msra.gmra.mrb[8].mxu0 %v11604_v23  ;;  %12460 = vmatmul.mubr.f32.vlgmr.msra.gmra.mrb[10].mxu1 %v11604_v23  ;;  %v34319_v23 = vld [vmem:[#allocation61_spill] sm:$0xff] }
 0x830   :  { %25904 = vmatpush1.bf16.msra.mxu0 %v34071_v4  ;;  %26096 = vmatpush1.bf16.msra.mxu1 %v34072_v15 }
 0x831   :  { %25906 = vmatprep.subr.bf16.mxu0 %v34189_v41  ;;  %26098 = vmatprep.subr.bf16.mxu1 %v34190_v26 }
 0x832   :  { %11835 = vmatprep.mubr.f32.mxu0 %v33562_v5  ;;  %12690 = vmatprep.mubr.f32.mxu1 %v33562_v5 }
 0x834   :  { %25908 = vmatpush1.bf16.msra.mxu0 %v34307_v2  ;;  %26100 = vmatpush1.bf16.msra.mxu1 %v34308_v18 }
 0x835   :  { %25910 = vmatprep.subr.bf16.mxu0 %v34309_v25  ;;  %26102 = vmatprep.subr.bf16.mxu1 %v34310_v13  ;;  %v34320_v25 = vld [vmem:[#allocation148_spill] sm:$0xff]  ;;  %v34321_v13 = vld [vmem:[#allocation63_spill] sm:$0xff] }
 0x838   :  { %25912 = vmatpush1.bf16.msra.mxu0 %v34311_v6  ;;  %26104 = vmatpush1.bf16.msra.mxu1 %v34312_v12  ;;  %v34322_v6 = vld [vmem:[#allocation149_spill] sm:$0xff]  ;;  %v34323_v12 = vld [vmem:[#allocation66_spill] sm:$0xff] }
 0x839   :  { %25914 = vmatprep.subr.bf16.mxu0 %v34313_v59  ;;  %26106 = vmatprep.subr.bf16.mxu1 %v34314_v8  ;;  %v34324_v59 = vld [vmem:[#allocation150_spill] sm:$0xff]  ;;  %v34325_v8 = vld [vmem:[#allocation67_spill] sm:$0xff] }
 0x83c   :  { %25916 = vmatpush1.bf16.msra.mxu0 %v34315_v24  ;;  %26108 = vmatpush1.bf16.msra.mxu1 %v34316_v31  ;;  %v34326_v24 = vld [vmem:[#allocation151_spill] sm:$0xff]  ;;  %v34327_v31 = vld [vmem:[#allocation68_spill] sm:$0xff] }
 0x83d   :  { %25918 = vmatprep.subr.bf16.mxu0 %v34317_v47  ;;  %26110 = vmatprep.subr.bf16.mxu1 %v34318_v51  ;;  %v34328_v47 = vld [vmem:[#allocation152_spill] sm:$0xff]  ;;  %v34329_v51 = vld [vmem:[#allocation70_spill] sm:$0xff] }
 0x840   :  { %25920 = vmatpush1.bf16.msra.mxu0 %v34319_v23  ;;  %26112 = vmatpush1.bf16.msra.mxu1 %v34320_v25  ;;  %v34330_v23 = vld [vmem:[#allocation153_spill] sm:$0xff]  ;;  %v34331_v25 = vld [vmem:[#allocation72_spill] sm:$0xff] }
 0x841   :  { %25922 = vmatprep.subr.bf16.mxu0 %v34321_v13  ;;  %26114 = vmatprep.subr.bf16.mxu1 %v34322_v6  ;;  %v34332_v13 = vld [vmem:[#allocation154_spill] sm:$0xff] }
 0x842   :  { %v34333_v6 = vld [vmem:[#allocation74_spill] sm:$0xff] }
 0x844   :  { %25924 = vmatpush1.bf16.msra.mxu0 %v34323_v12  ;;  %26116 = vmatpush1.bf16.msra.mxu1 %v34324_v59  ;;  %v34334_v12 = vld [vmem:[#allocation115_spill] sm:$0xff] }
 0x845   :  { %25926 = vmatprep.subr.bf16.mxu0 %v34325_v8  ;;  %26118 = vmatprep.subr.bf16.mxu1 %v34326_v24  ;;  %v34335_v24 = vld [vmem:[#allocation75_spill] sm:$0xff]  ;;  %v34405_v8 = vld [vmem:[#allocation104_spill] sm:$0xff] }
 0x848   :  { %25928 = vmatpush1.bf16.msra.mxu0 %v34327_v31  ;;  %26120 = vmatpush1.bf16.msra.mxu1 %v34328_v47  ;;  %v34336_v31 = vld [vmem:[#allocation155_spill] sm:$0xff]  ;;  %v34337_v47 = vld [vmem:[#allocation76_spill] sm:$0xff] }
 0x849   :  { %25930 = vmatprep.subr.bf16.mxu0 %v34329_v51  ;;  %26122 = vmatprep.subr.bf16.mxu1 %v34330_v23  ;;  %v34338_v51 = vld [vmem:[#allocation156_spill] sm:$0xff]  ;;  %v34347_v23 = vld [vmem:[#allocation79_spill] sm:$0xff] }
 0x84c   :  { %25932 = vmatpush1.bf16.msra.mxu0 %v34331_v25  ;;  %26124 = vmatpush1.bf16.msra.mxu1 %v34332_v13  ;;  %v34339_v13 = vld [vmem:[#allocation32_spill] sm:$0xff]  ;;  %v34342_v25 = vld [vmem:[#allocation121_spill] sm:$0xff] }
 0x84d   :  { %25934 = vmatprep.subr.bf16.mxu0 %v34333_v6  ;;  %26126 = vmatprep.subr.bf16.mxu1 %v34334_v12  ;;  %v34340_v6 = vld [vmem:[#allocation30_spill] sm:$0xff]  ;;  %v34341_v12 = vld [vmem:[#allocation39_spill] sm:$0xff] }
 0x84f   :  { %11837 = vmatmul.mubr.f32.vlgmr.msra.gmra.mrb[8].mxu0 %v31501_v7  ;;  %12692 = vmatmul.mubr.f32.vlgmr.msra.gmra.mrb[10].mxu1 %v31501_v7 }
 0x850   :  { %25936 = vmatpush1.bf16.msra.mxu0 %v34335_v24  ;;  %26128 = vmatpush1.bf16.msra.mxu1 %v34336_v31  ;;  %v34343_v31 = vld [vmem:[#allocation77_spill] sm:$0xff]  ;;  %v34346_v24 = vld [vmem:[#allocation158_spill] sm:$0xff] }
 0x851   :  { %25938 = vmatprep.subr.bf16.mxu0 %v34337_v47  ;;  %26130 = vmatprep.subr.bf16.mxu1 %v34338_v51  ;;  %v34344_v47 = vld [vmem:[#allocation128_spill] sm:$0xff]  ;;  %v34345_v51 = vld [vmem:[#allocation78_spill] sm:$0xff] }
 0x852   :  { %11971 = vmatprep.mubr.f32.mxu0 %v33562_v5  ;;  %12826 = vmatprep.mubr.f32.mxu1 %v33562_v5 }
 0x854   :  { %25940 = vmatpush1.bf16.msra.mxu0 %v34339_v13  ;;  %26132 = vmatpush1.bf16.msra.mxu1 %v34340_v6  ;;  %v34348_v13 = vld [vmem:[#allocation159_spill] sm:$0xff]  ;;  %v34349_v6 = vld [vmem:[#allocation80_spill] sm:$0xff] }
 0x855   :  { %25942 = vmatprep.subr.bf16.mxu0 %v34341_v12  ;;  %26134 = vmatprep.subr.bf16.mxu1 %v34342_v25  ;;  %v34350_v12 = vld [vmem:[#allocation160_spill] sm:$0xff]  ;;  %v34351_v25 = vld [vmem:[#allocation81_spill] sm:$0xff] }
 0x858   :  { %25944 = vmatpush1.bf16.msra.mxu0 %v34227_v61  ;;  %26136 = vmatpush1.bf16.msra.mxu1 %v34228_v49  ;;  %v34352_v49 = vld [vmem:[#allocation82_spill] sm:$0xff]  ;;  %v34403_v61 = vld [vmem:[#allocation103_spill] sm:$0xff] }
 0x859   :  { %25946 = vmatprep.subr.bf16.mxu0 %v34343_v31  ;;  %26138 = vmatprep.subr.bf16.mxu1 %v34344_v47  ;;  %v34353_v31 = vld [vmem:[#allocation162_spill] sm:$0xff]  ;;  %v34354_v47 = vld [vmem:[#allocation83_spill] sm:$0xff] }
 0x85c   :  { %25948 = vmatpush1.bf16.msra.mxu0 %v34345_v51  ;;  %26140 = vmatpush1.bf16.msra.mxu1 %v34346_v24  ;;  %v34355_v51 = vld [vmem:[#allocation163_spill] sm:$0xff]  ;;  %v34356_v24 = vld [vmem:[#allocation84_spill] sm:$0xff] }
 0x85d   :  { %25950 = vmatprep.subr.bf16.mxu0 %v34347_v23  ;;  %26142 = vmatprep.subr.bf16.mxu1 %v34348_v13  ;;  %v34357_v23 = vld [vmem:[#allocation164_spill] sm:$0xff]  ;;  %v34358_v13 = vld [vmem:[#allocation85_spill] sm:$0xff] }
 0x860   :  { %25952 = vmatpush1.bf16.msra.mxu0 %v34349_v6  ;;  %26144 = vmatpush1.bf16.msra.mxu1 %v34350_v12  ;;  %v34359_v6 = vld [vmem:[#allocation165_spill] sm:$0xff]  ;;  %v34360_v12 = vld [vmem:[#allocation86_spill] sm:$0xff] }
 0x861   :  { %25954 = vmatprep.subr.bf16.mxu0 %v34351_v25  ;;  %26146 = vmatprep.subr.bf16.mxu1 %v34122_v9  ;;  %v34361_v25 = vld [vmem:[#allocation166_spill] sm:$0xff]  ;;  %v34402_v9 = vld [vmem:[#allocation111_spill] sm:$0xff] }
 0x864   :  { %25956 = vmatpush1.bf16.msra.mxu0 %v34352_v49  ;;  %26148 = vmatpush1.bf16.msra.mxu1 %v34353_v31  ;;  %v34378_v31 = vld [vmem:[#allocation57_spill] sm:$0xff]  ;;  %v34401_v49 = vld [vmem:[#allocation94_spill] sm:$0xff] }
 0x865   :  { %25958 = vmatprep.subr.bf16.mxu0 %v34354_v47  ;;  %26150 = vmatprep.subr.bf16.mxu1 %v34355_v51  ;;  %v34371_v51 = vld [vmem:[#allocation116_spill] sm:$0xff] }
 0x866   :  { %v34377_v47 = vld [vmem:[#allocation136_spill] sm:$0xff] }
 0x868   :  { %25960 = vmatpush1.bf16.msra.mxu0 %v34356_v24  ;;  %26152 = vmatpush1.bf16.msra.mxu1 %v34357_v23  ;;  %v34367_v23 = vld [vmem:[#allocation101_spill] sm:$0xff]  ;;  %v34368_v24 = vld [vmem:[#allocation46_spill] sm:$0xff] }
 0x869   :  { %25962 = vmatprep.subr.bf16.mxu0 %v34358_v13  ;;  %26154 = vmatprep.subr.bf16.mxu1 %v34359_v6  ;;  %v34365_v6 = vld [vmem:[#allocation100_spill] sm:$0xff]  ;;  %v34366_v13 = vld [vmem:[#allocation45_spill] sm:$0xff] }
 0x86c   :  { %25964 = vmatpush1.bf16.msra.mxu0 %v34360_v12  ;;  %26156 = vmatpush1.bf16.msra.mxu1 %v34361_v25  ;;  %v34363_v25 = vld [vmem:[#allocation99_spill] sm:$0xff]  ;;  %v34364_v12 = vld [vmem:[#allocation41_spill] sm:$0xff] }
 0x86d   :  { %25966 = vmatprep.subr.bf16.mxu0 %v34003_v36  ;;  %26158 = vmatprep.subr.bf16.mxu1 %v33893_v39 }
 0x86f   :  { %11974 = vmatmul.mubr.f32.vlgmr.msra.gmra.mrb[8].mxu0 %v31504_v57  ;;  %12829 = vmatmul.mubr.f32.vlgmr.msra.gmra.mrb[10].mxu1 %v31504_v57  ;;  %v34362_v57 = vld [vmem:[#allocation40_spill] sm:$0xff] }
 0x870   :  { %25968 = vmatpush1.bf16.msra.mxu0 %v34004_v22  ;;  %26160 = vmatpush1.bf16.msra.mxu1 %v33895_v45 }
 0x871   :  { %25970 = vmatprep.subr.bf16.mxu0 %v34005_v30  ;;  %26162 = vmatprep.subr.bf16.mxu1 %v33896_v34 }
 0x872   :  { %12076 = vmatprep.mubr.f32.mxu0 %v33562_v5  ;;  %12931 = vmatprep.mubr.f32.mxu1 %v33562_v5 }
 0x874   :  { %25972 = vmatpush1.bf16.msra.mxu0 %v34006_v54  ;;  %26164 = vmatpush1.bf16.msra.mxu1 %v33897_v21 }
 0x875   :  { %25974 = vmatprep.subr.bf16.mxu0 %v34007_v62  ;;  %26166 = vmatprep.subr.bf16.mxu1 %v33898_v60 }
 0x878   :  { %25976 = vmatpush1.bf16.msra.mxu0 %v34008_v56  ;;  %26168 = vmatpush1.bf16.msra.mxu1 %v33899_v55 }
 0x879   :  { %25978 = vmatprep.subr.bf16.mxu0 %v34009_v46  ;;  %26170 = vmatprep.subr.bf16.mxu1 %v33900_v48 }
 0x87c   :  { %25980 = vmatpush1.bf16.msra.mxu0 %v34010_v16  ;;  %26172 = vmatpush1.bf16.msra.mxu1 %v33901_v52 }
 0x87d   :  { %25982 = vmatprep.subr.bf16.mxu0 %v34011_v19  ;;  %26174 = vmatprep.subr.bf16.mxu1 %v33902_v3 }
 0x880   :  { %25984 = vmatpush1.bf16.msra.mxu0 %v34012_v28  ;;  %26176 = vmatpush1.bf16.msra.mxu1 %v33903_v11 }
 0x881   :  { %25986 = vmatprep.subr.bf16.mxu0 %v34013_v29  ;;  %26178 = vmatprep.subr.bf16.mxu1 %v33904_v0 }
 0x884   :  { %25988 = vmatpush1.bf16.msra.mxu0 %v34014_v10  ;;  %26180 = vmatpush1.bf16.msra.mxu1 %v33905_v32 }
 0x885   :  { %25990 = vmatprep.subr.bf16.mxu0 %v34015_v38  ;;  %26182 = vmatprep.subr.bf16.mxu1 %v33906_v17 }
 0x888   :  { %25992 = vmatpush1.bf16.msra.mxu0 %v34016_v53  ;;  %26184 = vmatpush1.bf16.msra.mxu1 %v33907_v1 }
 0x889   :  { %25994 = vmatprep.subr.bf16.mxu0 %v34017_v14  ;;  %26186 = vmatprep.subr.bf16.mxu1 %v33908_v42 }
 0x88c   :  { %25996 = vmatpush1.bf16.msra.mxu0 %v34018_v27  ;;  %26188 = vmatpush1.bf16.msra.mxu1 %v33909_v50 }
 0x88d   :  { %25998 = vmatprep.subr.bf16.mxu0 %v34362_v57  ;;  %26190 = vmatprep.subr.bf16.mxu1 %v34363_v25  ;;  %v34369_v57 = vld [vmem:[#allocation102_spill] sm:$0xff] }
 0x88e   :  { %v34370_v25 = vld [vmem:[#allocation50_spill] sm:$0xff] }
 0x88f   :  { %12080 = vmatmul.mubr.f32.vlgmr.msra.gmra.mrb[8].mxu0 %v31507_v37  ;;  %12935 = vmatmul.mubr.f32.vlgmr.msra.gmra.mrb[10].mxu1 %v31507_v37  ;;  %v34372_v37 = vld [vmem:[#allocation52_spill] sm:$0xff] }
 0x890   :  { %26000 = vmatpush1.bf16.msra.mxu0 %v34364_v12  ;;  %26192 = vmatpush1.bf16.msra.mxu1 %v34365_v6  ;;  %v34373_v12 = vld [vmem:[#allocation117_spill] sm:$0xff]  ;;  %v34374_v6 = vld [vmem:[#allocation54_spill] sm:$0xff] }
 0x891   :  { %26002 = vmatprep.subr.bf16.mxu0 %v34366_v13  ;;  %26194 = vmatprep.subr.bf16.mxu1 %v34367_v23  ;;  %v34375_v13 = vld [vmem:[#allocation135_spill] sm:$0xff] }
 0x892   :  { %12246 = vmatprep.mubr.f32.mxu0 %v33562_v5  ;;  %13101 = vmatprep.mubr.f32.mxu1 %v33562_v5  ;;  %v34376_v23 = vld [vmem:[#allocation55_spill] sm:$0xff] }
 0x894   :  { %26004 = vmatpush1.bf16.msra.mxu0 %v34368_v24  ;;  %26196 = vmatpush1.bf16.msra.mxu1 %v34369_v57  ;;  %v34379_v24 = vld [vmem:[#allocation137_spill] sm:$0xff]  ;;  %v34380_v57 = vld [vmem:[#allocation59_spill] sm:$0xff] }
 0x895   :  { %26006 = vmatprep.subr.bf16.mxu0 %v34370_v25  ;;  %26198 = vmatprep.subr.bf16.mxu1 %v34371_v51  ;;  %v34381_v25 = vld [vmem:[#allocation138_spill] sm:$0xff] }
 0x896   :  { %v34382_v51 = vld [vmem:[#allocation62_spill] sm:$0xff] }
 0x898   :  { %26008 = vmatpush1.bf16.msra.mxu0 %v34372_v37  ;;  %26200 = vmatpush1.bf16.msra.mxu1 %v34373_v12  ;;  %v34383_v37 = vld [vmem:[#allocation139_spill] sm:$0xff]  ;;  %v34384_v12 = vld [vmem:[#allocation64_spill] sm:$0xff] }
 0x899   :  { %26010 = vmatprep.subr.bf16.mxu0 %v34374_v6  ;;  %26202 = vmatprep.subr.bf16.mxu1 %v34375_v13  ;;  %v34385_v6 = vld [vmem:[#allocation140_spill] sm:$0xff]  ;;  %v34386_v13 = vld [vmem:[#allocation65_spill] sm:$0xff] }
 0x89c   :  { %26012 = vmatpush1.bf16.msra.mxu0 %v34376_v23  ;;  %26204 = vmatpush1.bf16.msra.mxu1 %v34377_v47  ;;  %v34387_v23 = vld [vmem:[#allocation141_spill] sm:$0xff] }
 0x89d   :  { %26014 = vmatprep.subr.bf16.mxu0 %v34378_v31  ;;  %26206 = vmatprep.subr.bf16.mxu1 %v34379_v24  ;;  %v34388_v47 = vld [vmem:[#allocation69_spill] sm:$0xff]  ;;  %v34389_v31 = vld [vmem:[#allocation142_spill] sm:$0xff]  ;;  %v34390_v24 = vld [vmem:[#allocation71_spill] sm:$0xff] }
 0x8a0   :  { %26016 = vmatpush1.bf16.msra.mxu0 %v34380_v57  ;;  %26208 = vmatpush1.bf16.msra.mxu1 %v34381_v25  ;;  %v34391_v57 = vld [vmem:[#allocation143_spill] sm:$0xff]  ;;  %v34392_v25 = vld [vmem:[#allocation73_spill] sm:$0xff] }
 0x8a1   :  { %26018 = vmatprep.subr.bf16.mxu0 %v34382_v51  ;;  %26210 = vmatprep.subr.bf16.mxu1 %v34383_v37  ;;  %v34393_v51 = vld [vmem:[#allocation144_spill] sm:$0xff] }
 0x8a2   :  { %v34400_v37 = vld [vmem:[#allocation108_spill] sm:$0xff] }
 0x8a4   :  { %26020 = vmatpush1.bf16.msra.mxu0 %v34384_v12  ;;  %26212 = vmatpush1.bf16.msra.mxu1 %v34385_v6  ;;  %v34397_v6 = vld [vmem:[#allocation90_spill] sm:$0xff]  ;;  %v34398_v12 = vld [vmem:[#allocation105_spill] sm:$0xff] }
 0x8a5   :  { %26022 = vmatprep.subr.bf16.mxu0 %v34386_v13  ;;  %26214 = vmatprep.subr.bf16.mxu1 %v34387_v23  ;;  %v34396_v13 = vld [vmem:[#allocation97_spill] sm:$0xff] }
 0x8a8   :  { %26024 = vmatpush1.bf16.msra.mxu0 %v34388_v47  ;;  %26216 = vmatpush1.bf16.msra.mxu1 %v34389_v31  ;;  %v34394_v31 = vld [vmem:[#allocation93_spill] sm:$0xff]  ;;  %v34395_v47 = vld [vmem:[#allocation31_spill] sm:$0xff] }
 0x8a9   :  { %26026 = vmatprep.subr.bf16.mxu0 %v34390_v24  ;;  %26218 = vmatprep.subr.bf16.mxu1 %v34391_v57 }
 0x8ac   :  { %26028 = vmatpush1.bf16.msra.mxu0 %v34392_v25  ;;  %26220 = vmatpush1.bf16.msra.mxu1 %v34393_v51  ;;  %v23614_v51 = vld [vmem:[%s33080_s0 + $0x8] sm:$0x3] }
 0x8ad   :  { %26030 = vmatprep.subr.bf16.mxu0 %v34003_v36  ;;  %26222 = vmatprep.subr.bf16.mxu1 %v33893_v39  ;;  %v13214_v25 = vsel %vm1892_vm0, %v23614_v51, 0 }
 0x8ae   :  { %v31681_v57 = vand.u32 4294901760, %v13214_v25 }
 0x8af   :  { %12248 = vmatmul.mubr.f32.vlgmr.msra.gmra.mrb[8].mxu0 %v31501_v7  ;;  %13103 = vmatmul.mubr.f32.vlgmr.msra.gmra.mrb[10].mxu1 %v31501_v7 }
 0x8b0   :  { %26032 = vmatpush1.bf16.msra.mxu0 %v34004_v22  ;;  %26224 = vmatpush1.bf16.msra.mxu1 %v33895_v45  ;;  %v13290_v24 = vsub.f32 %v13214_v25, %v31681_v57 }
 0x8b1   :  { %26034 = vmatprep.subr.bf16.mxu0 %v34005_v30  ;;  %26226 = vmatprep.subr.bf16.mxu1 %v33896_v34 }
 0x8b2   :  { %12350 = vmatprep.mubr.f32.mxu0 %v33562_v5  ;;  %13205 = vmatprep.mubr.f32.mxu1 %v33562_v5  ;;  %v13291_v51 = vand.u32 4294901760, %v13290_v24 }
 0x8b4   :  { %26036 = vmatpush1.bf16.msra.mxu0 %v34006_v54  ;;  %26228 = vmatpush1.bf16.msra.mxu1 %v33897_v21  ;;  %v13292_v25 = vsub.f32 %v13290_v24, %v13291_v51 }
 0x8b5   :  { %26038 = vmatprep.subr.bf16.mxu0 %v34007_v62  ;;  %26230 = vmatprep.subr.bf16.mxu1 %v33898_v60 }
 0x8b6   :  { %v13293_v23 = vand.u32 4294901760, %v13292_v25  ;;  %v34404_v25 = vld [vmem:[#allocation122_spill] sm:$0xff] }
 0x8b8   :  { %26040 = vmatpush1.bf16.msra.mxu0 %v34008_v56  ;;  %26232 = vmatpush1.bf16.msra.mxu1 %v33899_v55 }
 0x8b9   :  { %26042 = vmatprep.subr.bf16.mxu0 %v34009_v46  ;;  %26234 = vmatprep.subr.bf16.mxu1 %v33900_v48 }
 0x8bc   :  { %26044 = vmatpush1.bf16.msra.mxu0 %v34010_v16  ;;  %26236 = vmatpush1.bf16.msra.mxu1 %v33901_v52 }
 0x8bd   :  { %26046 = vmatprep.subr.bf16.mxu0 %v34011_v19  ;;  %26238 = vmatprep.subr.bf16.mxu1 %v33902_v3 }
 0x8c0   :  { %26048 = vmatpush1.bf16.msra.mxu0 %v34012_v28  ;;  %26240 = vmatpush1.bf16.msra.mxu1 %v33903_v11 }
 0x8c1   :  { %26050 = vmatprep.subr.bf16.mxu0 %v34013_v29  ;;  %26242 = vmatprep.subr.bf16.mxu1 %v33904_v0 }
 0x8c4   :  { %26052 = vmatpush1.bf16.msra.mxu0 %v34014_v10  ;;  %26244 = vmatpush1.bf16.msra.mxu1 %v33905_v32 }
 0x8c5   :  { %26054 = vmatprep.subr.bf16.mxu0 %v34015_v38  ;;  %26246 = vmatprep.subr.bf16.mxu1 %v33906_v17 }
 0x8c8   :  { %26056 = vmatpush1.bf16.msra.mxu0 %v34016_v53  ;;  %26248 = vmatpush1.bf16.msra.mxu1 %v33907_v1 }
 0x8c9   :  { %26058 = vmatprep.subr.bf16.mxu0 %v34017_v14  ;;  %26250 = vmatprep.subr.bf16.mxu1 %v33908_v42 }
 0x8cc   :  { %26060 = vmatpush1.bf16.msra.mxu0 %v34018_v27  ;;  %26252 = vmatpush1.bf16.msra.mxu1 %v33909_v50 }
 0x8cd   :  { %26254 = vmatprep.subr.bf16.mxu0 %v34051_v44  ;;  %26302 = vmatprep.subr.bf16.mxu1 %v30433_v40 }
 0x8cf   :  { %12352 = vmatmul.mubr.f32.vlgmr.msra.gmra.mrb[8].mxu0 %v31501_v7  ;;  %13207 = vmatmul.mubr.f32.vlgmr.msra.gmra.mrb[10].mxu1 %v31501_v7  ;;  %v34399_v7 = vld [vmem:[#allocation92_spill] sm:$0xff] }
 0x8d0   :  { %26256 = vmatpush1.bf16.msra.mxu0 %v34052_v43  ;;  %26304 = vmatpush1.bf16.msra.mxu1 %v34275_v35 }
 0x8d1   :  { %26258 = vmatprep.subr.bf16.mxu0 %v34394_v31  ;;  %26306 = vmatprep.subr.bf16.mxu1 %v34395_v47 }
 0x8d2   :  { %13288 = vmatprep.mubr.f32.mxu0 %v33562_v5  ;;  %13831 = vmatprep.mubr.f32.mxu1 %v33562_v5 }
 0x8d4   :  { %26260 = vmatpush1.bf16.msra.mxu0 %v34396_v13  ;;  %26308 = vmatpush1.bf16.msra.mxu1 %v34397_v6 }
 0x8d5   :  { %26262 = vmatprep.subr.bf16.mxu0 %v34398_v12  ;;  %26310 = vmatprep.subr.bf16.mxu1 %v34399_v7  ;;  %v34406_v12 = vld [vmem:[#allocation110_spill] sm:$0xff] }
 0x8d6   :  { %v34407_v7 = vld [vmem:[#allocation106_spill] sm:$0xff] }
 0x8d7   :  { %13294 = vmatmul.mubr.f32.vlgmr.msra.gmra.mrb[8].mxu0 %v13293_v23  ;;  %13837 = vmatmul.mubr.f32.vlgmr.msra.gmra.mrb[10].mxu1 %v13293_v23  ;;  %v34408_v23 = vld [vmem:[#allocation114_spill] sm:$0xff] }
 0x8d8   :  { %26264 = vmatpush1.bf16.msra.mxu0 %v34400_v37  ;;  %26312 = vmatpush1.bf16.msra.mxu1 %v34401_v49  ;;  %v34411_v49 = vld [vmem:[#allocation112_spill] sm:$0xff] }
 0x8d9   :  { %26266 = vmatprep.subr.bf16.mxu0 %v34402_v9  ;;  %26314 = vmatprep.subr.bf16.mxu1 %v34403_v61  ;;  %v34409_v9 = vld [vmem:[#allocation109_spill] sm:$0xff]  ;;  %v34410_v61 = vld [vmem:[#allocation118_spill] sm:$0xff] }
 0x8da   :  { %13404 = vmatprep.mubr.f32.mxu0 %v33562_v5  ;;  %13947 = vmatprep.mubr.f32.mxu1 %v33562_v5 }
 0x8dc   :  { %26268 = vmatpush1.bf16.msra.mxu0 %v34404_v25  ;;  %26316 = vmatpush1.bf16.msra.mxu1 %v34405_v8  ;;  %v34412_v8 = vld [vmem:[#allocation120_spill] sm:$0xff] }
 0x8dd   :  { %26270 = vmatprep.subr.bf16.mxu0 %v34406_v12  ;;  %26318 = vmatprep.subr.bf16.mxu1 %v34407_v7  ;;  %v34413_v12 = vld [vmem:[#allocation113_spill] sm:$0xff] }
 0x8de   :  { %v34421_v7 = vld [vmem:[#allocation125_spill] sm:$0xff] }
 0x8df   :  { %13406 = vmatmul.mubr.f32.vlgmr.msra.gmra.mrb[8].mxu0 %v31681_v57  ;;  %13949 = vmatmul.mubr.f32.vlgmr.msra.gmra.mrb[10].mxu1 %v31681_v57 }
 0x8e0   :  { %26272 = vmatpush1.bf16.msra.mxu0 %v34408_v23  ;;  %26320 = vmatpush1.bf16.msra.mxu1 %v34409_v9  ;;  %v34419_v9 = vld [vmem:[#allocation124_spill] sm:$0xff]  ;;  %v34420_v23 = vld [vmem:[#allocation47_spill] sm:$0xff] }
 0x8e1   :  { %26274 = vmatprep.subr.bf16.mxu0 %v34410_v61  ;;  %26322 = vmatprep.subr.bf16.mxu1 %v34411_v49  ;;  %v34417_v49 = vld [vmem:[#allocation123_spill] sm:$0xff]  ;;  %v34418_v61 = vld [vmem:[#allocation132_spill] sm:$0xff] }
 0x8e2   :  { %13492 = vmatprep.mubr.f32.mxu0 %v33562_v5  ;;  %14035 = vmatprep.mubr.f32.mxu1 %v33562_v5 }
 0x8e4   :  { %26276 = vmatpush1.bf16.msra.mxu0 %v34412_v8  ;;  %26324 = vmatpush1.bf16.msra.mxu1 %v34413_v12  ;;  %v34414_v12 = vld [vmem:[#allocation127_spill] sm:$0xff] }
 0x8e5   :  { %26278 = vmatprep.subr.bf16.mxu0 %v34051_v44  ;;  %26326 = vmatprep.subr.bf16.mxu1 %v30433_v40  ;;  %v34415_v8 = vld [vmem:[#allocation119_spill] sm:$0xff] }
 0x8e7   :  { %13495 = vmatmul.mubr.f32.vlgmr.msra.gmra.mrb[8].mxu0 %v13290_v24  ;;  %14038 = vmatmul.mubr.f32.vlgmr.msra.gmra.mrb[10].mxu1 %v13290_v24  ;;  %v34416_v24 = vld [vmem:[#allocation130_spill] sm:$0xff] }
 0x8e8   :  { %26280 = vmatpush1.bf16.msra.mxu0 %v34052_v43  ;;  %26328 = vmatpush1.bf16.msra.mxu1 %v34275_v35 }
 0x8e9   :  { %26282 = vmatprep.subr.bf16.mxu0 %v34394_v31  ;;  %26330 = vmatprep.subr.bf16.mxu1 %v34395_v47 }
 0x8ea   :  { %13573 = vmatprep.mubr.f32.mxu0 %v33562_v5  ;;  %14116 = vmatprep.mubr.f32.mxu1 %v33562_v5 }
 0x8ec   :  { %26284 = vmatpush1.bf16.msra.mxu0 %v34396_v13  ;;  %26332 = vmatpush1.bf16.msra.mxu1 %v34397_v6 }
 0x8ed   :  { %26286 = vmatprep.subr.bf16.mxu0 %v34414_v12  ;;  %26334 = vmatprep.subr.bf16.mxu1 %v34415_v8 }
 0x8ef   :  { %13577 = vmatmul.mubr.f32.vlgmr.msra.gmra.mrb[8].mxu0 %v13291_v51  ;;  %14120 = vmatmul.mubr.f32.vlgmr.msra.gmra.mrb[10].mxu1 %v13291_v51  ;;  %v34423_v51 = vld [vmem:[#allocation131_spill] sm:$0xff] }
 0x8f0   :  { %26288 = vmatpush1.bf16.msra.mxu0 %v34416_v24  ;;  %26336 = vmatpush1.bf16.msra.mxu1 %v34417_v49 }
 0x8f1   :  { %26290 = vmatprep.subr.bf16.mxu0 %v34418_v61  ;;  %26338 = vmatprep.subr.bf16.mxu1 %v34419_v9  ;;  %v34424_v9 = vld [vmem:[#allocation129_spill] sm:$0xff] }
 0x8f2   :  { %13671 = vmatprep.mubr.f32.mxu0 %v33562_v5  ;;  %14214 = vmatprep.mubr.f32.mxu1 %v33562_v5 }
 0x8f4   :  { %26292 = vmatpush1.bf16.msra.mxu0 %v34420_v23  ;;  %26340 = vmatpush1.bf16.msra.mxu1 %v34421_v7 }
 0x8f5   :  { %26294 = vmatprep.subr.bf16.mxu0 %v34051_v44  ;;  %26342 = vmatprep.subr.bf16.mxu1 %v30433_v40 }
 0x8f7   :  { %13673 = vmatmul.mubr.f32.vlgmr.msra.gmra.mrb[8].mxu0 %v31681_v57  ;;  %14216 = vmatmul.mubr.f32.vlgmr.msra.gmra.mrb[10].mxu1 %v31681_v57 }
 0x8f8   :  { %26296 = vmatpush1.bf16.msra.mxu0 %v34052_v43  ;;  %26344 = vmatpush1.bf16.msra.mxu1 %v34275_v35 }
 0x8f9   :  { %26298 = vmatprep.subr.bf16.mxu0 %v34394_v31  ;;  %26346 = vmatprep.subr.bf16.mxu1 %v34395_v47 }
 0x8fa   :  { %13751 = vmatprep.mubr.f32.mxu0 %v33562_v5  ;;  %14294 = vmatprep.mubr.f32.mxu1 %v33562_v5 }
 0x8fc   :  { %26300 = vmatpush1.bf16.msra.mxu0 %v34396_v13  ;;  %26348 = vmatpush1.bf16.msra.mxu1 %v34397_v6 }
 0x8fd   :  { %26350 = vmatprep.subr.bf16.mxu0 %v34003_v36  ;;  %26542 = vmatprep.subr.bf16.mxu1 %v33893_v39 }
 0x8ff   :  { %13753 = vmatmul.mubr.f32.vlgmr.msra.gmra.mrb[8].mxu0 %v31681_v57  ;;  %14296 = vmatmul.mubr.f32.vlgmr.msra.gmra.mrb[10].mxu1 %v31681_v57  ;;  %v34422_v57 = vld [vmem:[#allocation42_spill] sm:$0xff] }
 0x900   :  { %26352 = vmatpush1.bf16.msra.mxu0 %v34004_v22  ;;  %26544 = vmatpush1.bf16.msra.mxu1 %v33895_v45 }
 0x901   :  { %26354 = vmatprep.subr.bf16.mxu0 %v34005_v30  ;;  %26546 = vmatprep.subr.bf16.mxu1 %v33896_v34 }
 0x902   :  { %14429 = vmatprep.mubr.f32.mxu0 %v33562_v5  ;;  %15284 = vmatprep.mubr.f32.mxu1 %v33562_v5 }
 0x904   :  { %26356 = vmatpush1.bf16.msra.mxu0 %v34006_v54  ;;  %26548 = vmatpush1.bf16.msra.mxu1 %v33897_v21 }
 0x905   :  { %26358 = vmatprep.subr.bf16.mxu0 %v34007_v62  ;;  %26550 = vmatprep.subr.bf16.mxu1 %v33898_v60 }
 0x908   :  { %26360 = vmatpush1.bf16.msra.mxu0 %v34008_v56  ;;  %26552 = vmatpush1.bf16.msra.mxu1 %v33899_v55 }
 0x909   :  { %26362 = vmatprep.subr.bf16.mxu0 %v34009_v46  ;;  %26554 = vmatprep.subr.bf16.mxu1 %v33900_v48 }
 0x90c   :  { %26364 = vmatpush1.bf16.msra.mxu0 %v34010_v16  ;;  %26556 = vmatpush1.bf16.msra.mxu1 %v33901_v52 }
 0x90d   :  { %26366 = vmatprep.subr.bf16.mxu0 %v34011_v19  ;;  %26558 = vmatprep.subr.bf16.mxu1 %v33902_v3 }
 0x910   :  { %26368 = vmatpush1.bf16.msra.mxu0 %v34012_v28  ;;  %26560 = vmatpush1.bf16.msra.mxu1 %v33903_v11 }
 0x911   :  { %26370 = vmatprep.subr.bf16.mxu0 %v34013_v29  ;;  %26562 = vmatprep.subr.bf16.mxu1 %v33904_v0 }
 0x914   :  { %26372 = vmatpush1.bf16.msra.mxu0 %v34014_v10  ;;  %26564 = vmatpush1.bf16.msra.mxu1 %v33905_v32 }
 0x915   :  { %26374 = vmatprep.subr.bf16.mxu0 %v34015_v38  ;;  %26566 = vmatprep.subr.bf16.mxu1 %v33906_v17 }
 0x918   :  { %26376 = vmatpush1.bf16.msra.mxu0 %v34016_v53  ;;  %26568 = vmatpush1.bf16.msra.mxu1 %v33907_v1 }
 0x919   :  { %26378 = vmatprep.subr.bf16.mxu0 %v34017_v14  ;;  %26570 = vmatprep.subr.bf16.mxu1 %v33908_v42 }
 0x91c   :  { %26380 = vmatpush1.bf16.msra.mxu0 %v34018_v27  ;;  %26572 = vmatpush1.bf16.msra.mxu1 %v33909_v50 }
 0x91d   :  { %26382 = vmatprep.subr.bf16.mxu0 %v34422_v57  ;;  %26574 = vmatprep.subr.bf16.mxu1 %v34423_v51 }
 0x9d2   :  { %v13754_v7 = vpop.f32.mrb[8].mxu0  ;;  %v14297_v23 = vpop.f32.mrb[10].mxu1 }
 0x9d3   :  { %v14302_v61 = vadd.f32 %v13754_v7, %v34424_v9  ;;  %v13756_v49 = vpop.f32.mrb[9].mxu0  ;;  %v14299_v24 = vpop.f32.mrb[11].mxu1  ;;  %v14304_v13 = vadd.f32 %v14297_v23, %v30574_v63 }
 0x9d4   :  { %v14303_v8 = vadd.f32 %v13756_v49, %v34188_v20  ;;  %v14305_v37 = vadd.f32 %v14299_v24, %v30576_v33 }
 0x9d5   :  { %v23615_v12 = vmul.f32 -1.442695, %v14302_v61 }
 0x9d6   :  { %v23616_v25 = vmul.f32 -1.442695, %v14303_v8  ;;  %v23617_v6 = vmul.f32 -1.442695, %v14305_v37 }
 0x9d7   :  { %28421 = vpow2.f32 %v23615_v12 }
 0x9d8   :  { %28423 = vpow2.f32 %v23616_v25 }
 0x9d9   :  { %28425 = vpow2.f32 %v23617_v6 }
 0x9da   :  { %28427 = vtanh.f32 %v14304_v13 }
 0x9e1   :  { %v28422_v57 = vpop.eup %28421 }
 0x9e2   :  { %v28424_v47 = vpop.eup %28423  ;;  %v14309_v51 = vadd.f32 1.0, %v28422_v57  ;;  %v34425_v57 = vld [vmem:[#allocation51_spill] sm:$0xff] }
 0x9e3   :  { %v14315_v31 = vadd.f32 1.0, %v28424_v47  ;;  %v28426_v7 = vpop.eup %28425 }
 0x9e4   :  { %28429 = vrcp.f32 %v14309_v51  ;;  %v28428_v9 = vpop.eup %28427  ;;  %v14322_v12 = vadd.f32 1.0, %v28426_v7  ;;  %v34426_v51 = vld [vmem:[#allocation96_spill] sm:$0xff]  ;;  %v34427_v7 = vld [vmem:[#allocation53_spill] sm:$0xff] }
 0x9e5   :  { %28431 = vrcp.f32 %v14315_v31 }
 0x9e6   :  { %28433 = vrcp.f32 %v14322_v12  ;;  %v34431_v12 = vld [vmem:[#allocation58_spill] sm:$0xff] }
 0x9ee   :  { %v28430_v49 = vpop.eup %28429 }
 0x9ef   :  { %v28432_v61 = vpop.eup %28431  ;;  %v14326_v8 = vmul.f32 %v28430_v49, %v28428_v9  ;;  %v34428_v49 = vld [vmem:[#allocation98_spill] sm:$0xff] }
 0x9f0   :  { %v14325_v25 = vmul.f32 %v28432_v61, %v31498_v58  ;;  %v28434_v37 = vpop.eup %28433  ;;  %v34429_v61 = vld [vmem:[#allocation56_spill] sm:$0xff] }
 0x9f2   :  { %v31803_v24 = vadd.f32 %v14326_v8, %v14325_v25  ;;  %v34430_v8 = vld [vmem:[#allocation145_spill] sm:$0xff]  ;;  %v34432_v25 = vld [vmem:[#allocation146_spill] sm:$0xff] }
 0x9f4   :  { %28435 = vtanh.f32 %v31803_v24 }
 0x9fe   :  { %v28436_v23 = vpop.eup %28435 }
 0x9ff   :  { %v14329_v6 = vmul.f32 %v28436_v23, %v28434_v37  ;;  %v34433_v37 = vld [vmem:[#allocation60_spill] sm:$0xff]  ;;  %v34434_v23 = vld [vmem:[#allocation147_spill] sm:$0xff] }
 0xa01   :  { %14330 = vst [vmem:[#allocation8 + $0x8] sm:$0x3] %v14329_v6  ;;  %v31806_v13 = vand.u32 4294901760, %v14329_v6 }
 0xa03   :  { %v31809_v31 = vsub.f32 %v14329_v6, %v31806_v13  ;;  %v34435_v6 = vld [vmem:[#allocation61_spill] sm:$0xff] }
 0xa05   :  { %v31812_v47 = vand.u32 4294901760, %v31809_v31 }
 0xa07   :  { %v14433_v9 = vsub.f32 %v31809_v31, %v31812_v47 }
 0xa09   :  { %v14434_v58 = vand.u32 4294901760, %v14433_v9  ;;  %v34436_v9 = vld [vmem:[#allocation148_spill] sm:$0xff] }
 0xa0b   :  { %14435 = vmatmul.mubr.f32.vlgmr.msra.gmra.mrb[10].mxu0 %v14434_v58  ;;  %15290 = vmatmul.mubr.f32.vlgmr.msra.gmra.mrb[12].mxu1 %v14434_v58  ;;  %v34437_v58 = vld [vmem:[#allocation63_spill] sm:$0xff] }
 0xa0c   :  { %26384 = vmatpush1.bf16.msra.mxu0 %v34071_v4  ;;  %26576 = vmatpush1.bf16.msra.mxu1 %v34072_v15 }
 0xa0d   :  { %26386 = vmatprep.subr.bf16.mxu0 %v34189_v41  ;;  %26578 = vmatprep.subr.bf16.mxu1 %v34190_v26 }
 0xa0e   :  { %14665 = vmatprep.mubr.f32.mxu0 %v33562_v5  ;;  %15520 = vmatprep.mubr.f32.mxu1 %v33562_v5 }
 0xa10   :  { %26388 = vmatpush1.bf16.msra.mxu0 %v34307_v2  ;;  %26580 = vmatpush1.bf16.msra.mxu1 %v34308_v18 }
 0xa11   :  { %26390 = vmatprep.subr.bf16.mxu0 %v34425_v57  ;;  %26582 = vmatprep.subr.bf16.mxu1 %v34426_v51  ;;  %v34523_v51 = vld [vmem:[#allocation104_spill] sm:$0xff] }
 0xa14   :  { %26392 = vmatpush1.bf16.msra.mxu0 %v34427_v7  ;;  %26584 = vmatpush1.bf16.msra.mxu1 %v34428_v49  ;;  %v34438_v7 = vld [vmem:[#allocation149_spill] sm:$0xff]  ;;  %v34439_v49 = vld [vmem:[#allocation66_spill] sm:$0xff] }
 0xa15   :  { %26394 = vmatprep.subr.bf16.mxu0 %v34429_v61  ;;  %26586 = vmatprep.subr.bf16.mxu1 %v34430_v8  ;;  %v34440_v8 = vld [vmem:[#allocation67_spill] sm:$0xff] }
 0xa16   :  { %v34521_v61 = vld [vmem:[#allocation103_spill] sm:$0xff] }
 0xa18   :  { %26396 = vmatpush1.bf16.msra.mxu0 %v34431_v12  ;;  %26588 = vmatpush1.bf16.msra.mxu1 %v34432_v25  ;;  %v34441_v12 = vld [vmem:[#allocation151_spill] sm:$0xff]  ;;  %v34442_v25 = vld [vmem:[#allocation68_spill] sm:$0xff] }
 0xa19   :  { %26398 = vmatprep.subr.bf16.mxu0 %v34433_v37  ;;  %26590 = vmatprep.subr.bf16.mxu1 %v34434_v23  ;;  %v34443_v37 = vld [vmem:[#allocation152_spill] sm:$0xff]  ;;  %v34444_v23 = vld [vmem:[#allocation70_spill] sm:$0xff] }
 0xa1c   :  { %26400 = vmatpush1.bf16.msra.mxu0 %v34435_v6  ;;  %26592 = vmatpush1.bf16.msra.mxu1 %v34436_v9  ;;  %v34445_v6 = vld [vmem:[#allocation153_spill] sm:$0xff]  ;;  %v34446_v9 = vld [vmem:[#allocation72_spill] sm:$0xff] }
 0xa1d   :  { %26402 = vmatprep.subr.bf16.mxu0 %v34437_v58  ;;  %26594 = vmatprep.subr.bf16.mxu1 %v34438_v7  ;;  %v34447_v58 = vld [vmem:[#allocation154_spill] sm:$0xff] }
 0xa1e   :  { %v34448_v7 = vld [vmem:[#allocation74_spill] sm:$0xff] }
 0xa20   :  { %26404 = vmatpush1.bf16.msra.mxu0 %v34439_v49  ;;  %26596 = vmatpush1.bf16.msra.mxu1 %v34324_v59  ;;  %v34449_v49 = vld [vmem:[#allocation115_spill] sm:$0xff] }
 0xa21   :  { %26406 = vmatprep.subr.bf16.mxu0 %v34440_v8  ;;  %26598 = vmatprep.subr.bf16.mxu1 %v34441_v12  ;;  %v34450_v12 = vld [vmem:[#allocation75_spill] sm:$0xff]  ;;  %v34463_v8 = vld [vmem:[#allocation158_spill] sm:$0xff] }
 0xa22   :  { %v34464_v59 = vld [vmem:[#allocation79_spill] sm:$0xff] }
 0xa24   :  { %26408 = vmatpush1.bf16.msra.mxu0 %v34442_v25  ;;  %26600 = vmatpush1.bf16.msra.mxu1 %v34443_v37  ;;  %v34451_v25 = vld [vmem:[#allocation155_spill] sm:$0xff]  ;;  %v34452_v37 = vld [vmem:[#allocation76_spill] sm:$0xff] }
 0xa25   :  { %26410 = vmatprep.subr.bf16.mxu0 %v34444_v23  ;;  %26602 = vmatprep.subr.bf16.mxu1 %v34445_v6  ;;  %v34453_v23 = vld [vmem:[#allocation156_spill] sm:$0xff]  ;;  %v34458_v6 = vld [vmem:[#allocation43_spill] sm:$0xff] }
 0xa28   :  { %26412 = vmatpush1.bf16.msra.mxu0 %v34446_v9  ;;  %26604 = vmatpush1.bf16.msra.mxu1 %v34447_v58  ;;  %v34454_v58 = vld [vmem:[#allocation32_spill] sm:$0xff]  ;;  %v34457_v9 = vld [vmem:[#allocation121_spill] sm:$0xff] }
 0xa29   :  { %26414 = vmatprep.subr.bf16.mxu0 %v34448_v7  ;;  %26606 = vmatprep.subr.bf16.mxu1 %v34449_v49  ;;  %v34455_v7 = vld [vmem:[#allocation30_spill] sm:$0xff]  ;;  %v34456_v49 = vld [vmem:[#allocation39_spill] sm:$0xff] }
 0xa2b   :  { %14667 = vmatmul.mubr.f32.vlgmr.msra.gmra.mrb[10].mxu0 %v31806_v13  ;;  %15522 = vmatmul.mubr.f32.vlgmr.msra.gmra.mrb[12].mxu1 %v31806_v13 }
 0xa2c   :  { %26416 = vmatpush1.bf16.msra.mxu0 %v34450_v12  ;;  %26608 = vmatpush1.bf16.msra.mxu1 %v34451_v25  ;;  %v34459_v12 = vld [vmem:[#allocation157_spill] sm:$0xff] }
 0xa2d   :  { %26418 = vmatprep.subr.bf16.mxu0 %v34452_v37  ;;  %26610 = vmatprep.subr.bf16.mxu1 %v34453_v23  ;;  %v34460_v25 = vld [vmem:[#allocation77_spill] sm:$0xff]  ;;  %v34461_v37 = vld [vmem:[#allocation128_spill] sm:$0xff]  ;;  %v34462_v23 = vld [vmem:[#allocation78_spill] sm:$0xff] }
 0xa2e   :  { %14801 = vmatprep.mubr.f32.mxu0 %v33562_v5  ;;  %15656 = vmatprep.mubr.f32.mxu1 %v33562_v5 }
 0xa30   :  { %26420 = vmatpush1.bf16.msra.mxu0 %v34454_v58  ;;  %26612 = vmatpush1.bf16.msra.mxu1 %v34455_v7  ;;  %v34465_v58 = vld [vmem:[#allocation159_spill] sm:$0xff]  ;;  %v34466_v7 = vld [vmem:[#allocation80_spill] sm:$0xff] }
 0xa31   :  { %26422 = vmatprep.subr.bf16.mxu0 %v34456_v49  ;;  %26614 = vmatprep.subr.bf16.mxu1 %v34457_v9  ;;  %v34467_v49 = vld [vmem:[#allocation160_spill] sm:$0xff]  ;;  %v34468_v9 = vld [vmem:[#allocation81_spill] sm:$0xff] }
 0xa34   :  { %26424 = vmatpush1.bf16.msra.mxu0 %v34458_v6  ;;  %26616 = vmatpush1.bf16.msra.mxu1 %v34459_v12  ;;  %v34469_v6 = vld [vmem:[#allocation161_spill] sm:$0xff]  ;;  %v34470_v12 = vld [vmem:[#allocation82_spill] sm:$0xff] }
 0xa35   :  { %26426 = vmatprep.subr.bf16.mxu0 %v34460_v25  ;;  %26618 = vmatprep.subr.bf16.mxu1 %v34461_v37  ;;  %v34471_v25 = vld [vmem:[#allocation162_spill] sm:$0xff]  ;;  %v34472_v37 = vld [vmem:[#allocation83_spill] sm:$0xff] }
 0xa38   :  { %26428 = vmatpush1.bf16.msra.mxu0 %v34462_v23  ;;  %26620 = vmatpush1.bf16.msra.mxu1 %v34463_v8  ;;  %v34473_v23 = vld [vmem:[#allocation163_spill] sm:$0xff]  ;;  %v34474_v8 = vld [vmem:[#allocation84_spill] sm:$0xff] }
 0xa39   :  { %26430 = vmatprep.subr.bf16.mxu0 %v34464_v59  ;;  %26622 = vmatprep.subr.bf16.mxu1 %v34465_v58  ;;  %v34475_v59 = vld [vmem:[#allocation164_spill] sm:$0xff]  ;;  %v34476_v58 = vld [vmem:[#allocation85_spill] sm:$0xff] }
 0xa3c   :  { %26432 = vmatpush1.bf16.msra.mxu0 %v34466_v7  ;;  %26624 = vmatpush1.bf16.msra.mxu1 %v34467_v49  ;;  %v34477_v7 = vld [vmem:[#allocation165_spill] sm:$0xff]  ;;  %v34478_v49 = vld [vmem:[#allocation86_spill] sm:$0xff] }
 0xa3d   :  { %26434 = vmatprep.subr.bf16.mxu0 %v34468_v9  ;;  %26626 = vmatprep.subr.bf16.mxu1 %v34469_v6  ;;  %v34479_v9 = vld [vmem:[#allocation166_spill] sm:$0xff]  ;;  %v34520_v6 = vld [vmem:[#allocation111_spill] sm:$0xff] }
 0xa40   :  { %26436 = vmatpush1.bf16.msra.mxu0 %v34470_v12  ;;  %26628 = vmatpush1.bf16.msra.mxu1 %v34471_v25  ;;  %v34496_v25 = vld [vmem:[#allocation57_spill] sm:$0xff]  ;;  %v34519_v12 = vld [vmem:[#allocation94_spill] sm:$0xff] }
 0xa41   :  { %26438 = vmatprep.subr.bf16.mxu0 %v34472_v37  ;;  %26630 = vmatprep.subr.bf16.mxu1 %v34473_v23  ;;  %v34489_v23 = vld [vmem:[#allocation116_spill] sm:$0xff] }
 0xa42   :  { %v34495_v37 = vld [vmem:[#allocation136_spill] sm:$0xff] }
 0xa44   :  { %26440 = vmatpush1.bf16.msra.mxu0 %v34474_v8  ;;  %26632 = vmatpush1.bf16.msra.mxu1 %v34475_v59  ;;  %v34485_v59 = vld [vmem:[#allocation101_spill] sm:$0xff]  ;;  %v34486_v8 = vld [vmem:[#allocation46_spill] sm:$0xff] }
 0xa45   :  { %26442 = vmatprep.subr.bf16.mxu0 %v34476_v58  ;;  %26634 = vmatprep.subr.bf16.mxu1 %v34477_v7  ;;  %v34483_v7 = vld [vmem:[#allocation100_spill] sm:$0xff]  ;;  %v34484_v58 = vld [vmem:[#allocation45_spill] sm:$0xff] }
 0xa48   :  { %26444 = vmatpush1.bf16.msra.mxu0 %v34478_v49  ;;  %26636 = vmatpush1.bf16.msra.mxu1 %v34479_v9  ;;  %v34481_v9 = vld [vmem:[#allocation99_spill] sm:$0xff]  ;;  %v34482_v49 = vld [vmem:[#allocation41_spill] sm:$0xff] }
 0xa49   :  { %26446 = vmatprep.subr.bf16.mxu0 %v34003_v36  ;;  %26638 = vmatprep.subr.bf16.mxu1 %v33893_v39 }
 0xa4b   :  { %14804 = vmatmul.mubr.f32.vlgmr.msra.gmra.mrb[10].mxu0 %v31809_v31  ;;  %15659 = vmatmul.mubr.f32.vlgmr.msra.gmra.mrb[12].mxu1 %v31809_v31  ;;  %v34480_v31 = vld [vmem:[#allocation40_spill] sm:$0xff] }
 0xa4c   :  { %26448 = vmatpush1.bf16.msra.mxu0 %v34004_v22  ;;  %26640 = vmatpush1.bf16.msra.mxu1 %v33895_v45 }
 0xa4d   :  { %26450 = vmatprep.subr.bf16.mxu0 %v34005_v30  ;;  %26642 = vmatprep.subr.bf16.mxu1 %v33896_v34 }
 0xa4e   :  { %14906 = vmatprep.mubr.f32.mxu0 %v33562_v5  ;;  %15761 = vmatprep.mubr.f32.mxu1 %v33562_v5 }
 0xa50   :  { %26452 = vmatpush1.bf16.msra.mxu0 %v34006_v54  ;;  %26644 = vmatpush1.bf16.msra.mxu1 %v33897_v21 }
 0xa51   :  { %26454 = vmatprep.subr.bf16.mxu0 %v34007_v62  ;;  %26646 = vmatprep.subr.bf16.mxu1 %v33898_v60 }
 0xa54   :  { %26456 = vmatpush1.bf16.msra.mxu0 %v34008_v56  ;;  %26648 = vmatpush1.bf16.msra.mxu1 %v33899_v55 }
 0xa55   :  { %26458 = vmatprep.subr.bf16.mxu0 %v34009_v46  ;;  %26650 = vmatprep.subr.bf16.mxu1 %v33900_v48 }
 0xa58   :  { %26460 = vmatpush1.bf16.msra.mxu0 %v34010_v16  ;;  %26652 = vmatpush1.bf16.msra.mxu1 %v33901_v52 }
 0xa59   :  { %26462 = vmatprep.subr.bf16.mxu0 %v34011_v19  ;;  %26654 = vmatprep.subr.bf16.mxu1 %v33902_v3 }
 0xa5c   :  { %26464 = vmatpush1.bf16.msra.mxu0 %v34012_v28  ;;  %26656 = vmatpush1.bf16.msra.mxu1 %v33903_v11 }
 0xa5d   :  { %26466 = vmatprep.subr.bf16.mxu0 %v34013_v29  ;;  %26658 = vmatprep.subr.bf16.mxu1 %v33904_v0 }
 0xa60   :  { %26468 = vmatpush1.bf16.msra.mxu0 %v34014_v10  ;;  %26660 = vmatpush1.bf16.msra.mxu1 %v33905_v32 }
 0xa61   :  { %26470 = vmatprep.subr.bf16.mxu0 %v34015_v38  ;;  %26662 = vmatprep.subr.bf16.mxu1 %v33906_v17 }
 0xa64   :  { %26472 = vmatpush1.bf16.msra.mxu0 %v34016_v53  ;;  %26664 = vmatpush1.bf16.msra.mxu1 %v33907_v1 }
 0xa65   :  { %26474 = vmatprep.subr.bf16.mxu0 %v34017_v14  ;;  %26666 = vmatprep.subr.bf16.mxu1 %v33908_v42 }
 0xa68   :  { %26476 = vmatpush1.bf16.msra.mxu0 %v34018_v27  ;;  %26668 = vmatpush1.bf16.msra.mxu1 %v33909_v50 }
 0xa69   :  { %26478 = vmatprep.subr.bf16.mxu0 %v34480_v31  ;;  %26670 = vmatprep.subr.bf16.mxu1 %v34481_v9  ;;  %v34487_v31 = vld [vmem:[#allocation102_spill] sm:$0xff] }
 0xa6a   :  { %v34488_v9 = vld [vmem:[#allocation50_spill] sm:$0xff] }
 0xa6b   :  { %14910 = vmatmul.mubr.f32.vlgmr.msra.gmra.mrb[10].mxu0 %v31812_v47  ;;  %15765 = vmatmul.mubr.f32.vlgmr.msra.gmra.mrb[12].mxu1 %v31812_v47  ;;  %v34490_v47 = vld [vmem:[#allocation52_spill] sm:$0xff] }
 0xa6c   :  { %26480 = vmatpush1.bf16.msra.mxu0 %v34482_v49  ;;  %26672 = vmatpush1.bf16.msra.mxu1 %v34483_v7  ;;  %v34491_v49 = vld [vmem:[#allocation117_spill] sm:$0xff]  ;;  %v34492_v7 = vld [vmem:[#allocation54_spill] sm:$0xff] }
 0xa6d   :  { %26482 = vmatprep.subr.bf16.mxu0 %v34484_v58  ;;  %26674 = vmatprep.subr.bf16.mxu1 %v34485_v59  ;;  %v34493_v58 = vld [vmem:[#allocation135_spill] sm:$0xff] }
 0xa6e   :  { %15076 = vmatprep.mubr.f32.mxu0 %v33562_v5  ;;  %15931 = vmatprep.mubr.f32.mxu1 %v33562_v5  ;;  %v34494_v59 = vld [vmem:[#allocation55_spill] sm:$0xff] }
 0xa70   :  { %26484 = vmatpush1.bf16.msra.mxu0 %v34486_v8  ;;  %26676 = vmatpush1.bf16.msra.mxu1 %v34487_v31  ;;  %v34497_v8 = vld [vmem:[#allocation137_spill] sm:$0xff]  ;;  %v34498_v31 = vld [vmem:[#allocation59_spill] sm:$0xff] }
 0xa71   :  { %26486 = vmatprep.subr.bf16.mxu0 %v34488_v9  ;;  %26678 = vmatprep.subr.bf16.mxu1 %v34489_v23  ;;  %v34499_v9 = vld [vmem:[#allocation138_spill] sm:$0xff] }
 0xa72   :  { %v34500_v23 = vld [vmem:[#allocation62_spill] sm:$0xff] }
 0xa74   :  { %26488 = vmatpush1.bf16.msra.mxu0 %v34490_v47  ;;  %26680 = vmatpush1.bf16.msra.mxu1 %v34491_v49  ;;  %v34501_v47 = vld [vmem:[#allocation139_spill] sm:$0xff]  ;;  %v34502_v49 = vld [vmem:[#allocation64_spill] sm:$0xff] }
 0xa75   :  { %26490 = vmatprep.subr.bf16.mxu0 %v34492_v7  ;;  %26682 = vmatprep.subr.bf16.mxu1 %v34493_v58  ;;  %v34503_v7 = vld [vmem:[#allocation140_spill] sm:$0xff]  ;;  %v34504_v58 = vld [vmem:[#allocation65_spill] sm:$0xff] }
 0xa78   :  { %26492 = vmatpush1.bf16.msra.mxu0 %v34494_v59  ;;  %26684 = vmatpush1.bf16.msra.mxu1 %v34495_v37  ;;  %v34505_v59 = vld [vmem:[#allocation141_spill] sm:$0xff] }
 0xa79   :  { %26494 = vmatprep.subr.bf16.mxu0 %v34496_v25  ;;  %26686 = vmatprep.subr.bf16.mxu1 %v34497_v8  ;;  %v34506_v37 = vld [vmem:[#allocation69_spill] sm:$0xff]  ;;  %v34507_v25 = vld [vmem:[#allocation142_spill] sm:$0xff]  ;;  %v34508_v8 = vld [vmem:[#allocation71_spill] sm:$0xff] }
 0xa7c   :  { %26496 = vmatpush1.bf16.msra.mxu0 %v34498_v31  ;;  %26688 = vmatpush1.bf16.msra.mxu1 %v34499_v9  ;;  %v34509_v31 = vld [vmem:[#allocation143_spill] sm:$0xff]  ;;  %v34510_v9 = vld [vmem:[#allocation73_spill] sm:$0xff] }
 0xa7d   :  { %26498 = vmatprep.subr.bf16.mxu0 %v34500_v23  ;;  %26690 = vmatprep.subr.bf16.mxu1 %v34501_v47  ;;  %v34511_v23 = vld [vmem:[#allocation144_spill] sm:$0xff] }
 0xa7e   :  { %v34518_v47 = vld [vmem:[#allocation108_spill] sm:$0xff] }
 0xa80   :  { %26500 = vmatpush1.bf16.msra.mxu0 %v34502_v49  ;;  %26692 = vmatpush1.bf16.msra.mxu1 %v34503_v7  ;;  %v34515_v7 = vld [vmem:[#allocation90_spill] sm:$0xff]  ;;  %v34516_v49 = vld [vmem:[#allocation105_spill] sm:$0xff] }
 0xa81   :  { %26502 = vmatprep.subr.bf16.mxu0 %v34504_v58  ;;  %26694 = vmatprep.subr.bf16.mxu1 %v34505_v59  ;;  %v34514_v58 = vld [vmem:[#allocation97_spill] sm:$0xff] }
 0xa84   :  { %26504 = vmatpush1.bf16.msra.mxu0 %v34506_v37  ;;  %26696 = vmatpush1.bf16.msra.mxu1 %v34507_v25  ;;  %v34512_v25 = vld [vmem:[#allocation93_spill] sm:$0xff]  ;;  %v34513_v37 = vld [vmem:[#allocation31_spill] sm:$0xff] }
 0xa85   :  { %26506 = vmatprep.subr.bf16.mxu0 %v34508_v8  ;;  %26698 = vmatprep.subr.bf16.mxu1 %v34509_v31 }
 0xa88   :  { %26508 = vmatpush1.bf16.msra.mxu0 %v34510_v9  ;;  %26700 = vmatpush1.bf16.msra.mxu1 %v34511_v23  ;;  %v23618_v23 = vld [vmem:[%s33080_s0 + $0xa] sm:$0x3] }
 0xa89   :  { %26510 = vmatprep.subr.bf16.mxu0 %v34003_v36  ;;  %26702 = vmatprep.subr.bf16.mxu1 %v33893_v39  ;;  %v16044_v9 = vsel %vm1892_vm0, %v23618_v23, 0 }
 0xa8a   :  { %v31986_v31 = vand.u32 4294901760, %v16044_v9 }
 0xa8b   :  { %15078 = vmatmul.mubr.f32.vlgmr.msra.gmra.mrb[10].mxu0 %v31806_v13  ;;  %15933 = vmatmul.mubr.f32.vlgmr.msra.gmra.mrb[12].mxu1 %v31806_v13 }
 0xa8c   :  { %26512 = vmatpush1.bf16.msra.mxu0 %v34004_v22  ;;  %26704 = vmatpush1.bf16.msra.mxu1 %v33895_v45  ;;  %v16120_v8 = vsub.f32 %v16044_v9, %v31986_v31 }
 0xa8d   :  { %26514 = vmatprep.subr.bf16.mxu0 %v34005_v30  ;;  %26706 = vmatprep.subr.bf16.mxu1 %v33896_v34 }
 0xa8e   :  { %15180 = vmatprep.mubr.f32.mxu0 %v33562_v5  ;;  %16035 = vmatprep.mubr.f32.mxu1 %v33562_v5  ;;  %v16121_v23 = vand.u32 4294901760, %v16120_v8 }
 0xa90   :  { %26516 = vmatpush1.bf16.msra.mxu0 %v34006_v54  ;;  %26708 = vmatpush1.bf16.msra.mxu1 %v33897_v21  ;;  %v16122_v9 = vsub.f32 %v16120_v8, %v16121_v23 }
 0xa91   :  { %26518 = vmatprep.subr.bf16.mxu0 %v34007_v62  ;;  %26710 = vmatprep.subr.bf16.mxu1 %v33898_v60 }
 0xa92   :  { %v16123_v59 = vand.u32 4294901760, %v16122_v9  ;;  %v34522_v9 = vld [vmem:[#allocation122_spill] sm:$0xff] }
 0xa94   :  { %26520 = vmatpush1.bf16.msra.mxu0 %v34008_v56  ;;  %26712 = vmatpush1.bf16.msra.mxu1 %v33899_v55 }
 0xa95   :  { %26522 = vmatprep.subr.bf16.mxu0 %v34009_v46  ;;  %26714 = vmatprep.subr.bf16.mxu1 %v33900_v48 }
 0xa98   :  { %26524 = vmatpush1.bf16.msra.mxu0 %v34010_v16  ;;  %26716 = vmatpush1.bf16.msra.mxu1 %v33901_v52 }
 0xa99   :  { %26526 = vmatprep.subr.bf16.mxu0 %v34011_v19  ;;  %26718 = vmatprep.subr.bf16.mxu1 %v33902_v3 }
 0xa9c   :  { %26528 = vmatpush1.bf16.msra.mxu0 %v34012_v28  ;;  %26720 = vmatpush1.bf16.msra.mxu1 %v33903_v11 }
 0xa9d   :  { %26530 = vmatprep.subr.bf16.mxu0 %v34013_v29  ;;  %26722 = vmatprep.subr.bf16.mxu1 %v33904_v0 }
 0xaa0   :  { %26532 = vmatpush1.bf16.msra.mxu0 %v34014_v10  ;;  %26724 = vmatpush1.bf16.msra.mxu1 %v33905_v32 }
 0xaa1   :  { %26534 = vmatprep.subr.bf16.mxu0 %v34015_v38  ;;  %26726 = vmatprep.subr.bf16.mxu1 %v33906_v17 }
 0xaa4   :  { %26536 = vmatpush1.bf16.msra.mxu0 %v34016_v53  ;;  %26728 = vmatpush1.bf16.msra.mxu1 %v33907_v1 }
 0xaa5   :  { %26538 = vmatprep.subr.bf16.mxu0 %v34017_v14  ;;  %26730 = vmatprep.subr.bf16.mxu1 %v33908_v42 }
 0xaa8   :  { %26540 = vmatpush1.bf16.msra.mxu0 %v34018_v27  ;;  %26732 = vmatpush1.bf16.msra.mxu1 %v33909_v50 }
 0xaa9   :  { %26734 = vmatprep.subr.bf16.mxu0 %v34051_v44  ;;  %26782 = vmatprep.subr.bf16.mxu1 %v30433_v40 }
 0xaab   :  { %15182 = vmatmul.mubr.f32.vlgmr.msra.gmra.mrb[10].mxu0 %v31806_v13  ;;  %16037 = vmatmul.mubr.f32.vlgmr.msra.gmra.mrb[12].mxu1 %v31806_v13  ;;  %v34517_v13 = vld [vmem:[#allocation92_spill] sm:$0xff] }
 0xaac   :  { %26736 = vmatpush1.bf16.msra.mxu0 %v34052_v43  ;;  %26784 = vmatpush1.bf16.msra.mxu1 %v34275_v35 }
 0xaad   :  { %26738 = vmatprep.subr.bf16.mxu0 %v34512_v25  ;;  %26786 = vmatprep.subr.bf16.mxu1 %v34513_v37 }
 0xaae   :  { %16118 = vmatprep.mubr.f32.mxu0 %v33562_v5  ;;  %16661 = vmatprep.mubr.f32.mxu1 %v33562_v5 }
 0xab0   :  { %26740 = vmatpush1.bf16.msra.mxu0 %v34514_v58  ;;  %26788 = vmatpush1.bf16.msra.mxu1 %v34515_v7 }
 0xab1   :  { %26742 = vmatprep.subr.bf16.mxu0 %v34516_v49  ;;  %26790 = vmatprep.subr.bf16.mxu1 %v34517_v13  ;;  %v34524_v49 = vld [vmem:[#allocation110_spill] sm:$0xff] }
 0xab2   :  { %v34525_v13 = vld [vmem:[#allocation106_spill] sm:$0xff] }
 0xab3   :  { %16124 = vmatmul.mubr.f32.vlgmr.msra.gmra.mrb[10].mxu0 %v16123_v59  ;;  %16667 = vmatmul.mubr.f32.vlgmr.msra.gmra.mrb[12].mxu1 %v16123_v59  ;;  %v34526_v59 = vld [vmem:[#allocation114_spill] sm:$0xff] }
 0xab4   :  { %26744 = vmatpush1.bf16.msra.mxu0 %v34518_v47  ;;  %26792 = vmatpush1.bf16.msra.mxu1 %v34519_v12  ;;  %v34529_v12 = vld [vmem:[#allocation112_spill] sm:$0xff] }
 0xab5   :  { %26746 = vmatprep.subr.bf16.mxu0 %v34520_v6  ;;  %26794 = vmatprep.subr.bf16.mxu1 %v34521_v61  ;;  %v34527_v6 = vld [vmem:[#allocation109_spill] sm:$0xff]  ;;  %v34528_v61 = vld [vmem:[#allocation118_spill] sm:$0xff] }
 0xab6   :  { %16234 = vmatprep.mubr.f32.mxu0 %v33562_v5  ;;  %16777 = vmatprep.mubr.f32.mxu1 %v33562_v5 }
 0xab8   :  { %26748 = vmatpush1.bf16.msra.mxu0 %v34522_v9  ;;  %26796 = vmatpush1.bf16.msra.mxu1 %v34523_v51  ;;  %v34530_v51 = vld [vmem:[#allocation120_spill] sm:$0xff] }
 0xab9   :  { %26750 = vmatprep.subr.bf16.mxu0 %v34524_v49  ;;  %26798 = vmatprep.subr.bf16.mxu1 %v34525_v13  ;;  %v34531_v49 = vld [vmem:[#allocation113_spill] sm:$0xff] }
 0xaba   :  { %v34539_v13 = vld [vmem:[#allocation125_spill] sm:$0xff] }
 0xabb   :  { %16236 = vmatmul.mubr.f32.vlgmr.msra.gmra.mrb[10].mxu0 %v31986_v31  ;;  %16779 = vmatmul.mubr.f32.vlgmr.msra.gmra.mrb[12].mxu1 %v31986_v31 }
 0xabc   :  { %26752 = vmatpush1.bf16.msra.mxu0 %v34526_v59  ;;  %26800 = vmatpush1.bf16.msra.mxu1 %v34527_v6  ;;  %v34537_v6 = vld [vmem:[#allocation124_spill] sm:$0xff]  ;;  %v34538_v59 = vld [vmem:[#allocation47_spill] sm:$0xff] }
 0xabd   :  { %26754 = vmatprep.subr.bf16.mxu0 %v34528_v61  ;;  %26802 = vmatprep.subr.bf16.mxu1 %v34529_v12  ;;  %v34535_v12 = vld [vmem:[#allocation123_spill] sm:$0xff]  ;;  %v34536_v61 = vld [vmem:[#allocation132_spill] sm:$0xff] }
 0xabe   :  { %16322 = vmatprep.mubr.f32.mxu0 %v33562_v5  ;;  %16865 = vmatprep.mubr.f32.mxu1 %v33562_v5 }
 0xac0   :  { %26756 = vmatpush1.bf16.msra.mxu0 %v34530_v51  ;;  %26804 = vmatpush1.bf16.msra.mxu1 %v34531_v49  ;;  %v34532_v49 = vld [vmem:[#allocation127_spill] sm:$0xff] }
 0xac1   :  { %26758 = vmatprep.subr.bf16.mxu0 %v34051_v44  ;;  %26806 = vmatprep.subr.bf16.mxu1 %v30433_v40  ;;  %v34533_v51 = vld [vmem:[#allocation119_spill] sm:$0xff] }
 0xac3   :  { %16325 = vmatmul.mubr.f32.vlgmr.msra.gmra.mrb[10].mxu0 %v16120_v8  ;;  %16868 = vmatmul.mubr.f32.vlgmr.msra.gmra.mrb[12].mxu1 %v16120_v8  ;;  %v34534_v8 = vld [vmem:[#allocation130_spill] sm:$0xff] }
 0xac4   :  { %26760 = vmatpush1.bf16.msra.mxu0 %v34052_v43  ;;  %26808 = vmatpush1.bf16.msra.mxu1 %v34275_v35 }
 0xac5   :  { %26762 = vmatprep.subr.bf16.mxu0 %v34512_v25  ;;  %26810 = vmatprep.subr.bf16.mxu1 %v34513_v37 }
 0xac6   :  { %16403 = vmatprep.mubr.f32.mxu0 %v33562_v5  ;;  %16946 = vmatprep.mubr.f32.mxu1 %v33562_v5 }
 0xac8   :  { %26764 = vmatpush1.bf16.msra.mxu0 %v34514_v58  ;;  %26812 = vmatpush1.bf16.msra.mxu1 %v34515_v7 }
 0xac9   :  { %26766 = vmatprep.subr.bf16.mxu0 %v34532_v49  ;;  %26814 = vmatprep.subr.bf16.mxu1 %v34533_v51 }
 0xacb   :  { %16407 = vmatmul.mubr.f32.vlgmr.msra.gmra.mrb[10].mxu0 %v16121_v23  ;;  %16950 = vmatmul.mubr.f32.vlgmr.msra.gmra.mrb[12].mxu1 %v16121_v23  ;;  %v34541_v23 = vld [vmem:[#allocation131_spill] sm:$0xff] }
 0xacc   :  { %26768 = vmatpush1.bf16.msra.mxu0 %v34534_v8  ;;  %26816 = vmatpush1.bf16.msra.mxu1 %v34535_v12 }
 0xacd   :  { %26770 = vmatprep.subr.bf16.mxu0 %v34536_v61  ;;  %26818 = vmatprep.subr.bf16.mxu1 %v34537_v6  ;;  %v34542_v6 = vld [vmem:[#allocation129_spill] sm:$0xff] }
 0xace   :  { %16501 = vmatprep.mubr.f32.mxu0 %v33562_v5  ;;  %17044 = vmatprep.mubr.f32.mxu1 %v33562_v5 }
 0xad0   :  { %26772 = vmatpush1.bf16.msra.mxu0 %v34538_v59  ;;  %26820 = vmatpush1.bf16.msra.mxu1 %v34539_v13 }
 0xad1   :  { %26774 = vmatprep.subr.bf16.mxu0 %v34051_v44  ;;  %26822 = vmatprep.subr.bf16.mxu1 %v30433_v40 }
 0xad3   :  { %16503 = vmatmul.mubr.f32.vlgmr.msra.gmra.mrb[10].mxu0 %v31986_v31  ;;  %17046 = vmatmul.mubr.f32.vlgmr.msra.gmra.mrb[12].mxu1 %v31986_v31 }
 0xad4   :  { %26776 = vmatpush1.bf16.msra.mxu0 %v34052_v43  ;;  %26824 = vmatpush1.bf16.msra.mxu1 %v34275_v35 }
 0xad5   :  { %26778 = vmatprep.subr.bf16.mxu0 %v34512_v25  ;;  %26826 = vmatprep.subr.bf16.mxu1 %v34513_v37 }
 0xad6   :  { %16581 = vmatprep.mubr.f32.mxu0 %v33562_v5  ;;  %17124 = vmatprep.mubr.f32.mxu1 %v33562_v5 }
 0xad8   :  { %26780 = vmatpush1.bf16.msra.mxu0 %v34514_v58  ;;  %26828 = vmatpush1.bf16.msra.mxu1 %v34515_v7 }
 0xad9   :  { %26830 = vmatprep.subr.bf16.mxu0 %v34003_v36  ;;  %27022 = vmatprep.subr.bf16.mxu1 %v33893_v39 }
 0xadb   :  { %16583 = vmatmul.mubr.f32.vlgmr.msra.gmra.mrb[10].mxu0 %v31986_v31  ;;  %17126 = vmatmul.mubr.f32.vlgmr.msra.gmra.mrb[12].mxu1 %v31986_v31  ;;  %v34540_v31 = vld [vmem:[#allocation42_spill] sm:$0xff] }
 0xadc   :  { %26832 = vmatpush1.bf16.msra.mxu0 %v34004_v22  ;;  %27024 = vmatpush1.bf16.msra.mxu1 %v33895_v45 }
 0xadd   :  { %26834 = vmatprep.subr.bf16.mxu0 %v34005_v30  ;;  %27026 = vmatprep.subr.bf16.mxu1 %v33896_v34 }
 0xade   :  { %17259 = vmatprep.mubr.f32.mxu0 %v33562_v5  ;;  %18114 = vmatprep.mubr.f32.mxu1 %v33562_v5 }
 0xae0   :  { %26836 = vmatpush1.bf16.msra.mxu0 %v34006_v54  ;;  %27028 = vmatpush1.bf16.msra.mxu1 %v33897_v21 }
 0xae1   :  { %26838 = vmatprep.subr.bf16.mxu0 %v34007_v62  ;;  %27030 = vmatprep.subr.bf16.mxu1 %v33898_v60 }
 0xae4   :  { %26840 = vmatpush1.bf16.msra.mxu0 %v34008_v56  ;;  %27032 = vmatpush1.bf16.msra.mxu1 %v33899_v55 }
 0xae5   :  { %26842 = vmatprep.subr.bf16.mxu0 %v34009_v46  ;;  %27034 = vmatprep.subr.bf16.mxu1 %v33900_v48 }
 0xae8   :  { %26844 = vmatpush1.bf16.msra.mxu0 %v34010_v16  ;;  %27036 = vmatpush1.bf16.msra.mxu1 %v33901_v52 }
 0xae9   :  { %26846 = vmatprep.subr.bf16.mxu0 %v34011_v19  ;;  %27038 = vmatprep.subr.bf16.mxu1 %v33902_v3 }
 0xaec   :  { %26848 = vmatpush1.bf16.msra.mxu0 %v34012_v28  ;;  %27040 = vmatpush1.bf16.msra.mxu1 %v33903_v11 }
 0xaed   :  { %26850 = vmatprep.subr.bf16.mxu0 %v34013_v29  ;;  %27042 = vmatprep.subr.bf16.mxu1 %v33904_v0 }
 0xaf0   :  { %26852 = vmatpush1.bf16.msra.mxu0 %v34014_v10  ;;  %27044 = vmatpush1.bf16.msra.mxu1 %v33905_v32 }
 0xaf1   :  { %26854 = vmatprep.subr.bf16.mxu0 %v34015_v38  ;;  %27046 = vmatprep.subr.bf16.mxu1 %v33906_v17 }
 0xaf4   :  { %26856 = vmatpush1.bf16.msra.mxu0 %v34016_v53  ;;  %27048 = vmatpush1.bf16.msra.mxu1 %v33907_v1 }
 0xaf5   :  { %26858 = vmatprep.subr.bf16.mxu0 %v34017_v14  ;;  %27050 = vmatprep.subr.bf16.mxu1 %v33908_v42 }
 0xaf8   :  { %26860 = vmatpush1.bf16.msra.mxu0 %v34018_v27  ;;  %27052 = vmatpush1.bf16.msra.mxu1 %v33909_v50 }
 0xaf9   :  { %26862 = vmatprep.subr.bf16.mxu0 %v34540_v31  ;;  %27054 = vmatprep.subr.bf16.mxu1 %v34541_v23 }
 0xbae   :  { %v16584_v13 = vpop.f32.mrb[10].mxu0  ;;  %v17127_v59 = vpop.f32.mrb[12].mxu1 }
 0xbaf   :  { %v17132_v61 = vadd.f32 %v16584_v13, %v34542_v6  ;;  %v16586_v12 = vpop.f32.mrb[11].mxu0  ;;  %v17129_v8 = vpop.f32.mrb[13].mxu1  ;;  %v17134_v58 = vadd.f32 %v17127_v59, %v30574_v63 }
 0xbb0   :  { %v17133_v51 = vadd.f32 %v16586_v12, %v34188_v20  ;;  %v17135_v47 = vadd.f32 %v17129_v8, %v30576_v33 }
 0xbb1   :  { %v23619_v49 = vmul.f32 -1.442695, %v17132_v61 }
 0xbb2   :  { %v23620_v9 = vmul.f32 -1.442695, %v17133_v51  ;;  %v23621_v7 = vmul.f32 -1.442695, %v17135_v47 }
 0xbb3   :  { %28437 = vpow2.f32 %v23619_v49 }
 0xbb4   :  { %28439 = vpow2.f32 %v23620_v9 }
 0xbb5   :  { %28441 = vpow2.f32 %v23621_v7 }
 0xbb6   :  { %28443 = vtanh.f32 %v17134_v58 }
 0xbbd   :  { %v28438_v31 = vpop.eup %28437 }
 0xbbe   :  { %v28440_v37 = vpop.eup %28439  ;;  %v17139_v23 = vadd.f32 1.0, %v28438_v31  ;;  %v34543_v31 = vld [vmem:[#allocation96_spill] sm:$0xff] }
 0xbbf   :  { %v17145_v25 = vadd.f32 1.0, %v28440_v37  ;;  %v28442_v13 = vpop.eup %28441 }
 0xbc0   :  { %28445 = vrcp.f32 %v17139_v23  ;;  %v28444_v6 = vpop.eup %28443  ;;  %v17152_v49 = vadd.f32 1.0, %v28442_v13  ;;  %v34544_v23 = vld [vmem:[#allocation53_spill] sm:$0xff]  ;;  %v34545_v13 = vld [vmem:[#allocation98_spill] sm:$0xff] }
 0xbc1   :  { %28447 = vrcp.f32 %v17145_v25 }
 0xbc2   :  { %28449 = vrcp.f32 %v17152_v49  ;;  %v34549_v49 = vld [vmem:[#allocation146_spill] sm:$0xff] }
 0xbca   :  { %v28446_v12 = vpop.eup %28445 }
 0xbcb   :  { %v28448_v61 = vpop.eup %28447  ;;  %v17156_v51 = vmul.f32 %v28446_v12, %v28444_v6  ;;  %v34546_v12 = vld [vmem:[#allocation56_spill] sm:$0xff] }
 0xbcc   :  { %v17155_v9 = vmul.f32 %v28448_v61, %v31803_v24  ;;  %v28450_v47 = vpop.eup %28449  ;;  %v34547_v61 = vld [vmem:[#allocation145_spill] sm:$0xff] }
 0xbce   :  { %v32108_v8 = vadd.f32 %v17156_v51, %v17155_v9  ;;  %v34548_v51 = vld [vmem:[#allocation58_spill] sm:$0xff]  ;;  %v34550_v9 = vld [vmem:[#allocation60_spill] sm:$0xff] }
 0xbd0   :  { %28451 = vtanh.f32 %v32108_v8 }
 0xbda   :  { %v28452_v59 = vpop.eup %28451 }
 0xbdb   :  { %v17159_v7 = vmul.f32 %v28452_v59, %v28450_v47  ;;  %v34551_v47 = vld [vmem:[#allocation147_spill] sm:$0xff]  ;;  %v34552_v59 = vld [vmem:[#allocation61_spill] sm:$0xff] }
 0xbdd   :  { %17160 = vst [vmem:[#allocation8 + $0xa] sm:$0x3] %v17159_v7  ;;  %v32111_v37 = vand.u32 4294901760, %v17159_v7 }
 0xbdf   :  { %v32114_v25 = vsub.f32 %v17159_v7, %v32111_v37  ;;  %v34553_v7 = vld [vmem:[#allocation148_spill] sm:$0xff] }
 0xbe1   :  { %v32117_v58 = vand.u32 4294901760, %v32114_v25 }
 0xbe3   :  { %v17263_v24 = vsub.f32 %v32114_v25, %v32117_v58 }
 0xbe5   :  { %v17264_v6 = vand.u32 4294901760, %v17263_v24  ;;  %v34554_v24 = vld [vmem:[#allocation63_spill] sm:$0xff] }
 0xbe7   :  { %17265 = vmatmul.mubr.f32.vlgmr.msra.gmra.mrb[12].mxu0 %v17264_v6  ;;  %18120 = vmatmul.mubr.f32.vlgmr.msra.gmra.mrb[14].mxu1 %v17264_v6  ;;  %v34555_v6 = vld [vmem:[#allocation149_spill] sm:$0xff] }
 0xbe8   :  { %26864 = vmatpush1.bf16.msra.mxu0 %v34071_v4  ;;  %27056 = vmatpush1.bf16.msra.mxu1 %v34072_v15 }
 0xbe9   :  { %26866 = vmatprep.subr.bf16.mxu0 %v34189_v41  ;;  %27058 = vmatprep.subr.bf16.mxu1 %v34190_v26 }
 0xbea   :  { %17495 = vmatprep.mubr.f32.mxu0 %v33562_v5  ;;  %18350 = vmatprep.mubr.f32.mxu1 %v33562_v5 }
 0xbec   :  { %26868 = vmatpush1.bf16.msra.mxu0 %v34307_v2  ;;  %27060 = vmatpush1.bf16.msra.mxu1 %v34308_v18 }
 0xbed   :  { %26870 = vmatprep.subr.bf16.mxu0 %v34425_v57  ;;  %27062 = vmatprep.subr.bf16.mxu1 %v34543_v31  ;;  %v34641_v31 = vld [vmem:[#allocation104_spill] sm:$0xff] }
 0xbf0   :  { %26872 = vmatpush1.bf16.msra.mxu0 %v34544_v23  ;;  %27064 = vmatpush1.bf16.msra.mxu1 %v34545_v13  ;;  %v34556_v13 = vld [vmem:[#allocation66_spill] sm:$0xff]  ;;  %v34639_v23 = vld [vmem:[#allocation103_spill] sm:$0xff] }
 0xbf1   :  { %26874 = vmatprep.subr.bf16.mxu0 %v34546_v12  ;;  %27066 = vmatprep.subr.bf16.mxu1 %v34547_v61  ;;  %v34557_v12 = vld [vmem:[#allocation150_spill] sm:$0xff]  ;;  %v34558_v61 = vld [vmem:[#allocation67_spill] sm:$0xff] }
 0xbf4   :  { %26876 = vmatpush1.bf16.msra.mxu0 %v34548_v51  ;;  %27068 = vmatpush1.bf16.msra.mxu1 %v34549_v49  ;;  %v34559_v51 = vld [vmem:[#allocation151_spill] sm:$0xff]  ;;  %v34560_v49 = vld [vmem:[#allocation68_spill] sm:$0xff] }
 0xbf5   :  { %26878 = vmatprep.subr.bf16.mxu0 %v34550_v9  ;;  %27070 = vmatprep.subr.bf16.mxu1 %v34551_v47  ;;  %v34561_v9 = vld [vmem:[#allocation152_spill] sm:$0xff]  ;;  %v34562_v47 = vld [vmem:[#allocation70_spill] sm:$0xff] }
 0xbf8   :  { %26880 = vmatpush1.bf16.msra.mxu0 %v34552_v59  ;;  %27072 = vmatpush1.bf16.msra.mxu1 %v34553_v7  ;;  %v34563_v59 = vld [vmem:[#allocation153_spill] sm:$0xff]  ;;  %v34564_v7 = vld [vmem:[#allocation72_spill] sm:$0xff] }
 0xbf9   :  { %26882 = vmatprep.subr.bf16.mxu0 %v34554_v24  ;;  %27074 = vmatprep.subr.bf16.mxu1 %v34555_v6  ;;  %v34565_v24 = vld [vmem:[#allocation154_spill] sm:$0xff] }
 0xbfa   :  { %v34566_v6 = vld [vmem:[#allocation74_spill] sm:$0xff] }
 0xbfc   :  { %26884 = vmatpush1.bf16.msra.mxu0 %v34556_v13  ;;  %27076 = vmatpush1.bf16.msra.mxu1 %v34557_v12  ;;  %v34567_v13 = vld [vmem:[#allocation115_spill] sm:$0xff] }
 0xbfd   :  { %26886 = vmatprep.subr.bf16.mxu0 %v34558_v61  ;;  %27078 = vmatprep.subr.bf16.mxu1 %v34559_v51  ;;  %v34568_v51 = vld [vmem:[#allocation75_spill] sm:$0xff]  ;;  %v34581_v61 = vld [vmem:[#allocation158_spill] sm:$0xff] }
 0xbfe   :  { %v34582_v12 = vld [vmem:[#allocation79_spill] sm:$0xff] }
 0xc00   :  { %26888 = vmatpush1.bf16.msra.mxu0 %v34560_v49  ;;  %27080 = vmatpush1.bf16.msra.mxu1 %v34561_v9  ;;  %v34569_v49 = vld [vmem:[#allocation155_spill] sm:$0xff]  ;;  %v34570_v9 = vld [vmem:[#allocation76_spill] sm:$0xff] }
 0xc01   :  { %26890 = vmatprep.subr.bf16.mxu0 %v34562_v47  ;;  %27082 = vmatprep.subr.bf16.mxu1 %v34563_v59  ;;  %v34571_v47 = vld [vmem:[#allocation156_spill] sm:$0xff]  ;;  %v34576_v59 = vld [vmem:[#allocation43_spill] sm:$0xff] }
 0xc04   :  { %26892 = vmatpush1.bf16.msra.mxu0 %v34564_v7  ;;  %27084 = vmatpush1.bf16.msra.mxu1 %v34565_v24  ;;  %v34572_v24 = vld [vmem:[#allocation32_spill] sm:$0xff]  ;;  %v34575_v7 = vld [vmem:[#allocation121_spill] sm:$0xff] }
 0xc05   :  { %26894 = vmatprep.subr.bf16.mxu0 %v34566_v6  ;;  %27086 = vmatprep.subr.bf16.mxu1 %v34567_v13  ;;  %v34573_v6 = vld [vmem:[#allocation30_spill] sm:$0xff]  ;;  %v34574_v13 = vld [vmem:[#allocation39_spill] sm:$0xff] }
 0xc07   :  { %17497 = vmatmul.mubr.f32.vlgmr.msra.gmra.mrb[12].mxu0 %v32111_v37  ;;  %18352 = vmatmul.mubr.f32.vlgmr.msra.gmra.mrb[14].mxu1 %v32111_v37 }
 0xc08   :  { %26896 = vmatpush1.bf16.msra.mxu0 %v34568_v51  ;;  %27088 = vmatpush1.bf16.msra.mxu1 %v34569_v49  ;;  %v34577_v51 = vld [vmem:[#allocation157_spill] sm:$0xff] }
 0xc09   :  { %26898 = vmatprep.subr.bf16.mxu0 %v34570_v9  ;;  %27090 = vmatprep.subr.bf16.mxu1 %v34571_v47  ;;  %v34578_v49 = vld [vmem:[#allocation77_spill] sm:$0xff]  ;;  %v34579_v9 = vld [vmem:[#allocation128_spill] sm:$0xff]  ;;  %v34580_v47 = vld [vmem:[#allocation78_spill] sm:$0xff] }
 0xc0a   :  { %17631 = vmatprep.mubr.f32.mxu0 %v33562_v5  ;;  %18486 = vmatprep.mubr.f32.mxu1 %v33562_v5 }
 0xc0c   :  { %26900 = vmatpush1.bf16.msra.mxu0 %v34572_v24  ;;  %27092 = vmatpush1.bf16.msra.mxu1 %v34573_v6  ;;  %v34583_v24 = vld [vmem:[#allocation159_spill] sm:$0xff]  ;;  %v34584_v6 = vld [vmem:[#allocation80_spill] sm:$0xff] }
 0xc0d   :  { %26902 = vmatprep.subr.bf16.mxu0 %v34574_v13  ;;  %27094 = vmatprep.subr.bf16.mxu1 %v34575_v7  ;;  %v34585_v13 = vld [vmem:[#allocation160_spill] sm:$0xff]  ;;  %v34586_v7 = vld [vmem:[#allocation81_spill] sm:$0xff] }
 0xc10   :  { %26904 = vmatpush1.bf16.msra.mxu0 %v34576_v59  ;;  %27096 = vmatpush1.bf16.msra.mxu1 %v34577_v51  ;;  %v34587_v59 = vld [vmem:[#allocation161_spill] sm:$0xff]  ;;  %v34588_v51 = vld [vmem:[#allocation82_spill] sm:$0xff] }
 0xc11   :  { %26906 = vmatprep.subr.bf16.mxu0 %v34578_v49  ;;  %27098 = vmatprep.subr.bf16.mxu1 %v34579_v9  ;;  %v34589_v49 = vld [vmem:[#allocation162_spill] sm:$0xff]  ;;  %v34590_v9 = vld [vmem:[#allocation83_spill] sm:$0xff] }
 0xc14   :  { %26908 = vmatpush1.bf16.msra.mxu0 %v34580_v47  ;;  %27100 = vmatpush1.bf16.msra.mxu1 %v34581_v61  ;;  %v34591_v47 = vld [vmem:[#allocation163_spill] sm:$0xff]  ;;  %v34592_v61 = vld [vmem:[#allocation84_spill] sm:$0xff] }
 0xc15   :  { %26910 = vmatprep.subr.bf16.mxu0 %v34582_v12  ;;  %27102 = vmatprep.subr.bf16.mxu1 %v34583_v24  ;;  %v34593_v12 = vld [vmem:[#allocation164_spill] sm:$0xff]  ;;  %v34594_v24 = vld [vmem:[#allocation85_spill] sm:$0xff] }
 0xc18   :  { %26912 = vmatpush1.bf16.msra.mxu0 %v34584_v6  ;;  %27104 = vmatpush1.bf16.msra.mxu1 %v34585_v13  ;;  %v34595_v6 = vld [vmem:[#allocation165_spill] sm:$0xff]  ;;  %v34596_v13 = vld [vmem:[#allocation86_spill] sm:$0xff] }
 0xc19   :  { %26914 = vmatprep.subr.bf16.mxu0 %v34586_v7  ;;  %27106 = vmatprep.subr.bf16.mxu1 %v34587_v59  ;;  %v34597_v7 = vld [vmem:[#allocation166_spill] sm:$0xff]  ;;  %v34638_v59 = vld [vmem:[#allocation111_spill] sm:$0xff] }
 0xc1c   :  { %26916 = vmatpush1.bf16.msra.mxu0 %v34588_v51  ;;  %27108 = vmatpush1.bf16.msra.mxu1 %v34589_v49  ;;  %v34614_v49 = vld [vmem:[#allocation57_spill] sm:$0xff]  ;;  %v34637_v51 = vld [vmem:[#allocation94_spill] sm:$0xff] }
 0xc1d   :  { %26918 = vmatprep.subr.bf16.mxu0 %v34590_v9  ;;  %27110 = vmatprep.subr.bf16.mxu1 %v34591_v47  ;;  %v34607_v47 = vld [vmem:[#allocation116_spill] sm:$0xff] }
 0xc1e   :  { %v34613_v9 = vld [vmem:[#allocation136_spill] sm:$0xff] }
 0xc20   :  { %26920 = vmatpush1.bf16.msra.mxu0 %v34592_v61  ;;  %27112 = vmatpush1.bf16.msra.mxu1 %v34593_v12  ;;  %v34603_v12 = vld [vmem:[#allocation101_spill] sm:$0xff]  ;;  %v34604_v61 = vld [vmem:[#allocation46_spill] sm:$0xff] }
 0xc21   :  { %26922 = vmatprep.subr.bf16.mxu0 %v34594_v24  ;;  %27114 = vmatprep.subr.bf16.mxu1 %v34595_v6  ;;  %v34601_v6 = vld [vmem:[#allocation100_spill] sm:$0xff]  ;;  %v34602_v24 = vld [vmem:[#allocation45_spill] sm:$0xff] }
 0xc24   :  { %26924 = vmatpush1.bf16.msra.mxu0 %v34596_v13  ;;  %27116 = vmatpush1.bf16.msra.mxu1 %v34597_v7  ;;  %v34599_v7 = vld [vmem:[#allocation99_spill] sm:$0xff]  ;;  %v34600_v13 = vld [vmem:[#allocation41_spill] sm:$0xff] }
 0xc25   :  { %26926 = vmatprep.subr.bf16.mxu0 %v34003_v36  ;;  %27118 = vmatprep.subr.bf16.mxu1 %v33893_v39 }
 0xc27   :  { %17634 = vmatmul.mubr.f32.vlgmr.msra.gmra.mrb[12].mxu0 %v32114_v25  ;;  %18489 = vmatmul.mubr.f32.vlgmr.msra.gmra.mrb[14].mxu1 %v32114_v25  ;;  %v34598_v25 = vld [vmem:[#allocation40_spill] sm:$0xff] }
 0xc28   :  { %26928 = vmatpush1.bf16.msra.mxu0 %v34004_v22  ;;  %27120 = vmatpush1.bf16.msra.mxu1 %v33895_v45 }
 0xc29   :  { %26930 = vmatprep.subr.bf16.mxu0 %v34005_v30  ;;  %27122 = vmatprep.subr.bf16.mxu1 %v33896_v34 }
 0xc2a   :  { %17736 = vmatprep.mubr.f32.mxu0 %v33562_v5  ;;  %18591 = vmatprep.mubr.f32.mxu1 %v33562_v5 }
 0xc2c   :  { %26932 = vmatpush1.bf16.msra.mxu0 %v34006_v54  ;;  %27124 = vmatpush1.bf16.msra.mxu1 %v33897_v21 }
 0xc2d   :  { %26934 = vmatprep.subr.bf16.mxu0 %v34007_v62  ;;  %27126 = vmatprep.subr.bf16.mxu1 %v33898_v60 }
 0xc30   :  { %26936 = vmatpush1.bf16.msra.mxu0 %v34008_v56  ;;  %27128 = vmatpush1.bf16.msra.mxu1 %v33899_v55 }
 0xc31   :  { %26938 = vmatprep.subr.bf16.mxu0 %v34009_v46  ;;  %27130 = vmatprep.subr.bf16.mxu1 %v33900_v48 }
 0xc34   :  { %26940 = vmatpush1.bf16.msra.mxu0 %v34010_v16  ;;  %27132 = vmatpush1.bf16.msra.mxu1 %v33901_v52 }
 0xc35   :  { %26942 = vmatprep.subr.bf16.mxu0 %v34011_v19  ;;  %27134 = vmatprep.subr.bf16.mxu1 %v33902_v3 }
 0xc38   :  { %26944 = vmatpush1.bf16.msra.mxu0 %v34012_v28  ;;  %27136 = vmatpush1.bf16.msra.mxu1 %v33903_v11 }
 0xc39   :  { %26946 = vmatprep.subr.bf16.mxu0 %v34013_v29  ;;  %27138 = vmatprep.subr.bf16.mxu1 %v33904_v0 }
 0xc3c   :  { %26948 = vmatpush1.bf16.msra.mxu0 %v34014_v10  ;;  %27140 = vmatpush1.bf16.msra.mxu1 %v33905_v32 }
 0xc3d   :  { %26950 = vmatprep.subr.bf16.mxu0 %v34015_v38  ;;  %27142 = vmatprep.subr.bf16.mxu1 %v33906_v17 }
 0xc40   :  { %26952 = vmatpush1.bf16.msra.mxu0 %v34016_v53  ;;  %27144 = vmatpush1.bf16.msra.mxu1 %v33907_v1 }
 0xc41   :  { %26954 = vmatprep.subr.bf16.mxu0 %v34017_v14  ;;  %27146 = vmatprep.subr.bf16.mxu1 %v33908_v42 }
 0xc44   :  { %26956 = vmatpush1.bf16.msra.mxu0 %v34018_v27  ;;  %27148 = vmatpush1.bf16.msra.mxu1 %v33909_v50 }
 0xc45   :  { %26958 = vmatprep.subr.bf16.mxu0 %v34598_v25  ;;  %27150 = vmatprep.subr.bf16.mxu1 %v34599_v7  ;;  %v34605_v25 = vld [vmem:[#allocation102_spill] sm:$0xff] }
 0xc46   :  { %v34606_v7 = vld [vmem:[#allocation50_spill] sm:$0xff] }
 0xc47   :  { %17740 = vmatmul.mubr.f32.vlgmr.msra.gmra.mrb[12].mxu0 %v32117_v58  ;;  %18595 = vmatmul.mubr.f32.vlgmr.msra.gmra.mrb[14].mxu1 %v32117_v58  ;;  %v34608_v58 = vld [vmem:[#allocation52_spill] sm:$0xff] }
 0xc48   :  { %26960 = vmatpush1.bf16.msra.mxu0 %v34600_v13  ;;  %27152 = vmatpush1.bf16.msra.mxu1 %v34601_v6  ;;  %v34609_v13 = vld [vmem:[#allocation117_spill] sm:$0xff]  ;;  %v34610_v6 = vld [vmem:[#allocation54_spill] sm:$0xff] }
 0xc49   :  { %26962 = vmatprep.subr.bf16.mxu0 %v34602_v24  ;;  %27154 = vmatprep.subr.bf16.mxu1 %v34603_v12  ;;  %v34611_v24 = vld [vmem:[#allocation135_spill] sm:$0xff] }
 0xc4a   :  { %17906 = vmatprep.mubr.f32.mxu0 %v33562_v5  ;;  %18761 = vmatprep.mubr.f32.mxu1 %v33562_v5  ;;  %v34612_v12 = vld [vmem:[#allocation55_spill] sm:$0xff] }
 0xc4c   :  { %26964 = vmatpush1.bf16.msra.mxu0 %v34604_v61  ;;  %27156 = vmatpush1.bf16.msra.mxu1 %v34605_v25  ;;  %v34615_v61 = vld [vmem:[#allocation137_spill] sm:$0xff]  ;;  %v34616_v25 = vld [vmem:[#allocation59_spill] sm:$0xff] }
 0xc4d   :  { %26966 = vmatprep.subr.bf16.mxu0 %v34606_v7  ;;  %27158 = vmatprep.subr.bf16.mxu1 %v34607_v47  ;;  %v34617_v7 = vld [vmem:[#allocation138_spill] sm:$0xff] }
 0xc4e   :  { %v34618_v47 = vld [vmem:[#allocation62_spill] sm:$0xff] }
 0xc50   :  { %26968 = vmatpush1.bf16.msra.mxu0 %v34608_v58  ;;  %27160 = vmatpush1.bf16.msra.mxu1 %v34609_v13  ;;  %v34619_v58 = vld [vmem:[#allocation139_spill] sm:$0xff]  ;;  %v34620_v13 = vld [vmem:[#allocation64_spill] sm:$0xff] }
 0xc51   :  { %26970 = vmatprep.subr.bf16.mxu0 %v34610_v6  ;;  %27162 = vmatprep.subr.bf16.mxu1 %v34611_v24  ;;  %v34621_v6 = vld [vmem:[#allocation140_spill] sm:$0xff]  ;;  %v34622_v24 = vld [vmem:[#allocation65_spill] sm:$0xff] }
 0xc54   :  { %26972 = vmatpush1.bf16.msra.mxu0 %v34612_v12  ;;  %27164 = vmatpush1.bf16.msra.mxu1 %v34613_v9  ;;  %v34623_v12 = vld [vmem:[#allocation141_spill] sm:$0xff] }
 0xc55   :  { %26974 = vmatprep.subr.bf16.mxu0 %v34614_v49  ;;  %27166 = vmatprep.subr.bf16.mxu1 %v34615_v61  ;;  %v34624_v9 = vld [vmem:[#allocation69_spill] sm:$0xff]  ;;  %v34625_v49 = vld [vmem:[#allocation142_spill] sm:$0xff]  ;;  %v34626_v61 = vld [vmem:[#allocation71_spill] sm:$0xff] }
 0xc58   :  { %26976 = vmatpush1.bf16.msra.mxu0 %v34616_v25  ;;  %27168 = vmatpush1.bf16.msra.mxu1 %v34617_v7  ;;  %v34627_v25 = vld [vmem:[#allocation143_spill] sm:$0xff]  ;;  %v34628_v7 = vld [vmem:[#allocation73_spill] sm:$0xff] }
 0xc59   :  { %26978 = vmatprep.subr.bf16.mxu0 %v34618_v47  ;;  %27170 = vmatprep.subr.bf16.mxu1 %v34619_v58  ;;  %v34629_v47 = vld [vmem:[#allocation144_spill] sm:$0xff] }
 0xc5a   :  { %v34636_v58 = vld [vmem:[#allocation108_spill] sm:$0xff] }
 0xc5c   :  { %26980 = vmatpush1.bf16.msra.mxu0 %v34620_v13  ;;  %27172 = vmatpush1.bf16.msra.mxu1 %v34621_v6  ;;  %v34633_v6 = vld [vmem:[#allocation90_spill] sm:$0xff]  ;;  %v34634_v13 = vld [vmem:[#allocation105_spill] sm:$0xff] }
 0xc5d   :  { %26982 = vmatprep.subr.bf16.mxu0 %v34622_v24  ;;  %27174 = vmatprep.subr.bf16.mxu1 %v34623_v12  ;;  %v34632_v24 = vld [vmem:[#allocation97_spill] sm:$0xff] }
 0xc60   :  { %26984 = vmatpush1.bf16.msra.mxu0 %v34624_v9  ;;  %27176 = vmatpush1.bf16.msra.mxu1 %v34625_v49  ;;  %v34630_v49 = vld [vmem:[#allocation93_spill] sm:$0xff]  ;;  %v34631_v9 = vld [vmem:[#allocation31_spill] sm:$0xff] }
 0xc61   :  { %26986 = vmatprep.subr.bf16.mxu0 %v34626_v61  ;;  %27178 = vmatprep.subr.bf16.mxu1 %v34627_v25 }
 0xc64   :  { %26988 = vmatpush1.bf16.msra.mxu0 %v34628_v7  ;;  %27180 = vmatpush1.bf16.msra.mxu1 %v34629_v47  ;;  %v23622_v47 = vld [vmem:[%s33080_s0 + $0xc] sm:$0x3] }
 0xc65   :  { %26990 = vmatprep.subr.bf16.mxu0 %v34003_v36  ;;  %27182 = vmatprep.subr.bf16.mxu1 %v33893_v39  ;;  %v18874_v7 = vsel %vm1892_vm0, %v23622_v47, 0 }
 0xc66   :  { %v32291_v25 = vand.u32 4294901760, %v18874_v7 }
 0xc67   :  { %17908 = vmatmul.mubr.f32.vlgmr.msra.gmra.mrb[12].mxu0 %v32111_v37  ;;  %18763 = vmatmul.mubr.f32.vlgmr.msra.gmra.mrb[14].mxu1 %v32111_v37 }
 0xc68   :  { %26992 = vmatpush1.bf16.msra.mxu0 %v34004_v22  ;;  %27184 = vmatpush1.bf16.msra.mxu1 %v33895_v45  ;;  %v18950_v61 = vsub.f32 %v18874_v7, %v32291_v25 }
 0xc69   :  { %26994 = vmatprep.subr.bf16.mxu0 %v34005_v30  ;;  %27186 = vmatprep.subr.bf16.mxu1 %v33896_v34 }
 0xc6a   :  { %18010 = vmatprep.mubr.f32.mxu0 %v33562_v5  ;;  %18865 = vmatprep.mubr.f32.mxu1 %v33562_v5  ;;  %v18951_v47 = vand.u32 4294901760, %v18950_v61 }
 0xc6c   :  { %26996 = vmatpush1.bf16.msra.mxu0 %v34006_v54  ;;  %27188 = vmatpush1.bf16.msra.mxu1 %v33897_v21  ;;  %v18952_v7 = vsub.f32 %v18950_v61, %v18951_v47 }
 0xc6d   :  { %26998 = vmatprep.subr.bf16.mxu0 %v34007_v62  ;;  %27190 = vmatprep.subr.bf16.mxu1 %v33898_v60 }
 0xc6e   :  { %v18953_v12 = vand.u32 4294901760, %v18952_v7  ;;  %v34640_v7 = vld [vmem:[#allocation122_spill] sm:$0xff] }
 0xc70   :  { %27000 = vmatpush1.bf16.msra.mxu0 %v34008_v56  ;;  %27192 = vmatpush1.bf16.msra.mxu1 %v33899_v55 }
 0xc71   :  { %27002 = vmatprep.subr.bf16.mxu0 %v34009_v46  ;;  %27194 = vmatprep.subr.bf16.mxu1 %v33900_v48 }
 0xc74   :  { %27004 = vmatpush1.bf16.msra.mxu0 %v34010_v16  ;;  %27196 = vmatpush1.bf16.msra.mxu1 %v33901_v52 }
 0xc75   :  { %27006 = vmatprep.subr.bf16.mxu0 %v34011_v19  ;;  %27198 = vmatprep.subr.bf16.mxu1 %v33902_v3 }
 0xc78   :  { %27008 = vmatpush1.bf16.msra.mxu0 %v34012_v28  ;;  %27200 = vmatpush1.bf16.msra.mxu1 %v33903_v11 }
 0xc79   :  { %27010 = vmatprep.subr.bf16.mxu0 %v34013_v29  ;;  %27202 = vmatprep.subr.bf16.mxu1 %v33904_v0 }
 0xc7c   :  { %27012 = vmatpush1.bf16.msra.mxu0 %v34014_v10  ;;  %27204 = vmatpush1.bf16.msra.mxu1 %v33905_v32 }
 0xc7d   :  { %27014 = vmatprep.subr.bf16.mxu0 %v34015_v38  ;;  %27206 = vmatprep.subr.bf16.mxu1 %v33906_v17 }
 0xc80   :  { %27016 = vmatpush1.bf16.msra.mxu0 %v34016_v53  ;;  %27208 = vmatpush1.bf16.msra.mxu1 %v33907_v1 }
 0xc81   :  { %27018 = vmatprep.subr.bf16.mxu0 %v34017_v14  ;;  %27210 = vmatprep.subr.bf16.mxu1 %v33908_v42 }
 0xc84   :  { %27020 = vmatpush1.bf16.msra.mxu0 %v34018_v27  ;;  %27212 = vmatpush1.bf16.msra.mxu1 %v33909_v50 }
 0xc85   :  { %27214 = vmatprep.subr.bf16.mxu0 %v34051_v44  ;;  %27262 = vmatprep.subr.bf16.mxu1 %v30433_v40 }
 0xc87   :  { %18012 = vmatmul.mubr.f32.vlgmr.msra.gmra.mrb[12].mxu0 %v32111_v37  ;;  %18867 = vmatmul.mubr.f32.vlgmr.msra.gmra.mrb[14].mxu1 %v32111_v37  ;;  %v34635_v37 = vld [vmem:[#allocation92_spill] sm:$0xff] }
 0xc88   :  { %27216 = vmatpush1.bf16.msra.mxu0 %v34052_v43  ;;  %27264 = vmatpush1.bf16.msra.mxu1 %v34275_v35 }
 0xc89   :  { %27218 = vmatprep.subr.bf16.mxu0 %v34630_v49  ;;  %27266 = vmatprep.subr.bf16.mxu1 %v34631_v9 }
 0xc8a   :  { %18948 = vmatprep.mubr.f32.mxu0 %v33562_v5  ;;  %19491 = vmatprep.mubr.f32.mxu1 %v33562_v5 }
 0xc8c   :  { %27220 = vmatpush1.bf16.msra.mxu0 %v34632_v24  ;;  %27268 = vmatpush1.bf16.msra.mxu1 %v34633_v6 }
 0xc8d   :  { %27222 = vmatprep.subr.bf16.mxu0 %v34634_v13  ;;  %27270 = vmatprep.subr.bf16.mxu1 %v34635_v37  ;;  %v34642_v13 = vld [vmem:[#allocation110_spill] sm:$0xff] }
 0xc8e   :  { %v34643_v37 = vld [vmem:[#allocation106_spill] sm:$0xff] }
 0xc8f   :  { %18954 = vmatmul.mubr.f32.vlgmr.msra.gmra.mrb[12].mxu0 %v18953_v12  ;;  %19497 = vmatmul.mubr.f32.vlgmr.msra.gmra.mrb[14].mxu1 %v18953_v12  ;;  %v34644_v12 = vld [vmem:[#allocation114_spill] sm:$0xff] }
 0xc90   :  { %27224 = vmatpush1.bf16.msra.mxu0 %v34636_v58  ;;  %27272 = vmatpush1.bf16.msra.mxu1 %v34637_v51  ;;  %v34647_v51 = vld [vmem:[#allocation112_spill] sm:$0xff] }
 0xc91   :  { %27226 = vmatprep.subr.bf16.mxu0 %v34638_v59  ;;  %27274 = vmatprep.subr.bf16.mxu1 %v34639_v23  ;;  %v34645_v59 = vld [vmem:[#allocation109_spill] sm:$0xff]  ;;  %v34646_v23 = vld [vmem:[#allocation118_spill] sm:$0xff] }
 0xc92   :  { %19064 = vmatprep.mubr.f32.mxu0 %v33562_v5  ;;  %19607 = vmatprep.mubr.f32.mxu1 %v33562_v5 }
 0xc94   :  { %27228 = vmatpush1.bf16.msra.mxu0 %v34640_v7  ;;  %27276 = vmatpush1.bf16.msra.mxu1 %v34641_v31  ;;  %v34648_v31 = vld [vmem:[#allocation120_spill] sm:$0xff] }
 0xc95   :  { %27230 = vmatprep.subr.bf16.mxu0 %v34642_v13  ;;  %27278 = vmatprep.subr.bf16.mxu1 %v34643_v37  ;;  %v34649_v13 = vld [vmem:[#allocation113_spill] sm:$0xff] }
 0xc96   :  { %v34657_v37 = vld [vmem:[#allocation125_spill] sm:$0xff] }
 0xc97   :  { %19066 = vmatmul.mubr.f32.vlgmr.msra.gmra.mrb[12].mxu0 %v32291_v25  ;;  %19609 = vmatmul.mubr.f32.vlgmr.msra.gmra.mrb[14].mxu1 %v32291_v25 }
 0xc98   :  { %27232 = vmatpush1.bf16.msra.mxu0 %v34644_v12  ;;  %27280 = vmatpush1.bf16.msra.mxu1 %v34645_v59  ;;  %v34655_v59 = vld [vmem:[#allocation124_spill] sm:$0xff]  ;;  %v34656_v12 = vld [vmem:[#allocation47_spill] sm:$0xff] }
 0xc99   :  { %27234 = vmatprep.subr.bf16.mxu0 %v34646_v23  ;;  %27282 = vmatprep.subr.bf16.mxu1 %v34647_v51  ;;  %v34653_v51 = vld [vmem:[#allocation123_spill] sm:$0xff]  ;;  %v34654_v23 = vld [vmem:[#allocation132_spill] sm:$0xff] }
 0xc9a   :  { %19152 = vmatprep.mubr.f32.mxu0 %v33562_v5  ;;  %19695 = vmatprep.mubr.f32.mxu1 %v33562_v5 }
 0xc9c   :  { %27236 = vmatpush1.bf16.msra.mxu0 %v34648_v31  ;;  %27284 = vmatpush1.bf16.msra.mxu1 %v34649_v13  ;;  %v34650_v13 = vld [vmem:[#allocation127_spill] sm:$0xff] }
 0xc9d   :  { %27238 = vmatprep.subr.bf16.mxu0 %v34051_v44  ;;  %27286 = vmatprep.subr.bf16.mxu1 %v30433_v40  ;;  %v34651_v31 = vld [vmem:[#allocation119_spill] sm:$0xff] }
 0xc9f   :  { %19155 = vmatmul.mubr.f32.vlgmr.msra.gmra.mrb[12].mxu0 %v18950_v61  ;;  %19698 = vmatmul.mubr.f32.vlgmr.msra.gmra.mrb[14].mxu1 %v18950_v61  ;;  %v34652_v61 = vld [vmem:[#allocation130_spill] sm:$0xff] }
 0xca0   :  { %27240 = vmatpush1.bf16.msra.mxu0 %v34052_v43  ;;  %27288 = vmatpush1.bf16.msra.mxu1 %v34275_v35 }
 0xca1   :  { %27242 = vmatprep.subr.bf16.mxu0 %v34630_v49  ;;  %27290 = vmatprep.subr.bf16.mxu1 %v34631_v9 }
 0xca2   :  { %19233 = vmatprep.mubr.f32.mxu0 %v33562_v5  ;;  %19776 = vmatprep.mubr.f32.mxu1 %v33562_v5 }
 0xca4   :  { %27244 = vmatpush1.bf16.msra.mxu0 %v34632_v24  ;;  %27292 = vmatpush1.bf16.msra.mxu1 %v34633_v6 }
 0xca5   :  { %27246 = vmatprep.subr.bf16.mxu0 %v34650_v13  ;;  %27294 = vmatprep.subr.bf16.mxu1 %v34651_v31 }
 0xca7   :  { %19237 = vmatmul.mubr.f32.vlgmr.msra.gmra.mrb[12].mxu0 %v18951_v47  ;;  %19780 = vmatmul.mubr.f32.vlgmr.msra.gmra.mrb[14].mxu1 %v18951_v47  ;;  %v34659_v47 = vld [vmem:[#allocation131_spill] sm:$0xff] }
 0xca8   :  { %27248 = vmatpush1.bf16.msra.mxu0 %v34652_v61  ;;  %27296 = vmatpush1.bf16.msra.mxu1 %v34653_v51 }
 0xca9   :  { %27250 = vmatprep.subr.bf16.mxu0 %v34654_v23  ;;  %27298 = vmatprep.subr.bf16.mxu1 %v34655_v59  ;;  %v34660_v59 = vld [vmem:[#allocation129_spill] sm:$0xff] }
 0xcaa   :  { %19331 = vmatprep.mubr.f32.mxu0 %v33562_v5  ;;  %19874 = vmatprep.mubr.f32.mxu1 %v33562_v5 }
 0xcac   :  { %27252 = vmatpush1.bf16.msra.mxu0 %v34656_v12  ;;  %27300 = vmatpush1.bf16.msra.mxu1 %v34657_v37 }
 0xcad   :  { %27254 = vmatprep.subr.bf16.mxu0 %v34051_v44  ;;  %27302 = vmatprep.subr.bf16.mxu1 %v30433_v40 }
 0xcaf   :  { %19333 = vmatmul.mubr.f32.vlgmr.msra.gmra.mrb[12].mxu0 %v32291_v25  ;;  %19876 = vmatmul.mubr.f32.vlgmr.msra.gmra.mrb[14].mxu1 %v32291_v25 }
 0xcb0   :  { %27256 = vmatpush1.bf16.msra.mxu0 %v34052_v43  ;;  %27304 = vmatpush1.bf16.msra.mxu1 %v34275_v35 }
 0xcb1   :  { %27258 = vmatprep.subr.bf16.mxu0 %v34630_v49  ;;  %27306 = vmatprep.subr.bf16.mxu1 %v34631_v9 }
 0xcb2   :  { %19411 = vmatprep.mubr.f32.mxu0 %v33562_v5  ;;  %19954 = vmatprep.mubr.f32.mxu1 %v33562_v5 }
 0xcb4   :  { %27260 = vmatpush1.bf16.msra.mxu0 %v34632_v24  ;;  %27308 = vmatpush1.bf16.msra.mxu1 %v34633_v6 }
 0xcb5   :  { %27310 = vmatprep.subr.bf16.mxu0 %v34003_v36  ;;  %27502 = vmatprep.subr.bf16.mxu1 %v33893_v39 }
 0xcb7   :  { %19413 = vmatmul.mubr.f32.vlgmr.msra.gmra.mrb[12].mxu0 %v32291_v25  ;;  %19956 = vmatmul.mubr.f32.vlgmr.msra.gmra.mrb[14].mxu1 %v32291_v25  ;;  %v34658_v25 = vld [vmem:[#allocation42_spill] sm:$0xff] }
 0xcb8   :  { %27312 = vmatpush1.bf16.msra.mxu0 %v34004_v22  ;;  %27504 = vmatpush1.bf16.msra.mxu1 %v33895_v45 }
 0xcb9   :  { %27314 = vmatprep.subr.bf16.mxu0 %v34005_v30  ;;  %27506 = vmatprep.subr.bf16.mxu1 %v33896_v34 }
 0xcba   :  { %20089 = vmatprep.mubr.f32.mxu0 %v33562_v5  ;;  %20944 = vmatprep.mubr.f32.mxu1 %v33562_v5 }
 0xcbc   :  { %27316 = vmatpush1.bf16.msra.mxu0 %v34006_v54  ;;  %27508 = vmatpush1.bf16.msra.mxu1 %v33897_v21 }
 0xcbd   :  { %27318 = vmatprep.subr.bf16.mxu0 %v34007_v62  ;;  %27510 = vmatprep.subr.bf16.mxu1 %v33898_v60 }
 0xcc0   :  { %27320 = vmatpush1.bf16.msra.mxu0 %v34008_v56  ;;  %27512 = vmatpush1.bf16.msra.mxu1 %v33899_v55 }
 0xcc1   :  { %27322 = vmatprep.subr.bf16.mxu0 %v34009_v46  ;;  %27514 = vmatprep.subr.bf16.mxu1 %v33900_v48 }
 0xcc4   :  { %27324 = vmatpush1.bf16.msra.mxu0 %v34010_v16  ;;  %27516 = vmatpush1.bf16.msra.mxu1 %v33901_v52 }
 0xcc5   :  { %27326 = vmatprep.subr.bf16.mxu0 %v34011_v19  ;;  %27518 = vmatprep.subr.bf16.mxu1 %v33902_v3 }
 0xcc8   :  { %27328 = vmatpush1.bf16.msra.mxu0 %v34012_v28  ;;  %27520 = vmatpush1.bf16.msra.mxu1 %v33903_v11 }
 0xcc9   :  { %27330 = vmatprep.subr.bf16.mxu0 %v34013_v29  ;;  %27522 = vmatprep.subr.bf16.mxu1 %v33904_v0 }
 0xccc   :  { %27332 = vmatpush1.bf16.msra.mxu0 %v34014_v10  ;;  %27524 = vmatpush1.bf16.msra.mxu1 %v33905_v32 }
 0xccd   :  { %27334 = vmatprep.subr.bf16.mxu0 %v34015_v38  ;;  %27526 = vmatprep.subr.bf16.mxu1 %v33906_v17 }
 0xcd0   :  { %27336 = vmatpush1.bf16.msra.mxu0 %v34016_v53  ;;  %27528 = vmatpush1.bf16.msra.mxu1 %v33907_v1 }
 0xcd1   :  { %27338 = vmatprep.subr.bf16.mxu0 %v34017_v14  ;;  %27530 = vmatprep.subr.bf16.mxu1 %v33908_v42 }
 0xcd4   :  { %27340 = vmatpush1.bf16.msra.mxu0 %v34018_v27  ;;  %27532 = vmatpush1.bf16.msra.mxu1 %v33909_v50 }
 0xcd5   :  { %27342 = vmatprep.subr.bf16.mxu0 %v34658_v25  ;;  %27534 = vmatprep.subr.bf16.mxu1 %v34659_v47 }
 0xd8a   :  { %v19414_v37 = vpop.f32.mrb[12].mxu0  ;;  %v19957_v12 = vpop.f32.mrb[14].mxu1 }
 0xd8b   :  { %v19962_v23 = vadd.f32 %v19414_v37, %v34660_v59  ;;  %v19416_v51 = vpop.f32.mrb[13].mxu0  ;;  %v19959_v61 = vpop.f32.mrb[15].mxu1  ;;  %v19964_v24 = vadd.f32 %v19957_v12, %v30574_v63 }
 0xd8c   :  { %v19963_v31 = vadd.f32 %v19416_v51, %v34188_v20  ;;  %v19965_v58 = vadd.f32 %v19959_v61, %v30576_v33 }
 0xd8d   :  { %v23623_v13 = vmul.f32 -1.442695, %v19962_v23 }
 0xd8e   :  { %v23624_v7 = vmul.f32 -1.442695, %v19963_v31  ;;  %v23625_v6 = vmul.f32 -1.442695, %v19965_v58 }
 0xd8f   :  { %28453 = vpow2.f32 %v23623_v13 }
 0xd90   :  { %28455 = vpow2.f32 %v23624_v7 }
 0xd91   :  { %28457 = vpow2.f32 %v23625_v6 }
 0xd92   :  { %28459 = vtanh.f32 %v19964_v24 }
 0xd99   :  { %v28454_v25 = vpop.eup %28453 }
 0xd9a   :  { %v28456_v9 = vpop.eup %28455  ;;  %v19969_v47 = vadd.f32 1.0, %v28454_v25  ;;  %v34661_v25 = vld [vmem:[#allocation96_spill] sm:$0xff] }
 0xd9b   :  { %v19975_v49 = vadd.f32 1.0, %v28456_v9  ;;  %v28458_v37 = vpop.eup %28457 }
 0xd9c   :  { %28461 = vrcp.f32 %v19969_v47  ;;  %v28460_v59 = vpop.eup %28459  ;;  %v19982_v13 = vadd.f32 1.0, %v28458_v37  ;;  %v34662_v47 = vld [vmem:[#allocation53_spill] sm:$0xff]  ;;  %v34667_v37 = vld [vmem:[#allocation146_spill] sm:$0xff] }
 0xd9d   :  { %28463 = vrcp.f32 %v19975_v49 }
 0xd9e   :  { %28465 = vrcp.f32 %v19982_v13  ;;  %v34674_v13 = vld [vmem:[#allocation66_spill] sm:$0xff] }
 0xda6   :  { %v28462_v51 = vpop.eup %28461 }
 0xda7   :  { %v28464_v23 = vpop.eup %28463  ;;  %v19986_v31 = vmul.f32 %v28462_v51, %v28460_v59  ;;  %v34668_v51 = vld [vmem:[#allocation60_spill] sm:$0xff] }
 0xda8   :  { %v19985_v7 = vmul.f32 %v28464_v23, %v32108_v8  ;;  %v28466_v58 = vpop.eup %28465  ;;  %v34672_v23 = vld [vmem:[#allocation63_spill] sm:$0xff] }
 0xdaa   :  { %v32413_v61 = vadd.f32 %v19986_v31, %v19985_v7  ;;  %v34673_v31 = vld [vmem:[#allocation149_spill] sm:$0xff]  ;;  %v34675_v7 = vld [vmem:[#allocation150_spill] sm:$0xff] }
 0xdac   :  { %28467 = vtanh.f32 %v32413_v61 }
 0xdb6   :  { %v28468_v12 = vpop.eup %28467 }
 0xdb7   :  { %v19989_v6 = vmul.f32 %v28468_v12, %v28466_v58  ;;  %v34676_v58 = vld [vmem:[#allocation67_spill] sm:$0xff] }
 0xdb8   :  { %v34677_v12 = vld [vmem:[#allocation151_spill] sm:$0xff] }
 0xdb9   :  { %19990 = vst [vmem:[#allocation8 + $0xc] sm:$0x3] %v19989_v6  ;;  %v32416_v9 = vand.u32 4294901760, %v19989_v6 }
 0xdbb   :  { %v32419_v49 = vsub.f32 %v19989_v6, %v32416_v9  ;;  %v34678_v6 = vld [vmem:[#allocation68_spill] sm:$0xff] }
 0xdbd   :  { %v32422_v24 = vand.u32 4294901760, %v32419_v49 }
 0xdbf   :  { %v20093_v8 = vsub.f32 %v32419_v49, %v32422_v24 }
 0xdc1   :  { %v20094_v59 = vand.u32 4294901760, %v20093_v8  ;;  %v34679_v8 = vld [vmem:[#allocation152_spill] sm:$0xff] }
 0xdc3   :  { %20095 = vmatmul.mubr.f32.vlgmr.msra.gmra.mrb[14].mxu0 %v20094_v59  ;;  %20950 = vmatmul.mubr.f32.vlgmr.msra.gmra.mrb[16].mxu1 %v20094_v59  ;;  %v34680_v59 = vld [vmem:[#allocation70_spill] sm:$0xff] }
 0xdc4   :  { %27344 = vmatpush1.bf16.msra.mxu0 %v34071_v4  ;;  %27536 = vmatpush1.bf16.msra.mxu1 %v34072_v15  ;;  %v34663_v4 = vld [vmem:[#allocation98_spill] sm:$0xff]  ;;  %v34664_v15 = vld [vmem:[#allocation56_spill] sm:$0xff] }
 0xdc5   :  { %27346 = vmatprep.subr.bf16.mxu0 %v34189_v41  ;;  %27538 = vmatprep.subr.bf16.mxu1 %v34190_v26  ;;  %v34665_v41 = vld [vmem:[#allocation145_spill] sm:$0xff]  ;;  %v34666_v26 = vld [vmem:[#allocation58_spill] sm:$0xff] }
 0xdc6   :  { %20325 = vmatprep.mubr.f32.mxu0 %v33562_v5  ;;  %21180 = vmatprep.mubr.f32.mxu1 %v33562_v5 }
 0xdc8   :  { %27348 = vmatpush1.bf16.msra.mxu0 %v34307_v2  ;;  %27540 = vmatpush1.bf16.msra.mxu1 %v34308_v18  ;;  %v34669_v2 = vld [vmem:[#allocation147_spill] sm:$0xff]  ;;  %v34670_v18 = vld [vmem:[#allocation61_spill] sm:$0xff] }
 0xdc9   :  { %27350 = vmatprep.subr.bf16.mxu0 %v34425_v57  ;;  %27542 = vmatprep.subr.bf16.mxu1 %v34661_v25  ;;  %v34671_v57 = vld [vmem:[#allocation148_spill] sm:$0xff]  ;;  %v34681_v25 = vld [vmem:[#allocation153_spill] sm:$0xff] }
 0xdcc   :  { %27352 = vmatpush1.bf16.msra.mxu0 %v34662_v47  ;;  %27544 = vmatpush1.bf16.msra.mxu1 %v34663_v4  ;;  %v34682_v47 = vld [vmem:[#allocation72_spill] sm:$0xff]  ;;  %v34683_v4 = vld [vmem:[#allocation154_spill] sm:$0xff] }
 0xdcd   :  { %27354 = vmatprep.subr.bf16.mxu0 %v34664_v15  ;;  %27546 = vmatprep.subr.bf16.mxu1 %v34665_v41  ;;  %v34684_v15 = vld [vmem:[#allocation74_spill] sm:$0xff]  ;;  %v34685_v41 = vld [vmem:[#allocation115_spill] sm:$0xff] }
 0xdd0   :  { %27356 = vmatpush1.bf16.msra.mxu0 %v34666_v26  ;;  %27548 = vmatpush1.bf16.msra.mxu1 %v34667_v37  ;;  %v34686_v26 = vld [vmem:[#allocation75_spill] sm:$0xff] }
 0xdd1   :  { %27358 = vmatprep.subr.bf16.mxu0 %v34668_v51  ;;  %27550 = vmatprep.subr.bf16.mxu1 %v34669_v2  ;;  %v34687_v37 = vld [vmem:[#allocation155_spill] sm:$0xff]  ;;  %v34688_v51 = vld [vmem:[#allocation76_spill] sm:$0xff] }
 0xdd2   :  { %v34689_v2 = vld [vmem:[#allocation156_spill] sm:$0xff] }
 0xdd4   :  { %27360 = vmatpush1.bf16.msra.mxu0 %v34670_v18  ;;  %27552 = vmatpush1.bf16.msra.mxu1 %v34671_v57  ;;  %v34690_v18 = vld [vmem:[#allocation32_spill] sm:$0xff]  ;;  %v34691_v57 = vld [vmem:[#allocation30_spill] sm:$0xff] }
 0xdd5   :  { %27362 = vmatprep.subr.bf16.mxu0 %v34672_v23  ;;  %27554 = vmatprep.subr.bf16.mxu1 %v34673_v31  ;;  %v34692_v23 = vld [vmem:[#allocation39_spill] sm:$0xff]  ;;  %v34693_v31 = vld [vmem:[#allocation121_spill] sm:$0xff] }
 0xdd8   :  { %27364 = vmatpush1.bf16.msra.mxu0 %v34674_v13  ;;  %27556 = vmatpush1.bf16.msra.mxu1 %v34675_v7  ;;  %v34694_v13 = vld [vmem:[#allocation43_spill] sm:$0xff]  ;;  %v34695_v7 = vld [vmem:[#allocation157_spill] sm:$0xff] }
 0xdd9   :  { %27366 = vmatprep.subr.bf16.mxu0 %v34676_v58  ;;  %27558 = vmatprep.subr.bf16.mxu1 %v34677_v12  ;;  %v34696_v58 = vld [vmem:[#allocation77_spill] sm:$0xff]  ;;  %v34697_v12 = vld [vmem:[#allocation128_spill] sm:$0xff] }
 0xddc   :  { %27368 = vmatpush1.bf16.msra.mxu0 %v34678_v6  ;;  %27560 = vmatpush1.bf16.msra.mxu1 %v34679_v8  ;;  %v34698_v6 = vld [vmem:[#allocation78_spill] sm:$0xff] }
 0xddd   :  { %27370 = vmatprep.subr.bf16.mxu0 %v34680_v59  ;;  %27562 = vmatprep.subr.bf16.mxu1 %v34681_v25  ;;  %v34699_v8 = vld [vmem:[#allocation158_spill] sm:$0xff]  ;;  %v34700_v59 = vld [vmem:[#allocation79_spill] sm:$0xff] }
 0xdde   :  { %v34701_v25 = vld [vmem:[#allocation159_spill] sm:$0xff] }
 0xde0   :  { %27372 = vmatpush1.bf16.msra.mxu0 %v34682_v47  ;;  %27564 = vmatpush1.bf16.msra.mxu1 %v34683_v4  ;;  %v34702_v47 = vld [vmem:[#allocation80_spill] sm:$0xff] }
 0xde1   :  { %27374 = vmatprep.subr.bf16.mxu0 %v34684_v15  ;;  %27566 = vmatprep.subr.bf16.mxu1 %v34685_v41  ;;  %v34703_v4 = vld [vmem:[#allocation160_spill] sm:$0xff]  ;;  %v34704_v15 = vld [vmem:[#allocation81_spill] sm:$0xff] }
 0xde2   :  { %v34705_v41 = vld [vmem:[#allocation161_spill] sm:$0xff] }
 0xde3   :  { %20327 = vmatmul.mubr.f32.vlgmr.msra.gmra.mrb[14].mxu0 %v32416_v9  ;;  %21182 = vmatmul.mubr.f32.vlgmr.msra.gmra.mrb[16].mxu1 %v32416_v9 }
 0xde4   :  { %27376 = vmatpush1.bf16.msra.mxu0 %v34686_v26  ;;  %27568 = vmatpush1.bf16.msra.mxu1 %v34687_v37  ;;  %v34706_v26 = vld [vmem:[#allocation82_spill] sm:$0xff] }
 0xde5   :  { %27378 = vmatprep.subr.bf16.mxu0 %v34688_v51  ;;  %27570 = vmatprep.subr.bf16.mxu1 %v34689_v2  ;;  %v34707_v37 = vld [vmem:[#allocation162_spill] sm:$0xff]  ;;  %v34708_v51 = vld [vmem:[#allocation83_spill] sm:$0xff] }
 0xde6   :  { %20461 = vmatprep.mubr.f32.mxu0 %v33562_v5  ;;  %21316 = vmatprep.mubr.f32.mxu1 %v33562_v5  ;;  %v34709_v2 = vld [vmem:[#allocation163_spill] sm:$0xff] }
 0xde8   :  { %27380 = vmatpush1.bf16.msra.mxu0 %v34690_v18  ;;  %27572 = vmatpush1.bf16.msra.mxu1 %v34691_v57  ;;  %v34710_v18 = vld [vmem:[#allocation84_spill] sm:$0xff] }
 0xde9   :  { %27382 = vmatprep.subr.bf16.mxu0 %v34692_v23  ;;  %27574 = vmatprep.subr.bf16.mxu1 %v34693_v31  ;;  %v34711_v57 = vld [vmem:[#allocation164_spill] sm:$0xff]  ;;  %v34712_v23 = vld [vmem:[#allocation85_spill] sm:$0xff] }
 0xdea   :  { %v34713_v31 = vld [vmem:[#allocation165_spill] sm:$0xff] }
 0xdec   :  { %27384 = vmatpush1.bf16.msra.mxu0 %v34694_v13  ;;  %27576 = vmatpush1.bf16.msra.mxu1 %v34695_v7  ;;  %v34714_v13 = vld [vmem:[#allocation86_spill] sm:$0xff] }
 0xded   :  { %27386 = vmatprep.subr.bf16.mxu0 %v34696_v58  ;;  %27578 = vmatprep.subr.bf16.mxu1 %v34697_v12  ;;  %v34715_v7 = vld [vmem:[#allocation166_spill] sm:$0xff]  ;;  %v34717_v58 = vld [vmem:[#allocation99_spill] sm:$0xff]  ;;  %v34718_v12 = vld [vmem:[#allocation41_spill] sm:$0xff] }
 0xdf0   :  { %27388 = vmatpush1.bf16.msra.mxu0 %v34698_v6  ;;  %27580 = vmatpush1.bf16.msra.mxu1 %v34699_v8  ;;  %v34719_v6 = vld [vmem:[#allocation100_spill] sm:$0xff]  ;;  %v34720_v8 = vld [vmem:[#allocation45_spill] sm:$0xff] }
 0xdf1   :  { %27390 = vmatprep.subr.bf16.mxu0 %v34700_v59  ;;  %27582 = vmatprep.subr.bf16.mxu1 %v34701_v25  ;;  %v34721_v59 = vld [vmem:[#allocation101_spill] sm:$0xff]  ;;  %v34722_v25 = vld [vmem:[#allocation46_spill] sm:$0xff] }
 0xdf4   :  { %27392 = vmatpush1.bf16.msra.mxu0 %v34702_v47  ;;  %27584 = vmatpush1.bf16.msra.mxu1 %v34703_v4  ;;  %v34723_v47 = vld [vmem:[#allocation102_spill] sm:$0xff] }
 0xdf5   :  { %27394 = vmatprep.subr.bf16.mxu0 %v34704_v15  ;;  %27586 = vmatprep.subr.bf16.mxu1 %v34705_v41  ;;  %v34724_v4 = vld [vmem:[#allocation50_spill] sm:$0xff]  ;;  %v34725_v15 = vld [vmem:[#allocation116_spill] sm:$0xff]  ;;  %v34727_v41 = vld [vmem:[#allocation117_spill] sm:$0xff] }
 0xdf8   :  { %27396 = vmatpush1.bf16.msra.mxu0 %v34706_v26  ;;  %27588 = vmatpush1.bf16.msra.mxu1 %v34707_v37  ;;  %v34728_v26 = vld [vmem:[#allocation54_spill] sm:$0xff]  ;;  %v34729_v37 = vld [vmem:[#allocation135_spill] sm:$0xff] }
 0xdf9   :  { %27398 = vmatprep.subr.bf16.mxu0 %v34708_v51  ;;  %27590 = vmatprep.subr.bf16.mxu1 %v34709_v2  ;;  %v34730_v51 = vld [vmem:[#allocation55_spill] sm:$0xff]  ;;  %v34731_v2 = vld [vmem:[#allocation136_spill] sm:$0xff] }
 0xdfc   :  { %27400 = vmatpush1.bf16.msra.mxu0 %v34710_v18  ;;  %27592 = vmatpush1.bf16.msra.mxu1 %v34711_v57  ;;  %v34732_v18 = vld [vmem:[#allocation57_spill] sm:$0xff] }
 0xdfd   :  { %27402 = vmatprep.subr.bf16.mxu0 %v34712_v23  ;;  %27594 = vmatprep.subr.bf16.mxu1 %v34713_v31  ;;  %v34733_v57 = vld [vmem:[#allocation137_spill] sm:$0xff]  ;;  %v34734_v23 = vld [vmem:[#allocation59_spill] sm:$0xff]  ;;  %v34735_v31 = vld [vmem:[#allocation138_spill] sm:$0xff] }
 0xe00   :  { %27404 = vmatpush1.bf16.msra.mxu0 %v34714_v13  ;;  %27596 = vmatpush1.bf16.msra.mxu1 %v34715_v7  ;;  %v34736_v13 = vld [vmem:[#allocation62_spill] sm:$0xff]  ;;  %v34737_v7 = vld [vmem:[#allocation139_spill] sm:$0xff] }
 0xe01   :  { %27406 = vmatprep.subr.bf16.mxu0 %v34003_v36  ;;  %27598 = vmatprep.subr.bf16.mxu1 %v33893_v39 }
 0xe03   :  { %20464 = vmatmul.mubr.f32.vlgmr.msra.gmra.mrb[14].mxu0 %v32419_v49  ;;  %21319 = vmatmul.mubr.f32.vlgmr.msra.gmra.mrb[16].mxu1 %v32419_v49  ;;  %v34716_v49 = vld [vmem:[#allocation40_spill] sm:$0xff] }
 0xe04   :  { %27408 = vmatpush1.bf16.msra.mxu0 %v34004_v22  ;;  %27600 = vmatpush1.bf16.msra.mxu1 %v33895_v45 }
 0xe05   :  { %27410 = vmatprep.subr.bf16.mxu0 %v34005_v30  ;;  %27602 = vmatprep.subr.bf16.mxu1 %v33896_v34 }
 0xe06   :  { %20566 = vmatprep.mubr.f32.mxu0 %v33562_v5  ;;  %21421 = vmatprep.mubr.f32.mxu1 %v33562_v5 }
 0xe08   :  { %27412 = vmatpush1.bf16.msra.mxu0 %v34006_v54  ;;  %27604 = vmatpush1.bf16.msra.mxu1 %v33897_v21 }
 0xe09   :  { %27414 = vmatprep.subr.bf16.mxu0 %v34007_v62  ;;  %27606 = vmatprep.subr.bf16.mxu1 %v33898_v60 }
 0xe0c   :  { %27416 = vmatpush1.bf16.msra.mxu0 %v34008_v56  ;;  %27608 = vmatpush1.bf16.msra.mxu1 %v33899_v55 }
 0xe0d   :  { %27418 = vmatprep.subr.bf16.mxu0 %v34009_v46  ;;  %27610 = vmatprep.subr.bf16.mxu1 %v33900_v48 }
 0xe10   :  { %27420 = vmatpush1.bf16.msra.mxu0 %v34010_v16  ;;  %27612 = vmatpush1.bf16.msra.mxu1 %v33901_v52 }
 0xe11   :  { %27422 = vmatprep.subr.bf16.mxu0 %v34011_v19  ;;  %27614 = vmatprep.subr.bf16.mxu1 %v33902_v3 }
 0xe14   :  { %27424 = vmatpush1.bf16.msra.mxu0 %v34012_v28  ;;  %27616 = vmatpush1.bf16.msra.mxu1 %v33903_v11 }
 0xe15   :  { %27426 = vmatprep.subr.bf16.mxu0 %v34013_v29  ;;  %27618 = vmatprep.subr.bf16.mxu1 %v33904_v0 }
 0xe18   :  { %27428 = vmatpush1.bf16.msra.mxu0 %v34014_v10  ;;  %27620 = vmatpush1.bf16.msra.mxu1 %v33905_v32 }
 0xe19   :  { %27430 = vmatprep.subr.bf16.mxu0 %v34015_v38  ;;  %27622 = vmatprep.subr.bf16.mxu1 %v33906_v17 }
 0xe1c   :  { %27432 = vmatpush1.bf16.msra.mxu0 %v34016_v53  ;;  %27624 = vmatpush1.bf16.msra.mxu1 %v33907_v1 }
 0xe1d   :  { %27434 = vmatprep.subr.bf16.mxu0 %v34017_v14  ;;  %27626 = vmatprep.subr.bf16.mxu1 %v33908_v42 }
 0xe20   :  { %27436 = vmatpush1.bf16.msra.mxu0 %v34018_v27  ;;  %27628 = vmatpush1.bf16.msra.mxu1 %v33909_v50 }
 0xe21   :  { %27438 = vmatprep.subr.bf16.mxu0 %v34716_v49  ;;  %27630 = vmatprep.subr.bf16.mxu1 %v34717_v58  ;;  %v34738_v49 = vld [vmem:[#allocation64_spill] sm:$0xff] }
 0xe22   :  { %v34739_v58 = vld [vmem:[#allocation140_spill] sm:$0xff] }
 0xe23   :  { %20570 = vmatmul.mubr.f32.vlgmr.msra.gmra.mrb[14].mxu0 %v32422_v24  ;;  %21425 = vmatmul.mubr.f32.vlgmr.msra.gmra.mrb[16].mxu1 %v32422_v24  ;;  %v34726_v24 = vld [vmem:[#allocation52_spill] sm:$0xff] }
 0xe24   :  { %27440 = vmatpush1.bf16.msra.mxu0 %v34718_v12  ;;  %27632 = vmatpush1.bf16.msra.mxu1 %v34719_v6  ;;  %v34740_v12 = vld [vmem:[#allocation65_spill] sm:$0xff] }
 0xe25   :  { %27442 = vmatprep.subr.bf16.mxu0 %v34720_v8  ;;  %27634 = vmatprep.subr.bf16.mxu1 %v34721_v59  ;;  %v34741_v6 = vld [vmem:[#allocation141_spill] sm:$0xff]  ;;  %v34743_v59 = vld [vmem:[#allocation142_spill] sm:$0xff] }
 0xe26   :  { %20736 = vmatprep.mubr.f32.mxu0 %v33562_v5  ;;  %21591 = vmatprep.mubr.f32.mxu1 %v33562_v5  ;;  %v34742_v8 = vld [vmem:[#allocation69_spill] sm:$0xff] }
 0xe28   :  { %27444 = vmatpush1.bf16.msra.mxu0 %v34722_v25  ;;  %27636 = vmatpush1.bf16.msra.mxu1 %v34723_v47  ;;  %v34744_v25 = vld [vmem:[#allocation71_spill] sm:$0xff] }
 0xe29   :  { %27446 = vmatprep.subr.bf16.mxu0 %v34724_v4  ;;  %27638 = vmatprep.subr.bf16.mxu1 %v34725_v15  ;;  %v34745_v47 = vld [vmem:[#allocation143_spill] sm:$0xff]  ;;  %v34746_v4 = vld [vmem:[#allocation73_spill] sm:$0xff]  ;;  %v34747_v15 = vld [vmem:[#allocation144_spill] sm:$0xff] }
 0xe2c   :  { %27448 = vmatpush1.bf16.msra.mxu0 %v34726_v24  ;;  %27640 = vmatpush1.bf16.msra.mxu1 %v34727_v41  ;;  %v34772_v24 = vld [vmem:[#allocation132_spill] sm:$0xff] }
 0xe2d   :  { %27450 = vmatprep.subr.bf16.mxu0 %v34728_v26  ;;  %27642 = vmatprep.subr.bf16.mxu1 %v34729_v37  ;;  %v34773_v41 = vld [vmem:[#allocation124_spill] sm:$0xff]  ;;  %v34774_v37 = vld [vmem:[#allocation47_spill] sm:$0xff] }
 0xe30   :  { %27452 = vmatpush1.bf16.msra.mxu0 %v34730_v51  ;;  %27644 = vmatpush1.bf16.msra.mxu1 %v34731_v2  ;;  %v34775_v51 = vld [vmem:[#allocation125_spill] sm:$0xff] }
 0xe31   :  { %27454 = vmatprep.subr.bf16.mxu0 %v34732_v18  ;;  %27646 = vmatprep.subr.bf16.mxu1 %v34733_v57 }
 0xe34   :  { %27456 = vmatpush1.bf16.msra.mxu0 %v34734_v23  ;;  %27648 = vmatpush1.bf16.msra.mxu1 %v34735_v31  ;;  %v22829_v31 = vld [vmem:[#allocation7 + $0x18] sm:$0xff] }
 0xe35   :  { %27458 = vmatprep.subr.bf16.mxu0 %v34736_v13  ;;  %27650 = vmatprep.subr.bf16.mxu1 %v34737_v7  ;;  %v22859_v7 = vand.u32 4294901760, %v22829_v31 }
 0xe38   :  { %27460 = vmatpush1.bf16.msra.mxu0 %v34738_v49  ;;  %27652 = vmatpush1.bf16.msra.mxu1 %v34739_v58  ;;  %v22830_v58 = vld [vmem:[#allocation7 + $0x20] sm:$0xff] }
 0xe39   :  { %27462 = vmatprep.subr.bf16.mxu0 %v34740_v12  ;;  %27654 = vmatprep.subr.bf16.mxu1 %v34741_v6  ;;  %v22831_v12 = vld [vmem:[#allocation7 + $0x28] sm:$0xff]  ;;  %v22862_v6 = vand.u32 4294901760, %v22830_v58 }
 0xe3c   :  { %27464 = vmatpush1.bf16.msra.mxu0 %v34742_v8  ;;  %27656 = vmatpush1.bf16.msra.mxu1 %v34743_v59  ;;  %v22865_v8 = vand.u32 4294901760, %v22831_v12 }
 0xe3d   :  { %27466 = vmatprep.subr.bf16.mxu0 %v34744_v25  ;;  %27658 = vmatprep.subr.bf16.mxu1 %v34745_v47  ;;  %v22832_v25 = vld [vmem:[#allocation7 + $0x30] sm:$0xff]  ;;  %v22833_v47 = vld [vmem:[#allocation7 + $0x38] sm:$0xff] }
 0xe3e   :  { %v32694_v59 = vpack.c.bf16 %v22865_v8, %v22862_v6 }
 0xe40   :  { %27468 = vmatpush1.bf16.msra.mxu0 %v34746_v4  ;;  %27660 = vmatpush1.bf16.msra.mxu1 %v34747_v15  ;;  %v22868_v4 = vand.u32 4294901760, %v22832_v25  ;;  %v22871_v15 = vand.u32 4294901760, %v22833_v47 }
 0xe41   :  { %27470 = vmatprep.subr.bf16.mxu0 %v34003_v36  ;;  %27662 = vmatprep.subr.bf16.mxu1 %v33893_v39  ;;  %v34755_v39 = vld [vmem:[#allocation94_spill] sm:$0xff] }
 0xe42   :  { %v22824_v36 = vld [vmem:[#allocation8] sm:$0xff] }
 0xe43   :  { %20738 = vmatmul.mubr.f32.vlgmr.msra.gmra.mrb[14].mxu0 %v32416_v9  ;;  %21593 = vmatmul.mubr.f32.vlgmr.msra.gmra.mrb[16].mxu1 %v32416_v9 }
 0xe44   :  { %27472 = vmatpush1.bf16.msra.mxu0 %v34004_v22  ;;  %27664 = vmatpush1.bf16.msra.mxu1 %v33895_v45  ;;  %v23626_v22 = vld [vmem:[%s33080_s0 + $0xe] sm:$0x3]  ;;  %v34756_v45 = vld [vmem:[#allocation111_spill] sm:$0xff]  ;;  %s28657_s0 = smov [#allocation8]  }
 0xe45   :  { %27474 = vmatprep.subr.bf16.mxu0 %v34005_v30  ;;  %27666 = vmatprep.subr.bf16.mxu1 %v33896_v34  ;;  %v34757_v34 = vld [vmem:[#allocation103_spill] sm:$0xff]  ;;  %s23543_s30 = sshll.u32 %s28657_s0, 4  ;;  %s23544_s30 = int_to_ptr.vmem [resolvable:$true] %s23543_s30 }
 0xe46   :  { %20840 = vmatprep.mubr.f32.mxu0 %v33562_v5  ;;  %21695 = vmatprep.mubr.f32.mxu1 %v33562_v5  ;;  %s28551_s6 = scalar_lea.vmem %s23544_s30, 256  ;;  %p28556_p11 = scmp.lt.s32.totalorder %s23544_s30, %s23544_s30 }
 0xe47   :  { %p28552_p10 = scmp.ne.s32.totalorder %s23544_s30, %s28551_s6  ;;  %p28557_p12 = scmp.lt.s32.totalorder %s28551_s6, %s28551_s6 }
 0xe48   :  { %27476 = vmatpush1.bf16.msra.mxu0 %v34006_v54  ;;  %27668 = vmatpush1.bf16.msra.mxu1 %v33897_v21  ;;  %v21704_v54 = vsel %vm1892_vm0, %v23626_v22, 0  ;;  %v34758_v21 = vld [vmem:[#allocation122_spill] sm:$0xff]  ;;  %v32698_v22 = vpack.c.bf16 %v22871_v15, %v22868_v4 }
 0xe49   :  { %27478 = vmatprep.subr.bf16.mxu0 %v34007_v62  ;;  %27670 = vmatprep.subr.bf16.mxu1 %v33898_v60  ;;  %v34759_v60 = vld [vmem:[#allocation104_spill] sm:$0xff]  ;;  %v34769_v62 = vld [vmem:[#allocation119_spill] sm:$0xff]  ;;  %p28558_p13 = por %p28557_p12, %p28556_p11 }
 0xe4b   :  { %p28559_p0 = pnand %p28558_p13, %p28552_p10 }
 0xe4c   :  { %27480 = vmatpush1.bf16.msra.mxu0 %v34008_v56  ;;  %27672 = vmatpush1.bf16.msra.mxu1 %v33899_v55  ;;  %v34760_v55 = vld [vmem:[#allocation110_spill] sm:$0xff] }
 0xe4d   :  { %27482 = vmatprep.subr.bf16.mxu0 %v34009_v46  ;;  %27674 = vmatprep.subr.bf16.mxu1 %v33900_v48  ;;  %v32596_v46 = vand.u32 4294901760, %v21704_v54  ;;  %v34761_v48 = vld [vmem:[#allocation106_spill] sm:$0xff] }
 0xe4e   :  { %v34770_v56 = vld [vmem:[#allocation130_spill] sm:$0xff] }
 0xe4f   :  { %v21780_v30 = vsub.f32 %v21704_v54, %v32596_v46  ;;  %v32700_v54 = vld [vmem:[#allocation7 + $0x40] sm:$0xff] }
 0xe50   :  { %27484 = vmatpush1.bf16.msra.mxu0 %v34010_v16  ;;  %27676 = vmatpush1.bf16.msra.mxu1 %v33901_v52  ;;  %v34762_v52 = vld [vmem:[#allocation114_spill] sm:$0xff]  ;;  %v34768_v16 = vld [vmem:[#allocation127_spill] sm:$0xff] }
 0xe51   :  { %27486 = vmatprep.subr.bf16.mxu0 %v34011_v19  ;;  %27678 = vmatprep.subr.bf16.mxu1 %v33902_v3  ;;  %v34763_v3 = vld [vmem:[#allocation109_spill] sm:$0xff]  ;;  %v32655_v19 = vand.u32 4294901760, %v22824_v36 }
 0xe53   :  { %v32664_v26 = vsub.f32 %v22824_v36, %v32655_v19 }
 0xe54   :  { %27488 = vmatpush1.bf16.msra.mxu0 %v34012_v28  ;;  %27680 = vmatpush1.bf16.msra.mxu1 %v33903_v11  ;;  %v34754_v11 = vld [vmem:[#allocation108_spill] sm:$0xff]  ;;  %v34767_v28 = vld [vmem:[#allocation113_spill] sm:$0xff] }
 0xe55   :  { %27490 = vmatprep.subr.bf16.mxu0 %v34013_v29  ;;  %27682 = vmatprep.subr.bf16.mxu1 %v33904_v0  ;;  %v21781_v29 = vand.u32 4294901760, %v21780_v30  ;;  %v34764_v0 = vld [vmem:[#allocation118_spill] sm:$0xff]  ;;  %v22932_v2 = vand.u32 4294901760, %v32664_v26 }
 0xe58   :  { %27492 = vmatpush1.bf16.msra.mxu0 %v34014_v10  ;;  %27684 = vmatpush1.bf16.msra.mxu1 %v33905_v32  ;;  %v21782_v32 = vsub.f32 %v21780_v30, %v21781_v29  ;;  %v34749_v10 = vld [vmem:[#allocation31_spill] sm:$0xff] }
 0xe59   :  { %27494 = vmatprep.subr.bf16.mxu0 %v34015_v38  ;;  %27686 = vmatprep.subr.bf16.mxu1 %v33906_v17  ;;  %v34753_v17 = vld [vmem:[#allocation92_spill] sm:$0xff] }
 0xe5a   :  { %v34766_v38 = vld [vmem:[#allocation120_spill] sm:$0xff] }
 0xe5c   :  { %27496 = vmatpush1.bf16.msra.mxu0 %v34016_v53  ;;  %27688 = vmatpush1.bf16.msra.mxu1 %v33907_v1  ;;  %v34748_v53 = vld [vmem:[#allocation93_spill] sm:$0xff] }
 0xe5d   :  { %27498 = vmatprep.subr.bf16.mxu0 %v34017_v14  ;;  %27690 = vmatprep.subr.bf16.mxu1 %v33908_v42  ;;  %v34751_v42 = vld [vmem:[#allocation90_spill] sm:$0xff]  ;;  %v34752_v1 = vld [vmem:[#allocation105_spill] sm:$0xff]  ;;  %v34765_v14 = vld [vmem:[#allocation112_spill] sm:$0xff] }
 0xe60   :  { %27500 = vmatpush1.bf16.msra.mxu0 %v34018_v27  ;;  %27692 = vmatpush1.bf16.msra.mxu1 %v33909_v50  ;;  %v21783_v27 = vand.u32 4294901760, %v21782_v32  ;;  %v34750_v50 = vld [vmem:[#allocation97_spill] sm:$0xff] }
 0xe61   :  { %27694 = vmatprep.subr.bf16.mxu0 %v34051_v44  ;;  %27742 = vmatprep.subr.bf16.mxu1 %v30433_v40 }
 0xe63   :  { %20842 = vmatmul.mubr.f32.vlgmr.msra.gmra.mrb[14].mxu0 %v32416_v9  ;;  %21697 = vmatmul.mubr.f32.vlgmr.msra.gmra.mrb[16].mxu1 %v32416_v9  ;;  %v34771_v9 = vld [vmem:[#allocation123_spill] sm:$0xff] }
 0xe64   :  { %27696 = vmatpush1.bf16.msra.mxu0 %v34052_v43  ;;  %27744 = vmatpush1.bf16.msra.mxu1 %v34275_v35 }
 0xe65   :  { %27698 = vmatprep.subr.bf16.mxu0 %v34748_v53  ;;  %27746 = vmatprep.subr.bf16.mxu1 %v34749_v10 }
 0xe66   :  { %21778 = vmatprep.mubr.f32.mxu0 %v33562_v5  ;;  %22321 = vmatprep.mubr.f32.mxu1 %v33562_v5 }
 0xe68   :  { %27700 = vmatpush1.bf16.msra.mxu0 %v34750_v50  ;;  %27748 = vmatpush1.bf16.msra.mxu1 %v34751_v42 }
 0xe69   :  { %27702 = vmatprep.subr.bf16.mxu0 %v34752_v1  ;;  %27750 = vmatprep.subr.bf16.mxu1 %v34753_v17 }
 0xe6b   :  { %21784 = vmatmul.mubr.f32.vlgmr.msra.gmra.mrb[14].mxu0 %v21783_v27  ;;  %22327 = vmatmul.mubr.f32.vlgmr.msra.gmra.mrb[16].mxu1 %v21783_v27  ;;  %v32714_v27 = vld [vmem:[#allocation7 + $0x60] sm:$0xff] }
 0xe6c   :  { %27704 = vmatpush1.bf16.msra.mxu0 %v34754_v11  ;;  %27752 = vmatpush1.bf16.msra.mxu1 %v34755_v39  ;;  %v32722_v11 = vld [vmem:[#allocation7 + $0x68] sm:$0xff]  ;;  %v22886_v39 = vand.u32 4294901760, %v32714_v27 }
 0xe6d   :  { %27706 = vmatprep.subr.bf16.mxu0 %v34756_v45  ;;  %27754 = vmatprep.subr.bf16.mxu1 %v34757_v34  ;;  %v32725_v45 = vld [vmem:[#allocation7 + $0x70] sm:$0xff]  ;;  %v32727_v34 = vld [vmem:[#allocation7 + $0x78] sm:$0xff] }
 0xe6e   :  { %21894 = vmatprep.mubr.f32.mxu0 %v33562_v5  ;;  %22437 = vmatprep.mubr.f32.mxu1 %v33562_v5 }
 0xe70   :  { %27708 = vmatpush1.bf16.msra.mxu0 %v34758_v21  ;;  %27756 = vmatpush1.bf16.msra.mxu1 %v34759_v60  ;;  %v22889_v21 = vand.u32 4294901760, %v32722_v11 }
 0xe71   :  { %27710 = vmatprep.subr.bf16.mxu0 %v34760_v55  ;;  %27758 = vmatprep.subr.bf16.mxu1 %v34761_v48 }
 0xe73   :  { %21896 = vmatmul.mubr.f32.vlgmr.msra.gmra.mrb[14].mxu0 %v32596_v46  ;;  %22439 = vmatmul.mubr.f32.vlgmr.msra.gmra.mrb[16].mxu1 %v32596_v46 }
 0xe74   :  { %27712 = vmatpush1.bf16.msra.mxu0 %v34762_v52  ;;  %27760 = vmatpush1.bf16.msra.mxu1 %v34763_v3  ;;  %v32740_v52 = vpack.c.bf16 %v22889_v21, %v22886_v39  ;;  %v22892_v3 = vand.u32 4294901760, %v32725_v45 }
 0xe75   :  { %27714 = vmatprep.subr.bf16.mxu0 %v34764_v0  ;;  %27762 = vmatprep.subr.bf16.mxu1 %v34765_v14  ;;  %v22895_v0 = vand.u32 4294901760, %v32727_v34 }
 0xe76   :  { %21982 = vmatprep.mubr.f32.mxu0 %v33562_v5  ;;  %22525 = vmatprep.mubr.f32.mxu1 %v33562_v5 }
 0xe78   :  { %27716 = vmatpush1.bf16.msra.mxu0 %v34766_v38  ;;  %27764 = vmatpush1.bf16.msra.mxu1 %v34767_v28  ;;  %v32757_v28 = vpack.c.bf16 %v22895_v0, %v22892_v3 }
 0xe79   :  { %27718 = vmatprep.subr.bf16.mxu0 %v34051_v44  ;;  %27766 = vmatprep.subr.bf16.mxu1 %v30433_v40 }
 0xe7b   :  { %21985 = vmatmul.mubr.f32.vlgmr.msra.gmra.mrb[14].mxu0 %v21780_v30  ;;  %22528 = vmatmul.mubr.f32.vlgmr.msra.gmra.mrb[16].mxu1 %v21780_v30  ;;  %v22874_v30 = vand.u32 4294901760, %v32700_v54 }
 0xe7c   :  { %27720 = vmatpush1.bf16.msra.mxu0 %v34052_v43  ;;  %27768 = vmatpush1.bf16.msra.mxu1 %v34275_v35 }
 0xe7d   :  { %27722 = vmatprep.subr.bf16.mxu0 %v34748_v53  ;;  %27770 = vmatprep.subr.bf16.mxu1 %v34749_v10 }
 0xe7e   :  { %22063 = vmatprep.mubr.f32.mxu0 %v33562_v5  ;;  %22606 = vmatprep.mubr.f32.mxu1 %v33562_v5 }
 0xe80   :  { %27724 = vmatpush1.bf16.msra.mxu0 %v34750_v50  ;;  %27772 = vmatpush1.bf16.msra.mxu1 %v34751_v42 }
 0xe81   :  { %27726 = vmatprep.subr.bf16.mxu0 %v34768_v16  ;;  %27774 = vmatprep.subr.bf16.mxu1 %v34769_v62 }
 0xe83   :  { %22067 = vmatmul.mubr.f32.vlgmr.msra.gmra.mrb[14].mxu0 %v21781_v29  ;;  %22610 = vmatmul.mubr.f32.vlgmr.msra.gmra.mrb[16].mxu1 %v21781_v29 }
 0xe84   :  { %27728 = vmatpush1.bf16.msra.mxu0 %v34770_v56  ;;  %27776 = vmatpush1.bf16.msra.mxu1 %v34771_v9  ;;  %v32765_v9 = vsub.f32 %v22829_v31, %v22859_v7 }
 0xe85   :  { %27730 = vmatprep.subr.bf16.mxu0 %v34772_v24  ;;  %27778 = vmatprep.subr.bf16.mxu1 %v34773_v41 }
 0xe86   :  { %22161 = vmatprep.mubr.f32.mxu0 %v33562_v5  ;;  %22704 = vmatprep.mubr.f32.mxu1 %v33562_v5  ;;  %v33502_v41 = vand.u32 4294901760, %v32765_v9 }
 0xe88   :  { %27732 = vmatpush1.bf16.msra.mxu0 %v34774_v37  ;;  %27780 = vmatpush1.bf16.msra.mxu1 %v34775_v51  ;;  %v22975_v51 = vsub.f32 %v32765_v9, %v33502_v41 }
 0xe89   :  { %27734 = vmatprep.subr.bf16.mxu0 %v34051_v44  ;;  %27782 = vmatprep.subr.bf16.mxu1 %v30433_v40  ;;  %v22933_v40 = vsub.f32 %v32664_v26, %v22932_v2 }
 0xe8b   :  { %22163 = vmatmul.mubr.f32.vlgmr.msra.gmra.mrb[14].mxu0 %v32596_v46  ;;  %22706 = vmatmul.mubr.f32.vlgmr.msra.gmra.mrb[16].mxu1 %v32596_v46  ;;  %v22934_v44 = vand.u32 4294901760, %v22933_v40  ;;  %v32777_v40 = vsub.f32 %v22830_v58, %v22862_v6  ;;  %v32793_v58 = vsub.f32 %v22833_v47, %v22871_v15 }
 0xe8c   :  { %27736 = vmatpush1.bf16.msra.mxu0 %v34052_v43  ;;  %27784 = vmatpush1.bf16.msra.mxu1 %v34275_v35  ;;  %v22826_v43 = vld [vmem:[#allocation7] sm:$0xff]  ;;  %v22827_v35 = vld [vmem:[#allocation7 + $0x8] sm:$0xff] }
 0xe8d   :  { %27738 = vmatprep.subr.bf16.mxu0 %v34748_v53  ;;  %27786 = vmatprep.subr.bf16.mxu1 %v34749_v10  ;;  %v22850_v18 = vand.u32 4294901760, %v22826_v43  ;;  %v22853_v57 = vand.u32 4294901760, %v22827_v35  ;;  %v32710_v53 = vld [vmem:[#allocation7 + $0x50] sm:$0xff]  ;;  %v32712_v10 = vld [vmem:[#allocation7 + $0x58] sm:$0xff] }
 0xe8e   :  { %22241 = vmatprep.mubr.f32.mxu0 %v33562_v5  ;;  %22784 = vmatprep.mubr.f32.mxu1 %v33562_v5  ;;  %v22828_v5 = vld [vmem:[#allocation7 + $0x10] sm:$0xff]  ;;  %v22880_v1 = vand.u32 4294901760, %v32710_v53  ;;  %v22883_v17 = vand.u32 4294901760, %v32712_v10 }
 0xe8f   :  { %v32686_v23 = vpack.c.bf16 %v22853_v57, %v22850_v18  ;;  %v22856_v13 = vand.u32 4294901760, %v22828_v5 }
 0xe90   :  { %27740 = vmatpush1.bf16.msra.mxu0 %v34750_v50  ;;  %27788 = vmatpush1.bf16.msra.mxu1 %v34751_v42  ;;  %v32716_v50 = vsub.f32 %v22826_v43, %v22850_v18  ;;  %v32718_v42 = vsub.f32 %v22827_v35, %v22853_v57  ;;  %v32733_v55 = vpack.c.bf16 %v22883_v17, %v22880_v1  ;;  %v22976_v35 = vand.u32 4294901760, %v22975_v51 }
 0xe91   :  { %27790 = vmatprep.subr.bf16.mxu0 %v32686_v23  ;;  %v32690_v49 = vpack.c.bf16 %v22859_v7, %v22856_v13  ;;  %v32763_v56 = vsub.f32 %v22828_v5, %v22856_v13  ;;  %v33501_v18 = vand.u32 4294901760, %v32777_v40  ;;  %v32791_v7 = vsub.f32 %v22832_v25, %v22868_v4 }
 0xe92   :  { %v22953_v60 = vand.u32 4294901760, %v32716_v50  ;;  %v33504_v48 = vand.u32 4294901760, %v32718_v42 }
 0xe93   :  { %22243 = vmatmul.mubr.f32.vlgmr.msra.gmra.mrb[14].mxu0 %v32596_v46  ;;  %22786 = vmatmul.mubr.f32.vlgmr.msra.gmra.mrb[16].mxu1 %v32596_v46  ;;  %v32702_v46 = vld [vmem:[#allocation7 + $0x48] sm:$0xff]  ;;  %v33503_v24 = vand.u32 4294901760, %v32763_v56  ;;  %v22982_v31 = vsub.f32 %v32777_v40, %v33501_v18 }
 0xe94   :  { %23771 = vmatprep.mubr.f32.mxu0 %v22934_v44  ;;  %27792 = vmatpush3.bf16.msra.mxu0 %v32686_v23  ;;  %v22877_v29 = vand.u32 4294901760, %v32702_v46  ;;  %v22954_v14 = vsub.f32 %v32716_v50, %v22953_v60  ;;  %v22961_v38 = vsub.f32 %v32718_v42, %v33504_v48  ;;  %v32779_v44 = vsub.f32 %v22831_v12, %v22865_v8 }
 0xe95   :  { %27794 = vmatprep.subr.bf16.mxu0 %v32690_v49  ;;  %v22968_v37 = vsub.f32 %v32763_v56, %v33503_v24  ;;  %v22983_v12 = vand.u32 4294901760, %v22982_v31  ;;  %v33499_v8 = vand.u32 4294901760, %v32791_v7 }
 0xe96   :  { %v32708_v32 = vpack.c.bf16 %v22877_v29, %v22874_v30  ;;  %v22955_v36 = vand.u32 4294901760, %v22954_v14  ;;  %v22962_v16 = vand.u32 4294901760, %v22961_v38  ;;  %v33500_v57 = vand.u32 4294901760, %v32779_v44 }
 0xe97   :  { %v22969_v43 = vand.u32 4294901760, %v22968_v37  ;;  %v33498_v14 = vand.u32 4294901760, %v32793_v58  ;;  %v32806_v25 = vsub.f32 %v32702_v46, %v22877_v29  ;;  %v32820_v46 = vsub.f32 %v32710_v53, %v22880_v1 }
 0xe98   :  { %27796 = vmatpush3.bf16.msra.mxu0 %v32690_v49  ;;  %v32761_v62 = vpack.c.bf16 %v22962_v16, %v22955_v36  ;;  %v22989_v13 = vsub.f32 %v32779_v44, %v33500_v57  ;;  %v22996_v36 = vsub.f32 %v32791_v7, %v33499_v8  ;;  %v32803_v16 = vsub.f32 %v32700_v54, %v22874_v30 }
 0xe99   :  { %27798 = vmatprep.subr.bf16.mxu0 %v32694_v59  ;;  %v32783_v5 = vpack.c.bf16 %v22976_v35, %v22969_v43  ;;  %v23003_v47 = vsub.f32 %v32793_v58, %v33498_v14  ;;  %v33496_v37 = vand.u32 4294901760, %v32806_v25  ;;  %v32823_v30 = vsub.f32 %v32712_v10, %v22883_v17 }
 0xe9a   :  { %v22990_v6 = vand.u32 4294901760, %v22989_v13  ;;  %v22997_v4 = vand.u32 4294901760, %v22996_v36  ;;  %v33497_v15 = vand.u32 4294901760, %v32803_v16  ;;  %v33495_v13 = vand.u32 4294901760, %v32820_v46 }
 0xe9b   :  { %v23004_v51 = vand.u32 4294901760, %v23003_v47  ;;  %v23017_v54 = vsub.f32 %v32806_v25, %v33496_v37  ;;  %v32840_v10 = vsub.f32 %v32714_v27, %v22886_v39  ;;  %v32845_v1 = vsub.f32 %v32722_v11, %v22889_v21 }
 0xe9c   :  { %27800 = vmatpush3.bf16.msra.mxu0 %v32694_v59  ;;  %v32797_v38 = vpack.c.bf16 %v22990_v6, %v22983_v12  ;;  %v23010_v43 = vsub.f32 %v32803_v16, %v33497_v15  ;;  %v33494_v12 = vand.u32 4294901760, %v32823_v30  ;;  %v23024_v36 = vsub.f32 %v32820_v46, %v33495_v13 }
 0xe9d   :  { %27802 = vmatprep.subr.bf16.mxu0 %v32698_v22  ;;  %v32825_v29 = vpack.c.bf16 %v23004_v51, %v22997_v4  ;;  %v23018_v31 = vand.u32 4294901760, %v23017_v54  ;;  %v33493_v4 = vand.u32 4294901760, %v32840_v10  ;;  %v33492_v51 = vand.u32 4294901760, %v32845_v1 }
 0xe9e   :  { %v23011_v35 = vand.u32 4294901760, %v23010_v43  ;;  %v23031_v53 = vsub.f32 %v32823_v30, %v33494_v12  ;;  %v23025_v17 = vand.u32 4294901760, %v23024_v36  ;;  %v32857_v27 = vsub.f32 %v32725_v45, %v22892_v3 }
 0xe9f   :  { %v23038_v54 = vsub.f32 %v32840_v10, %v33493_v4  ;;  %v32862_v11 = vsub.f32 %v32727_v34, %v22895_v0  ;;  %v23045_v39 = vsub.f32 %v32845_v1, %v33492_v51 }
 0xea0   :  { %27804 = vmatpush3.bf16.msra.mxu0 %v32698_v22  ;;  %v32829_v6 = vpack.c.bf16 %v23018_v31, %v23011_v35  ;;  %v23032_v47 = vand.u32 4294901760, %v23031_v53  ;;  %v33491_v35 = vand.u32 4294901760, %v32857_v27 }
 0xea1   :  { %27806 = vmatprep.subr.bf16.mxu0 %v32708_v32  ;;  %v23039_v21 = vand.u32 4294901760, %v23038_v54  ;;  %v33490_v31 = vand.u32 4294901760, %v32862_v11  ;;  %v23046_v36 = vand.u32 4294901760, %v23045_v39  ;;  %v32885_v54 = vpack.c.bf16 %v32765_v9, %v32763_v56 }
 0xea2   :  { %v32849_v43 = vpack.c.bf16 %v23032_v47, %v23025_v17  ;;  %v23052_v45 = vsub.f32 %v32857_v27, %v33491_v35  ;;  %v32881_v47 = vpack.c.bf16 %v32718_v42, %v32716_v50  ;;  %v32889_v39 = vpack.c.bf16 %v32779_v44, %v32777_v40  ;;  %v34776_v35 = vld [vmem:[#allocation129_spill] sm:$0xff] }
 0xea3   :  { %v23059_v3 = vsub.f32 %v32862_v11, %v33490_v31  ;;  %v32875_v34 = vpack.c.bf16 %v23046_v36, %v23039_v21  ;;  %v32893_v21 = vpack.c.bf16 %v32793_v58, %v32791_v7  ;;  %v32897_v36 = vpack.c.bf16 %v32806_v25, %v32803_v16 }
 0xea4   :  { %27808 = vmatpush3.bf16.msra.mxu0 %v32708_v32  ;;  %v23053_v0 = vand.u32 4294901760, %v23052_v45  ;;  %v32901_v45 = vpack.c.bf16 %v32823_v30, %v32820_v46  ;;  %v34781_v50 = vand.u32 4294901760, %v32779_v44  ;;  %v34787_v44 = vand.u32 4294901760, %v32823_v30 }
 0xea5   :  { %27810 = vmatprep.subr.bf16.mxu0 %v32733_v55  ;;  %v23060_v53 = vand.u32 4294901760, %v23059_v3  ;;  %v32905_v3 = vpack.c.bf16 %v32845_v1, %v32840_v10 }
 0xea7   :  { %v32877_v17 = vpack.c.bf16 %v23060_v53, %v23053_v0  ;;  %v32909_v0 = vpack.c.bf16 %v32862_v11, %v32857_v27 }
 0xea8   :  { %27812 = vmatpush3.bf16.msra.mxu0 %v32733_v55 }
 0xea9   :  { %27814 = vmatprep.subr.bf16.mxu0 %v32740_v52 }
 0xeac   :  { %27816 = vmatpush3.bf16.msra.mxu0 %v32740_v52 }
 0xead   :  { %27818 = vmatprep.subr.bf16.mxu0 %v32757_v28 }
 0xeb0   :  { %27820 = vmatpush3.bf16.msra.mxu0 %v32757_v28 }
 0xeb1   :  { %27822 = vmatprep.subr.bf16.mxu0 %v32761_v62 }
 0xf66   :  { %v22244_v53 = vpop.f32.mrb[14].mxu0  ;;  %v22787_v31 = vpop.f32.mrb[16].mxu1 }
 0xf67   :  { %v22792_v51 = vadd.f32 %v22244_v53, %v34776_v35  ;;  %v22246_v4 = vpop.f32.mrb[15].mxu0  ;;  %v22789_v12 = vpop.f32.mrb[17].mxu1  ;;  %v22794_v57 = vadd.f32 %v22787_v31, %v30574_v63 }
 0xf68   :  { %v22793_v13 = vadd.f32 %v22246_v4, %v34188_v20  ;;  %v22795_v14 = vadd.f32 %v22789_v12, %v30576_v33 }
 0xf69   :  { %v23627_v37 = vmul.f32 -1.442695, %v22792_v51 }
 0xf6a   :  { %v23628_v15 = vmul.f32 -1.442695, %v22793_v13  ;;  %v23629_v8 = vmul.f32 -1.442695, %v22795_v14 }
 0xf6b   :  { %28469 = vpow2.f32 %v23627_v37 }
 0xf6c   :  { %28471 = vpow2.f32 %v23628_v15 }
 0xf6d   :  { %28473 = vpow2.f32 %v23629_v8 }
 0xf6e   :  { %28475 = vtanh.f32 %v22794_v57 }
 0xf75   :  { %v28470_v18 = vpop.eup %28469 }
 0xf76   :  { %v28472_v41 = vpop.eup %28471  ;;  %v22799_v24 = vadd.f32 1.0, %v28470_v18 }
 0xf77   :  { %v22805_v48 = vadd.f32 1.0, %v28472_v41  ;;  %v28474_v35 = vpop.eup %28473 }
 0xf78   :  { %28477 = vrcp.f32 %v22799_v24  ;;  %v28476_v53 = vpop.eup %28475  ;;  %v22812_v37 = vadd.f32 1.0, %v28474_v35 }
 0xf79   :  { %28479 = vrcp.f32 %v22805_v48 }
 0xf7a   :  { %28481 = vrcp.f32 %v22812_v37 }
 0xf82   :  { %v28478_v20 = vpop.eup %28477 }
 0xf83   :  { %v28480_v4 = vpop.eup %28479  ;;  %v22816_v13 = vmul.f32 %v28478_v20, %v28476_v53 }
 0xf84   :  { %v22815_v15 = vmul.f32 %v28480_v4, %v32413_v61  ;;  %v28482_v63 = vpop.eup %28481  ;;  %v34777_v61 = vand.u32 4294901760, %v32718_v42  ;;  %v34782_v42 = vand.u32 4294901760, %v32791_v7  ;;  %v34788_v7 = vand.u32 4294901760, %v32840_v10 }
 0xf86   :  { %v22817_v33 = vadd.f32 %v22816_v13, %v22815_v15 }
 0xf88   :  { %28483 = vtanh.f32 %v22817_v33  ;;  %22823 = vst.msk [vmem:[#allocation12] sm:$0x3] %vm22821_vm1, %v22817_v33 }
 0xf92   :  { %v28484_v18 = vpop.eup %28483 }
 0xf93   :  { %v22819_v8 = vmul.f32 %v28484_v18, %v28482_v63 }
 0xf95   :  { %22820 = vst [vmem:[#allocation8 + $0xe] sm:$0x3] %v22819_v8  ;;  %22822 = vst.msk [vmem:[#allocation11] sm:$0x3] %vm22821_vm1, %v22819_v8 }
 0xf9c   :  { %v22825_v24 = vld [vmem:[#allocation8 + $0x8] sm:$0xff] }
 0xf9d   :  { %v32916_v48 = vand.u32 4294901760, %v22825_v24 }
 0xf9f   :  { %v22941_v41 = vsub.f32 %v22825_v24, %v32916_v48 }
 0xfa1   :  { %v22942_v57 = vand.u32 4294901760, %v22941_v41 }
 0xfa3   :  { %v22943_v14 = vsub.f32 %v22941_v41, %v22942_v57 }
 0xfa5   :  { %v22944_v12 = vand.u32 4294901760, %v22943_v14 }
 0xfa7   :  { %23772 = vmatmul.mubr.f32.vlgmr.msra.gmra.mrb[16].mxu0 %v22944_v12 }
 0xfa8   :  { %27824 = vmatpush3.bf16.msra.mxu0 %v32761_v62  ;;  %23806 = vmatprep.mubr.f32.mxu0 %v32655_v19  ;;  %v34779_v62 = vand.u32 4294901760, %v32765_v9  ;;  %v34784_v9 = vand.u32 4294901760, %v32803_v16  ;;  %v34790_v16 = vand.u32 4294901760, %v32857_v27 }
 0xfa9   :  { %27826 = vmatprep.subr.bf16.mxu0 %v32783_v5 }
 0xfac   :  { %27828 = vmatpush3.bf16.msra.mxu0 %v32783_v5 }
 0xfad   :  { %27830 = vmatprep.subr.bf16.mxu0 %v32797_v38 }
 0xfb0   :  { %27832 = vmatpush3.bf16.msra.mxu0 %v32797_v38  ;;  %v34780_v38 = vand.u32 4294901760, %v32777_v40  ;;  %v34786_v40 = vand.u32 4294901760, %v32820_v46 }
 0xfb1   :  { %27834 = vmatprep.subr.bf16.mxu0 %v32825_v29 }
 0xfb4   :  { %27836 = vmatpush3.bf16.msra.mxu0 %v32825_v29  ;;  %v27925_v29 = vpack.c.bf16 %v34781_v50, %v34780_v38 }
 0xfb5   :  { %27838 = vmatprep.subr.bf16.mxu0 %v32829_v6 }
 0xfb8   :  { %27840 = vmatpush3.bf16.msra.mxu0 %v32829_v6  ;;  %v34785_v6 = vand.u32 4294901760, %v32806_v25  ;;  %v34791_v25 = vand.u32 4294901760, %v32862_v11 }
 0xfb9   :  { %27842 = vmatprep.subr.bf16.mxu0 %v32849_v43 }
 0xfba   :  { %v27933_v51 = vpack.c.bf16 %v34785_v6, %v34784_v9 }
 0xfbc   :  { %27844 = vmatpush3.bf16.msra.mxu0 %v32849_v43  ;;  %v27937_v43 = vpack.c.bf16 %v34787_v44, %v34786_v40 }
 0xfbd   :  { %27846 = vmatprep.subr.bf16.mxu0 %v32875_v34 }
 0xfc0   :  { %27848 = vmatpush3.bf16.msra.mxu0 %v32875_v34  ;;  %v27945_v34 = vpack.c.bf16 %v34791_v25, %v34790_v16 }
 0xfc1   :  { %27850 = vmatprep.subr.bf16.mxu0 %v32877_v17 }
 0xfc4   :  { %27852 = vmatpush3.bf16.msra.mxu0 %v32877_v17 }
 0xfc5   :  { %27854 = vmatprep.subr.bf16.mxu0 %v32881_v47 }
 0xfc7   :  { %23807 = vmatmul.mubr.f32.vlgmr.msra.gmra.mrb[16].mxu0 %v32916_v48 }
 0xfc8   :  { %27856 = vmatpush3.bf16.msra.mxu0 %v32881_v47  ;;  %23841 = vmatprep.mubr.f32.mxu0 %v32664_v26  ;;  %v27917_v26 = vpack.c.bf16 %v34777_v61, %v22953_v60  ;;  %v34783_v60 = vand.u32 4294901760, %v32793_v58  ;;  %v34789_v58 = vand.u32 4294901760, %v32845_v1 }
 0xfc9   :  { %27858 = vmatprep.subr.bf16.mxu0 %v32885_v54 }
 0xfca   :  { %v27941_v31 = vpack.c.bf16 %v34789_v58, %v34788_v7 }
 0xfcc   :  { %27860 = vmatpush3.bf16.msra.mxu0 %v32885_v54 }
 0xfcd   :  { %27862 = vmatprep.subr.bf16.mxu0 %v32889_v39 }
 0xfd0   :  { %27864 = vmatpush3.bf16.msra.mxu0 %v32889_v39 }
 0xfd1   :  { %27866 = vmatprep.subr.bf16.mxu0 %v32893_v21 }
 0xfd4   :  { %27868 = vmatpush3.bf16.msra.mxu0 %v32893_v21 }
 0xfd5   :  { %27870 = vmatprep.subr.bf16.mxu0 %v32897_v36 }
 0xfd8   :  { %27872 = vmatpush3.bf16.msra.mxu0 %v32897_v36 }
 0xfd9   :  { %27874 = vmatprep.subr.bf16.mxu0 %v32901_v45 }
 0xfdc   :  { %27876 = vmatpush3.bf16.msra.mxu0 %v32901_v45 }
 0xfdd   :  { %27878 = vmatprep.subr.bf16.mxu0 %v32905_v3 }
 0xfe0   :  { %27880 = vmatpush3.bf16.msra.mxu0 %v32905_v3 }
 0xfe1   :  { %27882 = vmatprep.subr.bf16.mxu0 %v32909_v0 }
 0xfe4   :  { %27884 = vmatpush3.bf16.msra.mxu0 %v32909_v0 }
 0xfe5   :  { %27886 = vmatprep.subr.bf16.mxu0 %v32686_v23 }
 0xfe7   :  { %23842 = vmatmul.mubr.f32.vlgmr.msra.gmra.mrb[16].mxu0 %v22941_v41 }
 0xfe8   :  { %27888 = vmatpush3.bf16.msra.mxu0 %v32686_v23  ;;  %23876 = vmatprep.mubr.f32.mxu0 %v22932_v2  ;;  %v34778_v2 = vand.u32 4294901760, %v32763_v56  ;;  %v27929_v56 = vpack.c.bf16 %v34783_v60, %v34782_v42 }
 0xfe9   :  { %27890 = vmatprep.subr.bf16.mxu0 %v32690_v49 }
 0xfea   :  { %v27921_v5 = vpack.c.bf16 %v34779_v62, %v34778_v2 }
 0xfec   :  { %27892 = vmatpush3.bf16.msra.mxu0 %v32690_v49 }
 0xfed   :  { %27894 = vmatprep.subr.bf16.mxu0 %v32694_v59 }
 0xff0   :  { %27896 = vmatpush3.bf16.msra.mxu0 %v32694_v59 }
 0xff1   :  { %27898 = vmatprep.subr.bf16.mxu0 %v32698_v22 }
 0xff4   :  { %27900 = vmatpush3.bf16.msra.mxu0 %v32698_v22 }
 0xff5   :  { %27902 = vmatprep.subr.bf16.mxu0 %v32708_v32 }
 0xff8   :  { %27904 = vmatpush3.bf16.msra.mxu0 %v32708_v32 }
 0xff9   :  { %27906 = vmatprep.subr.bf16.mxu0 %v32733_v55 }
 0xffc   :  { %27908 = vmatpush3.bf16.msra.mxu0 %v32733_v55 }
 0xffd   :  { %27910 = vmatprep.subr.bf16.mxu0 %v32740_v52 }
0x1000   :  { %27912 = vmatpush3.bf16.msra.mxu0 %v32740_v52 }
0x1001   :  { %27914 = vmatprep.subr.bf16.mxu0 %v32757_v28 }
0x1004   :  { %27916 = vmatpush3.bf16.msra.mxu0 %v32757_v28 }
0x1005   :  { %27918 = vmatprep.subr.bf16.mxu0 %v27917_v26 }
0x1007   :  { %23877 = vmatmul.mubr.f32.vlgmr.msra.gmra.mrb[16].mxu0 %v22942_v57 }
0x1008   :  { %27920 = vmatpush3.bf16.msra.mxu0 %v27917_v26  ;;  %23911 = vmatprep.mubr.f32.mxu0 %v32655_v19 }
0x1009   :  { %27922 = vmatprep.subr.bf16.mxu0 %v27921_v5 }
0x100c   :  { %27924 = vmatpush3.bf16.msra.mxu0 %v27921_v5 }
0x100d   :  { %27926 = vmatprep.subr.bf16.mxu0 %v27925_v29 }
0x1010   :  { %27928 = vmatpush3.bf16.msra.mxu0 %v27925_v29 }
0x1011   :  { %27930 = vmatprep.subr.bf16.mxu0 %v27929_v56 }
0x1014   :  { %27932 = vmatpush3.bf16.msra.mxu0 %v27929_v56 }
0x1015   :  { %27934 = vmatprep.subr.bf16.mxu0 %v27933_v51 }
0x1018   :  { %27936 = vmatpush3.bf16.msra.mxu0 %v27933_v51 }
0x1019   :  { %27938 = vmatprep.subr.bf16.mxu0 %v27937_v43 }
0x101c   :  { %27940 = vmatpush3.bf16.msra.mxu0 %v27937_v43 }
0x101d   :  { %27942 = vmatprep.subr.bf16.mxu0 %v27941_v31 }
0x1020   :  { %27944 = vmatpush3.bf16.msra.mxu0 %v27941_v31 }
0x1021   :  { %27946 = vmatprep.subr.bf16.mxu0 %v27945_v34 }
0x1024   :  { %27948 = vmatpush3.bf16.msra.mxu0 %v27945_v34 }
0x1025   :  { %27950 = vmatprep.subr.bf16.mxu0 %v32686_v23 }
0x1027   :  { %23912 = vmatmul.mubr.f32.vlgmr.msra.gmra.mrb[16].mxu0 %v32916_v48 }
0x1028   :  { %27952 = vmatpush3.bf16.msra.mxu0 %v32686_v23  ;;  %23946 = vmatprep.mubr.f32.mxu0 %v32655_v19 }
0x1029   :  { %27954 = vmatprep.subr.bf16.mxu0 %v32690_v49 }
0x102c   :  { %27956 = vmatpush3.bf16.msra.mxu0 %v32690_v49 }
0x102d   :  { %27958 = vmatprep.subr.bf16.mxu0 %v32694_v59 }
0x1030   :  { %27960 = vmatpush3.bf16.msra.mxu0 %v32694_v59 }
0x1031   :  { %27962 = vmatprep.subr.bf16.mxu0 %v32698_v22 }
0x1034   :  { %27964 = vmatpush3.bf16.msra.mxu0 %v32698_v22 }
0x1035   :  { %27966 = vmatprep.subr.bf16.mxu0 %v32708_v32 }
0x1038   :  { %27968 = vmatpush3.bf16.msra.mxu0 %v32708_v32 }
0x1039   :  { %27970 = vmatprep.subr.bf16.mxu0 %v32733_v55 }
0x103c   :  { %27972 = vmatpush3.bf16.msra.mxu0 %v32733_v55 }
0x103d   :  { %27974 = vmatprep.subr.bf16.mxu0 %v32740_v52 }
0x1040   :  { %27976 = vmatpush3.bf16.msra.mxu0 %v32740_v52 }
0x1041   :  { %27978 = vmatprep.subr.bf16.mxu0 %v32757_v28 }
0x1044   :  { %27980 = vmatpush3.bf16.msra.mxu0 %v32757_v28 }
0x1047   :  { %23947 = vmatmul.mubr.f32.vlgmr.msra.gmra.mrb[16].mxu0 %v32916_v48 }
0x1048   :  { %28562 = shalt.err (!%p28559_p0)
}
0x1049   :  { %s28563_s19 = scalar_lea.hbm %s33088_s8, 256 }
0x104a   :  { %p28564_p1 = scmp.ne.s32.totalorder %s33088_s8, %s28563_s19  ;;  %p28567_p2 = scmp.lt.u32.totalorder %s28563_s19, %s33088_s8 }
0x104c   :  { %p28569_p3 = pnand %p28567_p2, %p28564_p1 }
0x104e   :  { %28572 = shalt.err (!%p28569_p3)
}
0x104f   :  { %23549 = dma.vmem_to_hbm [thread:$0]  %s23544_s30, 256, %s33088_s8, [#allocation4], %s28654_s1, %s28654_s1, %s28655_s20  }
0x1050   :  { %s28658_s18 = smov [#allocation12]  }
0x1051   :  { %s23578_s24 = sshll.u32 %s28658_s18, 4  ;;  %s23579_s24 = int_to_ptr.vmem [resolvable:$true] %s23578_s24 }
0x1052   :  { %s28573_s25 = scalar_lea.vmem %s23579_s24, 32  ;;  %p28578_p5 = scmp.lt.s32.totalorder %s23579_s24, %s23579_s24 }
0x1053   :  { %p28574_p4 = scmp.ne.s32.totalorder %s23579_s24, %s28573_s25  ;;  %p28579_p6 = scmp.lt.s32.totalorder %s28573_s25, %s28573_s25 }
0x1055   :  { %p28580_p7 = por %p28579_p6, %p28578_p5 }
0x1057   :  { %p28581_p8 = pnand %p28580_p7, %p28574_p4 }
0x1059   :  { %28584 = shalt.err (!%p28581_p8)
}
0x105a   :  { %s28585_s28 = scalar_lea.hbm %s33091_s11, 32 }
0x105b   :  { %p28586_p9 = scmp.ne.s32.totalorder %s33091_s11, %s28585_s28  ;;  %p28589_p10 = scmp.lt.u32.totalorder %s28585_s28, %s33091_s11 }
0x105d   :  { %p28591_p11 = pnand %p28589_p10, %p28586_p9 }
0x105f   :  { %28594 = shalt.err (!%p28591_p11)
}
0x1060   :  { %23581 = dma.vmem_to_hbm [thread:$0]  %s23579_s24, 32, %s33091_s11, [#allocation13]   ;;  %v23630_v19 = vld [vmem:[%s33087_s7] ss:$0 sm:$0xff]  ;;  %vm23535_vm2 = vcmask 523264  }
0x1061   :  { %s28659_s30 = smov [#allocation9]   ;;  %s28660_s17 = smov [#allocation11]  }
0x1062   :  { %s23555_s6 = sshll.u32 %s28659_s30, 4  ;;  %s23568_s4 = sshll.u32 %s28660_s17, 4  ;;  %s23556_s6 = int_to_ptr.vmem [resolvable:$true] %s23555_s6  ;;  %s23569_s4 = int_to_ptr.vmem [resolvable:$true] %s23568_s4 }
0x1063   :  { %s28595_s11 = scalar_lea.vmem %s23556_s6, 256  ;;  %p28600_p13 = scmp.lt.s32.totalorder %s23556_s6, %s23556_s6 }
0x1064   :  { %p28596_p12 = scmp.ne.s32.totalorder %s23556_s6, %s28595_s11  ;;  %p28601_p0 = scmp.lt.s32.totalorder %s28595_s11, %s28595_s11 }
0x1066   :  { %p28602_p1 = por %p28601_p0, %p28600_p13 }
0x1068   :  { %p28603_p2 = pnand %p28602_p1, %p28596_p12 }
0x111a   :  { %v23948_v23 = vpop.f32.mrb[16].mxu0 }
0x111b   :  { %v27983_v49 = vadd.f32 %v23948_v23, %v23630_v19  ;;  %v23523_v59 = vpop.f32.mrb[17].mxu0 }
0x111c   :  { %v27984_v22 = vadd.f32 %v23630_v19, %v23523_v59 }
0x111d   :  { %v23534_v32 = vmax.f32 %v27983_v49, 0.0 }
0x111e   :  { %v23533_v55 = vmax.f32 %v27984_v22, 0.0 }
0x111f   :  { %23537 = vst.msk [vmem:[#allocation9 + $0x8] sm:$0xff] %vm23535_vm2, %v23534_v32 }
0x1120   :  { %23536 = vst.msk [vmem:[#allocation9] sm:$0xff] %vm23535_vm2, %v23533_v55 }
0x1121   :  { %28606 = shalt.err (!%p28603_p2)
}
0x1122   :  { %s28607_s21 = scalar_lea.hbm %s33089_s9, 256 }
0x1123   :  { %p28608_p3 = scmp.ne.s32.totalorder %s33089_s9, %s28607_s21  ;;  %p28611_p4 = scmp.lt.u32.totalorder %s28607_s21, %s33089_s9 }
0x1125   :  { %p28613_p5 = pnand %p28611_p4, %p28608_p3 }
0x1127   :  { %28616 = shalt.err (!%p28613_p5)
}
0x1128   :  { %23561 = dma.vmem_to_hbm [thread:$0]  %s23556_s6, 256, %s33089_s9, [#allocation10], %s28654_s1, %s28654_s1, %s28655_s20  }
0x1129   :  { %s28617_s24 = scalar_lea.vmem %s23569_s4, 32  ;;  %p28622_p7 = scmp.lt.s32.totalorder %s23569_s4, %s23569_s4 }
0x112a   :  { %p28618_p6 = scmp.ne.s32.totalorder %s23569_s4, %s28617_s24  ;;  %p28623_p8 = scmp.lt.s32.totalorder %s28617_s24, %s28617_s24 }
0x112c   :  { %p28624_p9 = por %p28623_p8, %p28622_p7 }
0x112e   :  { %p28625_p10 = pnand %p28624_p9, %p28618_p6 }
0x1130   :  { %28628 = shalt.err (!%p28625_p10)
}
0x1131   :  { %s28629_s27 = scalar_lea.hbm %s33090_s10, 32 }
0x1132   :  { %p28630_p11 = scmp.ne.s32.totalorder %s33090_s10, %s28629_s27  ;;  %p28633_p12 = scmp.lt.u32.totalorder %s28629_s27, %s33090_s10 }
0x1134   :  { %p28635_p13 = pnand %p28633_p12, %p28630_p11 }
0x1136   :  { %28638 = shalt.err (!%p28635_p13)
}
0x1137   :  { %23571 = dma.vmem_to_hbm [thread:$0]  %s23569_s4, 32, %s33090_s10, [#allocation10]  }
0x1138   :  { %28643 = dma.done.wait [#allocation4], 256  }
0x1139   :  { %28644 = vsyncadd [#allocation4], 4294967040 }
0x113a   :  { %28645 = dma.done.wait [#allocation10], 288  }
0x113b   :  { %28646 = vsyncadd [#allocation10], 4294967008 }
0x113c   :  { %28647 = dma.done.wait [#allocation13], 32  }
0x113d   :  { %28648 = vsyncadd [#allocation13], 4294967264 }
0x113e   :  { %23594 = vsyncpa [#allocation3], 1 }
0x113f   :  { %23595 = vsyncpa [#allocation6], 1 }
0x1140   :  { %23596 = vsyncpa [#allocation4], 1 }
0x1141   :  { %23597 = vsyncpa [#allocation10], 1 }
0x1142   :  { %23598 = vsyncpa [#allocation13], 1 }

</bundles_post_ra>
